<compile_context>
chip_gen: v6e
topology: v6e:2x2x1
jax: 0.10.0
libtpu: 0.0.40
codegen_flags: <defaults>
</compile_context>

<pallas_src>
import functools

import jax
import jax.numpy as jnp
from jax.experimental import pallas as pl
from jax.experimental.pallas import tpu as pltpu


# -----------------------------------------------------------------------------
# Shared helpers
# -----------------------------------------------------------------------------
@functools.lru_cache(maxsize=None)
def _vmem_limit_bytes():
    # 3/4 of the per-core VMEM: ~96 MiB on 128-MiB parts (v5e/v6e), ~48 MiB on v7x.
    try:
        cap = int(pltpu.get_tpu_info().vmem_capacity_bytes)
    except Exception:  # best-effort hardware query
        cap = 64 * 1024 * 1024
    return (3 * cap) // 4


def _compiler_params(*semantics):
    return pltpu.CompilerParams(
        dimension_semantics=tuple(semantics),
        vmem_limit_bytes=_vmem_limit_bytes(),
    )


def _pick_tile(total, target, unit):
    """Largest divisor of `total` that is <= target and a multiple of `unit`.
    Falls back to the full extent (always a legal block shape)."""
    if total <= target:
        return total
    best = 0
    for d in range(1, target + 1):
        if total % d == 0 and d % unit == 0:
            best = d
    return best if best else total


# -----------------------------------------------------------------------------
# Stem: conv1(7x7/s2/p3) + BN + ReLU + maxpool(3x3/s2/p1), fused, row-tiled
# -----------------------------------------------------------------------------
def _stem_kernel(x_ref, w_ref, scale_ref, bias_ref, o_ref, carry_ref):
    """One (image, pooled-row-tile) step.

    x_ref:      (1, tr*wo, 9*16*Cin) bf16 im2col patches.
    w_ref:      (9*16*Cin, 4*Cout) bf16; conv output phases
                [y(2u,2v) | y(2u,2v+1) | y(2u+1,2v) | y(2u+1,2v+1)] packed along N.
    scale/bias: (1, 4*Cout) f32 folded-BN affine (tiled over the 4 phases).
    o_ref:      (1, tr, wo, Cout) pooled output.
    carry_ref:  (1, wo, Cout) f32 scratch; row_odd of the previous tile's last row.
    """
    _, tr, wo, cout = o_ref.shape
    j = pl.program_id(1)

    # Single deep bf16 MXU matmul (K = 432, N = 4*Cout), f32 accumulation, then the
    # folded BN affine + ReLU applied once (hoisted out of any per-phase loop).
    y = jnp.dot(x_ref[0], w_ref[...], preferred_element_type=jnp.float32)
    y = jnp.maximum(y * scale_ref[...] + bias_ref[...], 0.0)
    y = y.reshape(tr, wo, 4 * cout)

    e = y[:, :, 0 * cout:1 * cout]   # conv row 2u,   col 2v
    f = y[:, :, 1 * cout:2 * cout]   # conv row 2u,   col 2v+1
    g = y[:, :, 2 * cout:3 * cout]   # conv row 2u+1, col 2v
    h = y[:, :, 3 * cout:4 * cout]   # conv row 2u+1, col 2v+1

    # 3x3/s2/pad1 max-pool.  Post-ReLU values are >= 0, so zero-fill at the -1 border is
    # equivalent to PyTorch's -inf padding.  The shifted copies are small per-tile
    # temporaries; the MXU matmul above dominates the step.
    zc = jnp.zeros((tr, 1, cout), jnp.float32)
    row_even = jnp.maximum(jnp.maximum(e, f),
                           jnp.concatenate([zc, f[:, :wo - 1, :]], axis=1))
    row_odd = jnp.maximum(jnp.maximum(g, h),
                          jnp.concatenate([zc, h[:, :wo - 1, :]], axis=1))

    # Pooled row u also needs row_odd[u-1]; carry the 1-row halo across row tiles.
    @pl.when(j == 0)
    def _():
        carry_ref[...] = jnp.zeros_like(carry_ref)

    prev_odd = carry_ref[...]                                   # (1, wo, cout)
    odd_up = jnp.concatenate([prev_odd, row_odd[:tr - 1]], axis=0)
    pooled = jnp.maximum(jnp.maximum(row_even, row_odd), odd_up)
    o_ref[0] = pooled.astype(o_ref.dtype)
    carry_ref[...] = row_odd[tr - 1:tr]


def _stem_space_to_depth(x_nhwc):
    # (B, H, W, C) -> (B, H//4 + 2, W//4 + 2, 16*C): zero margin for the conv pad (3)
    # plus the 2x2 output-phase offsets, then space-to-depth by 4.
    b, h, w, c = x_nhwc.shape
    hq, wq = h // 4 + 2, w // 4 + 2
    xp = jnp.pad(x_nhwc, ((0, 0), (5, 4 * hq - h - 5), (5, 4 * wq - w - 5), (0, 0)))
    xp = xp.reshape(b, hq, 4, wq, 4, c)
    xp = jnp.transpose(xp, (0, 1, 3, 2, 4, 5))
    return xp.reshape(b, hq, wq, 16 * c)


def _stem_build_patches(x_nhwc):
    # Host-side (XLA) im2col of the 3x3 taps so the stem kernel needs a single deep
    # matmul and no in-kernel slice/reshape expansion.  bf16 halves patch HBM traffic.
    xs = _stem_space_to_depth(x_nhwc)
    b, hq, wq, kc = xs.shape
    ho, wo = hq - 2, wq - 2
    taps = [xs[:, ra:ra + ho, rb:rb + wo, :] for ra in range(3) for rb in range(3)]
    patches = jnp.concatenate(taps, axis=-1)                    # (B, ho, wo, 9*16*Cin)
    return patches.reshape(b, ho * wo, 9 * kc).astype(jnp.bfloat16)


def _stem_pack_weights(w7):
    # (7, 7, Cin, Cout) -> (9*16*Cin, 4*Cout) bf16.  Output phase (p, q) of the 7x7/s2
    # conv becomes a 3x3/s1 conv over the space-to-depth(4) input with zero-padded,
    # re-tiled weights; the 3x3 taps are flattened into K (matching _stem_build_patches)
    # and the 4 phases are packed along N so one matmul feeds a whole 2x2 pooling cell.
    cin, cout = w7.shape[2], w7.shape[3]
    phases = []
    for p in range(2):
        for q in range(2):
            wk = jnp.pad(w7, ((2 * p + 2, 3 - 2 * p), (2 * q + 2, 3 - 2 * q),
                              (0, 0), (0, 0)))                  # (12, 12, Cin, Cout)
            wk = wk.reshape(3, 4, 3, 4, cin, cout)
            wk = jnp.transpose(wk, (0, 2, 1, 3, 4, 5))          # (3, 3, 4, 4, Cin, Cout)
            phases.append(wk.reshape(9 * 16 * cin, cout))
    return jnp.concatenate(phases, axis=1).astype(jnp.bfloat16)


def stem_conv_bn_relu_maxpool(patches, w_packed, scale4, bias4, *, ho, wo,
                              out_dtype=jnp.bfloat16, block_rows=8):
    b, _, kin = patches.shape
    cout = w_packed.shape[1] // 4
    tr = _pick_tile(ho, block_rows, 1)
    return pl.pallas_call(
        _stem_kernel,
        out_shape=jax.ShapeDtypeStruct((b, ho, wo, cout), out_dtype),
        grid=(b, ho // tr),
        in_specs=[
            pl.BlockSpec((1, tr * wo, kin), lambda i, j: (i, j, 0)),
            pl.BlockSpec(w_packed.shape, lambda i, j: (0, 0)),
            pl.BlockSpec((1, 4 * cout), lambda i, j: (0, 0)),
            pl.BlockSpec((1, 4 * cout), lambda i, j: (0, 0)),
        ],
        out_specs=pl.BlockSpec((1, tr, wo, cout), lambda i, j: (i, j, 0, 0)),
        scratch_shapes=[pltpu.VMEM((1, wo, cout), jnp.float32)],
        compiler_params=_compiler_params("parallel", "arbitrary"),
    )(patches, w_packed, scale4, bias4)


# -----------------------------------------------------------------------------
# 1x1-conv + folded BN + ReLU as (M, N)-tiled matmuls (layer1..layer4 stand-ins)
# -----------------------------------------------------------------------------
def _matmul_affine_relu_kernel(x_ref, w_ref, scale_ref, bias_ref, o_ref):
    k = x_ref.shape[-1]
    x = x_ref[...].reshape(-1, k)
    y = jnp.dot(x, w_ref[...], preferred_element_type=jnp.float32)
    o_ref[...] = jnp.maximum(y * scale_ref[...] + bias_ref[...], 0.0).astype(o_ref.dtype)


def conv1x1_bn_relu(x, w, scale, bias, *, out_dtype=jnp.bfloat16,
                    block_m=1024, block_n=512):
    m, k = x.shape
    n = w.shape[1]
    tm = _pick_tile(m, block_m, 8)
    tn = _pick_tile(n, block_n, 128)
    return pl.pallas_call(
        _matmul_affine_relu_kernel,
        out_shape=jax.ShapeDtypeStruct((m, n), out_dtype),
        grid=(m // tm, n // tn),
        in_specs=[
            pl.BlockSpec((tm, k), lambda i, j: (i, 0)),
            pl.BlockSpec((k, tn), lambda i, j: (0, j)),
            pl.BlockSpec((1, tn), lambda i, j: (0, j)),
            pl.BlockSpec((1, tn), lambda i, j: (0, j)),
        ],
        out_specs=pl.BlockSpec((tm, tn), lambda i, j: (i, j)),
        compiler_params=_compiler_params("parallel", "parallel"),
    )(x, w, scale, bias)


def strided_conv1x1_bn_relu(feat, spatial, w, scale, bias, *,
                            out_dtype=jnp.bfloat16, block_m=1024, block_n=512):
    """Stride-2 spatial subsample fused with the 1x1-conv + BN + ReLU.

    feat: (B*H*W, Cin) with spatial = (B, H, W).  Even rows are selected by the
    BlockSpec index_map and even columns by blocking the first Cin channels of a free
    (.., 2*Cin) reshape, so the odd 3/4 of the feature map is never DMA'd.  Falls back
    to an XLA-side subsample when the post-stride width is not sublane (8) aligned.
    """
    b, hh, ww = spatial
    c = feat.shape[-1]
    h2, w2 = hh // 2, ww // 2
    n = w.shape[1]
    if w2 % 8 != 0:
        # TODO(synk): widths not divisible by 16 keep the subsample in XLA; fusing them
        # needs an in-kernel flatten with a non-sublane-aligned second-minor dim.
        sub = feat.reshape(b, hh, ww, c)[:, ::2, ::2, :].reshape(b * h2 * w2, c)
        return conv1x1_bn_relu(sub, w, scale, bias, out_dtype=out_dtype,
                               block_m=block_m, block_n=block_n)
    b2 = b * h2
    x4 = feat.reshape(b2, 2, w2, 2 * c)            # free row-major reshape
    tb = _pick_tile(b2, max(1, block_m // w2), 1)
    tn = _pick_tile(n, block_n, 128)
    return pl.pallas_call(
        _matmul_affine_relu_kernel,
        out_shape=jax.ShapeDtypeStruct((b2 * w2, n), out_dtype),
        grid=(b2 // tb, n // tn),
        in_specs=[
            pl.BlockSpec((tb, 1, w2, c), lambda i, j: (i, 0, 0, 0)),
            pl.BlockSpec((c, tn), lambda i, j: (0, j)),
            pl.BlockSpec((1, tn), lambda i, j: (0, j)),
            pl.BlockSpec((1, tn), lambda i, j: (0, j)),
        ],
        out_specs=pl.BlockSpec((tb * w2, tn), lambda i, j: (i, j)),
        compiler_params=_compiler_params("parallel", "parallel"),
    )(x4, w, scale, bias)


# -----------------------------------------------------------------------------
# Head: l2norm(channels) -> fc -> l2norm(latent), fused, tiled over regions
# -----------------------------------------------------------------------------
def _head_kernel(x_ref, w_ref, b_ref, o_ref):
    x = x_ref[...].astype(jnp.float32)
    xn = x * jax.lax.rsqrt(jnp.sum(x * x, axis=-1, keepdims=True) + 1e-12)
    y = jnp.dot(xn.astype(w_ref.dtype), w_ref[...],
                preferred_element_type=jnp.float32) + b_ref[...]
    o_ref[...] = y * jax.lax.rsqrt(jnp.sum(y * y, axis=-1, keepdims=True) + 1e-12)


def l2norm_fc_l2norm(x, w, bias, *, block_m=1024):
    m, k = x.shape
    n = w.shape[1]
    tm = _pick_tile(m, block_m, 8)
    return pl.pallas_call(
        _head_kernel,
        out_shape=jax.ShapeDtypeStruct((m, n), jnp.float32),
        grid=(m // tm,),
        in_specs=[
            pl.BlockSpec((tm, k), lambda i: (i, 0)),
            pl.BlockSpec((k, n), lambda i: (0, 0)),
            pl.BlockSpec((1, n), lambda i: (0, 0)),
        ],
        out_specs=pl.BlockSpec((tm, n), lambda i: (i, 0)),
        compiler_params=_compiler_params("parallel"),
    )(x, w, bias)


# -----------------------------------------------------------------------------
# Pure-JAX reference implementations (independent check of the Pallas kernels)
# -----------------------------------------------------------------------------
def _stem_ref(x_nhwc, w7, scale, bias):
    y = jax.lax.conv_general_dilated(
        x_nhwc, w7, window_strides=(2, 2), padding=((3, 3), (3, 3)),
        dimension_numbers=("NHWC", "HWIO", "NHWC"),
        precision=jax.lax.Precision.HIGHEST)
    y = jnp.maximum(y * scale.reshape(1, 1, 1, -1) + bias.reshape(1, 1, 1, -1), 0.0)
    return jax.lax.reduce_window(
        y, -jnp.inf, jax.lax.max, (1, 3, 3, 1), (1, 2, 2, 1),
        padding=((0, 0), (1, 1), (1, 1), (0, 0)))


def _conv1x1_bn_relu_ref(x, w, scale, bias):
    y = jnp.dot(x.astype(w.dtype), w, preferred_element_type=jnp.float32)
    return jnp.maximum(y * scale + bias, 0.0)


def _head_ref(x, w, bias):
    xn = x * jax.lax.rsqrt(jnp.sum(x * x, axis=-1, keepdims=True) + 1e-12)
    y = jnp.dot(xn.astype(w.dtype), w, preferred_element_type=jnp.float32) + bias
    return y * jax.lax.rsqrt(jnp.sum(y * y, axis=-1, keepdims=True) + 1e-12)


# -----------------------------------------------------------------------------
# FullImageEncoder forward
# -----------------------------------------------------------------------------
def full_image_encoder_forward(images_nchw, params, use_pallas=True):
    x = jnp.transpose(images_nchw.astype(jnp.float32), (0, 2, 3, 1))   # NCHW -> NHWC
    b, h, w, _ = x.shape
    assert h % 32 == 0 and w % 32 == 0, "spatial dims must be divisible by 32"
    ho, wo = h // 4, w // 4

    # TODO(synk): layer1..layer4 of the torchvision ResNet backbone are injected
    # externally in the original code; substituted with single 1x1-conv + folded-BN +
    # ReLU stages at ResNet-50 widths (256/512/1024/2048), strides (1/2/2/2) so
    # fc(img_dim=2048) and the region count match.
    stages = [("l1", 1), ("l2", 2), ("l3", 2), ("l4", 2)]

    if use_pallas:
        patches = _stem_build_patches(x)
        x0 = stem_conv_bn_relu_maxpool(
            patches, params["stem_w_packed"], params["stem_scale4"],
            params["stem_bias4"], ho=ho, wo=wo)
        feat = x0.reshape(b * ho * wo, x0.shape[-1])
        hh, ww = ho, wo
        for name, stride in stages:
            out_dtype = jnp.float32 if name == "l4" else jnp.bfloat16
            if stride == 1:
                feat = conv1x1_bn_relu(feat, params[f"{name}_w"],
                                       params[f"{name}_scale"],
                                       params[f"{name}_bias"], out_dtype=out_dtype)
            else:
                feat = strided_conv1x1_bn_relu(feat, (b, hh, ww), params[f"{name}_w"],
                                               params[f"{name}_scale"],
                                               params[f"{name}_bias"],
                                               out_dtype=out_dtype)
                hh, ww = hh // 2, ww // 2
        latent = l2norm_fc_l2norm(feat, params["fc_w"], params["fc_b"])
    else:
        x0 = _stem_ref(x, params["conv1_w"], params["bn1_scale"], params["bn1_bias"])
        feat = x0.reshape(b * ho * wo, x0.shape[-1])
        hh, ww = ho, wo
        for name, stride in stages:
            if stride == 2:
                c = feat.shape[-1]
                feat = feat.reshape(b, hh, ww, c)[:, ::2, ::2, :]
                hh, ww = hh // 2, ww // 2
                feat = feat.reshape(b * hh * ww, c)
            feat = _conv1x1_bn_relu_ref(feat, params[f"{name}_w"],
                                        params[f"{name}_scale"],
                                        params[f"{name}_bias"])
        latent = _head_ref(feat, params["fc_w"], params["fc_b"])

    return latent.reshape(b, hh * ww, -1)           # (B, regions, latent_size)


# -----------------------------------------------------------------------------
# Deterministic synthetic parameters (no checkpoint); all packing done at init.
# -----------------------------------------------------------------------------
def init_params(key, latent_size):
    keys = iter(jax.random.split(key, 40))

    def bn_fold(c):
        gamma = 1.0 + 0.1 * jax.random.normal(next(keys), (c,), jnp.float32)
        beta = 0.1 * jax.random.normal(next(keys), (c,), jnp.float32)
        mean = 0.1 * jax.random.normal(next(keys), (c,), jnp.float32)
        var = jnp.abs(jax.random.normal(next(keys), (c,), jnp.float32)) + 0.5
        scale = gamma * jax.lax.rsqrt(var + 1e-5)
        bias = beta - mean * scale
        return scale.reshape(1, c), bias.reshape(1, c)

    params = {}
    params["conv1_w"] = 0.05 * jax.random.normal(next(keys), (7, 7, 3, 64), jnp.float32)
    params["bn1_scale"], params["bn1_bias"] = bn_fold(64)
    # Stem kernel operands are packed / bf16-cast once here, not inside the forward.
    params["stem_w_packed"] = _stem_pack_weights(params["conv1_w"])
    params["stem_scale4"] = jnp.tile(params["bn1_scale"], (1, 4))
    params["stem_bias4"] = jnp.tile(params["bn1_bias"], (1, 4))

    chans = {"l1": (64, 256), "l2": (256, 512), "l3": (512, 1024), "l4": (1024, 2048)}
    for name, (cin, cout) in chans.items():
        params[f"{name}_w"] = (0.05 * jax.random.normal(
            next(keys), (cin, cout), jnp.float32)).astype(jnp.bfloat16)
        params[f"{name}_scale"], params[f"{name}_bias"] = bn_fold(cout)

    # fc: Linear(2048, latent_size), module's Xavier init (bias = 0), bf16 weights.
    r = (6.0 / (2048 + latent_size)) ** 0.5
    params["fc_w"] = jax.random.uniform(next(keys), (2048, latent_size), jnp.float32,
                                        minval=-r, maxval=r).astype(jnp.bfloat16)
    params["fc_b"] = jnp.zeros((1, latent_size), jnp.float32)
    return params


if __name__ == "__main__":
    key = jax.random.PRNGKey(0)
    k_img, k_par = jax.random.split(key)
    latent_size = 128

    # NCHW float32 RGB images, like the PyTorch module.
    images = jax.random.normal(k_img, (2, 3, 64, 64), jnp.float32)
    params = init_params(k_par, latent_size)

    fwd_pallas = jax.jit(lambda im, p: full_image_encoder_forward(im, p, True))
    fwd_ref = jax.jit(lambda im, p: full_image_encoder_forward(im, p, False))

    out = jax.block_until_ready(fwd_pallas(images, params))
    ref = jax.block_until_ready(fwd_ref(images, params))

    assert out.shape == (2, 4, latent_size), out.shape
    assert bool(jnp.isfinite(out).all())
    max_diff = float(jnp.max(jnp.abs(out - ref)))
    assert max_diff < 2e-2, f"max diff vs reference too large: {max_diff}"

    print("KERNEL_OK")
</pallas_src>

<mosaic_0001>
module attributes {stable_mosaic.version = 11 : i64} {
  func.func @_stem_kernel(%arg0: i32, %arg1: i32, %arg2: memref<1x128x432xbf16, #tpu.memory_space<vmem>>, %arg3: memref<432x256xbf16, #tpu.memory_space<vmem>>, %arg4: memref<1x256xf32, #tpu.memory_space<vmem>>, %arg5: memref<1x256xf32, #tpu.memory_space<vmem>>, %arg6: memref<1x8x16x64xbf16, #tpu.memory_space<vmem>>, %arg7: memref<1x16x64xf32, #tpu.memory_space<vmem>>) attributes {dimension_semantics = [#tpu.dimension_semantics<parallel>, #tpu.dimension_semantics<arbitrary>], iteration_bounds = array<i64: 2, 2>, scalar_prefetch = 0 : i64, scratch_operands = 1 : i64, tpu.core_type = #tpu.core_type<tc>, window_params = [{transform_indices = @transform_0, window_bounds = array<i64: 1, 128, 432>}, {pipeline_mode = #tpu.pipeline_mode<synchronous>, transform_indices = @transform_1, window_bounds = array<i64: 432, 256>}, {pipeline_mode = #tpu.pipeline_mode<synchronous>, transform_indices = @transform_2, window_bounds = array<i64: 1, 256>}, {pipeline_mode = #tpu.pipeline_mode<synchronous>, transform_indices = @transform_3, window_bounds = array<i64: 1, 256>}, {transform_indices = @transform_4, window_bounds = array<i64: 1, 8, 16, 64>}]} {
    %c0 = arith.constant 0 : index
    %c0_0 = arith.constant 0 : index
    %c0_1 = arith.constant 0 : index
    %0 = vector.load %arg2[%c0, %c0_0, %c0_1] : memref<1x128x432xbf16, #tpu.memory_space<vmem>>, vector<1x128x432xbf16>
    %1 = vector.shape_cast %0 : vector<1x128x432xbf16> to vector<128x432xbf16>
    %c0_2 = arith.constant 0 : index
    %c0_3 = arith.constant 0 : index
    %2 = vector.load %arg3[%c0_2, %c0_3] : memref<432x256xbf16, #tpu.memory_space<vmem>>, vector<432x256xbf16>
    %cst = arith.constant dense<0.000000e+00> : vector<128x256xf32>
    %3 = tpu.matmul %1, %2, %cst {dimension_numbers = #tpu.dot_dimension_numbers<[1], [0], [0], [1], [0, 0, 1, 1], [], []>} : vector<128x432xbf16>, vector<432x256xbf16>, vector<128x256xf32> -> vector<128x256xf32>
    %c0_4 = arith.constant 0 : index
    %c0_5 = arith.constant 0 : index
    %4 = vector.load %arg4[%c0_4, %c0_5] : memref<1x256xf32, #tpu.memory_space<vmem>>, vector<1x256xf32>
    %5 = vector.broadcast %4 : vector<1x256xf32> to vector<128x256xf32>
    %6 = arith.mulf %3, %5 : vector<128x256xf32>
    %c0_6 = arith.constant 0 : index
    %c0_7 = arith.constant 0 : index
    %7 = vector.load %arg5[%c0_6, %c0_7] : memref<1x256xf32, #tpu.memory_space<vmem>>, vector<1x256xf32>
    %8 = vector.broadcast %7 : vector<1x256xf32> to vector<128x256xf32>
    %9 = arith.addf %6, %8 : vector<128x256xf32>
    %cst_8 = arith.constant 0.000000e+00 : f32
    %10 = vector.broadcast %cst_8 : f32 to vector<128x256xf32>
    %11 = arith.maximumf %9, %10 : vector<128x256xf32>
    %12 = vector.shape_cast %11 : vector<128x256xf32> to vector<8x16x256xf32>
    %13 = vector.extract_strided_slice %12 {offsets = [0, 0, 0], sizes = [8, 16, 64], strides = [1, 1, 1]} : vector<8x16x256xf32> to vector<8x16x64xf32>
    %14 = vector.extract_strided_slice %12 {offsets = [0, 0, 64], sizes = [8, 16, 64], strides = [1, 1, 1]} : vector<8x16x256xf32> to vector<8x16x64xf32>
    %15 = vector.extract_strided_slice %12 {offsets = [0, 0, 128], sizes = [8, 16, 64], strides = [1, 1, 1]} : vector<8x16x256xf32> to vector<8x16x64xf32>
    %16 = vector.extract_strided_slice %12 {offsets = [0, 0, 192], sizes = [8, 16, 64], strides = [1, 1, 1]} : vector<8x16x256xf32> to vector<8x16x64xf32>
    %cst_9 = arith.constant 0.000000e+00 : f32
    %17 = vector.broadcast %cst_9 : f32 to vector<8x1x64xf32>
    %18 = arith.maximumf %13, %14 : vector<8x16x64xf32>
    %19 = vector.extract_strided_slice %14 {offsets = [0, 0, 0], sizes = [8, 15, 64], strides = [1, 1, 1]} : vector<8x16x64xf32> to vector<8x15x64xf32>
    %20 = tpu.concatenate %17, %19 in 1 : vector<8x1x64xf32>, vector<8x15x64xf32> -> vector<8x16x64xf32>
    %21 = arith.maximumf %18, %20 : vector<8x16x64xf32>
    %22 = arith.maximumf %15, %16 : vector<8x16x64xf32>
    %23 = vector.extract_strided_slice %16 {offsets = [0, 0, 0], sizes = [8, 15, 64], strides = [1, 1, 1]} : vector<8x16x64xf32> to vector<8x15x64xf32>
    %24 = tpu.concatenate %17, %23 in 1 : vector<8x1x64xf32>, vector<8x15x64xf32> -> vector<8x16x64xf32>
    %25 = arith.maximumf %22, %24 : vector<8x16x64xf32>
    %c0_i32 = arith.constant 0 : i32
    %26 = arith.cmpi eq, %arg1, %c0_i32 : i32
    %27 = arith.extui %26 : i1 to i32
    %c0_i32_10 = arith.constant 0 : i32
    %28 = arith.cmpi ne, %27, %c0_i32_10 : i32
    scf.if %28 {
      %cst_21 = arith.constant 0.000000e+00 : f32
      %40 = vector.broadcast %cst_21 : f32 to vector<1x16x64xf32>
      %c0_22 = arith.constant 0 : index
      %c0_23 = arith.constant 0 : index
      %c0_24 = arith.constant 0 : index
      %41 = vector.load %arg7[%c0_22, %c0_23, %c0_24] : memref<1x16x64xf32, #tpu.memory_space<vmem>>, vector<1x16x64xf32>
      tpu.vector_store %arg7[%c0_22, %c0_23, %c0_24], %40 {strides = array<i32>} : memref<1x16x64xf32, #tpu.memory_space<vmem>>, vector<1x16x64xf32>,
    } else {
    }
    %c0_11 = arith.constant 0 : index
    %c0_12 = arith.constant 0 : index
    %c0_13 = arith.constant 0 : index
    %29 = vector.load %arg7[%c0_11, %c0_12, %c0_13] : memref<1x16x64xf32, #tpu.memory_space<vmem>>, vector<1x16x64xf32>
    %30 = vector.extract_strided_slice %25 {offsets = [0, 0, 0], sizes = [7, 16, 64], strides = [1, 1, 1]} : vector<8x16x64xf32> to vector<7x16x64xf32>
    %31 = tpu.concatenate %29, %30 in 0 : vector<1x16x64xf32>, vector<7x16x64xf32> -> vector<8x16x64xf32>
    %32 = arith.maximumf %21, %25 : vector<8x16x64xf32>
    %33 = arith.maximumf %32, %31 : vector<8x16x64xf32>
    %34 = arith.truncf %33 : vector<8x16x64xf32> to vector<8x16x64xbf16>
    %c0_14 = arith.constant 0 : index
    %c0_15 = arith.constant 0 : index
    %c0_16 = arith.constant 0 : index
    %c0_17 = arith.constant 0 : index
    %35 = vector.load %arg6[%c0_14, %c0_15, %c0_16, %c0_17] : memref<1x8x16x64xbf16, #tpu.memory_space<vmem>>, vector<1x8x16x64xbf16>
    %36 = vector.shape_cast %35 : vector<1x8x16x64xbf16> to vector<8x16x64xbf16>
    %37 = vector.shape_cast %34 : vector<8x16x64xbf16> to vector<1x8x16x64xbf16>
    tpu.vector_store %arg6[%c0_14, %c0_15, %c0_16, %c0_17], %37 {strides = array<i32>} : memref<1x8x16x64xbf16, #tpu.memory_space<vmem>>, vector<1x8x16x64xbf16>,
    %38 = vector.extract_strided_slice %25 {offsets = [7, 0, 0], sizes = [1, 16, 64], strides = [1, 1, 1]} : vector<8x16x64xf32> to vector<1x16x64xf32>
    %c0_18 = arith.constant 0 : index
    %c0_19 = arith.constant 0 : index
    %c0_20 = arith.constant 0 : index
    %39 = vector.load %arg7[%c0_18, %c0_19, %c0_20] : memref<1x16x64xf32, #tpu.memory_space<vmem>>, vector<1x16x64xf32>
    tpu.vector_store %arg7[%c0_18, %c0_19, %c0_20], %38 {strides = array<i32>} : memref<1x16x64xf32, #tpu.memory_space<vmem>>, vector<1x16x64xf32>,
    return
  }
  func.func @transform_0(%arg0: i32, %arg1: i32) -> (i32, i32, i32) {
    %c0_i32 = arith.constant 0 : i32
    %c0_i32_0 = arith.constant 0 : i32
    return %arg0, %arg1, %c0_i32 : i32, i32, i32
  }
  func.func @transform_1(%arg0: i32, %arg1: i32) -> (i32, i32) {
    %c0_i32 = arith.constant 0 : i32
    %c0_i32_0 = arith.constant 0 : i32
    %c0_i32_1 = arith.constant 0 : i32
    return %c0_i32, %c0_i32_0 : i32, i32
  }
  func.func @transform_2(%arg0: i32, %arg1: i32) -> (i32, i32) {
    %c0_i32 = arith.constant 0 : i32
    %c0_i32_0 = arith.constant 0 : i32
    %c0_i32_1 = arith.constant 0 : i32
    return %c0_i32, %c0_i32_0 : i32, i32
  }
  func.func @transform_3(%arg0: i32, %arg1: i32) -> (i32, i32) {
    %c0_i32 = arith.constant 0 : i32
    %c0_i32_0 = arith.constant 0 : i32
    %c0_i32_1 = arith.constant 0 : i32
    return %c0_i32, %c0_i32_0 : i32, i32
  }
  func.func @transform_4(%arg0: i32, %arg1: i32) -> (i32, i32, i32, i32) {
    %c0_i32 = arith.constant 0 : i32
    %c0_i32_0 = arith.constant 0 : i32
    %c0_i32_1 = arith.constant 0 : i32
    return %arg0, %arg1, %c0_i32, %c0_i32_0 : i32, i32, i32, i32
  }
}

module attributes {stable_mosaic.version = 11 : i64} {
  func.func @_matmul_affine_relu_kernel(%arg0: i32, %arg1: i32, %arg2: memref<512x64xbf16, #tpu.memory_space<vmem>>, %arg3: memref<64x256xbf16, #tpu.memory_space<vmem>>, %arg4: memref<1x256xf32, #tpu.memory_space<vmem>>, %arg5: memref<1x256xf32, #tpu.memory_space<vmem>>, %arg6: memref<512x256xbf16, #tpu.memory_space<vmem>>) attributes {dimension_semantics = [#tpu.dimension_semantics<parallel>, #tpu.dimension_semantics<parallel>], iteration_bounds = array<i64: 1, 1>, scalar_prefetch = 0 : i64, scratch_operands = 0 : i64, tpu.core_type = #tpu.core_type<tc>, window_params = [{transform_indices = @transform_0, window_bounds = array<i64: 512, 64>}, {transform_indices = @transform_1, window_bounds = array<i64: 64, 256>}, {transform_indices = @transform_2, window_bounds = array<i64: 1, 256>}, {transform_indices = @transform_3, window_bounds = array<i64: 1, 256>}, {transform_indices = @transform_4, window_bounds = array<i64: 512, 256>}]} {
    %c0 = arith.constant 0 : index
    %c0_0 = arith.constant 0 : index
    %0 = vector.load %arg2[%c0, %c0_0] : memref<512x64xbf16, #tpu.memory_space<vmem>>, vector<512x64xbf16>
    %c0_1 = arith.constant 0 : index
    %c0_2 = arith.constant 0 : index
    %1 = vector.load %arg3[%c0_1, %c0_2] : memref<64x256xbf16, #tpu.memory_space<vmem>>, vector<64x256xbf16>
    %cst = arith.constant dense<0.000000e+00> : vector<512x256xf32>
    %2 = tpu.matmul %0, %1, %cst {dimension_numbers = #tpu.dot_dimension_numbers<[1], [0], [0], [1], [0, 0, 1, 1], [], []>} : vector<512x64xbf16>, vector<64x256xbf16>, vector<512x256xf32> -> vector<512x256xf32>
    %c0_3 = arith.constant 0 : index
    %c0_4 = arith.constant 0 : index
    %3 = vector.load %arg4[%c0_3, %c0_4] : memref<1x256xf32, #tpu.memory_space<vmem>>, vector<1x256xf32>
    %4 = vector.broadcast %3 : vector<1x256xf32> to vector<512x256xf32>
    %5 = arith.mulf %2, %4 : vector<512x256xf32>
    %c0_5 = arith.constant 0 : index
    %c0_6 = arith.constant 0 : index
    %6 = vector.load %arg5[%c0_5, %c0_6] : memref<1x256xf32, #tpu.memory_space<vmem>>, vector<1x256xf32>
    %7 = vector.broadcast %6 : vector<1x256xf32> to vector<512x256xf32>
    %8 = arith.addf %5, %7 : vector<512x256xf32>
    %cst_7 = arith.constant 0.000000e+00 : f32
    %9 = vector.broadcast %cst_7 : f32 to vector<512x256xf32>
    %10 = arith.maximumf %8, %9 : vector<512x256xf32>
    %11 = arith.truncf %10 : vector<512x256xf32> to vector<512x256xbf16>
    %c0_8 = arith.constant 0 : index
    %c0_9 = arith.constant 0 : index
    %12 = vector.load %arg6[%c0_8, %c0_9] : memref<512x256xbf16, #tpu.memory_space<vmem>>, vector<512x256xbf16>
    tpu.vector_store %arg6[%c0_8, %c0_9], %11 {strides = array<i32>} : memref<512x256xbf16, #tpu.memory_space<vmem>>, vector<512x256xbf16>,
    return
  }
  func.func @transform_0(%arg0: i32, %arg1: i32) -> (i32, i32) {
    %c0_i32 = arith.constant 0 : i32
    %c0_i32_0 = arith.constant 0 : i32
    return %arg0, %c0_i32 : i32, i32
  }
  func.func @transform_1(%arg0: i32, %arg1: i32) -> (i32, i32) {
    %c0_i32 = arith.constant 0 : i32
    %c0_i32_0 = arith.constant 0 : i32
    return %c0_i32, %arg1 : i32, i32
  }
  func.func @transform_2(%arg0: i32, %arg1: i32) -> (i32, i32) {
    %c0_i32 = arith.constant 0 : i32
    %c0_i32_0 = arith.constant 0 : i32
    return %c0_i32, %arg1 : i32, i32
  }
  func.func @transform_3(%arg0: i32, %arg1: i32) -> (i32, i32) {
    %c0_i32 = arith.constant 0 : i32
    %c0_i32_0 = arith.constant 0 : i32
    return %c0_i32, %arg1 : i32, i32
  }
  func.func @transform_4(%arg0: i32, %arg1: i32) -> (i32, i32) {
    %c0_i32 = arith.constant 0 : i32
    return %arg0, %arg1 : i32, i32
  }
}

module attributes {stable_mosaic.version = 11 : i64} {
  func.func @_matmul_affine_relu_kernel(%arg0: i32, %arg1: i32, %arg2: memref<16x1x8x256xbf16, #tpu.memory_space<vmem>>, %arg3: memref<256x512xbf16, #tpu.memory_space<vmem>>, %arg4: memref<1x512xf32, #tpu.memory_space<vmem>>, %arg5: memref<1x512xf32, #tpu.memory_space<vmem>>, %arg6: memref<128x512xbf16, #tpu.memory_space<vmem>>) attributes {dimension_semantics = [#tpu.dimension_semantics<parallel>, #tpu.dimension_semantics<parallel>], iteration_bounds = array<i64: 1, 1>, scalar_prefetch = 0 : i64, scratch_operands = 0 : i64, tpu.core_type = #tpu.core_type<tc>, window_params = [{transform_indices = @transform_0, window_bounds = array<i64: 16, 1, 8, 256>}, {transform_indices = @transform_1, window_bounds = array<i64: 256, 512>}, {transform_indices = @transform_2, window_bounds = array<i64: 1, 512>}, {transform_indices = @transform_3, window_bounds = array<i64: 1, 512>}, {transform_indices = @transform_4, window_bounds = array<i64: 128, 512>}]} {
    %c0 = arith.constant 0 : index
    %c0_0 = arith.constant 0 : index
    %c0_1 = arith.constant 0 : index
    %c0_2 = arith.constant 0 : index
    %0 = vector.load %arg2[%c0, %c0_0, %c0_1, %c0_2] : memref<16x1x8x256xbf16, #tpu.memory_space<vmem>>, vector<16x1x8x256xbf16>
    %1 = vector.shape_cast %0 : vector<16x1x8x256xbf16> to vector<128x256xbf16>
    %c0_3 = arith.constant 0 : index
    %c0_4 = arith.constant 0 : index
    %2 = vector.load %arg3[%c0_3, %c0_4] : memref<256x512xbf16, #tpu.memory_space<vmem>>, vector<256x512xbf16>
    %cst = arith.constant dense<0.000000e+00> : vector<128x512xf32>
    %3 = tpu.matmul %1, %2, %cst {dimension_numbers = #tpu.dot_dimension_numbers<[1], [0], [0], [1], [0, 0, 1, 1], [], []>} : vector<128x256xbf16>, vector<256x512xbf16>, vector<128x512xf32> -> vector<128x512xf32>
    %c0_5 = arith.constant 0 : index
    %c0_6 = arith.constant 0 : index
    %4 = vector.load %arg4[%c0_5, %c0_6] : memref<1x512xf32, #tpu.memory_space<vmem>>, vector<1x512xf32>
    %5 = vector.broadcast %4 : vector<1x512xf32> to vector<128x512xf32>
    %6 = arith.mulf %3, %5 : vector<128x512xf32>
    %c0_7 = arith.constant 0 : index
    %c0_8 = arith.constant 0 : index
    %7 = vector.load %arg5[%c0_7, %c0_8] : memref<1x512xf32, #tpu.memory_space<vmem>>, vector<1x512xf32>
    %8 = vector.broadcast %7 : vector<1x512xf32> to vector<128x512xf32>
    %9 = arith.addf %6, %8 : vector<128x512xf32>
    %cst_9 = arith.constant 0.000000e+00 : f32
    %10 = vector.broadcast %cst_9 : f32 to vector<128x512xf32>
    %11 = arith.maximumf %9, %10 : vector<128x512xf32>
    %12 = arith.truncf %11 : vector<128x512xf32> to vector<128x512xbf16>
    %c0_10 = arith.constant 0 : index
    %c0_11 = arith.constant 0 : index
    %13 = vector.load %arg6[%c0_10, %c0_11] : memref<128x512xbf16, #tpu.memory_space<vmem>>, vector<128x512xbf16>
    tpu.vector_store %arg6[%c0_10, %c0_11], %12 {strides = array<i32>} : memref<128x512xbf16, #tpu.memory_space<vmem>>, vector<128x512xbf16>,
    return
  }
  func.func @transform_0(%arg0: i32, %arg1: i32) -> (i32, i32, i32, i32) {
    %c0_i32 = arith.constant 0 : i32
    %c0_i32_0 = arith.constant 0 : i32
    %c0_i32_1 = arith.constant 0 : i32
    %c0_i32_2 = arith.constant 0 : i32
    return %arg0, %c0_i32, %c0_i32_0, %c0_i32_1 : i32, i32, i32, i32
  }
  func.func @transform_1(%arg0: i32, %arg1: i32) -> (i32, i32) {
    %c0_i32 = arith.constant 0 : i32
    %c0_i32_0 = arith.constant 0 : i32
    return %c0_i32, %arg1 : i32, i32
  }
  func.func @transform_2(%arg0: i32, %arg1: i32) -> (i32, i32) {
    %c0_i32 = arith.constant 0 : i32
    %c0_i32_0 = arith.constant 0 : i32
    return %c0_i32, %arg1 : i32, i32
  }
  func.func @transform_3(%arg0: i32, %arg1: i32) -> (i32, i32) {
    %c0_i32 = arith.constant 0 : i32
    %c0_i32_0 = arith.constant 0 : i32
    return %c0_i32, %arg1 : i32, i32
  }
  func.func @transform_4(%arg0: i32, %arg1: i32) -> (i32, i32) {
    %c0_i32 = arith.constant 0 : i32
    return %arg0, %arg1 : i32, i32
  }
}

module attributes {stable_mosaic.version = 11 : i64} {
  func.func @_matmul_affine_relu_kernel(%arg0: i32, %arg1: i32, %arg2: memref<32x512xbf16, #tpu.memory_space<vmem>>, %arg3: memref<512x512xbf16, #tpu.memory_space<vmem>>, %arg4: memref<1x512xf32, #tpu.memory_space<vmem>>, %arg5: memref<1x512xf32, #tpu.memory_space<vmem>>, %arg6: memref<32x512xbf16, #tpu.memory_space<vmem>>) attributes {dimension_semantics = [#tpu.dimension_semantics<parallel>, #tpu.dimension_semantics<parallel>], iteration_bounds = array<i64: 1, 2>, scalar_prefetch = 0 : i64, scratch_operands = 0 : i64, tpu.core_type = #tpu.core_type<tc>, window_params = [{transform_indices = @transform_0, window_bounds = array<i64: 32, 512>}, {transform_indices = @transform_1, window_bounds = array<i64: 512, 512>}, {transform_indices = @transform_2, window_bounds = array<i64: 1, 512>}, {transform_indices = @transform_3, window_bounds = array<i64: 1, 512>}, {transform_indices = @transform_4, window_bounds = array<i64: 32, 512>}]} {
    %c0 = arith.constant 0 : index
    %c0_0 = arith.constant 0 : index
    %0 = vector.load %arg2[%c0, %c0_0] : memref<32x512xbf16, #tpu.memory_space<vmem>>, vector<32x512xbf16>
    %c0_1 = arith.constant 0 : index
    %c0_2 = arith.constant 0 : index
    %1 = vector.load %arg3[%c0_1, %c0_2] : memref<512x512xbf16, #tpu.memory_space<vmem>>, vector<512x512xbf16>
    %cst = arith.constant dense<0.000000e+00> : vector<32x512xf32>
    %2 = tpu.matmul %0, %1, %cst {dimension_numbers = #tpu.dot_dimension_numbers<[1], [0], [0], [1], [0, 0, 1, 1], [], []>} : vector<32x512xbf16>, vector<512x512xbf16>, vector<32x512xf32> -> vector<32x512xf32>
    %c0_3 = arith.constant 0 : index
    %c0_4 = arith.constant 0 : index
    %3 = vector.load %arg4[%c0_3, %c0_4] : memref<1x512xf32, #tpu.memory_space<vmem>>, vector<1x512xf32>
    %4 = vector.broadcast %3 : vector<1x512xf32> to vector<32x512xf32>
    %5 = arith.mulf %2, %4 : vector<32x512xf32>
    %c0_5 = arith.constant 0 : index
    %c0_6 = arith.constant 0 : index
    %6 = vector.load %arg5[%c0_5, %c0_6] : memref<1x512xf32, #tpu.memory_space<vmem>>, vector<1x512xf32>
    %7 = vector.broadcast %6 : vector<1x512xf32> to vector<32x512xf32>
    %8 = arith.addf %5, %7 : vector<32x512xf32>
    %cst_7 = arith.constant 0.000000e+00 : f32
    %9 = vector.broadcast %cst_7 : f32 to vector<32x512xf32>
    %10 = arith.maximumf %8, %9 : vector<32x512xf32>
    %11 = arith.truncf %10 : vector<32x512xf32> to vector<32x512xbf16>
    %c0_8 = arith.constant 0 : index
    %c0_9 = arith.constant 0 : index
    %12 = vector.load %arg6[%c0_8, %c0_9] : memref<32x512xbf16, #tpu.memory_space<vmem>>, vector<32x512xbf16>
    tpu.vector_store %arg6[%c0_8, %c0_9], %11 {strides = array<i32>} : memref<32x512xbf16, #tpu.memory_space<vmem>>, vector<32x512xbf16>,
    return
  }
  func.func @transform_0(%arg0: i32, %arg1: i32) -> (i32, i32) {
    %c0_i32 = arith.constant 0 : i32
    %c0_i32_0 = arith.constant 0 : i32
    return %arg0, %c0_i32 : i32, i32
  }
  func.func @transform_1(%arg0: i32, %arg1: i32) -> (i32, i32) {
    %c0_i32 = arith.constant 0 : i32
    %c0_i32_0 = arith.constant 0 : i32
    return %c0_i32, %arg1 : i32, i32
  }
  func.func @transform_2(%arg0: i32, %arg1: i32) -> (i32, i32) {
    %c0_i32 = arith.constant 0 : i32
    %c0_i32_0 = arith.constant 0 : i32
    return %c0_i32, %arg1 : i32, i32
  }
  func.func @transform_3(%arg0: i32, %arg1: i32) -> (i32, i32) {
    %c0_i32 = arith.constant 0 : i32
    %c0_i32_0 = arith.constant 0 : i32
    return %c0_i32, %arg1 : i32, i32
  }
  func.func @transform_4(%arg0: i32, %arg1: i32) -> (i32, i32) {
    %c0_i32 = arith.constant 0 : i32
    return %arg0, %arg1 : i32, i32
  }
}

module attributes {stable_mosaic.version = 11 : i64} {
  func.func @_head_kernel(%arg0: i32, %arg1: memref<8x2048xf32, #tpu.memory_space<vmem>>, %arg2: memref<2048x128xbf16, #tpu.memory_space<vmem>>, %arg3: memref<1x128xf32, #tpu.memory_space<vmem>>, %arg4: memref<8x128xf32, #tpu.memory_space<vmem>>) attributes {dimension_semantics = [#tpu.dimension_semantics<parallel>], iteration_bounds = array<i64: 1>, scalar_prefetch = 0 : i64, scratch_operands = 0 : i64, tpu.core_type = #tpu.core_type<tc>, window_params = [{transform_indices = @transform_0, window_bounds = array<i64: 8, 2048>}, {pipeline_mode = #tpu.pipeline_mode<synchronous>, transform_indices = @transform_1, window_bounds = array<i64: 2048, 128>}, {pipeline_mode = #tpu.pipeline_mode<synchronous>, transform_indices = @transform_2, window_bounds = array<i64: 1, 128>}, {transform_indices = @transform_3, window_bounds = array<i64: 8, 128>}]} {
    %c0 = arith.constant 0 : index
    %c0_0 = arith.constant 0 : index
    %0 = vector.load %arg1[%c0, %c0_0] : memref<8x2048xf32, #tpu.memory_space<vmem>>, vector<8x2048xf32>
    %1 = arith.mulf %0, %0 : vector<8x2048xf32>
    %cst = arith.constant dense<0.000000e+00> : vector<8xf32>
    %2 = vector.multi_reduction <add>, %1, %cst [1] : vector<8x2048xf32> to vector<8xf32>
    %3 = vector.shape_cast %2 : vector<8xf32> to vector<8x1xf32>
    %cst_1 = arith.constant 9.99999996E-13 : f32
    %4 = vector.broadcast %cst_1 : f32 to vector<8x1xf32>
    %5 = arith.addf %3, %4 : vector<8x1xf32>
    %6 = math.rsqrt %5 : vector<8x1xf32>
    %7 = vector.broadcast %6 : vector<8x1xf32> to vector<8x2048xf32>
    %8 = arith.mulf %0, %7 : vector<8x2048xf32>
    %9 = arith.truncf %8 : vector<8x2048xf32> to vector<8x2048xbf16>
    %c0_2 = arith.constant 0 : index
    %c0_3 = arith.constant 0 : index
    %10 = vector.load %arg2[%c0_2, %c0_3] : memref<2048x128xbf16, #tpu.memory_space<vmem>>, vector<2048x128xbf16>
    %cst_4 = arith.constant dense<0.000000e+00> : vector<8x128xf32>
    %11 = tpu.matmul %9, %10, %cst_4 {dimension_numbers = #tpu.dot_dimension_numbers<[1], [0], [0], [1], [0, 0, 1, 1], [], []>} : vector<8x2048xbf16>, vector<2048x128xbf16>, vector<8x128xf32> -> vector<8x128xf32>
    %c0_5 = arith.constant 0 : index
    %c0_6 = arith.constant 0 : index
    %12 = vector.load %arg3[%c0_5, %c0_6] : memref<1x128xf32, #tpu.memory_space<vmem>>, vector<1x128xf32>
    %13 = vector.broadcast %12 : vector<1x128xf32> to vector<8x128xf32>
    %14 = arith.addf %11, %13 : vector<8x128xf32>
    %15 = arith.mulf %14, %14 : vector<8x128xf32>
    %cst_7 = arith.constant dense<0.000000e+00> : vector<8xf32>
    %16 = vector.multi_reduction <add>, %15, %cst_7 [1] : vector<8x128xf32> to vector<8xf32>
    %17 = vector.shape_cast %16 : vector<8xf32> to vector<8x1xf32>
    %cst_8 = arith.constant 9.99999996E-13 : f32
    %18 = vector.broadcast %cst_8 : f32 to vector<8x1xf32>
    %19 = arith.addf %17, %18 : vector<8x1xf32>
    %20 = math.rsqrt %19 : vector<8x1xf32>
    %21 = vector.broadcast %20 : vector<8x1xf32> to vector<8x128xf32>
    %22 = arith.mulf %14, %21 : vector<8x128xf32>
    %c0_9 = arith.constant 0 : index
    %c0_10 = arith.constant 0 : index
    %23 = vector.load %arg4[%c0_9, %c0_10] : memref<8x128xf32, #tpu.memory_space<vmem>>, vector<8x128xf32>
    tpu.vector_store %arg4[%c0_9, %c0_10], %22 {strides = array<i32>} : memref<8x128xf32, #tpu.memory_space<vmem>>, vector<8x128xf32>,
    return
  }
  func.func @transform_0(%arg0: i32) -> (i32, i32) {
    %c0_i32 = arith.constant 0 : i32
    %c0_i32_0 = arith.constant 0 : i32
    return %arg0, %c0_i32 : i32, i32
  }
  func.func @transform_1(%arg0: i32) -> (i32, i32) {
    %c0_i32 = arith.constant 0 : i32
    %c0_i32_0 = arith.constant 0 : i32
    %c0_i32_1 = arith.constant 0 : i32
    return %c0_i32, %c0_i32_0 : i32, i32
  }
  func.func @transform_2(%arg0: i32) -> (i32, i32) {
    %c0_i32 = arith.constant 0 : i32
    %c0_i32_0 = arith.constant 0 : i32
    %c0_i32_1 = arith.constant 0 : i32
    return %c0_i32, %c0_i32_0 : i32, i32
  }
  func.func @transform_3(%arg0: i32) -> (i32, i32) {
    %c0_i32 = arith.constant 0 : i32
    %c0_i32_0 = arith.constant 0 : i32
    return %arg0, %c0_i32 : i32, i32
  }
}

module attributes {stable_mosaic.version = 11 : i64} {
  func.func @_matmul_affine_relu_kernel(%arg0: i32, %arg1: i32, %arg2: memref<8x1024xbf16, #tpu.memory_space<vmem>>, %arg3: memref<1024x512xbf16, #tpu.memory_space<vmem>>, %arg4: memref<1x512xf32, #tpu.memory_space<vmem>>, %arg5: memref<1x512xf32, #tpu.memory_space<vmem>>, %arg6: memref<8x512xf32, #tpu.memory_space<vmem>>) attributes {dimension_semantics = [#tpu.dimension_semantics<parallel>, #tpu.dimension_semantics<parallel>], iteration_bounds = array<i64: 1, 4>, scalar_prefetch = 0 : i64, scratch_operands = 0 : i64, tpu.core_type = #tpu.core_type<tc>, window_params = [{transform_indices = @transform_0, window_bounds = array<i64: 8, 1024>}, {transform_indices = @transform_1, window_bounds = array<i64: 1024, 512>}, {transform_indices = @transform_2, window_bounds = array<i64: 1, 512>}, {transform_indices = @transform_3, window_bounds = array<i64: 1, 512>}, {transform_indices = @transform_4, window_bounds = array<i64: 8, 512>}]} {
    %c0 = arith.constant 0 : index
    %c0_0 = arith.constant 0 : index
    %0 = vector.load %arg2[%c0, %c0_0] : memref<8x1024xbf16, #tpu.memory_space<vmem>>, vector<8x1024xbf16>
    %c0_1 = arith.constant 0 : index
    %c0_2 = arith.constant 0 : index
    %1 = vector.load %arg3[%c0_1, %c0_2] : memref<1024x512xbf16, #tpu.memory_space<vmem>>, vector<1024x512xbf16>
    %cst = arith.constant dense<0.000000e+00> : vector<8x512xf32>
    %2 = tpu.matmul %0, %1, %cst {dimension_numbers = #tpu.dot_dimension_numbers<[1], [0], [0], [1], [0, 0, 1, 1], [], []>} : vector<8x1024xbf16>, vector<1024x512xbf16>, vector<8x512xf32> -> vector<8x512xf32>
    %c0_3 = arith.constant 0 : index
    %c0_4 = arith.constant 0 : index
    %3 = vector.load %arg4[%c0_3, %c0_4] : memref<1x512xf32, #tpu.memory_space<vmem>>, vector<1x512xf32>
    %4 = vector.broadcast %3 : vector<1x512xf32> to vector<8x512xf32>
    %5 = arith.mulf %2, %4 : vector<8x512xf32>
    %c0_5 = arith.constant 0 : index
    %c0_6 = arith.constant 0 : index
    %6 = vector.load %arg5[%c0_5, %c0_6] : memref<1x512xf32, #tpu.memory_space<vmem>>, vector<1x512xf32>
    %7 = vector.broadcast %6 : vector<1x512xf32> to vector<8x512xf32>
    %8 = arith.addf %5, %7 : vector<8x512xf32>
    %cst_7 = arith.constant 0.000000e+00 : f32
    %9 = vector.broadcast %cst_7 : f32 to vector<8x512xf32>
    %10 = arith.maximumf %8, %9 : vector<8x512xf32>
    %c0_8 = arith.constant 0 : index
    %c0_9 = arith.constant 0 : index
    %11 = vector.load %arg6[%c0_8, %c0_9] : memref<8x512xf32, #tpu.memory_space<vmem>>, vector<8x512xf32>
    tpu.vector_store %arg6[%c0_8, %c0_9], %10 {strides = array<i32>} : memref<8x512xf32, #tpu.memory_space<vmem>>, vector<8x512xf32>,
    return
  }
  func.func @transform_0(%arg0: i32, %arg1: i32) -> (i32, i32) {
    %c0_i32 = arith.constant 0 : i32
    %c0_i32_0 = arith.constant 0 : i32
    return %arg0, %c0_i32 : i32, i32
  }
  func.func @transform_1(%arg0: i32, %arg1: i32) -> (i32, i32) {
    %c0_i32 = arith.constant 0 : i32
    %c0_i32_0 = arith.constant 0 : i32
    return %c0_i32, %arg1 : i32, i32
  }
  func.func @transform_2(%arg0: i32, %arg1: i32) -> (i32, i32) {
    %c0_i32 = arith.constant 0 : i32
    %c0_i32_0 = arith.constant 0 : i32
    return %c0_i32, %arg1 : i32, i32
  }
  func.func @transform_3(%arg0: i32, %arg1: i32) -> (i32, i32) {
    %c0_i32 = arith.constant 0 : i32
    %c0_i32_0 = arith.constant 0 : i32
    return %c0_i32, %arg1 : i32, i32
  }
  func.func @transform_4(%arg0: i32, %arg1: i32) -> (i32, i32) {
    %c0_i32 = arith.constant 0 : i32
    return %arg0, %arg1 : i32, i32
  }
}

</mosaic_0001>

<bundles_post_ra>
// kernel: _lambda_.6
= control target key start
LH: loop header
LB: loop body
LE: loop exit
PB: predicated region body
PF: predicated region fallthrough
CT: control target
= control target key end

     0   :  { %s2079_s15 = smov 0   ;;  %s2081_s16 = smov 0   ;;  %s2904_s0 = inlined_call_operand.vmem [shape: bf16[2,256,432], index: 0, kind: input, shape index: {}]   ;;  %s2905_s1 = inlined_call_operand.vmem [shape: bf16[432,256], index: 1, kind: input, shape index: {}]   ;;  %s2906_s2 = inlined_call_operand.vmem [shape: f32[1,256], index: 2, kind: input, shape index: {}]   ;;  %s2907_s3 = inlined_call_operand.vmem [shape: f32[1,256], index: 3, kind: input, shape index: {}]   ;;  %s2908_s4 = inlined_call_operand.vmem [shape: bf16[2,16,16,64], index: 4, kind: output, shape index: {}]  }
   0x1   :  { %s2083_s17 = smov 0   ;;  %s2085_s18 = smov 0  }
   0x2   :  { %s2087_s19 = smov 0  }
   0x3 LB: > { %s23_s20 = sadd.s32 1, %s2042_s17  ;;  %s26_s21 = sadd.s32 1, %s2046_s18  ;;  %s2050_s19 = sphi %s2087_s19, %s14_s19   ;;  %s2046_s18 = sphi %s2085_s18, %s2912_s18   ;;  %s2042_s17 = sphi %s2083_s17, %s2911_s17   ;;  %s2038_s16 = sphi %s2081_s16, %s2910_s16   ;;  %s2034_s15 = sphi %s2079_s15, %s2909_s15  }
   0x4   : > { %p24_p0 = scmp.ge.s32.totalorder %s23_s20, 2  ;;  %p1703_p1 = scmp.ge.s32.totalorder %s2050_s19, 1 }
   0x5   : > { %p184_p2 = scmp.lt.s32.totalorder %s2050_s19, 5 }
   0x6   : > { %s2914_s20 = smov (%p24_p0, %s23_s20), 0  ;;  %s2916_s21 = smov (!%p24_p0, %s26_s21), %s2046_s18 }
   0x7   : > { %p185_p3 = pnand %p1703_p1, %p184_p2  ;;  %p28_p4 = scmp.ge.s32.totalorder %s2916_s21, 2 }
   0x8   : > { %p221_p5 = scmp.lt.s32.totalorder (!%p185_p3), %s2038_s16, 1  ;;  %s1708_s28 = sshll.u32 (!%p185_p3), %s2034_s15, 3 }
   0x9   : > { %s2918_s21 = smov (%p28_p4, %s2916_s21), 0  ;;  %188 = sbr.rel (%p185_p3) target bundleno = 545 (0x221), region = 36 }
   0xa   : > { %p234_p6 = scmp.lt.s32.totalorder (!%p185_p3), %s1708_s28, 15  ;;  %s1704_s9 = sshll.u32 (!%p185_p3), %s2034_s15, 4 }
   0xb   : > { %p223_p7 = scmp.lt.s32.totalorder (!%p185_p3), %s1704_s9, 31  ;;  %p1806_p8 = scmp.ne.s32.totalorder (!%p185_p3), %s2034_s15, 0 }
   0xe   : > { %v1883_v0 = vld [vmem:[%s2905_s1 + $0x74] ss:$8 sps:$4 sm:$0xff]   ;;  %v1885_v1 = vld [vmem:[%s2905_s1 + $0x70] ss:$8 sps:$4 sm:$0xff]   ;;  %v1886_v2 = vld [vmem:[%s2905_s1 + $0x64] ss:$8 sps:$4 sm:$0xff]  }
   0xf   : > { %776 = vmatprep.subr.bf16.mxu0 %v1883_v0  ;;  %v1888_v3 = vld [vmem:[%s2905_s1 + $0x60] ss:$8 sps:$4 sm:$0xff]   ;;  %v1889_v4 = vld [vmem:[%s2905_s1 + $0x54] ss:$8 sps:$4 sm:$0xff]   ;;  %v1897_v6 = vld [vmem:[%s2905_s1 + $0x170] ss:$8 sps:$4 sm:$0xff]  }
  0x10   : > { %777 = vmatpush1.bf16.msra.mxu0 %v1885_v1  ;;  %v1895_v5 = vld [vmem:[%s2905_s1 + $0x174] ss:$8 sps:$4 sm:$0xff]   ;;  %s2920_s16 = smov (!%p221_p5, %s2038_s16), 1  ;;  %v1891_v7 = vld [vmem:[%s2905_s1 + $0x50] ss:$8 sps:$4 sm:$0xff]   ;;  %s2922_s28 = smov (!%p234_p6, %s1708_s28), 15 }
  0x11   : > { %778 = vmatprep.subr.bf16.mxu0 %v1886_v2  ;;  %v1892_v8 = vld [vmem:[%s2905_s1 + $0x44] ss:$8 sps:$4 sm:$0xff]   ;;  %889 = vmatprep.subr.bf16.mxu1 %v1895_v5  ;;  %s1710_s24 = sshll.u32 %s2920_s16, 5  ;;  %v1903_v10 = vld [vmem:[%s2905_s1 + $0x160] ss:$8 sps:$4 sm:$0xff]   ;;  %s1709_s6 = sshll.u32 %s2922_s28, 1 }
  0x12   : > { %v1901_v9 = vld [vmem:[%s2905_s1 + $0x164] ss:$8 sps:$4 sm:$0xff]   ;;  %890 = vmatpush1.bf16.msra.mxu1 %v1897_v6  ;;  %v1894_v11 = vld [vmem:[%s2905_s1 + $0x40] ss:$8 sps:$4 sm:$0xff]   ;;  %v1907_v12 = vld [vmem:[%s2905_s1 + $0x154] ss:$8 sps:$4 sm:$0xff]   ;;  %s238_s10 = sadd.s32 %s1710_s24, %s1709_s6 }
  0x13   : > { %891 = vmatprep.subr.bf16.mxu1 %v1901_v9  ;;  %v1898_v13 = vld [vmem:[%s2905_s1 + $0x34] ss:$8 sps:$4 sm:$0xff]   ;;  %v1909_v14 = vld [vmem:[%s2905_s1 + $0x150] ss:$8 sps:$4 sm:$0xff]   ;;  %s1711_s13 = sshll.u32 %s238_s10, 2  ;;  %s2924_s9 = smov (!%p223_p7, %s1704_s9), 31 }
  0x14   : > { %779 = vmatpush1.bf16.msra.mxu0 %v1888_v3  ;;  %v1913_v15 = vld [vmem:[%s2905_s1 + $0x144] ss:$8 sps:$4 sm:$0xff]   ;;  %s2167_s25 = scalar_lea.vmem %s2908_s4, %s1711_s13  ;;  %v1900_v16 = vld [vmem:[%s2905_s1 + $0x30] ss:$8 sps:$4 sm:$0xff]   ;;  %v1915_v18 = vld [vmem:[%s2905_s1 + $0x140] ss:$8 sps:$4 sm:$0xff]  }
  0x15   : > { %780 = vmatprep.subr.bf16.mxu0 %v1889_v4  ;;  %v1904_v17 = vld [vmem:[%s2905_s1 + $0x24] ss:$8 sps:$4 sm:$0xff]   ;;  %v1919_v19 = vld [vmem:[%s2905_s1 + $0x134] ss:$8 sps:$4 sm:$0xff]   ;;  %v1906_v20 = vld [vmem:[%s2905_s1 + $0x20] ss:$8 sps:$4 sm:$0xff]  }
  0x16   : > { %892 = vmatpush1.bf16.msra.mxu1 %v1903_v10  ;;  %v1910_v21 = vld [vmem:[%s2905_s1 + $0x14] ss:$8 sps:$4 sm:$0xff]   ;;  %v1921_v22 = vld [vmem:[%s2905_s1 + $0x130] ss:$8 sps:$4 sm:$0xff]   ;;  %v1925_v23 = vld [vmem:[%s2905_s1 + $0x124] ss:$8 sps:$4 sm:$0xff]  }
  0x17   : > { %893 = vmatprep.subr.bf16.mxu1 %v1907_v12  ;;  %v1912_v24 = vld [vmem:[%s2905_s1 + $0x10] ss:$8 sps:$4 sm:$0xff]   ;;  %s1705_s27 = sshll.u32 %s2924_s9, 2  ;;  %s1706_s24 = sshll.u32 %s2920_s16, 7  ;;  %v1916_v25 = vld [vmem:[%s2905_s1 + $0x4] ss:$8 sps:$4 sm:$0xff]  }
  0x18   : > { %781 = vmatpush1.bf16.msra.mxu0 %v1891_v7  ;;  %v1927_v26 = vld [vmem:[%s2905_s1 + $0x120] ss:$8 sps:$4 sm:$0xff]   ;;  %v1931_v27 = vld [vmem:[%s2905_s1 + $0x114] ss:$8 sps:$4 sm:$0xff]   ;;  %s227_s10 = sadd.s32 %s1706_s24, %s1705_s27  ;;  %v1933_v30 = vld [vmem:[%s2905_s1 + $0x110] ss:$8 sps:$4 sm:$0xff]  }
  0x19   : > { %782 = vmatprep.subr.bf16.mxu0 %v1892_v8  ;;  %v1918_v28 = vld [vmem:[%s2905_s1] ss:$8 sps:$4 sm:$0xff]   ;;  %v1922_v29 = vld [vmem:[%s2905_s1 + $0xf4] ss:$8 sps:$4 sm:$0xff]   ;;  %s1707_s22 = sshll.u32 %s227_s10, 2  ;;  %vm751_vm0 = vcmask 392192  }
  0x1a   : > { %894 = vmatpush1.bf16.msra.mxu1 %v1909_v14  ;;  %v1937_v31 = vld [vmem:[%s2905_s1 + $0x104] ss:$8 sps:$4 sm:$0xff]   ;;  %v1924_v32 = vld [vmem:[%s2905_s1 + $0xf0] ss:$8 sps:$4 sm:$0xff]   ;;  %s2227_s6 = scalar_lea.vmem %s2904_s0, %s1707_s22  ;;  %v1939_v34 = vld [vmem:[%s2905_s1 + $0x100] ss:$8 sps:$4 sm:$0xff]  }
  0x1b   : > { %895 = vmatprep.subr.bf16.mxu1 %v1913_v15  ;;  %v1928_v33 = vld [vmem:[%s2905_s1 + $0xe4] ss:$8 sps:$4 sm:$0xff]   ;;  %v1930_v36 = vld [vmem:[%s2905_s1 + $0xe0] ss:$8 sps:$4 sm:$0xff]   ;;  %v1934_v38 = vld [vmem:[%s2905_s1 + $0xd4] ss:$8 sps:$4 sm:$0xff]  }
  0x1c   : > { %783 = vmatpush1.bf16.msra.mxu0 %v1894_v11  ;;  %v1943_v35 = vld [vmem:[%s2905_s1 + $0x1a4] ss:$8 sps:$4 sm:$0xff]   ;;  %v1945_v39 = vld [vmem:[%s2905_s1 + $0x1a0] ss:$8 sps:$4 sm:$0xff]   ;;  %v1949_v40 = vld [vmem:[%s2905_s1 + $0x194] ss:$8 sps:$4 sm:$0xff]  }
  0x1d   : > { %784 = vmatprep.subr.bf16.mxu0 %v1898_v13  ;;  %v1963_v37 = vld [vmem:[%s2227_s6 + $0xc] ss:$16 sps:$4 sm:$0xff]   ;;  %v1969_v41 = vld [vmem:[%s2227_s6 + $0x4] ss:$16 sps:$4 sm:$0xff]   ;;  %v1936_v42 = vld [vmem:[%s2905_s1 + $0xd0] ss:$8 sps:$4 sm:$0xff]  }
  0x1e   : > { %896 = vmatpush1.bf16.msra.mxu1 %v1915_v18  ;;  %1798 = vmatprep.mubr.msk.bf16.mxu1 %vm751_vm0, %v1963_v37  ;;  %v1940_v43 = vld [vmem:[%s2905_s1 + $0xc4] ss:$8 sps:$4 sm:$0xff]   ;;  %v1951_v44 = vld [vmem:[%s2905_s1 + $0x190] ss:$8 sps:$4 sm:$0xff]   ;;  %v1942_v46 = vld [vmem:[%s2905_s1 + $0xc0] ss:$8 sps:$4 sm:$0xff]  }
  0x1f   : > { %897 = vmatprep.subr.bf16.mxu1 %v1919_v19  ;;  %808 = vmatprep.mubr.bf16.mxu0 %v1969_v41  ;;  %v1955_v45 = vld [vmem:[%s2905_s1 + $0x184] ss:$8 sps:$4 sm:$0xff]   ;;  %v1946_v47 = vld [vmem:[%s2905_s1 + $0xb4] ss:$8 sps:$4 sm:$0xff]   ;;  %v1957_v48 = vld [vmem:[%s2905_s1 + $0x180] ss:$8 sps:$4 sm:$0xff]  }
  0x20   : > { %785 = vmatpush1.bf16.msra.mxu0 %v1900_v16  ;;  %v1948_v49 = vld [vmem:[%s2905_s1 + $0xb0] ss:$8 sps:$4 sm:$0xff]   ;;  %v1952_v50 = vld [vmem:[%s2905_s1 + $0xa4] ss:$8 sps:$4 sm:$0xff]   ;;  %v1954_v53 = vld [vmem:[%s2905_s1 + $0xa0] ss:$8 sps:$4 sm:$0xff]  }
  0x21   : > { %786 = vmatprep.subr.bf16.mxu0 %v1904_v17  ;;  %v1961_v51 = vld [vmem:[%s2227_s6 + $0x8] ss:$16 sps:$4 sm:$0xff]   ;;  %v1972_v52 = vld [vmem:[%s2227_s6 + $0x2c] ss:$16 sps:$4 sm:$0xff]   ;;  %v1967_v60 = vld [vmem:[%s2227_s6] ss:$16 sps:$4 sm:$0xff]  }
  0x22   : > { %898 = vmatpush1.bf16.msra.mxu1 %v1921_v22  ;;  %v1958_v54 = vld [vmem:[%s2905_s1 + $0x94] ss:$8 sps:$4 sm:$0xff]   ;;  %v1960_v55 = vld [vmem:[%s2905_s1 + $0x90] ss:$8 sps:$4 sm:$0xff]   ;;  %v1964_v56 = vld [vmem:[%s2905_s1 + $0x84] ss:$8 sps:$4 sm:$0xff]  }
  0x23   : > { %899 = vmatprep.subr.bf16.mxu1 %v1925_v23  ;;  %v1975_v57 = vld [vmem:[%s2227_s6 + $0x28] ss:$16 sps:$4 sm:$0xff]   ;;  %v1978_v58 = vld [vmem:[%s2227_s6 + $0x4c] ss:$16 sps:$4 sm:$0xff]   ;;  %v1970_v61 = vld [vmem:[%s2227_s6 + $0x24] ss:$16 sps:$4 sm:$0xff]   ;;  %v1004_v23 = vlaneseq }
  0x24   : > { %787 = vmatpush1.bf16.msra.mxu0 %v1906_v20  ;;  %v1966_v59 = vld [vmem:[%s2905_s1 + $0x80] ss:$8 sps:$4 sm:$0xff]   ;;  %v1984_v63 = vld [vmem:[%s2227_s6 + $0x6c] ss:$16 sps:$4 sm:$0xff]   ;;  %v1976_v1 = vld [vmem:[%s2227_s6 + $0x44] ss:$16 sps:$4 sm:$0xff]  }
  0x25   : > { %788 = vmatprep.subr.bf16.mxu0 %v1910_v21  ;;  %v1981_v62 = vld [vmem:[%s2227_s6 + $0x48] ss:$16 sps:$4 sm:$0xff]   ;;  %v1974_v0 = vld [vmem:[%s2227_s6 + $0x20] ss:$16 sps:$4 sm:$0xff]   ;;  %v1990_v3 = vld [vmem:[%s2227_s6 + $0x8c] ss:$16 sps:$4 sm:$0xff]  }
  0x26   : > { %900 = vmatpush1.bf16.msra.mxu1 %v1927_v26  ;;  %v1987_v2 = vld [vmem:[%s2227_s6 + $0x68] ss:$16 sps:$4 sm:$0xff]   ;;  %v1980_v4 = vld [vmem:[%s2227_s6 + $0x40] ss:$16 sps:$4 sm:$0xff]   ;;  %v1982_v5 = vld [vmem:[%s2227_s6 + $0x64] ss:$16 sps:$4 sm:$0xff]  }
  0x27   : > { %901 = vmatprep.subr.bf16.mxu1 %v1931_v27  ;;  %v1993_v6 = vld [vmem:[%s2227_s6 + $0x88] ss:$16 sps:$4 sm:$0xff]   ;;  %v1996_v7 = vld [vmem:[%s2227_s6 + $0xac] ss:$16 sps:$4 sm:$0xff]   ;;  %v1986_v8 = vld [vmem:[%s2227_s6 + $0x60] ss:$16 sps:$4 sm:$0xff]  }
  0x28   : > { %789 = vmatpush1.bf16.msra.mxu0 %v1912_v24  ;;  %v1988_v9 = vld [vmem:[%s2227_s6 + $0x84] ss:$16 sps:$4 sm:$0xff]   ;;  %v1999_v10 = vld [vmem:[%s2227_s6 + $0xa8] ss:$16 sps:$4 sm:$0xff]   ;;  %v2002_v11 = vld [vmem:[%s2227_s6 + $0xcc] ss:$16 sps:$4 sm:$0xff]  }
  0x29   : > { %790 = vmatprep.subr.bf16.mxu0 %v1916_v25  ;;  %v1992_v12 = vld [vmem:[%s2227_s6 + $0x80] ss:$16 sps:$4 sm:$0xff]   ;;  %v1994_v13 = vld [vmem:[%s2227_s6 + $0xa4] ss:$16 sps:$4 sm:$0xff]   ;;  %v2005_v14 = vld [vmem:[%s2227_s6 + $0xc8] ss:$16 sps:$4 sm:$0xff]  }
  0x2a   : > { %902 = vmatpush1.bf16.msra.mxu1 %v1933_v30  ;;  %v2008_v15 = vld [vmem:[%s2227_s6 + $0xec] ss:$16 sps:$4 sm:$0xff]   ;;  %v1998_v16 = vld [vmem:[%s2227_s6 + $0xa0] ss:$16 sps:$4 sm:$0xff]   ;;  %v2000_v17 = vld [vmem:[%s2227_s6 + $0xc4] ss:$16 sps:$4 sm:$0xff]  }
  0x2b   : > { %903 = vmatprep.subr.bf16.mxu1 %v1937_v31  ;;  %v2011_v18 = vld [vmem:[%s2227_s6 + $0xe8] ss:$16 sps:$4 sm:$0xff]   ;;  %v2004_v19 = vld [vmem:[%s2227_s6 + $0xc0] ss:$16 sps:$4 sm:$0xff]   ;;  %v2006_v20 = vld [vmem:[%s2227_s6 + $0xe4] ss:$16 sps:$4 sm:$0xff]  }
  0x2c   : > { %791 = vmatpush1.bf16.msra.mxu0 %v1918_v28  ;;  %v2010_v21 = vld [vmem:[%s2227_s6 + $0xe0] ss:$16 sps:$4 sm:$0xff]   ;;  %v1005_v26 = vshrl.u32 %v1004_v23, 7  ;;  %s2052_s6 = smov 64   ;;  %vm1202_vm1 = vcmask 1040384  }
  0x2d   : > { %792 = vmatprep.subr.bf16.mxu0 %v1922_v29  ;;  %v1002_v30 = vld [vmem:[%s2906_s2] sm:$0x3] }
  0x2e   : > { %904 = vmatpush1.bf16.msra.mxu1 %v1939_v34  ;;  %v1006_v29 = vsub.s32 0, %v1005_v26 }
  0x2f   : > { %915 = vmatprep.subr.bf16.mxu1 %v1943_v35 }
  0x30   : > { %793 = vmatpush2.bf16.msra.mxu0 %v1924_v32  ;;  %v1010_v32 = vsub.s32 1, %v1005_v26  ;;  %v2335_v35 = vrot.slane %v1002_v30, %v1006_v29 }
  0x31   : > { %794 = vmatprep.subr.bf16.mxu0 %v1928_v33  ;;  %v1046_v33 = vld [vmem:[%s2907_s3] sm:$0x3] }
  0x32   : > { %916 = vmatpush2.bf16.msra.mxu1 %v1945_v39  ;;  %v2337_v39 = vrot.slane %v1046_v33, %v1006_v29  ;;  %v2339_v41 = vrot.slane %v1002_v30, %v1010_v32 }
  0x33   : > { %917 = vmatprep.subr.bf16.mxu1 %v1949_v40 }
  0x34   : > { %795 = vmatpush2.bf16.msra.mxu0 %v1930_v36 }
  0x35   : > { %796 = vmatprep.subr.bf16.mxu0 %v1934_v38 }
  0x36   : > { %918 = vmatpush2.bf16.msra.mxu1 %v1951_v44 }
  0x37   : > { %919 = vmatprep.subr.bf16.mxu1 %v1955_v45 }
  0x38   : > { %797 = vmatpush2.bf16.msra.mxu0 %v1936_v42 }
  0x39   : > { %798 = vmatprep.subr.bf16.mxu0 %v1940_v43 }
  0x3a   : > { %920 = vmatpush2.bf16.msra.mxu1 %v1957_v48 }
  0x3c   : > { %799 = vmatpush2.bf16.msra.mxu0 %v1942_v46 }
  0x3d   : > { %800 = vmatprep.subr.bf16.mxu0 %v1946_v47  ;;  %922 = vmatmul.mubr.bf16.vlgmr.msra.gmra.mxu1 %v1961_v51  ;;  %v2348_v51 = vrot.slane %v1046_v33, %v1010_v32 }
  0x3e   : > { %1799 = vmatprep.mubr.msk.bf16.mxu1 %vm751_vm0, %v1972_v52 }
  0x40   : > { %801 = vmatpush2.bf16.msra.mxu0 %v1948_v49 }
  0x41   : > { %802 = vmatprep.subr.bf16.mxu0 %v1952_v50 }
  0x44   : > { %803 = vmatpush2.bf16.msra.mxu0 %v1954_v53 }
  0x45   : > { %804 = vmatprep.subr.bf16.mxu0 %v1958_v54  ;;  %932 = vmatmul.mubr.bf16.gmra.mxu1 %v1975_v57 }
  0x46   : > { %1800 = vmatprep.mubr.msk.bf16.mxu1 %vm751_vm0, %v1978_v58 }
  0x48   : > { %805 = vmatpush2.bf16.msra.mxu0 %v1960_v55 }
  0x49   : > { %806 = vmatprep.subr.bf16.mxu0 %v1964_v56 }
  0x4c   : > { %807 = vmatpush2.bf16.msra.mxu0 %v1966_v59 }
  0x4d   : > { %942 = vmatmul.mubr.bf16.gmra.mxu1 %v1981_v62 }
  0x4e   : > { %1801 = vmatprep.mubr.msk.bf16.mxu1 %vm751_vm0, %v1984_v63 }
  0x4f   : > { %809 = vmatmul.mubr.bf16.vlgmr.msra.gmra.mxu0 %v1967_v60 }
  0x50   : > { %818 = vmatprep.mubr.bf16.mxu0 %v1970_v61 }
  0x55   : > { %952 = vmatmul.mubr.bf16.gmra.mxu1 %v1987_v2 }
  0x56   : > { %1802 = vmatprep.mubr.msk.bf16.mxu1 %vm751_vm0, %v1990_v3 }
  0x57   : > { %819 = vmatmul.mubr.bf16.gmra.mxu0 %v1974_v0 }
  0x58   : > { %828 = vmatprep.mubr.bf16.mxu0 %v1976_v1 }
  0x5d   : > { %962 = vmatmul.mubr.bf16.gmra.mxu1 %v1993_v6 }
  0x5e   : > { %1803 = vmatprep.mubr.msk.bf16.mxu1 %vm751_vm0, %v1996_v7 }
  0x5f   : > { %829 = vmatmul.mubr.bf16.gmra.mxu0 %v1980_v4 }
  0x60   : > { %838 = vmatprep.mubr.bf16.mxu0 %v1982_v5 }
  0x65   : > { %972 = vmatmul.mubr.bf16.gmra.mxu1 %v1999_v10 }
  0x66   : > { %1804 = vmatprep.mubr.msk.bf16.mxu1 %vm751_vm0, %v2002_v11 }
  0x67   : > { %839 = vmatmul.mubr.bf16.gmra.mxu0 %v1986_v8 }
  0x68   : > { %848 = vmatprep.mubr.bf16.mxu0 %v1988_v9 }
  0x6d   : > { %982 = vmatmul.mubr.bf16.gmra.mxu1 %v2005_v14 }
  0x6e   : > { %1805 = vmatprep.mubr.msk.bf16.mxu1 %vm751_vm0, %v2008_v15 }
  0x6f   : > { %849 = vmatmul.mubr.bf16.gmra.mxu0 %v1992_v12 }
  0x70   : > { %858 = vmatprep.mubr.bf16.mxu0 %v1994_v13 }
  0x75   : > { %992 = vmatmul.mubr.bf16.gmra.mxu1 %v2011_v18 }
  0x77   : > { %859 = vmatmul.mubr.bf16.gmra.mxu0 %v1998_v16 }
  0x78   : > { %868 = vmatprep.mubr.bf16.mxu0 %v2000_v17 }
  0x7f   : > { %869 = vmatmul.mubr.bf16.gmra.mxu0 %v2004_v19 }
  0x80   : > { %878 = vmatprep.mubr.bf16.mxu0 %v2006_v20 }
  0x87   : > { %879 = vmatmul.mubr.bf16.gmra.mxu0 %v2010_v21 }
  0xfd   : > { %v923_v22 = vpop.f32.mrf.mxu1 }
  0xff   : > { %v925_v24 = vpop.f32.mrf.mxu1 }
 0x101   : > { %v927_v25 = vpop.f32.mrf.mxu1 }
 0x103   : > { %v929_v27 = vpop.f32.mrf.mxu1 }
 0x105   : > { %v933_v28 = vpop.f32.mrf.mxu1 }
 0x107   : > { %v935_v31 = vpop.f32.mrf.mxu1 }
 0x109   : > { %v937_v34 = vpop.f32.mrf.mxu1 }
 0x10b   : > { %v939_v37 = vpop.f32.mrf.mxu1 }
 0x10d   : > { %v2341_v42 = vpop.f32.mrf.mxu1 }
 0x10f   : > { %v810_v36 = vpop.f32.mrf.mxu0  ;;  %v2344_v46 = vpop.f32.mrf.mxu1 }
 0x110   : > { %v924_v38 = vadd.f32 %v923_v22, %v810_v36 }
 0x111   : > { %v812_v40 = vpop.f32.mrf.mxu0  ;;  %v2350_v52 = vpop.f32.mrf.mxu1 }
 0x112   : > { %v1014_v43 = vmul.f32 %v2335_v35, %v924_v38  ;;  %v926_v44 = vadd.f32 %v925_v24, %v812_v40 }
 0x113   : > { %v814_v45 = vpop.f32.mrf.mxu0  ;;  %v2355_v57 = vpop.f32.mrf.mxu1 }
 0x114   : > { %v928_v47 = vadd.f32 %v927_v25, %v814_v45  ;;  %v1058_v48 = vadd.f32 %v2337_v39, %v1014_v43  ;;  %v1015_v49 = vmul.f32 %v2339_v41, %v926_v44 }
 0x115   : > { %v816_v50 = vpop.f32.mrf.mxu0  ;;  %v2362_v63 = vpop.f32.mrf.mxu1 }
 0x116   : > { %v1016_v53 = vmul.f32 %v2335_v35, %v928_v47  ;;  %v930_v54 = vadd.f32 %v929_v27, %v816_v50  ;;  %v2353_v55 = vmax.f32 %v1058_v48, 0.0  ;;  %v1059_v62 = vadd.f32 %v2348_v51, %v1015_v49 }
 0x117   : > { %v820_v56 = vpop.f32.mrf.mxu0  ;;  %v2369_v5 = vpop.f32.mrf.mxu1 }
 0x118   : > { %v1060_v58 = vadd.f32 %v2337_v39, %v1016_v53  ;;  %v1017_v59 = vmul.f32 %v2339_v41, %v930_v54  ;;  %v934_v60 = vadd.f32 %v933_v28, %v820_v56  ;;  %1138 = vrot.lane.b32.xlu0 %v2353_v55, %s2052_s6  ;;  %v1203_v2 = vrot.slane %v2353_v55, 7 }
 0x119   : > { %v822_v61 = vpop.f32.mrf.mxu0  ;;  %v2375_v11 = vpop.f32.mrf.mxu1  ;;  %v2379_v12 = vmax.f32 %v1059_v62, 0.0 }
 0x11a   : > { %v2364_v0 = vmax.f32 %v1060_v58, 0.0  ;;  %v1018_v1 = vmul.f32 %v2335_v35, %v934_v60  ;;  %v1061_v3 = vadd.f32 %v2348_v51, %v1017_v59  ;;  %v936_v6 = vadd.f32 %v935_v31, %v822_v61 }
 0x11b   : > { %v824_v4 = vpop.f32.mrf.mxu0  ;;  %v2382_v15 = vpop.f32.mrf.mxu1  ;;  %v1379_v29 = vrot.slane %v2379_v12, 7 }
 0x11c   : > { %v938_v7 = vadd.f32 %v937_v34, %v824_v4  ;;  %1227 = vrot.lane.b32.xlu0 %v1203_v2, %s2052_s6  ;;  %v2372_v8 = vmax.f32 %v1061_v3, 0.0  ;;  %v1204_v10 = vrot.slane %v2364_v0, 7  ;;  %v1062_v13 = vadd.f32 %v2337_v39, %v1018_v1 }
 0x11d   : > { %v826_v9 = vpop.f32.mrf.mxu0  ;;  %v1019_v16 = vmul.f32 %v2339_v41, %v936_v6  ;;  %v963_v20 = vpop.f32.mrf.mxu1 }
 0x11e   : > { %1317 = vrot.lane.b32.xlu1 %v2372_v8, %s2052_s6  ;;  %v1020_v17 = vmul.f32 %v2335_v35, %v938_v7  ;;  %v1205_v18 = vsel %vm1202_vm1, %v1203_v2, %v1204_v10  ;;  %v2390_v21 = vmax.f32 %v1062_v13, 0.0  ;;  %v940_v25 = vadd.f32 %v939_v37, %v826_v9 }
 0x11f   : > { %v830_v14 = vpop.f32.mrf.mxu0  ;;  %v965_v23 = vpop.f32.mrf.mxu1  ;;  %v1063_v24 = vadd.f32 %v2348_v51, %v1019_v16  ;;  %v1380_v30 = vrot.slane %v2372_v8, 7 }
 0x120   : > { %1315 = vrot.lane.b32.xlu0 %v2379_v12, %s2052_s6  ;;  %v1064_v26 = vadd.f32 %v2337_v39, %v1020_v17  ;;  %v1021_v34 = vmul.f32 %v2339_v41, %v940_v25  ;;  %v944_v37 = vadd.f32 %v2341_v42, %v830_v14  ;;  %v1206_v53 = vrot.slane %v2390_v21, 7 }
 0x121   : > { %v832_v19 = vpop.f32.mrf.mxu0  ;;  %v967_v28 = vpop.f32.mrf.mxu1  ;;  %v2402_v33 = vmax.f32 %v1063_v24, 0.0  ;;  %v1381_v43 = vsel %vm1202_vm1, %v1379_v29, %v1380_v30 }
 0x122   : > { %1229 = vrot.lane.b32.xlu1 %v1205_v18, %s2052_s6  ;;  %v2406_v36 = vmax.f32 %v1064_v26, 0.0  ;;  %v1022_v47 = vmul.f32 %v2335_v35, %v944_v37  ;;  %v1065_v49 = vadd.f32 %v2348_v51, %v1021_v34  ;;  %v946_v62 = vadd.f32 %v2344_v46, %v832_v19 }
 0x123   : > { %v834_v22 = vpop.f32.mrf.mxu0  ;;  %v969_v32 = vpop.f32.mrf.mxu1  ;;  %v1382_v48 = vrot.slane %v2402_v33, 7 }
 0x124   : > { %1140 = vrot.lane.b32.xlu0 %v2364_v0, %s2052_s6  ;;  %v948_v54 = vadd.f32 %v2350_v52, %v834_v22  ;;  %v2422_v59 = vmax.f32 %v1065_v49, 0.0  ;;  %v1066_v60 = vadd.f32 %v2337_v39, %v1022_v47  ;;  %v1207_v1 = vrot.slane %v2406_v36, 7 }
 0x125   : > { %v836_v27 = vpop.f32.mrf.mxu0  ;;  %v973_v40 = vpop.f32.mrf.mxu1  ;;  %v1023_v16 = vmul.f32 %v2339_v41, %v946_v62 }
 0x126   : > { %1142 = vrot.lane.b32.xlu1 %v2390_v21, %s2052_s6  ;;  %v1024_v6 = vmul.f32 %v2335_v35, %v948_v54  ;;  %v950_v7 = vadd.f32 %v2355_v57, %v836_v27  ;;  %v2436_v46 = vmax.f32 %v1066_v60, 0.0  ;;  %v1208_v17 = vsel %vm1202_vm1, %v1206_v53, %v1207_v1 }
 0x127   : > { %v2400_v31 = vpop.f32.mrf.mxu0  ;;  %v975_v45 = vpop.f32.mrf.mxu1  ;;  %v1383_v18 = vrot.slane %v2422_v59, 7  ;;  %v1067_v34 = vadd.f32 %v2348_v51, %v1023_v16 }
 0x128   : > { %1403 = vrot.lane.b32.xlu0 %v1379_v29, %s2052_s6  ;;  %v1209_v24 = vrot.slane %v2436_v46, 7  ;;  %v1068_v27 = vadd.f32 %v2337_v39, %v1024_v6  ;;  %v954_v47 = vadd.f32 %v2362_v63, %v2400_v31 }
 0x129   : > { %v842_v38 = vpop.f32.mrf.mxu0  ;;  %v977_v42 = vpop.f32.mrf.mxu1  ;;  %v2475_v62 = vmax.f32 %v1067_v34, 0.0 }
 0x12a   : > { %1144 = vrot.lane.b32.xlu1 %v2406_v36, %s2052_s6 }
 0x12b   : > { %v844_v44 = vpop.f32.mrf.mxu0  ;;  %v979_v58 = vpop.f32.mrf.mxu1 }
 0x12c   : > { %1405 = vrot.lane.b32.xlu0 %v1381_v43, %s2052_s6  ;;  %v958_v60 = vadd.f32 %v2375_v11, %v844_v44 }
 0x12d   : > { %v2416_v50 = vpop.f32.mrf.mxu0  ;;  %v2427_v3 = vpop.f32.mrf.mxu1 }
 0x12e   : > { %1407 = vrot.lane.b32.xlu1 %v1382_v48, %s2052_s6 }
 0x12f   : > { %v850_v56 = vpop.f32.mrf.mxu0  ;;  %v985_v57 = vpop.f32.mrf.mxu1 }
 0x130   : > { %1231 = vrot.lane.b32.xlu0 %v1206_v53, %s2052_s6  ;;  %v964_v61 = vadd.f32 %v963_v20, %v850_v56 }
 0x131   : > { %v852_v2 = vpop.f32.mrf.mxu0  ;;  %v987_v43 = vpop.f32.mrf.mxu1 }
 0x132   : > { %1321 = vrot.lane.b32.xlu1 %v2422_v59, %s2052_s6  ;;  %v1030_v52 = vmul.f32 %v2335_v35, %v964_v61  ;;  %v966_v4 = vadd.f32 %v965_v23, %v852_v2  ;;  %v1025_v23 = vmul.f32 %v2339_v41, %v950_v7  ;;  %v2472_v61 = vmax.f32 %v1068_v27, 0.0 }
 0x133   : > { %v854_v9 = vpop.f32.mrf.mxu0  ;;  %v989_v2 = vpop.f32.mrf.mxu1  ;;  %v1028_v7 = vmul.f32 %v2335_v35, %v958_v60 }
 0x134   : > { %1319 = vrot.lane.b32.xlu0 %v2402_v33, %s2052_s6  ;;  %v1031_v10 = vmul.f32 %v2339_v41, %v966_v4  ;;  %v968_v13 = vadd.f32 %v967_v28, %v854_v9  ;;  %v2440_v14 = vadd.f32 %v2337_v39, %v1030_v52  ;;  %v1069_v56 = vadd.f32 %v2348_v51, %v1025_v23 }
 0x135   : > { %v856_v19 = vpop.f32.mrf.mxu0  ;;  %v993_v6 = vpop.f32.mrf.mxu1  ;;  %v960_v23 = vadd.f32 %v2382_v15, %v2416_v50 }
 0x136   : > { %1233 = vrot.lane.b32.xlu1 %v1208_v17, %s2052_s6  ;;  %v1032_v20 = vmul.f32 %v2335_v35, %v968_v13  ;;  %v970_v22 = vadd.f32 %v969_v32, %v856_v19  ;;  %v2450_v26 = vadd.f32 %v2348_v51, %v1031_v10  ;;  %v1384_v32 = vsel %vm1202_vm1, %v1382_v48, %v1383_v18 }
 0x137   : > { %v860_v25 = vpop.f32.mrf.mxu0  ;;  %v2488_v52 = vmax.f32 %v1069_v56, 0.0  ;;  %v1385_v17 = vrot.slane %v2475_v62, 7  ;;  %v995_v27 = vpop.f32.mrf.mxu1 }
 0x138   : > { %1146 = vrot.lane.b32.xlu0 %v2436_v46, %s2052_s6  ;;  %v1033_v28 = vmul.f32 %v2339_v41, %v970_v22  ;;  %v974_v29 = vadd.f32 %v973_v40, %v860_v25  ;;  %v2457_v30 = vadd.f32 %v2337_v39, %v1032_v20  ;;  %v956_v40 = vadd.f32 %v2369_v5, %v842_v38 }
 0x139   : > { %v862_v37 = vpop.f32.mrf.mxu0  ;;  %v1026_v5 = vmul.f32 %v2335_v35, %v954_v47  ;;  %v997_v56 = vpop.f32.mrf.mxu1 }
 0x13a   : > { %1409 = vrot.lane.b32.xlu1 %v1384_v32, %s2052_s6  ;;  %v1034_v49 = vmul.f32 %v2335_v35, %v974_v29  ;;  %v976_v53 = vadd.f32 %v975_v45, %v862_v37  ;;  %v2466_v54 = vadd.f32 %v2348_v51, %v1033_v28  ;;  %v1072_v28 = vadd.f32 %v2337_v39, %v1028_v7 }
 0x13b   : > { %v864_v48 = vpop.f32.mrf.mxu0  ;;  %v1070_v18 = vadd.f32 %v2337_v39, %v1026_v5 }
 0x13c   : > { %1235 = vrot.lane.b32.xlu0 %v1209_v24, %s2052_s6  ;;  %v1035_v63 = vmul.f32 %v2339_v41, %v976_v53  ;;  %v978_v31 = vadd.f32 %v977_v42, %v864_v48  ;;  %v2478_v1 = vadd.f32 %v2337_v39, %v1034_v49  ;;  %v1027_v42 = vmul.f32 %v2339_v41, %v956_v40 }
 0x13d   : > { %v866_v45 = vpop.f32.mrf.mxu0  ;;  %v2518_v15 = vmax.f32 %v1070_v18, 0.0  ;;  %v1029_v53 = vmul.f32 %v2339_v41, %v960_v23  ;;  %v1386_v40 = vrot.slane %v2488_v52, 7 }
 0x13e   : > { %1148 = vrot.lane.b32.xlu1 %v2472_v61, %s2052_s6  ;;  %v2484_v11 = vadd.f32 %v2348_v51, %v1035_v63  ;;  %v1036_v38 = vmul.f32 %v2335_v35, %v978_v31  ;;  %v980_v44 = vadd.f32 %v979_v58, %v866_v45  ;;  %v1210_v58 = vrot.slane %v2472_v61, 7 }
 0x13f   : > { %v870_v4 = vpop.f32.mrf.mxu0  ;;  %v1071_v22 = vadd.f32 %v2348_v51, %v1027_v42  ;;  %v1073_v7 = vadd.f32 %v2348_v51, %v1029_v53  ;;  %v1212_v18 = vrot.slane %v2518_v15, 7 }
 0x140   : > { %1323 = vrot.lane.b32.xlu0 %v2475_v62, %s2052_s6  ;;  %v1037_v9 = vmul.f32 %v2339_v41, %v980_v44  ;;  %v2495_v10 = vadd.f32 %v2337_v39, %v1036_v38  ;;  %v984_v13 = vadd.f32 %v2427_v3, %v870_v4  ;;  %v1387_v44 = vsel %vm1202_vm1, %v1385_v17, %v1386_v40  ;;  %v999_v4 = vpop.f32.mrf.mxu1 }
 0x141   : > { %v872_v16 = vpop.f32.mrf.mxu0  ;;  %v2521_v49 = vmax.f32 %v1071_v22, 0.0  ;;  %v2557_v22 = vmax.f32 %v1073_v7, 0.0 }
 0x142   : > { %1325 = vrot.lane.b32.xlu1 %v2488_v52, %s2052_s6  ;;  %v1038_v19 = vmul.f32 %v2335_v35, %v984_v13  ;;  %v986_v20 = vadd.f32 %v985_v57, %v872_v16  ;;  %v2508_v3 = vadd.f32 %v2348_v51, %v1037_v9  ;;  %v1211_v57 = vsel %vm1202_vm1, %v1209_v24, %v1210_v58 }
 0x143   : > { %v874_v25 = vpop.f32.mrf.mxu0  ;;  %v2530_v24 = vmax.f32 %v1072_v28, 0.0  ;;  %v2613_v53 = vmax.f32 %v2495_v10, 0.0 }
 0x144   : > { %1411 = vrot.lane.b32.xlu0 %v1385_v17, %s2052_s6  ;;  %v1039_v29 = vmul.f32 %v2339_v41, %v986_v20  ;;  %v988_v32 = vadd.f32 %v987_v43, %v874_v25  ;;  %v2514_v34 = vadd.f32 %v2337_v39, %v1038_v19 }
 0x145   : > { %v876_v37 = vpop.f32.mrf.mxu0  ;;  %v1219_v10 = vrot.slane %v2613_v53, 7 }
 0x146   : > { %1237 = vrot.lane.b32.xlu1 %v1211_v57, %s2052_s6  ;;  %v1040_v50 = vmul.f32 %v2335_v35, %v988_v32  ;;  %v990_v47 = vadd.f32 %v989_v2, %v876_v37  ;;  %v2526_v48 = vadd.f32 %v2348_v51, %v1039_v29  ;;  %v2589_v32 = vmax.f32 %v2450_v26, 0.0 }
 0x147   : > { %v880_v43 = vpop.f32.mrf.mxu0  ;;  %v2594_v57 = vmax.f32 %v2466_v54, 0.0  ;;  %v2604_v26 = vmax.f32 %v2478_v1, 0.0  ;;  %v2608_v54 = vmax.f32 %v2484_v11, 0.0 }
 0x148   : > { %1150 = vrot.lane.b32.xlu0 %v2518_v15, %s2052_s6  ;;  %v1041_v60 = vmul.f32 %v2339_v41, %v990_v47  ;;  %v994_v63 = vadd.f32 %v993_v6, %v880_v43  ;;  %v2534_v31 = vadd.f32 %v2337_v39, %v1040_v50  ;;  %v1388_v6 = vrot.slane %v2521_v49, 7 }
 0x149   : > { %v882_v45 = vpop.f32.mrf.mxu0  ;;  %v1392_v47 = vrot.slane %v2594_v57, 7  ;;  %v1394_v1 = vrot.slane %v2608_v54, 7  ;;  %v1218_v11 = vrot.slane %v2604_v26, 7  ;;  %v2624_v43 = vmax.f32 %v2508_v3, 0.0 }
 0x14a   : > { %1152 = vrot.lane.b32.xlu1 %v2530_v24, %s2052_s6  ;;  %v1042_v2 = vmul.f32 %v2335_v35, %v994_v63  ;;  %v996_v5 = vadd.f32 %v995_v27, %v882_v45  ;;  %v2540_v38 = vadd.f32 %v2348_v51, %v1041_v60  ;;  %v1213_v27 = vrot.slane %v2530_v24, 7 }
 0x14b   : > { %v884_v42 = vpop.f32.mrf.mxu0  ;;  %v1220_v60 = vsel %vm1202_vm1, %v1218_v11, %v1219_v10  ;;  %v1395_v63 = vrot.slane %v2624_v43, 7 }
 0x14c   : > { %1413 = vrot.lane.b32.xlu0 %v1387_v44, %s2052_s6  ;;  %v1043_v9 = vmul.f32 %v2339_v41, %v996_v5  ;;  %v998_v13 = vadd.f32 %v997_v56, %v884_v42  ;;  %v2548_v16 = vadd.f32 %v2337_v39, %v1042_v2  ;;  %v1214_v29 = vsel %vm1202_vm1, %v1212_v18, %v1213_v27 }
 0x14d   : > { %v886_v58 = vpop.f32.mrf.mxu0  ;;  %v2632_v56 = vmax.f32 %v2514_v34, 0.0  ;;  %v1396_v45 = vsel %vm1202_vm1, %v1394_v1, %v1395_v63  ;;  %v2644_v34 = vmax.f32 %v2534_v31, 0.0  ;;  %v2649_v2 = vmax.f32 %v2526_v48, 0.0 }
 0x14e   : > { %1415 = vrot.lane.b32.xlu1 %v1388_v6, %s2052_s6  ;;  %v2553_v17 = vadd.f32 %v2348_v51, %v1043_v9  ;;  %v1044_v19 = vmul.f32 %v2335_v35, %v998_v13  ;;  %v1000_v20 = vadd.f32 %v999_v4, %v886_v58  ;;  %v2572_v35 = vmax.f32 %v2440_v14, 0.0 }
 0x14f   : > { %v2584_v14 = vmax.f32 %v2457_v30, 0.0  ;;  %v1391_v30 = vrot.slane %v2589_v32, 7  ;;  %v1221_v3 = vrot.slane %v2632_v56, 7  ;;  %v2654_v5 = vmax.f32 %v2540_v38, 0.0 }
 0x150   : > { %1239 = vrot.lane.b32.xlu0 %v1212_v18, %s2052_s6  ;;  %v1045_v23 = vmul.f32 %v2339_v41, %v1000_v20  ;;  %v2561_v25 = vadd.f32 %v2337_v39, %v1044_v19  ;;  %v1389_v41 = vrot.slane %v2557_v22, 7  ;;  %v1215_v39 = vrot.slane %v2572_v35, 7 }
 0x151   : > { %v1216_v37 = vrot.slane %v2584_v14, 7  ;;  %v1393_v40 = vsel %vm1202_vm1, %v1391_v30, %v1392_v47  ;;  %v1222_v44 = vrot.slane %v2644_v34, 7  ;;  %v1397_v31 = vrot.slane %v2649_v2, 7 }
 0x152   : > { %1329 = vrot.lane.b32.xlu1 %v2557_v22, %s2052_s6  ;;  %v2567_v28 = vadd.f32 %v2348_v51, %v1045_v23  ;;  %v1390_v51 = vsel %vm1202_vm1, %v1388_v6, %v1389_v41  ;;  %v2664_v48 = vmax.f32 %v2548_v16, 0.0  ;;  %v2667_v4 = vmax.f32 %v2553_v17, 0.0 }
 0x153   : > { %v1217_v50 = vsel %vm1202_vm1, %v1215_v39, %v1216_v37  ;;  %v1223_v42 = vsel %vm1202_vm1, %v1221_v3, %v1222_v44  ;;  %v2672_v38 = vmax.f32 %v2561_v25, 0.0  ;;  %v1398_v18 = vrot.slane %v2654_v5, 7 }
 0x154   : > { %1327 = vrot.lane.b32.xlu0 %v2521_v49, %s2052_s6  ;;  %v1224_v7 = vrot.slane %v2664_v48, 7  ;;  %v1400_v9 = vrot.slane %v2667_v4, 7  ;;  %v2688_v20 = vmax.f32 %v2567_v28, 0.0 }
 0x155   : > { %v1225_v23 = vrot.slane %v2672_v38, 7 }
 0x156   : > { %1241 = vrot.lane.b32.xlu1 %v1214_v29, %s2052_s6  ;;  %v1401_v41 = vrot.slane %v2688_v20, 7 }
 0x157   : > { %v1226_v29 = vsel %vm1202_vm1, %v1224_v7, %v1225_v23 }
 0x158   : > { %1154 = vrot.lane.b32.xlu0 %v2572_v35, %s2052_s6 }
 0x15a   : > { %1417 = vrot.lane.b32.xlu1 %v1390_v51, %s2052_s6 }
 0x15c   : > { %1243 = vrot.lane.b32.xlu0 %v1215_v39, %s2052_s6 }
 0x15e   : > { %1156 = vrot.lane.b32.xlu1 %v2584_v14, %s2052_s6 }
 0x160   : > { %1331 = vrot.lane.b32.xlu0 %v2589_v32, %s2052_s6 }
 0x162   : > { %1333 = vrot.lane.b32.xlu1 %v2594_v57, %s2052_s6 }
 0x164   : > { %1419 = vrot.lane.b32.xlu0 %v1391_v30, %s2052_s6  ;;  %v1402_v30 = vsel %vm1202_vm1, %v1400_v9, %v1401_v41 }
 0x166   : > { %1245 = vrot.lane.b32.xlu1 %v1217_v50, %s2052_s6 }
 0x168   : > { %1158 = vrot.lane.b32.xlu0 %v2604_v26, %s2052_s6 }
 0x16a   : > { %1160 = vrot.lane.b32.xlu1 %v2613_v53, %s2052_s6 }
 0x16c   : > { %1421 = vrot.lane.b32.xlu0 %v1393_v40, %s2052_s6 }
 0x16e   : > { %1423 = vrot.lane.b32.xlu1 %v1394_v1, %s2052_s6 }
 0x170   : > { %1247 = vrot.lane.b32.xlu0 %v1218_v11, %s2052_s6 }
 0x172   : > { %1337 = vrot.lane.b32.xlu1 %v2624_v43, %s2052_s6 }
 0x174   : > { %1335 = vrot.lane.b32.xlu0 %v2608_v54, %s2052_s6 }
 0x176   : > { %1249 = vrot.lane.b32.xlu1 %v1220_v60, %s2052_s6 }
 0x178   : > { %1162 = vrot.lane.b32.xlu0 %v2632_v56, %s2052_s6 }
 0x17a   : > { %1425 = vrot.lane.b32.xlu1 %v1396_v45, %s2052_s6 }
 0x17c   : > { %1251 = vrot.lane.b32.xlu0 %v1221_v3, %s2052_s6 }
 0x17e   : > { %1164 = vrot.lane.b32.xlu1 %v2644_v34, %s2052_s6 }
 0x180   : > { %1339 = vrot.lane.b32.xlu0 %v2649_v2, %s2052_s6 }
 0x182   : > { %1341 = vrot.lane.b32.xlu1 %v2654_v5, %s2052_s6 }
 0x184   : > { %1427 = vrot.lane.b32.xlu0 %v1397_v31, %s2052_s6 }
 0x186   : > { %1253 = vrot.lane.b32.xlu1 %v1223_v42, %s2052_s6 }
 0x188   : > { %1166 = vrot.lane.b32.xlu0 %v2664_v48, %s2052_s6 }
 0x18a   : > { %v1139_v6 = vpop.permute.xlu0 %1138  ;;  %1168 = vrot.lane.b32.xlu1 %v2672_v38, %s2052_s6 }
 0x18b   : > { %v1186_v13 = vmax.f32 %v2353_v55, %v1139_v6  ;;  %v1399_v55 = vsel %vm1202_vm1, %v1397_v31, %v1398_v18 }
 0x18c   : > { %1255 = vrot.lane.b32.xlu0 %v1224_v7, %s2052_s6 }
 0x18e   : > { %v1228_v58 = vpop.permute.xlu0 %1227  ;;  %1431 = vrot.lane.b32.xlu1 %v1400_v9, %s2052_s6 }
 0x18f   : > { %v1275_v16 = vsel %vm1202_vm1, 0.0, %v1228_v58 }
 0x190   : > { %v2683_v17 = vmax.f32 %v1186_v13, %v1275_v16  ;;  %v1318_v19 = vpop.permute.xlu1 %1317  ;;  %1343 = vrot.lane.b32.xlu0 %v2667_v4, %s2052_s6 }
 0x191   : > { %v1364_v10 = vmax.f32 %v2372_v8, %v1318_v19 }
 0x192   : > { %v1316_v25 = vpop.permute.xlu0 %1315  ;;  %1345 = vrot.lane.b32.xlu1 %v2688_v20, %s2052_s6 }
 0x193   : > { %v1363_v50 = vmax.f32 %v2379_v12, %v1316_v25 }
 0x194   : > { %v1230_v27 = vpop.permute.xlu1 %1229  ;;  %1429 = vrot.lane.b32.xlu0 %v1399_v55, %s2052_s6 }
 0x196   : > { %v1141_v39 = vpop.permute.xlu0 %1140  ;;  %1257 = vrot.lane.b32.xlu1 %v1226_v29, %s2052_s6 }
 0x197   : > { %v1187_v28 = vmax.f32 %v2364_v0, %v1141_v39 }
 0x198   : > { %v1143_v51 = vpop.permute.xlu1 %1142 }
 0x199   : > { %v2699_v37 = vmax.f32 %v1187_v28, %v1230_v27  ;;  %v1188_v3 = vmax.f32 %v2390_v21, %v1143_v51 }
 0x19a   : > { %v1404_v47 = vpop.permute.xlu0 %1403  ;;  %1433 = vrot.lane.b32.xlu1 %v1402_v30, %s2052_s6 }
 0x19b   : > { %v1451_v40 = vsel %vm1202_vm1, 0.0, %v1404_v47 }
 0x19c   : > { %v2705_v1 = vmax.f32 %v1363_v50, %v1451_v40  ;;  %v1145_v11 = vpop.permute.xlu1 %1144 }
 0x19d   : > { %v1189_v6 = vmax.f32 %v2406_v36, %v1145_v11 }
 0x19e   : > { %v1406_v60 = vpop.permute.xlu0 %1405 }
 0x19f   : > { %v2708_v63 = vmax.f32 %v1364_v10, %v1406_v60 }
 0x1a0   : > { %v1408_v0 = vpop.permute.xlu1 %1407 }
 0x1a1   : > { %v1452_v9 = vsel %vm1202_vm1, 0.0, %v1408_v0 }
 0x1a2   : > { %v1232_v45 = vpop.permute.xlu0 %1231 }
 0x1a3   : > { %v1276_v44 = vsel %vm1202_vm1, 0.0, %v1232_v45 }
 0x1a4   : > { %v2712_v12 = vmax.f32 %v1188_v3, %v1276_v44  ;;  %v1322_v31 = vpop.permute.xlu1 %1321 }
 0x1a5   : > { %v1366_v21 = vmax.f32 %v2422_v59, %v1322_v31 }
 0x1a6   : > { %v1320_v42 = vpop.permute.xlu0 %1319 }
 0x1a7   : > { %v1365_v7 = vmax.f32 %v2402_v33, %v1320_v42 }
 0x1a8   : > { %v1234_v8 = vpop.permute.xlu1 %1233 }
 0x1a9   : > { %v2717_v13 = vmax.f32 %v1365_v7, %v1452_v9  ;;  %v2719_v58 = vmax.f32 %v1189_v6, %v1234_v8 }
 0x1aa   : > { %v1147_v16 = vpop.permute.xlu0 %1146 }
 0x1ab   : > { %v1190_v23 = vmax.f32 %v2436_v46, %v1147_v16 }
 0x1ac   : > { %v1410_v18 = vpop.permute.xlu1 %1409 }
 0x1ad   : > { %v2722_v19 = vmax.f32 %v1366_v21, %v1410_v18 }
 0x1ae   : > { %v1236_v25 = vpop.permute.xlu0 %1235 }
 0x1af   : > { %v1277_v36 = vsel %vm1202_vm1, 0.0, %v1236_v25 }
 0x1b0   : > { %v2726_v55 = vmax.f32 %v1190_v23, %v1277_v36  ;;  %v1149_v33 = vpop.permute.xlu1 %1148 }
 0x1b1   : > { %v1191_v28 = vmax.f32 %v2472_v61, %v1149_v33 }
 0x1b2   : > { %v1324_v27 = vpop.permute.xlu0 %1323 }
 0x1b3   : > { %v1367_v41 = vmax.f32 %v2475_v62, %v1324_v27 }
 0x1b4   : > { %v1326_v29 = vpop.permute.xlu1 %1325 }
 0x1b5   : > { %v1368_v40 = vmax.f32 %v2488_v52, %v1326_v29 }
 0x1b6   : > { %v1412_v39 = vpop.permute.xlu0 %1411 }
 0x1b7   : > { %v1453_v59 = vsel %vm1202_vm1, 0.0, %v1412_v39 }
 0x1b8   : > { %v2731_v51 = vmax.f32 %v1367_v41, %v1453_v59  ;;  %v1238_v30 = vpop.permute.xlu1 %1237 }
 0x1b9   : > { %v2733_v50 = vmax.f32 %v1191_v28, %v1238_v30 }
 0x1ba   : > { %v1151_v46 = vpop.permute.xlu0 %1150 }
 0x1bb   : > { %v1192_v62 = vmax.f32 %v2518_v15, %v1151_v46 }
 0x1bc   : > { %v1153_v47 = vpop.permute.xlu1 %1152 }
 0x1bd   : > { %v1193_v31 = vmax.f32 %v2530_v24, %v1153_v47 }
 0x1be   : > { %v1414_v11 = vpop.permute.xlu0 %1413 }
 0x1bf   : > { %v2736_v10 = vmax.f32 %v1368_v40, %v1414_v11 }
 0x1c0   : > { %v1416_v60 = vpop.permute.xlu1 %1415 }
 0x1c1   : > { %v1454_v6 = vsel %vm1202_vm1, 0.0, %v1416_v60 }
 0x1c2   : > { %v1240_v0 = vpop.permute.xlu0 %1239 }
 0x1c3   : > { %v1278_v61 = vsel %vm1202_vm1, 0.0, %v1240_v0 }
 0x1c4   : > { %v2740_v3 = vmax.f32 %v1192_v62, %v1278_v61  ;;  %v1330_v45 = vpop.permute.xlu1 %1329 }
 0x1c5   : > { %v1370_v15 = vmax.f32 %v2557_v22, %v1330_v45 }
 0x1c6   : > { %v1328_v44 = vpop.permute.xlu0 %1327 }
 0x1c7   : > { %v1369_v42 = vmax.f32 %v2521_v49, %v1328_v44 }
 0x1c8   : > { %v1242_v52 = vpop.permute.xlu1 %1241 }
 0x1c9   : > { %v2745_v7 = vmax.f32 %v1369_v42, %v1454_v6  ;;  %v2747_v9 = vmax.f32 %v1193_v31, %v1242_v52 }
 0x1ca   : > { %v1155_v8 = vpop.permute.xlu0 %1154 }
 0x1cb   : > { %v1194_v18 = vmax.f32 %v2572_v35, %v1155_v8 }
 0x1cc   : > { %v1418_v16 = vpop.permute.xlu1 %1417 }
 0x1cd   : > { %v2750_v21 = vmax.f32 %v1370_v15, %v1418_v16 }
 0x1ce   : > { %v1244_v23 = vpop.permute.xlu0 %1243 }
 0x1cf   : > { %v1279_v24 = vsel %vm1202_vm1, 0.0, %v1244_v23 }
 0x1d0   : > { %v2754_v25 = vmax.f32 %v1194_v18, %v1279_v24  ;;  %v1157_v49 = vpop.permute.xlu1 %1156 }
 0x1d1   : > { %v1195_v41 = vmax.f32 %v2584_v14, %v1157_v49 }
 0x1d2   : > { %v1332_v36 = vpop.permute.xlu0 %1331 }
 0x1d3   : > { %v1371_v27 = vmax.f32 %v2589_v32, %v1332_v36 }
 0x1d4   : > { %v1334_v33 = vpop.permute.xlu1 %1333 }
 0x1d5   : > { %v1372_v46 = vmax.f32 %v2594_v57, %v1334_v33 }
 0x1d6   : > { %v1420_v29 = vpop.permute.xlu0 %1419 }
 0x1d7   : > { %v1455_v22 = vsel %vm1202_vm1, 0.0, %v1420_v29 }
 0x1d8   : > { %v2759_v39 = vmax.f32 %v1371_v27, %v1455_v22  ;;  %v1246_v28 = vpop.permute.xlu1 %1245 }
 0x1d9   : > { %v2761_v59 = vmax.f32 %v1195_v41, %v1246_v28 }
 0x1da   : > { %v1159_v35 = vpop.permute.xlu0 %1158 }
 0x1db   : > { %v1196_v32 = vmax.f32 %v2604_v26, %v1159_v35 }
 0x1dc   : > { %v1161_v30 = vpop.permute.xlu1 %1160 }
 0x1dd   : > { %v1197_v45 = vmax.f32 %v2613_v53, %v1161_v30 }
 0x1de   : > { %v1422_v47 = vpop.permute.xlu0 %1421 }
 0x1df   : > { %v2764_v40 = vmax.f32 %v1372_v46, %v1422_v47 }
 0x1e0   : > { %v1424_v11 = vpop.permute.xlu1 %1423 }
 0x1e1   : > { %v1456_v31 = vsel %vm1202_vm1, 0.0, %v1424_v11 }
 0x1e2   : > { %v1248_v60 = vpop.permute.xlu0 %1247 }
 0x1e3   : > { %v1280_v14 = vsel %vm1202_vm1, 0.0, %v1248_v60 }
 0x1e4   : > { %v2768_v62 = vmax.f32 %v1196_v32, %v1280_v14  ;;  %v1338_v0 = vpop.permute.xlu1 %1337 }
 0x1e5   : > { %v1374_v26 = vmax.f32 %v2624_v43, %v1338_v0 }
 0x1e6   : > { %v1336_v61 = vpop.permute.xlu0 %1335 }
 0x1e7   : > { %v1373_v44 = vmax.f32 %v2608_v54, %v1336_v61 }
 0x1e8   : > { %v1250_v57 = vpop.permute.xlu1 %1249 }
 0x1e9   : > { %v2773_v42 = vmax.f32 %v1373_v44, %v1456_v31  ;;  %v2775_v6 = vmax.f32 %v1197_v45, %v1250_v57 }
 0x1ea   : > { %v1163_v52 = vpop.permute.xlu0 %1162 }
 0x1eb   : > { %v1198_v16 = vmax.f32 %v2632_v56, %v1163_v52 }
 0x1ec   : > { %v1426_v8 = vpop.permute.xlu1 %1425 }
 0x1ed   : > { %v2778_v15 = vmax.f32 %v1374_v26, %v1426_v8 }
 0x1ee   : > { %v1252_v18 = vpop.permute.xlu0 %1251 }
 0x1ef   : > { %v1281_v53 = vsel %vm1202_vm1, 0.0, %v1252_v18 }
 0x1f0   : > { %v2782_v23 = vmax.f32 %v1198_v16, %v1281_v53  ;;  %v1165_v54 = vpop.permute.xlu1 %1164 }
 0x1f1   : > { %v1199_v27 = vmax.f32 %v2644_v34, %v1165_v54 }
 0x1f2   : > { %v1340_v24 = vpop.permute.xlu0 %1339 }
 0x1f3   : > { %v1375_v36 = vmax.f32 %v2649_v2, %v1340_v24 }
 0x1f4   : > { %v1342_v49 = vpop.permute.xlu1 %1341 }
 0x1f5   : > { %v1376_v14 = vmax.f32 %v2654_v5, %v1342_v49 }
 0x1f6   : > { %v1428_v33 = vpop.permute.xlu0 %1427 }
 0x1f7   : > { %v1457_v43 = vsel %vm1202_vm1, 0.0, %v1428_v33 }
 0x1f8   : > { %v2787_v29 = vmax.f32 %v1375_v36, %v1457_v43  ;;  %v1254_v41 = vpop.permute.xlu1 %1253 }
 0x1f9   : > { %v2789_v22 = vmax.f32 %v1199_v27, %v1254_v41 }
 0x1fa   : > { %v1167_v56 = vpop.permute.xlu0 %1166 }
 0x1fb   : > { %v1200_v35 = vmax.f32 %v2664_v48, %v1167_v56 }
 0x1fc   : > { %v1169_v28 = vpop.permute.xlu1 %1168 }
 0x1fd   : > { %v1201_v45 = vmax.f32 %v2672_v38, %v1169_v28 }
 0x1fe   : > { %v1256_v30 = vpop.permute.xlu0 %1255 }
 0x1ff   : > { %v1282_v46 = vsel %vm1202_vm1, 0.0, %v1256_v30 }
 0x200   : > { %v2793_v47 = vmax.f32 %v1200_v35, %v1282_v46  ;;  %v1432_v2 = vpop.permute.xlu1 %1431 }
 0x201   : > { %v1458_v32 = vsel %vm1202_vm1, 0.0, %v1432_v2 }
 0x202   : > { %v1344_v11 = vpop.permute.xlu0 %1343 }
 0x203   : > { %v1377_v34 = vmax.f32 %v2667_v4, %v1344_v11 }
 0x204   : > { %v1346_v60 = vpop.permute.xlu1 %1345 }
 0x205   : > { %v2798_v0 = vmax.f32 %v1377_v34, %v1458_v32  ;;  %v1378_v57 = vmax.f32 %v2688_v20, %v1346_v60 }
 0x206   : > { %v1430_v61 = vpop.permute.xlu0 %1429 }
 0x207   : > { %v2801_v48 = vmax.f32 %v1376_v14, %v1430_v61 }
 0x208   : > { %v1258_v44 = vpop.permute.xlu1 %1257 }
 0x209   : > { %v2803_v31 = vmax.f32 %v1201_v45, %v1258_v44  ;;  %1478 = sbr.rel (%p1806_p8) target bundleno = 528 (0x210), region = 40 }
 0x20c   : > { %v1434_v52 = vpop.permute.xlu1 %1433 }
 0x20d   : > { %v2806_v26 = vmax.f32 %v1378_v57, %v1434_v52 }
 0x20e   : > { %vm1479_vm2 = vcmask 523264   ;;  %v2053_v5 = vmov 0.0  }
 0x20f   : > { %1480 = vst.msk [vmem:[#allocation2] sm:$0xff] %vm1479_vm2, %v2053_v5  ;;  %1481 = vst.msk [vmem:[#allocation2 + $0x8] sm:$0xff] %vm1479_vm2, %v2053_v5 }
 0x210 PF: > { %v1484_v38 = vmax.f32 %v2683_v17, %v2705_v1  ;;  %vm1580_vm3 = vcmask 519168   ;;  %v1485_v20 = vmax.f32 %v2699_v37, %v2708_v63  ;;  %v1486_v16 = vmax.f32 %v2712_v12, %v2717_v13 }
 0x211   : > { %v1487_v18 = vmax.f32 %v2719_v58, %v2722_v19  ;;  %v1488_v53 = vmax.f32 %v2726_v55, %v2731_v51  ;;  %v1489_v54 = vmax.f32 %v2733_v50, %v2736_v10  ;;  %v1490_v17 = vmax.f32 %v2740_v3, %v2745_v7 }
 0x212   : > { %v1502_v37 = vmax.f32 %v1486_v16, %v2705_v1  ;;  %v1491_v12 = vmax.f32 %v2747_v9, %v2750_v21  ;;  %vm1597_vm4 = vcmask 523264  }
 0x213   : > { %v1503_v58 = vmax.f32 %v1487_v18, %v2708_v63  ;;  %v1504_v55 = vmax.f32 %v1488_v53, %v2717_v13  ;;  %v1505_v36 = vmax.f32 %v1489_v54, %v2722_v19  ;;  %v1506_v50 = vmax.f32 %v1490_v17, %v2731_v51 }
 0x214   : > { %v1827_v27 = vpack.c.bf16 %v1502_v37, %v1502_v37  ;;  %v1507_v1 = vmax.f32 %v1491_v12, %v2736_v10  ;;  %v1492_v13 = vmax.f32 %v2754_v25, %v2759_v39  ;;  %v1493_v19 = vmax.f32 %v2761_v59, %v2764_v40 }
 0x215   : > { %v1828_v43 = vpack.c.bf16 %v1503_v58, %v1503_v58  ;;  %v1829_v41 = vpack.c.bf16 %v1504_v55, %v1504_v55  ;;  %v1830_v9 = vpack.c.bf16 %v1505_v36, %v1505_v36  ;;  %v1831_v56 = vpack.c.bf16 %v1506_v50, %v1506_v50 }
 0x216   : > { %v1482_v4 = vld [vmem:[#allocation2] sm:$0xff]  ;;  %v1483_v8 = vld [vmem:[#allocation2 + $0x8] sm:$0xff]  ;;  %1583 = vst.msk [vmem:[%s2167_s25 + $0x8] sm:$0xf] %vm1580_vm3, %v1827_v27  ;;  %v1832_v63 = vpack.c.bf16 %v1507_v1, %v1507_v1  ;;  %v1494_v51 = vmax.f32 %v2768_v62, %v2773_v42  ;;  %v1495_v10 = vmax.f32 %v2775_v6, %v2778_v15  ;;  %v1496_v25 = vmax.f32 %v2782_v23, %v2787_v29 }
 0x217   : > { %v1500_v24 = vmax.f32 %v1484_v38, %v1482_v4  ;;  %v1501_v49 = vmax.f32 %v1485_v20, %v1483_v8  ;;  %1584 = vst.msk [vmem:[%s2167_s25 + $0xc] sm:$0xf] %vm1580_vm3, %v1828_v43  ;;  %1585 = vst.msk [vmem:[%s2167_s25 + $0x10] sm:$0xf] %vm1580_vm3, %v1829_v41  ;;  %v1497_v59 = vmax.f32 %v2789_v22, %v2801_v48 }
 0x218   : > { %1586 = vst.msk [vmem:[%s2167_s25 + $0x14] sm:$0xf] %vm1580_vm3, %v1830_v9  ;;  %1587 = vst.msk [vmem:[%s2167_s25 + $0x18] sm:$0xf] %vm1580_vm3, %v1831_v56  ;;  %v1498_v62 = vmax.f32 %v2793_v47, %v2798_v0  ;;  %v1508_v28 = vmax.f32 %v1492_v13, %v2745_v7  ;;  %v1509_v35 = vmax.f32 %v1493_v19, %v2750_v21 }
 0x219   : > { %v1825_v3 = vpack.c.bf16 %v1500_v24, %v1500_v24  ;;  %v1826_v33 = vpack.c.bf16 %v1501_v49, %v1501_v49  ;;  %1588 = vst.msk [vmem:[%s2167_s25 + $0x1c] sm:$0xf] %vm1580_vm3, %v1832_v63  ;;  %v1510_v30 = vmax.f32 %v1494_v51, %v2759_v39  ;;  %v1499_v6 = vmax.f32 %v2803_v31, %v2806_v26 }
 0x21a   : > { %v1511_v23 = vmax.f32 %v1495_v10, %v2764_v40  ;;  %v1512_v22 = vmax.f32 %v1496_v25, %v2773_v42  ;;  %v1513_v46 = vmax.f32 %v1497_v59, %v2778_v15  ;;  %v1514_v7 = vmax.f32 %v1498_v62, %v2787_v29  ;;  %1598 = vst.msk [vmem:[#allocation2] sm:$0xff] %vm1597_vm4, %v2798_v0 }
 0x21b   : > { %1581 = vst.msk [vmem:[%s2167_s25] sm:$0xf] %vm1580_vm3, %v1825_v3  ;;  %1582 = vst.msk [vmem:[%s2167_s25 + $0x4] sm:$0xf] %vm1580_vm3, %v1826_v33  ;;  %v1833_v47 = vpack.c.bf16 %v1508_v28, %v1508_v28  ;;  %v1834_v21 = vpack.c.bf16 %v1509_v35, %v1509_v35  ;;  %v1835_v2 = vpack.c.bf16 %v1510_v30, %v1510_v30 }
 0x21c   : > { %v1515_v39 = vmax.f32 %v1499_v6, %v2801_v48  ;;  %v1836_v11 = vpack.c.bf16 %v1511_v23, %v1511_v23  ;;  %v1837_v34 = vpack.c.bf16 %v1512_v22, %v1512_v22  ;;  %v1838_v32 = vpack.c.bf16 %v1513_v46, %v1513_v46  ;;  %1599 = vst.msk [vmem:[#allocation2 + $0x8] sm:$0xff] %vm1597_vm4, %v2806_v26 }
 0x21d   : > { %v1839_v40 = vpack.c.bf16 %v1514_v7, %v1514_v7  ;;  %1589 = vst.msk [vmem:[%s2167_s25 + $0x20] sm:$0xf] %vm1580_vm3, %v1833_v47  ;;  %1590 = vst.msk [vmem:[%s2167_s25 + $0x24] sm:$0xf] %vm1580_vm3, %v1834_v21 }
 0x21e   : > { %1591 = vst.msk [vmem:[%s2167_s25 + $0x28] sm:$0xf] %vm1580_vm3, %v1835_v2  ;;  %v1840_v42 = vpack.c.bf16 %v1515_v39, %v1515_v39  ;;  %1592 = vst.msk [vmem:[%s2167_s25 + $0x2c] sm:$0xf] %vm1580_vm3, %v1836_v11 }
 0x21f   : > { %1593 = vst.msk [vmem:[%s2167_s25 + $0x30] sm:$0xf] %vm1580_vm3, %v1837_v34  ;;  %1594 = vst.msk [vmem:[%s2167_s25 + $0x34] sm:$0xf] %vm1580_vm3, %v1838_v32 }
 0x220   : > { %1595 = vst.msk [vmem:[%s2167_s25 + $0x38] sm:$0xf] %vm1580_vm3, %v1839_v40  ;;  %1596 = vst.msk [vmem:[%s2167_s25 + $0x3c] sm:$0xf] %vm1580_vm3, %v1840_v42 }
 0x221 PF: > { %s14_s19 = sadd.s32 1, %s2050_s19   ;;  %s2909_s15 = smov %s2042_s17 }
 0x222   : > { %p11_p9 = scmp.ge.s32.totalorder %s14_s19, 6   ;;  %s2910_s16 = smov %s2046_s18 }
 0x223   : > { %s2911_s17 = smov %s2914_s20  ;;  %s2912_s18 = smov %s2918_s21 }
 0x224   :  { %13 = sbr.rel (!%p11_p9) target bundleno = 3 (0x3), region = 70 }

// kernel: _lambda_.7
= control target key start
LH: loop header
LB: loop body
LE: loop exit
PB: predicated region body
PF: predicated region fallthrough
CT: control target
= control target key end

     0   :  { %v1853_v1 = vmov 0   ;;  %vm290_vm0 = vcmask 523264   ;;  %v742_v41 = vlaneseq  ;;  %s2525_s1 = inlined_call_operand.vmem [shape: bf16[64,256], index: 1, kind: input, shape index: {}]   ;;  %s2526_s0 = inlined_call_operand.vmem [shape: bf16[512,64], index: 0, kind: input, shape index: {}]   ;;  %s2527_s2 = inlined_call_operand.vmem [shape: f32[1,256], index: 2, kind: input, shape index: {}]   ;;  %s2528_s3 = inlined_call_operand.vmem [shape: f32[1,256], index: 3, kind: input, shape index: {}]   ;;  %s2529_s4 = inlined_call_operand.vmem [shape: bf16[512,256], index: 4, kind: output, shape index: {}]  }
   0x1   :  { %v1809_v0 = vld [vmem:[%s2525_s1 + $0x34] ss:$8 sps:$4 sm:$0xff]   ;;  %419 = vmatprep.mubr.bf16.mxu0 %v1853_v1  ;;  %579 = vmatprep.mubr.bf16.mxu1 %v1853_v1  ;;  %v1811_v2 = vld [vmem:[%s2525_s1 + $0x30] ss:$8 sps:$4 sm:$0xff]   ;;  %v1812_v3 = vld [vmem:[%s2525_s1 + $0x24] ss:$8 sps:$4 sm:$0xff]  }
   0x2   :  { %395 = vmatprep.subr.bf16.mxu0 %v1809_v0  ;;  %1800 = vmatprep.subr.bf16.mxu1 %v1809_v0  ;;  %v1814_v4 = vld [vmem:[%s2525_s1 + $0x20] ss:$8 sps:$4 sm:$0xff]   ;;  %v1815_v5 = vld [vmem:[%s2525_s1 + $0x14] ss:$8 sps:$4 sm:$0xff]   ;;  %v1817_v6 = vld [vmem:[%s2525_s1 + $0x10] ss:$8 sps:$4 sm:$0xff]  }
   0x3   :  { %396 = vmatpush1.bf16.msra.mxu0 %v1811_v2  ;;  %1804 = vmatpush1.bf16.msra.mxu1 %v1811_v2  ;;  %v1818_v7 = vld [vmem:[%s2525_s1 + $0x4] ss:$8 sps:$4 sm:$0xff]   ;;  %v1820_v8 = vld [vmem:[%s2525_s1] ss:$8 sps:$4 sm:$0xff]   ;;  %v1825_v13 = vld [vmem:[%s2526_s0 + $0x10] sm:$0xff]   ;;  %v743_v42 = vshrl.u32 %v742_v41, 7 }
   0x4   :  { %397 = vmatprep.subr.bf16.mxu0 %v1812_v3  ;;  %1801 = vmatprep.subr.bf16.mxu1 %v1812_v3  ;;  %v1821_v9 = vld [vmem:[%s2526_s0] sm:$0xff]   ;;  %v1823_v11 = vld [vmem:[%s2526_s0 + $0x8] sm:$0xff]   ;;  %v1826_v14 = vld [vmem:[%s2526_s0 + $0x90] sm:$0xff]  }
   0x5   :  { %v1822_v10 = vld [vmem:[%s2526_s0 + $0x80] sm:$0xff]   ;;  %v1824_v12 = vld [vmem:[%s2526_s0 + $0x88] sm:$0xff]   ;;  %v1827_v15 = vld [vmem:[%s2526_s0 + $0x18] sm:$0xff]   ;;  %v744_v43 = vsub.s32 0, %v743_v42  ;;  %v748_v45 = vsub.s32 1, %v743_v42 }
   0x6   :  { %v1828_v16 = vld [vmem:[%s2526_s0 + $0x98] sm:$0xff]   ;;  %v1829_v17 = vld [vmem:[%s2526_s0 + $0x20] sm:$0xff]   ;;  %v1831_v19 = vld [vmem:[%s2526_s0 + $0x28] sm:$0xff]  }
   0x7   :  { %398 = vmatpush1.bf16.msra.mxu0 %v1814_v4  ;;  %1805 = vmatpush1.bf16.msra.mxu1 %v1814_v4  ;;  %v1830_v18 = vld [vmem:[%s2526_s0 + $0xa0] sm:$0xff]   ;;  %v1832_v20 = vld [vmem:[%s2526_s0 + $0xa8] sm:$0xff]   ;;  %v1833_v21 = vld [vmem:[%s2526_s0 + $0x30] sm:$0xff]  }
   0x8   :  { %399 = vmatprep.subr.bf16.mxu0 %v1815_v5  ;;  %1802 = vmatprep.subr.bf16.mxu1 %v1815_v5  ;;  %v1834_v22 = vld [vmem:[%s2526_s0 + $0xb0] sm:$0xff]   ;;  %v1835_v23 = vld [vmem:[%s2526_s0 + $0x38] sm:$0xff]   ;;  %v1837_v25 = vld [vmem:[%s2526_s0 + $0x40] sm:$0xff]  }
   0x9   :  { %v1836_v24 = vld [vmem:[%s2526_s0 + $0xb8] sm:$0xff]   ;;  %v1838_v26 = vld [vmem:[%s2526_s0 + $0xc0] sm:$0xff]   ;;  %v1839_v27 = vld [vmem:[%s2526_s0 + $0x48] sm:$0xff]  }
   0xa   :  { %v1840_v28 = vld [vmem:[%s2526_s0 + $0xc8] sm:$0xff]   ;;  %v1841_v29 = vld [vmem:[%s2526_s0 + $0x50] sm:$0xff]   ;;  %v1843_v31 = vld [vmem:[%s2526_s0 + $0x58] sm:$0xff]  }
   0xb   :  { %400 = vmatpush1.bf16.msra.mxu0 %v1817_v6  ;;  %1806 = vmatpush1.bf16.msra.mxu1 %v1817_v6  ;;  %v1842_v30 = vld [vmem:[%s2526_s0 + $0xd0] sm:$0xff]   ;;  %v1844_v32 = vld [vmem:[%s2526_s0 + $0xd8] sm:$0xff]   ;;  %v1845_v33 = vld [vmem:[%s2526_s0 + $0x60] sm:$0xff]  }
   0xc   :  { %401 = vmatprep.subr.bf16.mxu0 %v1818_v7  ;;  %1803 = vmatprep.subr.bf16.mxu1 %v1818_v7  ;;  %v1846_v34 = vld [vmem:[%s2526_s0 + $0xe0] sm:$0xff]   ;;  %v1847_v35 = vld [vmem:[%s2526_s0 + $0x68] sm:$0xff]   ;;  %v1849_v37 = vld [vmem:[%s2526_s0 + $0x70] sm:$0xff]  }
   0xd   :  { %v1848_v36 = vld [vmem:[%s2526_s0 + $0xe8] sm:$0xff]   ;;  %v1850_v38 = vld [vmem:[%s2526_s0 + $0xf0] sm:$0xff]   ;;  %v1851_v39 = vld [vmem:[%s2526_s0 + $0x78] sm:$0xff]  }
   0xe   :  { %v1852_v40 = vld [vmem:[%s2526_s0 + $0xf8] sm:$0xff]   ;;  %v740_v44 = vld [vmem:[%s2527_s2] sm:$0x3] }
   0xf   :  { %402 = vmatpush1.bf16.msra.mxu0 %v1820_v8  ;;  %1807 = vmatpush1.bf16.msra.mxu1 %v1820_v8  ;;  %v880_v46 = vld [vmem:[%s2528_s3] sm:$0x3]  ;;  %v2069_v47 = vrot.slane %v740_v44, %v744_v43  ;;  %v2073_v49 = vrot.slane %v740_v44, %v748_v45 }
  0x10   :  { %v2071_v48 = vrot.slane %v880_v46, %v744_v43  ;;  %v2077_v54 = vrot.slane %v880_v46, %v748_v45 }
  0x12   :  { %1640 = vmatmul.mubr.msk.bf16.vlgmr.msra.gmra.mxu0 %vm290_vm0, %v1821_v9  ;;  %1656 = vmatmul.mubr.msk.bf16.vlgmr.msra.gmra.mxu1 %vm290_vm0, %v1822_v10 }
  0x13   :  { %429 = vmatprep.mubr.bf16.mxu0 %v1853_v1  ;;  %589 = vmatprep.mubr.bf16.mxu1 %v1853_v1 }
  0x1a   :  { %1641 = vmatmul.mubr.msk.bf16.gmra.mxu0 %vm290_vm0, %v1823_v11  ;;  %1657 = vmatmul.mubr.msk.bf16.gmra.mxu1 %vm290_vm0, %v1824_v12 }
  0x1b   :  { %439 = vmatprep.mubr.bf16.mxu0 %v1853_v1  ;;  %599 = vmatprep.mubr.bf16.mxu1 %v1853_v1 }
  0x22   :  { %1642 = vmatmul.mubr.msk.bf16.gmra.mxu0 %vm290_vm0, %v1825_v13  ;;  %1658 = vmatmul.mubr.msk.bf16.gmra.mxu1 %vm290_vm0, %v1826_v14 }
  0x23   :  { %449 = vmatprep.mubr.bf16.mxu0 %v1853_v1  ;;  %609 = vmatprep.mubr.bf16.mxu1 %v1853_v1 }
  0x2a   :  { %1643 = vmatmul.mubr.msk.bf16.gmra.mxu0 %vm290_vm0, %v1827_v15  ;;  %1659 = vmatmul.mubr.msk.bf16.gmra.mxu1 %vm290_vm0, %v1828_v16 }
  0x2b   :  { %459 = vmatprep.mubr.bf16.mxu0 %v1853_v1  ;;  %619 = vmatprep.mubr.bf16.mxu1 %v1853_v1 }
  0x32   :  { %1644 = vmatmul.mubr.msk.bf16.gmra.mxu0 %vm290_vm0, %v1829_v17  ;;  %1660 = vmatmul.mubr.msk.bf16.gmra.mxu1 %vm290_vm0, %v1830_v18 }
  0x33   :  { %469 = vmatprep.mubr.bf16.mxu0 %v1853_v1  ;;  %629 = vmatprep.mubr.bf16.mxu1 %v1853_v1 }
  0x3a   :  { %1645 = vmatmul.mubr.msk.bf16.gmra.mxu0 %vm290_vm0, %v1831_v19  ;;  %1661 = vmatmul.mubr.msk.bf16.gmra.mxu1 %vm290_vm0, %v1832_v20 }
  0x3b   :  { %479 = vmatprep.mubr.bf16.mxu0 %v1853_v1  ;;  %639 = vmatprep.mubr.bf16.mxu1 %v1853_v1 }
  0x42   :  { %1646 = vmatmul.mubr.msk.bf16.gmra.mxu0 %vm290_vm0, %v1833_v21  ;;  %1662 = vmatmul.mubr.msk.bf16.gmra.mxu1 %vm290_vm0, %v1834_v22 }
  0x43   :  { %489 = vmatprep.mubr.bf16.mxu0 %v1853_v1  ;;  %649 = vmatprep.mubr.bf16.mxu1 %v1853_v1 }
  0x4a   :  { %1647 = vmatmul.mubr.msk.bf16.gmra.mxu0 %vm290_vm0, %v1835_v23  ;;  %1663 = vmatmul.mubr.msk.bf16.gmra.mxu1 %vm290_vm0, %v1836_v24 }
  0x4b   :  { %499 = vmatprep.mubr.bf16.mxu0 %v1853_v1  ;;  %659 = vmatprep.mubr.bf16.mxu1 %v1853_v1 }
  0x52   :  { %1648 = vmatmul.mubr.msk.bf16.gmra.mxu0 %vm290_vm0, %v1837_v25  ;;  %1664 = vmatmul.mubr.msk.bf16.gmra.mxu1 %vm290_vm0, %v1838_v26 }
  0x53   :  { %509 = vmatprep.mubr.bf16.mxu0 %v1853_v1  ;;  %669 = vmatprep.mubr.bf16.mxu1 %v1853_v1 }
  0x5a   :  { %1649 = vmatmul.mubr.msk.bf16.gmra.mxu0 %vm290_vm0, %v1839_v27  ;;  %1665 = vmatmul.mubr.msk.bf16.gmra.mxu1 %vm290_vm0, %v1840_v28 }
  0x5b   :  { %519 = vmatprep.mubr.bf16.mxu0 %v1853_v1  ;;  %679 = vmatprep.mubr.bf16.mxu1 %v1853_v1 }
  0x62   :  { %1650 = vmatmul.mubr.msk.bf16.gmra.mxu0 %vm290_vm0, %v1841_v29  ;;  %1666 = vmatmul.mubr.msk.bf16.gmra.mxu1 %vm290_vm0, %v1842_v30 }
  0x63   :  { %529 = vmatprep.mubr.bf16.mxu0 %v1853_v1  ;;  %689 = vmatprep.mubr.bf16.mxu1 %v1853_v1 }
  0x6a   :  { %1651 = vmatmul.mubr.msk.bf16.gmra.mxu0 %vm290_vm0, %v1843_v31  ;;  %1667 = vmatmul.mubr.msk.bf16.gmra.mxu1 %vm290_vm0, %v1844_v32 }
  0x6b   :  { %539 = vmatprep.mubr.bf16.mxu0 %v1853_v1  ;;  %699 = vmatprep.mubr.bf16.mxu1 %v1853_v1 }
  0x72   :  { %1652 = vmatmul.mubr.msk.bf16.gmra.mxu0 %vm290_vm0, %v1845_v33  ;;  %1668 = vmatmul.mubr.msk.bf16.gmra.mxu1 %vm290_vm0, %v1846_v34 }
  0x73   :  { %549 = vmatprep.mubr.bf16.mxu0 %v1853_v1  ;;  %709 = vmatprep.mubr.bf16.mxu1 %v1853_v1 }
  0x7a   :  { %1653 = vmatmul.mubr.msk.bf16.gmra.mxu0 %vm290_vm0, %v1847_v35  ;;  %1669 = vmatmul.mubr.msk.bf16.gmra.mxu1 %vm290_vm0, %v1848_v36 }
  0x7b   :  { %559 = vmatprep.mubr.bf16.mxu0 %v1853_v1  ;;  %719 = vmatprep.mubr.bf16.mxu1 %v1853_v1 }
  0x82   :  { %1654 = vmatmul.mubr.msk.bf16.gmra.mxu0 %vm290_vm0, %v1849_v37  ;;  %1670 = vmatmul.mubr.msk.bf16.gmra.mxu1 %vm290_vm0, %v1850_v38 }
  0x83   :  { %569 = vmatprep.mubr.bf16.mxu0 %v1853_v1  ;;  %729 = vmatprep.mubr.bf16.mxu1 %v1853_v1 }
  0x8a   :  { %1655 = vmatmul.mubr.msk.bf16.gmra.mxu0 %vm290_vm0, %v1851_v39  ;;  %1671 = vmatmul.mubr.msk.bf16.gmra.mxu1 %vm290_vm0, %v1852_v40 }
  0xd2   :  { %v421_v50 = vpop.f32.mrf.mxu0  ;;  %v581_v51 = vpop.f32.mrf.mxu1 }
  0xd3   :  { %v752_v52 = vmul.f32 %v2069_v47, %v421_v50  ;;  %v816_v53 = vmul.f32 %v2069_v47, %v581_v51 }
  0xd4   :  { %v423_v55 = vpop.f32.mrf.mxu0  ;;  %v583_v56 = vpop.f32.mrf.mxu1 }
  0xd5   :  { %v892_v57 = vadd.f32 %v2071_v48, %v752_v52  ;;  %v956_v58 = vadd.f32 %v2071_v48, %v816_v53  ;;  %v753_v59 = vmul.f32 %v2073_v49, %v423_v55  ;;  %v817_v60 = vmul.f32 %v2073_v49, %v583_v56 }
  0xd6   :  { %v425_v61 = vpop.f32.mrf.mxu0  ;;  %v585_v62 = vpop.f32.mrf.mxu1 }
  0xd7   :  { %v893_v63 = vadd.f32 %v2077_v54, %v753_v59  ;;  %v957_v0 = vadd.f32 %v2077_v54, %v817_v60  ;;  %v1020_v1 = vmax.f32 %v892_v57, 0.0  ;;  %v1084_v2 = vmax.f32 %v956_v58, 0.0 }
  0xd8   :  { %v754_v3 = vmul.f32 %v2069_v47, %v425_v61  ;;  %v818_v4 = vmul.f32 %v2069_v47, %v585_v62  ;;  %v427_v5 = vpop.f32.mrf.mxu0  ;;  %v587_v6 = vpop.f32.mrf.mxu1 }
  0xd9   :  { %v1021_v7 = vmax.f32 %v893_v63, 0.0  ;;  %v1085_v8 = vmax.f32 %v957_v0, 0.0  ;;  %v755_v9 = vmul.f32 %v2073_v49, %v427_v5  ;;  %v819_v10 = vmul.f32 %v2073_v49, %v587_v6 }
  0xda   :  { %v894_v11 = vadd.f32 %v2071_v48, %v754_v3  ;;  %v958_v12 = vadd.f32 %v2071_v48, %v818_v4  ;;  %v431_v13 = vpop.f32.mrf.mxu0  ;;  %v591_v14 = vpop.f32.mrf.mxu1 }
  0xdb   :  { %v1736_v15 = vpack.c.bf16 %v1021_v7, %v1020_v1  ;;  %v1768_v16 = vpack.c.bf16 %v1085_v8, %v1084_v2  ;;  %v895_v17 = vadd.f32 %v2077_v54, %v755_v9  ;;  %v959_v18 = vadd.f32 %v2077_v54, %v819_v10 }
  0xdc   :  { %v1022_v19 = vmax.f32 %v894_v11, 0.0  ;;  %v1086_v20 = vmax.f32 %v958_v12, 0.0  ;;  %v756_v21 = vmul.f32 %v2069_v47, %v431_v13  ;;  %v820_v22 = vmul.f32 %v2069_v47, %v591_v14  ;;  %v433_v23 = vpop.f32.mrf.mxu0  ;;  %v593_v24 = vpop.f32.mrf.mxu1 }
  0xdd   :  { %1532 = vst [vmem:[%s2529_s4] sm:$0xff] %v1736_v15  ;;  %1564 = vst [vmem:[%s2529_s4 + $0x100] sm:$0xff] %v1768_v16  ;;  %v1023_v25 = vmax.f32 %v895_v17, 0.0  ;;  %v1087_v26 = vmax.f32 %v959_v18, 0.0  ;;  %v757_v27 = vmul.f32 %v2073_v49, %v433_v23  ;;  %v821_v28 = vmul.f32 %v2073_v49, %v593_v24 }
  0xde   :  { %v896_v29 = vadd.f32 %v2071_v48, %v756_v21  ;;  %v960_v30 = vadd.f32 %v2071_v48, %v820_v22  ;;  %v435_v31 = vpop.f32.mrf.mxu0  ;;  %v595_v32 = vpop.f32.mrf.mxu1 }
  0xdf   :  { %v1737_v33 = vpack.c.bf16 %v1023_v25, %v1022_v19  ;;  %v1769_v34 = vpack.c.bf16 %v1087_v26, %v1086_v20  ;;  %v897_v35 = vadd.f32 %v2077_v54, %v757_v27  ;;  %v961_v36 = vadd.f32 %v2077_v54, %v821_v28 }
  0xe0   :  { %v1024_v37 = vmax.f32 %v896_v29, 0.0  ;;  %v1088_v38 = vmax.f32 %v960_v30, 0.0  ;;  %v758_v39 = vmul.f32 %v2069_v47, %v435_v31  ;;  %v822_v40 = vmul.f32 %v2069_v47, %v595_v32  ;;  %v437_v41 = vpop.f32.mrf.mxu0  ;;  %v597_v42 = vpop.f32.mrf.mxu1 }
  0xe1   :  { %1533 = vst [vmem:[%s2529_s4 + $0x8] sm:$0xff] %v1737_v33  ;;  %1565 = vst [vmem:[%s2529_s4 + $0x108] sm:$0xff] %v1769_v34  ;;  %v1025_v43 = vmax.f32 %v897_v35, 0.0  ;;  %v1089_v44 = vmax.f32 %v961_v36, 0.0  ;;  %v759_v45 = vmul.f32 %v2073_v49, %v437_v41  ;;  %v823_v46 = vmul.f32 %v2073_v49, %v597_v42 }
  0xe2   :  { %v898_v50 = vadd.f32 %v2071_v48, %v758_v39  ;;  %v962_v51 = vadd.f32 %v2071_v48, %v822_v40  ;;  %v441_v52 = vpop.f32.mrf.mxu0  ;;  %v601_v53 = vpop.f32.mrf.mxu1 }
  0xe3   :  { %v1738_v55 = vpack.c.bf16 %v1025_v43, %v1024_v37  ;;  %v1770_v56 = vpack.c.bf16 %v1089_v44, %v1088_v38  ;;  %v899_v57 = vadd.f32 %v2077_v54, %v759_v45  ;;  %v963_v58 = vadd.f32 %v2077_v54, %v823_v46 }
  0xe4   :  { %v1026_v59 = vmax.f32 %v898_v50, 0.0  ;;  %v1090_v60 = vmax.f32 %v962_v51, 0.0  ;;  %v760_v61 = vmul.f32 %v2069_v47, %v441_v52  ;;  %v824_v62 = vmul.f32 %v2069_v47, %v601_v53  ;;  %v443_v63 = vpop.f32.mrf.mxu0  ;;  %v603_v0 = vpop.f32.mrf.mxu1 }
  0xe5   :  { %1534 = vst [vmem:[%s2529_s4 + $0x10] sm:$0xff] %v1738_v55  ;;  %1566 = vst [vmem:[%s2529_s4 + $0x110] sm:$0xff] %v1770_v56  ;;  %v1027_v1 = vmax.f32 %v899_v57, 0.0  ;;  %v1091_v2 = vmax.f32 %v963_v58, 0.0  ;;  %v761_v3 = vmul.f32 %v2073_v49, %v443_v63  ;;  %v825_v4 = vmul.f32 %v2073_v49, %v603_v0 }
  0xe6   :  { %v900_v5 = vadd.f32 %v2071_v48, %v760_v61  ;;  %v964_v6 = vadd.f32 %v2071_v48, %v824_v62  ;;  %v445_v7 = vpop.f32.mrf.mxu0  ;;  %v605_v8 = vpop.f32.mrf.mxu1 }
  0xe7   :  { %v1739_v9 = vpack.c.bf16 %v1027_v1, %v1026_v59  ;;  %v1771_v10 = vpack.c.bf16 %v1091_v2, %v1090_v60  ;;  %v901_v11 = vadd.f32 %v2077_v54, %v761_v3  ;;  %v965_v12 = vadd.f32 %v2077_v54, %v825_v4 }
  0xe8   :  { %v1028_v13 = vmax.f32 %v900_v5, 0.0  ;;  %v1092_v14 = vmax.f32 %v964_v6, 0.0  ;;  %v762_v15 = vmul.f32 %v2069_v47, %v445_v7  ;;  %v826_v16 = vmul.f32 %v2069_v47, %v605_v8  ;;  %v447_v17 = vpop.f32.mrf.mxu0  ;;  %v607_v18 = vpop.f32.mrf.mxu1 }
  0xe9   :  { %1535 = vst [vmem:[%s2529_s4 + $0x18] sm:$0xff] %v1739_v9  ;;  %1567 = vst [vmem:[%s2529_s4 + $0x118] sm:$0xff] %v1771_v10  ;;  %v1029_v19 = vmax.f32 %v901_v11, 0.0  ;;  %v1093_v20 = vmax.f32 %v965_v12, 0.0  ;;  %v763_v21 = vmul.f32 %v2073_v49, %v447_v17  ;;  %v827_v22 = vmul.f32 %v2073_v49, %v607_v18 }
  0xea   :  { %v902_v23 = vadd.f32 %v2071_v48, %v762_v15  ;;  %v966_v24 = vadd.f32 %v2071_v48, %v826_v16  ;;  %v451_v25 = vpop.f32.mrf.mxu0  ;;  %v611_v26 = vpop.f32.mrf.mxu1 }
  0xeb   :  { %v1740_v27 = vpack.c.bf16 %v1029_v19, %v1028_v13  ;;  %v1772_v28 = vpack.c.bf16 %v1093_v20, %v1092_v14  ;;  %v903_v29 = vadd.f32 %v2077_v54, %v763_v21  ;;  %v967_v30 = vadd.f32 %v2077_v54, %v827_v22 }
  0xec   :  { %v1030_v31 = vmax.f32 %v902_v23, 0.0  ;;  %v1094_v32 = vmax.f32 %v966_v24, 0.0  ;;  %v764_v33 = vmul.f32 %v2069_v47, %v451_v25  ;;  %v828_v34 = vmul.f32 %v2069_v47, %v611_v26  ;;  %v453_v35 = vpop.f32.mrf.mxu0  ;;  %v613_v36 = vpop.f32.mrf.mxu1 }
  0xed   :  { %1536 = vst [vmem:[%s2529_s4 + $0x20] sm:$0xff] %v1740_v27  ;;  %1568 = vst [vmem:[%s2529_s4 + $0x120] sm:$0xff] %v1772_v28  ;;  %v1031_v37 = vmax.f32 %v903_v29, 0.0  ;;  %v1095_v38 = vmax.f32 %v967_v30, 0.0  ;;  %v765_v39 = vmul.f32 %v2073_v49, %v453_v35  ;;  %v829_v40 = vmul.f32 %v2073_v49, %v613_v36 }
  0xee   :  { %v904_v41 = vadd.f32 %v2071_v48, %v764_v33  ;;  %v968_v42 = vadd.f32 %v2071_v48, %v828_v34  ;;  %v455_v43 = vpop.f32.mrf.mxu0  ;;  %v615_v44 = vpop.f32.mrf.mxu1 }
  0xef   :  { %v1741_v45 = vpack.c.bf16 %v1031_v37, %v1030_v31  ;;  %v1773_v46 = vpack.c.bf16 %v1095_v38, %v1094_v32  ;;  %v905_v50 = vadd.f32 %v2077_v54, %v765_v39  ;;  %v969_v51 = vadd.f32 %v2077_v54, %v829_v40 }
  0xf0   :  { %v1032_v52 = vmax.f32 %v904_v41, 0.0  ;;  %v1096_v53 = vmax.f32 %v968_v42, 0.0  ;;  %v766_v55 = vmul.f32 %v2069_v47, %v455_v43  ;;  %v830_v56 = vmul.f32 %v2069_v47, %v615_v44  ;;  %v457_v57 = vpop.f32.mrf.mxu0  ;;  %v617_v58 = vpop.f32.mrf.mxu1 }
  0xf1   :  { %1537 = vst [vmem:[%s2529_s4 + $0x28] sm:$0xff] %v1741_v45  ;;  %1569 = vst [vmem:[%s2529_s4 + $0x128] sm:$0xff] %v1773_v46  ;;  %v1033_v59 = vmax.f32 %v905_v50, 0.0  ;;  %v1097_v60 = vmax.f32 %v969_v51, 0.0  ;;  %v767_v61 = vmul.f32 %v2073_v49, %v457_v57  ;;  %v831_v62 = vmul.f32 %v2073_v49, %v617_v58 }
  0xf2   :  { %v906_v63 = vadd.f32 %v2071_v48, %v766_v55  ;;  %v970_v0 = vadd.f32 %v2071_v48, %v830_v56  ;;  %v461_v1 = vpop.f32.mrf.mxu0  ;;  %v621_v2 = vpop.f32.mrf.mxu1 }
  0xf3   :  { %v1742_v3 = vpack.c.bf16 %v1033_v59, %v1032_v52  ;;  %v1774_v4 = vpack.c.bf16 %v1097_v60, %v1096_v53  ;;  %v907_v5 = vadd.f32 %v2077_v54, %v767_v61  ;;  %v971_v6 = vadd.f32 %v2077_v54, %v831_v62 }
  0xf4   :  { %v1034_v7 = vmax.f32 %v906_v63, 0.0  ;;  %v1098_v8 = vmax.f32 %v970_v0, 0.0  ;;  %v768_v9 = vmul.f32 %v2069_v47, %v461_v1  ;;  %v832_v10 = vmul.f32 %v2069_v47, %v621_v2  ;;  %v463_v11 = vpop.f32.mrf.mxu0  ;;  %v623_v12 = vpop.f32.mrf.mxu1 }
  0xf5   :  { %1538 = vst [vmem:[%s2529_s4 + $0x30] sm:$0xff] %v1742_v3  ;;  %1570 = vst [vmem:[%s2529_s4 + $0x130] sm:$0xff] %v1774_v4  ;;  %v1035_v13 = vmax.f32 %v907_v5, 0.0  ;;  %v1099_v14 = vmax.f32 %v971_v6, 0.0  ;;  %v769_v15 = vmul.f32 %v2073_v49, %v463_v11  ;;  %v833_v16 = vmul.f32 %v2073_v49, %v623_v12 }
  0xf6   :  { %v908_v17 = vadd.f32 %v2071_v48, %v768_v9  ;;  %v972_v18 = vadd.f32 %v2071_v48, %v832_v10  ;;  %v465_v19 = vpop.f32.mrf.mxu0  ;;  %v625_v20 = vpop.f32.mrf.mxu1 }
  0xf7   :  { %v1743_v21 = vpack.c.bf16 %v1035_v13, %v1034_v7  ;;  %v1775_v22 = vpack.c.bf16 %v1099_v14, %v1098_v8  ;;  %v909_v23 = vadd.f32 %v2077_v54, %v769_v15  ;;  %v973_v24 = vadd.f32 %v2077_v54, %v833_v16 }
  0xf8   :  { %v1036_v25 = vmax.f32 %v908_v17, 0.0  ;;  %v1100_v26 = vmax.f32 %v972_v18, 0.0  ;;  %v770_v27 = vmul.f32 %v2069_v47, %v465_v19  ;;  %v834_v28 = vmul.f32 %v2069_v47, %v625_v20  ;;  %v467_v29 = vpop.f32.mrf.mxu0  ;;  %v627_v30 = vpop.f32.mrf.mxu1 }
  0xf9   :  { %1539 = vst [vmem:[%s2529_s4 + $0x38] sm:$0xff] %v1743_v21  ;;  %1571 = vst [vmem:[%s2529_s4 + $0x138] sm:$0xff] %v1775_v22  ;;  %v1037_v31 = vmax.f32 %v909_v23, 0.0  ;;  %v1101_v32 = vmax.f32 %v973_v24, 0.0  ;;  %v771_v33 = vmul.f32 %v2073_v49, %v467_v29  ;;  %v835_v34 = vmul.f32 %v2073_v49, %v627_v30 }
  0xfa   :  { %v910_v35 = vadd.f32 %v2071_v48, %v770_v27  ;;  %v974_v36 = vadd.f32 %v2071_v48, %v834_v28  ;;  %v471_v37 = vpop.f32.mrf.mxu0  ;;  %v631_v38 = vpop.f32.mrf.mxu1 }
  0xfb   :  { %v1744_v39 = vpack.c.bf16 %v1037_v31, %v1036_v25  ;;  %v1776_v40 = vpack.c.bf16 %v1101_v32, %v1100_v26  ;;  %v911_v41 = vadd.f32 %v2077_v54, %v771_v33  ;;  %v975_v42 = vadd.f32 %v2077_v54, %v835_v34 }
  0xfc   :  { %v1038_v43 = vmax.f32 %v910_v35, 0.0  ;;  %v1102_v44 = vmax.f32 %v974_v36, 0.0  ;;  %v772_v45 = vmul.f32 %v2069_v47, %v471_v37  ;;  %v836_v46 = vmul.f32 %v2069_v47, %v631_v38  ;;  %v473_v50 = vpop.f32.mrf.mxu0  ;;  %v633_v51 = vpop.f32.mrf.mxu1 }
  0xfd   :  { %1540 = vst [vmem:[%s2529_s4 + $0x40] sm:$0xff] %v1744_v39  ;;  %1572 = vst [vmem:[%s2529_s4 + $0x140] sm:$0xff] %v1776_v40  ;;  %v1039_v52 = vmax.f32 %v911_v41, 0.0  ;;  %v1103_v53 = vmax.f32 %v975_v42, 0.0  ;;  %v773_v55 = vmul.f32 %v2073_v49, %v473_v50  ;;  %v837_v56 = vmul.f32 %v2073_v49, %v633_v51 }
  0xfe   :  { %v912_v57 = vadd.f32 %v2071_v48, %v772_v45  ;;  %v976_v58 = vadd.f32 %v2071_v48, %v836_v46  ;;  %v475_v59 = vpop.f32.mrf.mxu0  ;;  %v635_v60 = vpop.f32.mrf.mxu1 }
  0xff   :  { %v1745_v61 = vpack.c.bf16 %v1039_v52, %v1038_v43  ;;  %v1777_v62 = vpack.c.bf16 %v1103_v53, %v1102_v44  ;;  %v913_v63 = vadd.f32 %v2077_v54, %v773_v55  ;;  %v977_v0 = vadd.f32 %v2077_v54, %v837_v56 }
 0x100   :  { %v1040_v1 = vmax.f32 %v912_v57, 0.0  ;;  %v1104_v2 = vmax.f32 %v976_v58, 0.0  ;;  %v774_v3 = vmul.f32 %v2069_v47, %v475_v59  ;;  %v838_v4 = vmul.f32 %v2069_v47, %v635_v60  ;;  %v477_v5 = vpop.f32.mrf.mxu0  ;;  %v637_v6 = vpop.f32.mrf.mxu1 }
 0x101   :  { %1541 = vst [vmem:[%s2529_s4 + $0x48] sm:$0xff] %v1745_v61  ;;  %1573 = vst [vmem:[%s2529_s4 + $0x148] sm:$0xff] %v1777_v62  ;;  %v1041_v7 = vmax.f32 %v913_v63, 0.0  ;;  %v1105_v8 = vmax.f32 %v977_v0, 0.0  ;;  %v775_v9 = vmul.f32 %v2073_v49, %v477_v5  ;;  %v839_v10 = vmul.f32 %v2073_v49, %v637_v6 }
 0x102   :  { %v914_v11 = vadd.f32 %v2071_v48, %v774_v3  ;;  %v978_v12 = vadd.f32 %v2071_v48, %v838_v4  ;;  %v481_v13 = vpop.f32.mrf.mxu0  ;;  %v641_v14 = vpop.f32.mrf.mxu1 }
 0x103   :  { %v1746_v15 = vpack.c.bf16 %v1041_v7, %v1040_v1  ;;  %v1778_v16 = vpack.c.bf16 %v1105_v8, %v1104_v2  ;;  %v915_v17 = vadd.f32 %v2077_v54, %v775_v9  ;;  %v979_v18 = vadd.f32 %v2077_v54, %v839_v10 }
 0x104   :  { %v1042_v19 = vmax.f32 %v914_v11, 0.0  ;;  %v1106_v20 = vmax.f32 %v978_v12, 0.0  ;;  %v776_v21 = vmul.f32 %v2069_v47, %v481_v13  ;;  %v840_v22 = vmul.f32 %v2069_v47, %v641_v14  ;;  %v483_v23 = vpop.f32.mrf.mxu0  ;;  %v643_v24 = vpop.f32.mrf.mxu1 }
 0x105   :  { %1542 = vst [vmem:[%s2529_s4 + $0x50] sm:$0xff] %v1746_v15  ;;  %1574 = vst [vmem:[%s2529_s4 + $0x150] sm:$0xff] %v1778_v16  ;;  %v1043_v25 = vmax.f32 %v915_v17, 0.0  ;;  %v1107_v26 = vmax.f32 %v979_v18, 0.0  ;;  %v777_v27 = vmul.f32 %v2073_v49, %v483_v23  ;;  %v841_v28 = vmul.f32 %v2073_v49, %v643_v24 }
 0x106   :  { %v916_v29 = vadd.f32 %v2071_v48, %v776_v21  ;;  %v980_v30 = vadd.f32 %v2071_v48, %v840_v22  ;;  %v485_v31 = vpop.f32.mrf.mxu0  ;;  %v645_v32 = vpop.f32.mrf.mxu1 }
 0x107   :  { %v1747_v33 = vpack.c.bf16 %v1043_v25, %v1042_v19  ;;  %v1779_v34 = vpack.c.bf16 %v1107_v26, %v1106_v20  ;;  %v917_v35 = vadd.f32 %v2077_v54, %v777_v27  ;;  %v981_v36 = vadd.f32 %v2077_v54, %v841_v28 }
 0x108   :  { %v1044_v37 = vmax.f32 %v916_v29, 0.0  ;;  %v1108_v38 = vmax.f32 %v980_v30, 0.0  ;;  %v778_v39 = vmul.f32 %v2069_v47, %v485_v31  ;;  %v842_v40 = vmul.f32 %v2069_v47, %v645_v32  ;;  %v487_v41 = vpop.f32.mrf.mxu0  ;;  %v647_v42 = vpop.f32.mrf.mxu1 }
 0x109   :  { %1543 = vst [vmem:[%s2529_s4 + $0x58] sm:$0xff] %v1747_v33  ;;  %1575 = vst [vmem:[%s2529_s4 + $0x158] sm:$0xff] %v1779_v34  ;;  %v1045_v43 = vmax.f32 %v917_v35, 0.0  ;;  %v1109_v44 = vmax.f32 %v981_v36, 0.0  ;;  %v779_v45 = vmul.f32 %v2073_v49, %v487_v41  ;;  %v843_v46 = vmul.f32 %v2073_v49, %v647_v42 }
 0x10a   :  { %v918_v50 = vadd.f32 %v2071_v48, %v778_v39  ;;  %v982_v51 = vadd.f32 %v2071_v48, %v842_v40  ;;  %v491_v52 = vpop.f32.mrf.mxu0  ;;  %v651_v53 = vpop.f32.mrf.mxu1 }
 0x10b   :  { %v1748_v55 = vpack.c.bf16 %v1045_v43, %v1044_v37  ;;  %v1780_v56 = vpack.c.bf16 %v1109_v44, %v1108_v38  ;;  %v919_v57 = vadd.f32 %v2077_v54, %v779_v45  ;;  %v983_v58 = vadd.f32 %v2077_v54, %v843_v46 }
 0x10c   :  { %v1046_v59 = vmax.f32 %v918_v50, 0.0  ;;  %v1110_v60 = vmax.f32 %v982_v51, 0.0  ;;  %v780_v61 = vmul.f32 %v2069_v47, %v491_v52  ;;  %v844_v62 = vmul.f32 %v2069_v47, %v651_v53  ;;  %v493_v63 = vpop.f32.mrf.mxu0  ;;  %v653_v0 = vpop.f32.mrf.mxu1 }
 0x10d   :  { %1544 = vst [vmem:[%s2529_s4 + $0x60] sm:$0xff] %v1748_v55  ;;  %1576 = vst [vmem:[%s2529_s4 + $0x160] sm:$0xff] %v1780_v56  ;;  %v1047_v1 = vmax.f32 %v919_v57, 0.0  ;;  %v1111_v2 = vmax.f32 %v983_v58, 0.0  ;;  %v781_v3 = vmul.f32 %v2073_v49, %v493_v63  ;;  %v845_v4 = vmul.f32 %v2073_v49, %v653_v0 }
 0x10e   :  { %v920_v5 = vadd.f32 %v2071_v48, %v780_v61  ;;  %v984_v6 = vadd.f32 %v2071_v48, %v844_v62  ;;  %v495_v7 = vpop.f32.mrf.mxu0  ;;  %v655_v8 = vpop.f32.mrf.mxu1 }
 0x10f   :  { %v1749_v9 = vpack.c.bf16 %v1047_v1, %v1046_v59  ;;  %v1781_v10 = vpack.c.bf16 %v1111_v2, %v1110_v60  ;;  %v921_v11 = vadd.f32 %v2077_v54, %v781_v3  ;;  %v985_v12 = vadd.f32 %v2077_v54, %v845_v4 }
 0x110   :  { %v1048_v13 = vmax.f32 %v920_v5, 0.0  ;;  %v1112_v14 = vmax.f32 %v984_v6, 0.0  ;;  %v782_v15 = vmul.f32 %v2069_v47, %v495_v7  ;;  %v846_v16 = vmul.f32 %v2069_v47, %v655_v8  ;;  %v497_v17 = vpop.f32.mrf.mxu0  ;;  %v657_v18 = vpop.f32.mrf.mxu1 }
 0x111   :  { %1545 = vst [vmem:[%s2529_s4 + $0x68] sm:$0xff] %v1749_v9  ;;  %1577 = vst [vmem:[%s2529_s4 + $0x168] sm:$0xff] %v1781_v10  ;;  %v1049_v19 = vmax.f32 %v921_v11, 0.0  ;;  %v1113_v20 = vmax.f32 %v985_v12, 0.0  ;;  %v783_v21 = vmul.f32 %v2073_v49, %v497_v17  ;;  %v847_v22 = vmul.f32 %v2073_v49, %v657_v18 }
 0x112   :  { %v922_v23 = vadd.f32 %v2071_v48, %v782_v15  ;;  %v986_v24 = vadd.f32 %v2071_v48, %v846_v16  ;;  %v501_v25 = vpop.f32.mrf.mxu0  ;;  %v661_v26 = vpop.f32.mrf.mxu1 }
 0x113   :  { %v1750_v27 = vpack.c.bf16 %v1049_v19, %v1048_v13  ;;  %v1782_v28 = vpack.c.bf16 %v1113_v20, %v1112_v14  ;;  %v923_v29 = vadd.f32 %v2077_v54, %v783_v21  ;;  %v987_v30 = vadd.f32 %v2077_v54, %v847_v22 }
 0x114   :  { %v1050_v31 = vmax.f32 %v922_v23, 0.0  ;;  %v1114_v32 = vmax.f32 %v986_v24, 0.0  ;;  %v784_v33 = vmul.f32 %v2069_v47, %v501_v25  ;;  %v848_v34 = vmul.f32 %v2069_v47, %v661_v26  ;;  %v503_v35 = vpop.f32.mrf.mxu0  ;;  %v663_v36 = vpop.f32.mrf.mxu1 }
 0x115   :  { %1546 = vst [vmem:[%s2529_s4 + $0x70] sm:$0xff] %v1750_v27  ;;  %1578 = vst [vmem:[%s2529_s4 + $0x170] sm:$0xff] %v1782_v28  ;;  %v1051_v37 = vmax.f32 %v923_v29, 0.0  ;;  %v1115_v38 = vmax.f32 %v987_v30, 0.0  ;;  %v785_v39 = vmul.f32 %v2073_v49, %v503_v35  ;;  %v849_v40 = vmul.f32 %v2073_v49, %v663_v36 }
 0x116   :  { %v924_v41 = vadd.f32 %v2071_v48, %v784_v33  ;;  %v988_v42 = vadd.f32 %v2071_v48, %v848_v34  ;;  %v505_v43 = vpop.f32.mrf.mxu0  ;;  %v665_v44 = vpop.f32.mrf.mxu1 }
 0x117   :  { %v1751_v45 = vpack.c.bf16 %v1051_v37, %v1050_v31  ;;  %v1783_v46 = vpack.c.bf16 %v1115_v38, %v1114_v32  ;;  %v925_v50 = vadd.f32 %v2077_v54, %v785_v39  ;;  %v989_v51 = vadd.f32 %v2077_v54, %v849_v40 }
 0x118   :  { %v1052_v52 = vmax.f32 %v924_v41, 0.0  ;;  %v1116_v53 = vmax.f32 %v988_v42, 0.0  ;;  %v786_v55 = vmul.f32 %v2069_v47, %v505_v43  ;;  %v850_v56 = vmul.f32 %v2069_v47, %v665_v44  ;;  %v507_v57 = vpop.f32.mrf.mxu0  ;;  %v667_v58 = vpop.f32.mrf.mxu1 }
 0x119   :  { %1547 = vst [vmem:[%s2529_s4 + $0x78] sm:$0xff] %v1751_v45  ;;  %1579 = vst [vmem:[%s2529_s4 + $0x178] sm:$0xff] %v1783_v46  ;;  %v1053_v59 = vmax.f32 %v925_v50, 0.0  ;;  %v1117_v60 = vmax.f32 %v989_v51, 0.0  ;;  %v787_v61 = vmul.f32 %v2073_v49, %v507_v57  ;;  %v851_v62 = vmul.f32 %v2073_v49, %v667_v58 }
 0x11a   :  { %v926_v63 = vadd.f32 %v2071_v48, %v786_v55  ;;  %v990_v0 = vadd.f32 %v2071_v48, %v850_v56  ;;  %v511_v1 = vpop.f32.mrf.mxu0  ;;  %v671_v2 = vpop.f32.mrf.mxu1 }
 0x11b   :  { %v1752_v3 = vpack.c.bf16 %v1053_v59, %v1052_v52  ;;  %v1784_v4 = vpack.c.bf16 %v1117_v60, %v1116_v53  ;;  %v927_v5 = vadd.f32 %v2077_v54, %v787_v61  ;;  %v991_v6 = vadd.f32 %v2077_v54, %v851_v62 }
 0x11c   :  { %v1054_v7 = vmax.f32 %v926_v63, 0.0  ;;  %v1118_v8 = vmax.f32 %v990_v0, 0.0  ;;  %v788_v9 = vmul.f32 %v2069_v47, %v511_v1  ;;  %v852_v10 = vmul.f32 %v2069_v47, %v671_v2  ;;  %v513_v11 = vpop.f32.mrf.mxu0  ;;  %v673_v12 = vpop.f32.mrf.mxu1 }
 0x11d   :  { %1548 = vst [vmem:[%s2529_s4 + $0x80] sm:$0xff] %v1752_v3  ;;  %1580 = vst [vmem:[%s2529_s4 + $0x180] sm:$0xff] %v1784_v4  ;;  %v1055_v13 = vmax.f32 %v927_v5, 0.0  ;;  %v1119_v14 = vmax.f32 %v991_v6, 0.0  ;;  %v789_v15 = vmul.f32 %v2073_v49, %v513_v11  ;;  %v853_v16 = vmul.f32 %v2073_v49, %v673_v12 }
 0x11e   :  { %v928_v17 = vadd.f32 %v2071_v48, %v788_v9  ;;  %v992_v18 = vadd.f32 %v2071_v48, %v852_v10  ;;  %v515_v19 = vpop.f32.mrf.mxu0  ;;  %v675_v20 = vpop.f32.mrf.mxu1 }
 0x11f   :  { %v1753_v21 = vpack.c.bf16 %v1055_v13, %v1054_v7  ;;  %v1785_v22 = vpack.c.bf16 %v1119_v14, %v1118_v8  ;;  %v929_v23 = vadd.f32 %v2077_v54, %v789_v15  ;;  %v993_v24 = vadd.f32 %v2077_v54, %v853_v16 }
 0x120   :  { %v1056_v25 = vmax.f32 %v928_v17, 0.0  ;;  %v1120_v26 = vmax.f32 %v992_v18, 0.0  ;;  %v790_v27 = vmul.f32 %v2069_v47, %v515_v19  ;;  %v854_v28 = vmul.f32 %v2069_v47, %v675_v20  ;;  %v517_v29 = vpop.f32.mrf.mxu0  ;;  %v677_v30 = vpop.f32.mrf.mxu1 }
 0x121   :  { %1549 = vst [vmem:[%s2529_s4 + $0x88] sm:$0xff] %v1753_v21  ;;  %1581 = vst [vmem:[%s2529_s4 + $0x188] sm:$0xff] %v1785_v22  ;;  %v1057_v31 = vmax.f32 %v929_v23, 0.0  ;;  %v1121_v32 = vmax.f32 %v993_v24, 0.0  ;;  %v791_v33 = vmul.f32 %v2073_v49, %v517_v29  ;;  %v855_v34 = vmul.f32 %v2073_v49, %v677_v30 }
 0x122   :  { %v930_v35 = vadd.f32 %v2071_v48, %v790_v27  ;;  %v994_v36 = vadd.f32 %v2071_v48, %v854_v28  ;;  %v521_v37 = vpop.f32.mrf.mxu0  ;;  %v681_v38 = vpop.f32.mrf.mxu1 }
 0x123   :  { %v1754_v39 = vpack.c.bf16 %v1057_v31, %v1056_v25  ;;  %v1786_v40 = vpack.c.bf16 %v1121_v32, %v1120_v26  ;;  %v931_v41 = vadd.f32 %v2077_v54, %v791_v33  ;;  %v995_v42 = vadd.f32 %v2077_v54, %v855_v34 }
 0x124   :  { %v1058_v43 = vmax.f32 %v930_v35, 0.0  ;;  %v1122_v44 = vmax.f32 %v994_v36, 0.0  ;;  %v792_v45 = vmul.f32 %v2069_v47, %v521_v37  ;;  %v856_v46 = vmul.f32 %v2069_v47, %v681_v38  ;;  %v523_v50 = vpop.f32.mrf.mxu0  ;;  %v683_v51 = vpop.f32.mrf.mxu1 }
 0x125   :  { %1550 = vst [vmem:[%s2529_s4 + $0x90] sm:$0xff] %v1754_v39  ;;  %1582 = vst [vmem:[%s2529_s4 + $0x190] sm:$0xff] %v1786_v40  ;;  %v1059_v52 = vmax.f32 %v931_v41, 0.0  ;;  %v1123_v53 = vmax.f32 %v995_v42, 0.0  ;;  %v793_v55 = vmul.f32 %v2073_v49, %v523_v50  ;;  %v857_v56 = vmul.f32 %v2073_v49, %v683_v51 }
 0x126   :  { %v932_v57 = vadd.f32 %v2071_v48, %v792_v45  ;;  %v996_v58 = vadd.f32 %v2071_v48, %v856_v46  ;;  %v525_v59 = vpop.f32.mrf.mxu0  ;;  %v685_v60 = vpop.f32.mrf.mxu1 }
 0x127   :  { %v1755_v61 = vpack.c.bf16 %v1059_v52, %v1058_v43  ;;  %v1787_v62 = vpack.c.bf16 %v1123_v53, %v1122_v44  ;;  %v933_v63 = vadd.f32 %v2077_v54, %v793_v55  ;;  %v997_v0 = vadd.f32 %v2077_v54, %v857_v56 }
 0x128   :  { %v1060_v1 = vmax.f32 %v932_v57, 0.0  ;;  %v1124_v2 = vmax.f32 %v996_v58, 0.0  ;;  %v794_v3 = vmul.f32 %v2069_v47, %v525_v59  ;;  %v858_v4 = vmul.f32 %v2069_v47, %v685_v60  ;;  %v527_v5 = vpop.f32.mrf.mxu0  ;;  %v687_v6 = vpop.f32.mrf.mxu1 }
 0x129   :  { %1551 = vst [vmem:[%s2529_s4 + $0x98] sm:$0xff] %v1755_v61  ;;  %1583 = vst [vmem:[%s2529_s4 + $0x198] sm:$0xff] %v1787_v62  ;;  %v1061_v7 = vmax.f32 %v933_v63, 0.0  ;;  %v1125_v8 = vmax.f32 %v997_v0, 0.0  ;;  %v795_v9 = vmul.f32 %v2073_v49, %v527_v5  ;;  %v859_v10 = vmul.f32 %v2073_v49, %v687_v6 }
 0x12a   :  { %v934_v11 = vadd.f32 %v2071_v48, %v794_v3  ;;  %v998_v12 = vadd.f32 %v2071_v48, %v858_v4  ;;  %v531_v13 = vpop.f32.mrf.mxu0  ;;  %v691_v14 = vpop.f32.mrf.mxu1 }
 0x12b   :  { %v1756_v15 = vpack.c.bf16 %v1061_v7, %v1060_v1  ;;  %v1788_v16 = vpack.c.bf16 %v1125_v8, %v1124_v2  ;;  %v935_v17 = vadd.f32 %v2077_v54, %v795_v9  ;;  %v999_v18 = vadd.f32 %v2077_v54, %v859_v10 }
 0x12c   :  { %v1062_v19 = vmax.f32 %v934_v11, 0.0  ;;  %v1126_v20 = vmax.f32 %v998_v12, 0.0  ;;  %v796_v21 = vmul.f32 %v2069_v47, %v531_v13  ;;  %v860_v22 = vmul.f32 %v2069_v47, %v691_v14  ;;  %v533_v23 = vpop.f32.mrf.mxu0  ;;  %v693_v24 = vpop.f32.mrf.mxu1 }
 0x12d   :  { %1552 = vst [vmem:[%s2529_s4 + $0xa0] sm:$0xff] %v1756_v15  ;;  %1584 = vst [vmem:[%s2529_s4 + $0x1a0] sm:$0xff] %v1788_v16  ;;  %v1063_v25 = vmax.f32 %v935_v17, 0.0  ;;  %v1127_v26 = vmax.f32 %v999_v18, 0.0  ;;  %v797_v27 = vmul.f32 %v2073_v49, %v533_v23  ;;  %v861_v28 = vmul.f32 %v2073_v49, %v693_v24 }
 0x12e   :  { %v936_v29 = vadd.f32 %v2071_v48, %v796_v21  ;;  %v1000_v30 = vadd.f32 %v2071_v48, %v860_v22  ;;  %v535_v31 = vpop.f32.mrf.mxu0  ;;  %v695_v32 = vpop.f32.mrf.mxu1 }
 0x12f   :  { %v1757_v33 = vpack.c.bf16 %v1063_v25, %v1062_v19  ;;  %v1789_v34 = vpack.c.bf16 %v1127_v26, %v1126_v20  ;;  %v937_v35 = vadd.f32 %v2077_v54, %v797_v27  ;;  %v1001_v36 = vadd.f32 %v2077_v54, %v861_v28 }
 0x130   :  { %v1064_v37 = vmax.f32 %v936_v29, 0.0  ;;  %v1128_v38 = vmax.f32 %v1000_v30, 0.0  ;;  %v798_v39 = vmul.f32 %v2069_v47, %v535_v31  ;;  %v862_v40 = vmul.f32 %v2069_v47, %v695_v32  ;;  %v537_v41 = vpop.f32.mrf.mxu0  ;;  %v697_v42 = vpop.f32.mrf.mxu1 }
 0x131   :  { %1553 = vst [vmem:[%s2529_s4 + $0xa8] sm:$0xff] %v1757_v33  ;;  %1585 = vst [vmem:[%s2529_s4 + $0x1a8] sm:$0xff] %v1789_v34  ;;  %v1065_v43 = vmax.f32 %v937_v35, 0.0  ;;  %v1129_v44 = vmax.f32 %v1001_v36, 0.0  ;;  %v799_v45 = vmul.f32 %v2073_v49, %v537_v41  ;;  %v863_v46 = vmul.f32 %v2073_v49, %v697_v42 }
 0x132   :  { %v938_v50 = vadd.f32 %v2071_v48, %v798_v39  ;;  %v1002_v51 = vadd.f32 %v2071_v48, %v862_v40  ;;  %v541_v52 = vpop.f32.mrf.mxu0  ;;  %v701_v53 = vpop.f32.mrf.mxu1 }
 0x133   :  { %v1758_v55 = vpack.c.bf16 %v1065_v43, %v1064_v37  ;;  %v1790_v56 = vpack.c.bf16 %v1129_v44, %v1128_v38  ;;  %v939_v57 = vadd.f32 %v2077_v54, %v799_v45  ;;  %v1003_v58 = vadd.f32 %v2077_v54, %v863_v46 }
 0x134   :  { %v1066_v59 = vmax.f32 %v938_v50, 0.0  ;;  %v1130_v60 = vmax.f32 %v1002_v51, 0.0  ;;  %v800_v61 = vmul.f32 %v2069_v47, %v541_v52  ;;  %v864_v62 = vmul.f32 %v2069_v47, %v701_v53  ;;  %v543_v63 = vpop.f32.mrf.mxu0  ;;  %v703_v0 = vpop.f32.mrf.mxu1 }
 0x135   :  { %1554 = vst [vmem:[%s2529_s4 + $0xb0] sm:$0xff] %v1758_v55  ;;  %1586 = vst [vmem:[%s2529_s4 + $0x1b0] sm:$0xff] %v1790_v56  ;;  %v1067_v1 = vmax.f32 %v939_v57, 0.0  ;;  %v1131_v2 = vmax.f32 %v1003_v58, 0.0  ;;  %v801_v3 = vmul.f32 %v2073_v49, %v543_v63  ;;  %v865_v4 = vmul.f32 %v2073_v49, %v703_v0 }
 0x136   :  { %v940_v5 = vadd.f32 %v2071_v48, %v800_v61  ;;  %v1004_v6 = vadd.f32 %v2071_v48, %v864_v62  ;;  %v545_v7 = vpop.f32.mrf.mxu0  ;;  %v705_v8 = vpop.f32.mrf.mxu1 }
 0x137   :  { %v1759_v9 = vpack.c.bf16 %v1067_v1, %v1066_v59  ;;  %v1791_v10 = vpack.c.bf16 %v1131_v2, %v1130_v60  ;;  %v941_v11 = vadd.f32 %v2077_v54, %v801_v3  ;;  %v1005_v12 = vadd.f32 %v2077_v54, %v865_v4 }
 0x138   :  { %v1068_v13 = vmax.f32 %v940_v5, 0.0  ;;  %v1132_v14 = vmax.f32 %v1004_v6, 0.0  ;;  %v802_v15 = vmul.f32 %v2069_v47, %v545_v7  ;;  %v866_v16 = vmul.f32 %v2069_v47, %v705_v8  ;;  %v547_v17 = vpop.f32.mrf.mxu0  ;;  %v707_v18 = vpop.f32.mrf.mxu1 }
 0x139   :  { %1555 = vst [vmem:[%s2529_s4 + $0xb8] sm:$0xff] %v1759_v9  ;;  %1587 = vst [vmem:[%s2529_s4 + $0x1b8] sm:$0xff] %v1791_v10  ;;  %v1069_v19 = vmax.f32 %v941_v11, 0.0  ;;  %v1133_v20 = vmax.f32 %v1005_v12, 0.0  ;;  %v803_v21 = vmul.f32 %v2073_v49, %v547_v17  ;;  %v867_v22 = vmul.f32 %v2073_v49, %v707_v18 }
 0x13a   :  { %v942_v23 = vadd.f32 %v2071_v48, %v802_v15  ;;  %v1006_v24 = vadd.f32 %v2071_v48, %v866_v16  ;;  %v551_v25 = vpop.f32.mrf.mxu0  ;;  %v711_v26 = vpop.f32.mrf.mxu1 }
 0x13b   :  { %v1760_v27 = vpack.c.bf16 %v1069_v19, %v1068_v13  ;;  %v1792_v28 = vpack.c.bf16 %v1133_v20, %v1132_v14  ;;  %v943_v29 = vadd.f32 %v2077_v54, %v803_v21  ;;  %v1007_v30 = vadd.f32 %v2077_v54, %v867_v22 }
 0x13c   :  { %v1070_v31 = vmax.f32 %v942_v23, 0.0  ;;  %v1134_v32 = vmax.f32 %v1006_v24, 0.0  ;;  %v804_v33 = vmul.f32 %v2069_v47, %v551_v25  ;;  %v868_v34 = vmul.f32 %v2069_v47, %v711_v26  ;;  %v553_v35 = vpop.f32.mrf.mxu0  ;;  %v713_v36 = vpop.f32.mrf.mxu1 }
 0x13d   :  { %1556 = vst [vmem:[%s2529_s4 + $0xc0] sm:$0xff] %v1760_v27  ;;  %1588 = vst [vmem:[%s2529_s4 + $0x1c0] sm:$0xff] %v1792_v28  ;;  %v1071_v37 = vmax.f32 %v943_v29, 0.0  ;;  %v1135_v38 = vmax.f32 %v1007_v30, 0.0  ;;  %v805_v39 = vmul.f32 %v2073_v49, %v553_v35  ;;  %v869_v40 = vmul.f32 %v2073_v49, %v713_v36 }
 0x13e   :  { %v944_v41 = vadd.f32 %v2071_v48, %v804_v33  ;;  %v1008_v42 = vadd.f32 %v2071_v48, %v868_v34  ;;  %v555_v43 = vpop.f32.mrf.mxu0  ;;  %v715_v44 = vpop.f32.mrf.mxu1 }
 0x13f   :  { %v1761_v45 = vpack.c.bf16 %v1071_v37, %v1070_v31  ;;  %v1793_v46 = vpack.c.bf16 %v1135_v38, %v1134_v32  ;;  %v945_v50 = vadd.f32 %v2077_v54, %v805_v39  ;;  %v1009_v51 = vadd.f32 %v2077_v54, %v869_v40 }
 0x140   :  { %v1072_v52 = vmax.f32 %v944_v41, 0.0  ;;  %v1136_v53 = vmax.f32 %v1008_v42, 0.0  ;;  %v806_v55 = vmul.f32 %v2069_v47, %v555_v43  ;;  %v870_v56 = vmul.f32 %v2069_v47, %v715_v44  ;;  %v557_v57 = vpop.f32.mrf.mxu0  ;;  %v717_v58 = vpop.f32.mrf.mxu1 }
 0x141   :  { %1557 = vst [vmem:[%s2529_s4 + $0xc8] sm:$0xff] %v1761_v45  ;;  %1589 = vst [vmem:[%s2529_s4 + $0x1c8] sm:$0xff] %v1793_v46  ;;  %v1073_v59 = vmax.f32 %v945_v50, 0.0  ;;  %v1137_v60 = vmax.f32 %v1009_v51, 0.0  ;;  %v807_v61 = vmul.f32 %v2073_v49, %v557_v57  ;;  %v871_v62 = vmul.f32 %v2073_v49, %v717_v58 }
 0x142   :  { %v946_v63 = vadd.f32 %v2071_v48, %v806_v55  ;;  %v1010_v0 = vadd.f32 %v2071_v48, %v870_v56  ;;  %v561_v1 = vpop.f32.mrf.mxu0  ;;  %v721_v2 = vpop.f32.mrf.mxu1 }
 0x143   :  { %v1762_v3 = vpack.c.bf16 %v1073_v59, %v1072_v52  ;;  %v1794_v4 = vpack.c.bf16 %v1137_v60, %v1136_v53  ;;  %v947_v5 = vadd.f32 %v2077_v54, %v807_v61  ;;  %v1011_v6 = vadd.f32 %v2077_v54, %v871_v62 }
 0x144   :  { %v1074_v7 = vmax.f32 %v946_v63, 0.0  ;;  %v1138_v8 = vmax.f32 %v1010_v0, 0.0  ;;  %v808_v9 = vmul.f32 %v2069_v47, %v561_v1  ;;  %v872_v10 = vmul.f32 %v2069_v47, %v721_v2  ;;  %v563_v11 = vpop.f32.mrf.mxu0  ;;  %v723_v12 = vpop.f32.mrf.mxu1 }
 0x145   :  { %1558 = vst [vmem:[%s2529_s4 + $0xd0] sm:$0xff] %v1762_v3  ;;  %1590 = vst [vmem:[%s2529_s4 + $0x1d0] sm:$0xff] %v1794_v4  ;;  %v1075_v13 = vmax.f32 %v947_v5, 0.0  ;;  %v1139_v14 = vmax.f32 %v1011_v6, 0.0  ;;  %v809_v15 = vmul.f32 %v2073_v49, %v563_v11  ;;  %v873_v16 = vmul.f32 %v2073_v49, %v723_v12 }
 0x146   :  { %v948_v17 = vadd.f32 %v2071_v48, %v808_v9  ;;  %v1012_v18 = vadd.f32 %v2071_v48, %v872_v10  ;;  %v565_v19 = vpop.f32.mrf.mxu0  ;;  %v725_v20 = vpop.f32.mrf.mxu1 }
 0x147   :  { %v1763_v21 = vpack.c.bf16 %v1075_v13, %v1074_v7  ;;  %v1795_v22 = vpack.c.bf16 %v1139_v14, %v1138_v8  ;;  %v949_v23 = vadd.f32 %v2077_v54, %v809_v15  ;;  %v1013_v24 = vadd.f32 %v2077_v54, %v873_v16 }
 0x148   :  { %v1076_v25 = vmax.f32 %v948_v17, 0.0  ;;  %v1140_v26 = vmax.f32 %v1012_v18, 0.0  ;;  %v810_v27 = vmul.f32 %v2069_v47, %v565_v19  ;;  %v874_v28 = vmul.f32 %v2069_v47, %v725_v20  ;;  %v567_v29 = vpop.f32.mrf.mxu0  ;;  %v727_v30 = vpop.f32.mrf.mxu1 }
 0x149   :  { %1559 = vst [vmem:[%s2529_s4 + $0xd8] sm:$0xff] %v1763_v21  ;;  %1591 = vst [vmem:[%s2529_s4 + $0x1d8] sm:$0xff] %v1795_v22  ;;  %v1077_v31 = vmax.f32 %v949_v23, 0.0  ;;  %v1141_v32 = vmax.f32 %v1013_v24, 0.0  ;;  %v811_v33 = vmul.f32 %v2073_v49, %v567_v29  ;;  %v875_v34 = vmul.f32 %v2073_v49, %v727_v30 }
 0x14a   :  { %v950_v35 = vadd.f32 %v2071_v48, %v810_v27  ;;  %v1014_v36 = vadd.f32 %v2071_v48, %v874_v28  ;;  %v571_v37 = vpop.f32.mrf.mxu0  ;;  %v731_v38 = vpop.f32.mrf.mxu1 }
 0x14b   :  { %v1764_v39 = vpack.c.bf16 %v1077_v31, %v1076_v25  ;;  %v1796_v40 = vpack.c.bf16 %v1141_v32, %v1140_v26  ;;  %v951_v41 = vadd.f32 %v2077_v54, %v811_v33  ;;  %v1015_v42 = vadd.f32 %v2077_v54, %v875_v34 }
 0x14c   :  { %v1078_v43 = vmax.f32 %v950_v35, 0.0  ;;  %v1142_v44 = vmax.f32 %v1014_v36, 0.0  ;;  %v812_v45 = vmul.f32 %v2069_v47, %v571_v37  ;;  %v876_v46 = vmul.f32 %v2069_v47, %v731_v38  ;;  %v573_v50 = vpop.f32.mrf.mxu0  ;;  %v733_v51 = vpop.f32.mrf.mxu1 }
 0x14d   :  { %1560 = vst [vmem:[%s2529_s4 + $0xe0] sm:$0xff] %v1764_v39  ;;  %1592 = vst [vmem:[%s2529_s4 + $0x1e0] sm:$0xff] %v1796_v40  ;;  %v1079_v52 = vmax.f32 %v951_v41, 0.0  ;;  %v1143_v53 = vmax.f32 %v1015_v42, 0.0  ;;  %v813_v55 = vmul.f32 %v2073_v49, %v573_v50  ;;  %v877_v56 = vmul.f32 %v2073_v49, %v733_v51 }
 0x14e   :  { %v952_v57 = vadd.f32 %v2071_v48, %v812_v45  ;;  %v1016_v58 = vadd.f32 %v2071_v48, %v876_v46  ;;  %v575_v59 = vpop.f32.mrf.mxu0  ;;  %v735_v60 = vpop.f32.mrf.mxu1 }
 0x14f   :  { %v1765_v61 = vpack.c.bf16 %v1079_v52, %v1078_v43  ;;  %v1797_v62 = vpack.c.bf16 %v1143_v53, %v1142_v44  ;;  %v953_v63 = vadd.f32 %v2077_v54, %v813_v55  ;;  %v1017_v0 = vadd.f32 %v2077_v54, %v877_v56 }
 0x150   :  { %v1080_v1 = vmax.f32 %v952_v57, 0.0  ;;  %v1144_v2 = vmax.f32 %v1016_v58, 0.0  ;;  %v814_v3 = vmul.f32 %v2069_v47, %v575_v59  ;;  %v878_v4 = vmul.f32 %v2069_v47, %v735_v60  ;;  %v577_v5 = vpop.f32.mrf.mxu0  ;;  %v737_v6 = vpop.f32.mrf.mxu1 }
 0x151   :  { %1561 = vst [vmem:[%s2529_s4 + $0xe8] sm:$0xff] %v1765_v61  ;;  %1593 = vst [vmem:[%s2529_s4 + $0x1e8] sm:$0xff] %v1797_v62  ;;  %v1081_v7 = vmax.f32 %v953_v63, 0.0  ;;  %v1145_v8 = vmax.f32 %v1017_v0, 0.0  ;;  %v815_v9 = vmul.f32 %v2073_v49, %v577_v5  ;;  %v879_v10 = vmul.f32 %v2073_v49, %v737_v6 }
 0x152   :  { %v954_v11 = vadd.f32 %v2071_v48, %v814_v3  ;;  %v1018_v47 = vadd.f32 %v2071_v48, %v878_v4 }
 0x153   :  { %v1766_v12 = vpack.c.bf16 %v1081_v7, %v1080_v1  ;;  %v1798_v13 = vpack.c.bf16 %v1145_v8, %v1144_v2  ;;  %v955_v14 = vadd.f32 %v2077_v54, %v815_v9  ;;  %v1019_v15 = vadd.f32 %v2077_v54, %v879_v10 }
 0x154   :  { %v1082_v16 = vmax.f32 %v954_v11, 0.0  ;;  %v1146_v49 = vmax.f32 %v1018_v47, 0.0 }
 0x155   :  { %1562 = vst [vmem:[%s2529_s4 + $0xf0] sm:$0xff] %v1766_v12  ;;  %1594 = vst [vmem:[%s2529_s4 + $0x1f0] sm:$0xff] %v1798_v13  ;;  %v1083_v17 = vmax.f32 %v955_v14, 0.0  ;;  %v1147_v18 = vmax.f32 %v1019_v15, 0.0 }
 0x157   :  { %v1767_v19 = vpack.c.bf16 %v1083_v17, %v1082_v16  ;;  %v1799_v48 = vpack.c.bf16 %v1147_v18, %v1146_v49 }
 0x159   :  { %1563 = vst [vmem:[%s2529_s4 + $0xf8] sm:$0xff] %v1767_v19  ;;  %1595 = vst [vmem:[%s2529_s4 + $0x1f8] sm:$0xff] %v1799_v48 }

// kernel: _lambda_.8
= control target key start
LH: loop header
LB: loop body
LE: loop exit
PB: predicated region body
PF: predicated region fallthrough
CT: control target
= control target key end

     0   :  { %s2037_s0 = inlined_call_operand.vmem [shape: bf16[16,2,8,512], index: 0, kind: input, shape index: {}]   ;;  %s2038_s1 = inlined_call_operand.vmem [shape: bf16[256,512], index: 1, kind: input, shape index: {}]   ;;  %s2039_s2 = inlined_call_operand.vmem [shape: f32[1,512], index: 2, kind: input, shape index: {}]   ;;  %s2040_s3 = inlined_call_operand.vmem [shape: f32[1,512], index: 3, kind: input, shape index: {}]   ;;  %s2041_s4 = inlined_call_operand.vmem [shape: bf16[128,512], index: 4, kind: output, shape index: {}]  }
   0x1   :  { %v1430_v0 = vld [vmem:[%s2038_s1 + $0xe4] ss:$16 sps:$4 sm:$0xff]   ;;  %v1432_v1 = vld [vmem:[%s2038_s1 + $0xec] ss:$16 sps:$4 sm:$0xff]   ;;  %v1434_v2 = vld [vmem:[%s2038_s1 + $0xe0] ss:$16 sps:$4 sm:$0xff]  }
   0x2   :  { %592 = vmatprep.subr.bf16.mxu0 %v1430_v0  ;;  %v1435_v3 = vld [vmem:[%s2038_s1 + $0xe8] ss:$16 sps:$4 sm:$0xff]   ;;  %705 = vmatprep.subr.bf16.mxu1 %v1432_v1  ;;  %v1436_v4 = vld [vmem:[%s2038_s1 + $0xc4] ss:$16 sps:$4 sm:$0xff]   ;;  %v1438_v5 = vld [vmem:[%s2038_s1 + $0xcc] ss:$16 sps:$4 sm:$0xff]  }
   0x3   :  { %593 = vmatpush1.bf16.msra.mxu0 %v1434_v2  ;;  %706 = vmatpush1.bf16.msra.mxu1 %v1435_v3  ;;  %v1440_v6 = vld [vmem:[%s2038_s1 + $0xc0] ss:$16 sps:$4 sm:$0xff]   ;;  %v1441_v7 = vld [vmem:[%s2038_s1 + $0xc8] ss:$16 sps:$4 sm:$0xff]   ;;  %v1442_v8 = vld [vmem:[%s2038_s1 + $0xa4] ss:$16 sps:$4 sm:$0xff]  }
   0x4   :  { %594 = vmatprep.subr.bf16.mxu0 %v1436_v4  ;;  %707 = vmatprep.subr.bf16.mxu1 %v1438_v5  ;;  %v1444_v9 = vld [vmem:[%s2038_s1 + $0xac] ss:$16 sps:$4 sm:$0xff]   ;;  %v1446_v10 = vld [vmem:[%s2038_s1 + $0xa0] ss:$16 sps:$4 sm:$0xff]   ;;  %v1447_v11 = vld [vmem:[%s2038_s1 + $0xa8] ss:$16 sps:$4 sm:$0xff]  }
   0x5   :  { %v1448_v12 = vld [vmem:[%s2038_s1 + $0x84] ss:$16 sps:$4 sm:$0xff]   ;;  %v1450_v13 = vld [vmem:[%s2038_s1 + $0x8c] ss:$16 sps:$4 sm:$0xff]   ;;  %v1452_v14 = vld [vmem:[%s2038_s1 + $0x80] ss:$16 sps:$4 sm:$0xff]  }
   0x6   :  { %v1453_v15 = vld [vmem:[%s2038_s1 + $0x88] ss:$16 sps:$4 sm:$0xff]   ;;  %v1454_v16 = vld [vmem:[%s2038_s1 + $0x64] ss:$16 sps:$4 sm:$0xff]   ;;  %v1456_v17 = vld [vmem:[%s2038_s1 + $0x6c] ss:$16 sps:$4 sm:$0xff]  }
   0x7   :  { %595 = vmatpush1.bf16.msra.mxu0 %v1440_v6  ;;  %708 = vmatpush1.bf16.msra.mxu1 %v1441_v7  ;;  %v1458_v18 = vld [vmem:[%s2038_s1 + $0x60] ss:$16 sps:$4 sm:$0xff]   ;;  %v1459_v19 = vld [vmem:[%s2038_s1 + $0x68] ss:$16 sps:$4 sm:$0xff]   ;;  %v1460_v20 = vld [vmem:[%s2038_s1 + $0x44] ss:$16 sps:$4 sm:$0xff]  }
   0x8   :  { %596 = vmatprep.subr.bf16.mxu0 %v1442_v8  ;;  %709 = vmatprep.subr.bf16.mxu1 %v1444_v9  ;;  %v1462_v21 = vld [vmem:[%s2038_s1 + $0x4c] ss:$16 sps:$4 sm:$0xff]   ;;  %v1464_v22 = vld [vmem:[%s2038_s1 + $0x40] ss:$16 sps:$4 sm:$0xff]   ;;  %v1465_v23 = vld [vmem:[%s2038_s1 + $0x48] ss:$16 sps:$4 sm:$0xff]  }
   0x9   :  { %v1466_v24 = vld [vmem:[%s2038_s1 + $0x24] ss:$16 sps:$4 sm:$0xff]   ;;  %v1468_v25 = vld [vmem:[%s2038_s1 + $0x2c] ss:$16 sps:$4 sm:$0xff]   ;;  %v1470_v26 = vld [vmem:[%s2038_s1 + $0x20] ss:$16 sps:$4 sm:$0xff]  }
   0xa   :  { %v1471_v27 = vld [vmem:[%s2038_s1 + $0x28] ss:$16 sps:$4 sm:$0xff]   ;;  %v1472_v28 = vld [vmem:[%s2038_s1 + $0x4] ss:$16 sps:$4 sm:$0xff]   ;;  %v1474_v29 = vld [vmem:[%s2038_s1 + $0xc] ss:$16 sps:$4 sm:$0xff]  }
   0xb   :  { %597 = vmatpush1.bf16.msra.mxu0 %v1446_v10  ;;  %710 = vmatpush1.bf16.msra.mxu1 %v1447_v11  ;;  %v1476_v30 = vld [vmem:[%s2038_s1] ss:$16 sps:$4 sm:$0xff]   ;;  %v1477_v31 = vld [vmem:[%s2038_s1 + $0x8] ss:$16 sps:$4 sm:$0xff]   ;;  %v1478_v32 = vld [vmem:[%s2038_s1 + $0x1e4] ss:$16 sps:$4 sm:$0xff]  }
   0xc   :  { %598 = vmatprep.subr.bf16.mxu0 %v1448_v12  ;;  %711 = vmatprep.subr.bf16.mxu1 %v1450_v13  ;;  %v1480_v33 = vld [vmem:[%s2038_s1 + $0x1ec] ss:$16 sps:$4 sm:$0xff]   ;;  %v1482_v34 = vld [vmem:[%s2038_s1 + $0x1e0] ss:$16 sps:$4 sm:$0xff]   ;;  %v1483_v35 = vld [vmem:[%s2038_s1 + $0x1e8] ss:$16 sps:$4 sm:$0xff]  }
   0xd   :  { %v1484_v36 = vld [vmem:[%s2038_s1 + $0x1c4] ss:$16 sps:$4 sm:$0xff]   ;;  %v1486_v37 = vld [vmem:[%s2038_s1 + $0x1cc] ss:$16 sps:$4 sm:$0xff]   ;;  %v1488_v38 = vld [vmem:[%s2038_s1 + $0x1c0] ss:$16 sps:$4 sm:$0xff]  }
   0xe   :  { %v1489_v39 = vld [vmem:[%s2038_s1 + $0x1c8] ss:$16 sps:$4 sm:$0xff]   ;;  %v1490_v40 = vld [vmem:[%s2038_s1 + $0x1a4] ss:$16 sps:$4 sm:$0xff]   ;;  %v1492_v41 = vld [vmem:[%s2038_s1 + $0x1ac] ss:$16 sps:$4 sm:$0xff]  }
   0xf   :  { %599 = vmatpush1.bf16.msra.mxu0 %v1452_v14  ;;  %712 = vmatpush1.bf16.msra.mxu1 %v1453_v15  ;;  %v1494_v42 = vld [vmem:[%s2038_s1 + $0x1a0] ss:$16 sps:$4 sm:$0xff]   ;;  %v1495_v43 = vld [vmem:[%s2038_s1 + $0x1a8] ss:$16 sps:$4 sm:$0xff]   ;;  %v1496_v44 = vld [vmem:[%s2038_s1 + $0x184] ss:$16 sps:$4 sm:$0xff]  }
  0x10   :  { %600 = vmatprep.subr.bf16.mxu0 %v1454_v16  ;;  %713 = vmatprep.subr.bf16.mxu1 %v1456_v17  ;;  %v1498_v45 = vld [vmem:[%s2038_s1 + $0x18c] ss:$16 sps:$4 sm:$0xff]   ;;  %v69_v46 = vld [vmem:[%s2037_s0] sm:$0xff]  ;;  %v1501_v49 = vld [vmem:[%s2038_s1 + $0x188] ss:$16 sps:$4 sm:$0xff]  }
  0x11   :  { %v71_v47 = vld [vmem:[%s2037_s0 + $0x20] sm:$0xff]  ;;  %v1504_v52 = vld [vmem:[%s2038_s1 + $0x16c] ss:$16 sps:$4 sm:$0xff]   ;;  %v1507_v54 = vld [vmem:[%s2038_s1 + $0x168] ss:$16 sps:$4 sm:$0xff]  }
  0x12   :  { %v1500_v48 = vld [vmem:[%s2038_s1 + $0x180] ss:$16 sps:$4 sm:$0xff]   ;;  %v1287_v50 = vcombine.high %v69_v46, %v71_v47  ;;  %v1502_v51 = vld [vmem:[%s2038_s1 + $0x164] ss:$16 sps:$4 sm:$0xff]   ;;  %v1510_v56 = vld [vmem:[%s2038_s1 + $0x14c] ss:$16 sps:$4 sm:$0xff]   ;;  %v1286_v5 = vcombine.low %v69_v46, %v71_v47 }
  0x13   :  { %601 = vmatpush1.bf16.msra.mxu0 %v1458_v18  ;;  %714 = vmatpush1.bf16.msra.mxu1 %v1459_v19  ;;  %v1506_v53 = vld [vmem:[%s2038_s1 + $0x160] ss:$16 sps:$4 sm:$0xff]   ;;  %v1508_v55 = vld [vmem:[%s2038_s1 + $0x144] ss:$16 sps:$4 sm:$0xff]   ;;  %v1513_v58 = vld [vmem:[%s2038_s1 + $0x148] ss:$16 sps:$4 sm:$0xff]  }
  0x14   :  { %602 = vmatprep.subr.bf16.mxu0 %v1460_v20  ;;  %715 = vmatprep.subr.bf16.mxu1 %v1462_v21  ;;  %v1512_v57 = vld [vmem:[%s2038_s1 + $0x140] ss:$16 sps:$4 sm:$0xff]   ;;  %v1514_v59 = vld [vmem:[%s2038_s1 + $0x124] ss:$16 sps:$4 sm:$0xff]   ;;  %v1516_v60 = vld [vmem:[%s2038_s1 + $0x12c] ss:$16 sps:$4 sm:$0xff]  }
  0x15   :  { %624 = vmatprep.mubr.bf16.mxu0 %v1287_v50  ;;  %737 = vmatprep.mubr.bf16.mxu1 %v1287_v50  ;;  %v1518_v61 = vld [vmem:[%s2038_s1 + $0x120] ss:$16 sps:$4 sm:$0xff]   ;;  %v1519_v62 = vld [vmem:[%s2038_s1 + $0x128] ss:$16 sps:$4 sm:$0xff]   ;;  %v1520_v63 = vld [vmem:[%s2038_s1 + $0x104] ss:$16 sps:$4 sm:$0xff]  }
  0x16   :  { %v1522_v0 = vld [vmem:[%s2038_s1 + $0x10c] ss:$16 sps:$4 sm:$0xff]   ;;  %v1524_v1 = vld [vmem:[%s2038_s1 + $0x100] ss:$16 sps:$4 sm:$0xff]   ;;  %v1525_v2 = vld [vmem:[%s2038_s1 + $0x108] ss:$16 sps:$4 sm:$0xff]  }
  0x17   :  { %603 = vmatpush1.bf16.msra.mxu0 %v1464_v22  ;;  %716 = vmatpush1.bf16.msra.mxu1 %v1465_v23  ;;  %v73_v3 = vld [vmem:[%s2037_s0 + $0x40] sm:$0xff] }
  0x18   :  { %604 = vmatprep.subr.bf16.mxu0 %v1466_v24  ;;  %717 = vmatprep.subr.bf16.mxu1 %v1468_v25  ;;  %v75_v4 = vld [vmem:[%s2037_s0 + $0x60] sm:$0xff] }
  0x19   :  { %v1289_v6 = vcombine.high %v73_v3, %v75_v4  ;;  %v77_v7 = vld [vmem:[%s2037_s0 + $0x80] sm:$0xff]  ;;  %v1288_v9 = vcombine.low %v73_v3, %v75_v4 }
  0x1a   :  { %v79_v8 = vld [vmem:[%s2037_s0 + $0xa0] sm:$0xff] }
  0x1b   :  { %605 = vmatpush1.bf16.msra.mxu0 %v1470_v26  ;;  %718 = vmatpush1.bf16.msra.mxu1 %v1471_v27  ;;  %v1291_v10 = vcombine.high %v77_v7, %v79_v8  ;;  %v81_v11 = vld [vmem:[%s2037_s0 + $0xc0] sm:$0xff]  ;;  %v1290_v13 = vcombine.low %v77_v7, %v79_v8 }
  0x1c   :  { %606 = vmatprep.subr.bf16.mxu0 %v1472_v28  ;;  %719 = vmatprep.subr.bf16.mxu1 %v1474_v29  ;;  %v83_v12 = vld [vmem:[%s2037_s0 + $0xe0] sm:$0xff] }
  0x1d   :  { %v1293_v14 = vcombine.high %v81_v11, %v83_v12  ;;  %v85_v15 = vld [vmem:[%s2037_s0 + $0x100] sm:$0xff]  ;;  %v1292_v17 = vcombine.low %v81_v11, %v83_v12 }
  0x1e   :  { %v87_v16 = vld [vmem:[%s2037_s0 + $0x120] sm:$0xff] }
  0x1f   :  { %607 = vmatpush1.bf16.msra.mxu0 %v1476_v30  ;;  %720 = vmatpush1.bf16.msra.mxu1 %v1477_v31  ;;  %v1295_v18 = vcombine.high %v85_v15, %v87_v16  ;;  %v89_v19 = vld [vmem:[%s2037_s0 + $0x140] sm:$0xff]  ;;  %v1294_v21 = vcombine.low %v85_v15, %v87_v16 }
  0x20   :  { %608 = vmatprep.subr.bf16.mxu0 %v1478_v32  ;;  %721 = vmatprep.subr.bf16.mxu1 %v1480_v33  ;;  %v91_v20 = vld [vmem:[%s2037_s0 + $0x160] sm:$0xff]  ;;  %v820_v32 = vlaneseq }
  0x21   :  { %v1297_v22 = vcombine.high %v89_v19, %v91_v20  ;;  %v93_v23 = vld [vmem:[%s2037_s0 + $0x180] sm:$0xff]  ;;  %v1296_v25 = vcombine.low %v89_v19, %v91_v20 }
  0x22   :  { %v95_v24 = vld [vmem:[%s2037_s0 + $0x1a0] sm:$0xff]  ;;  %v821_v33 = vshrl.u32 %v820_v32, 7 }
  0x23   :  { %609 = vmatpush2.bf16.msra.mxu0 %v1482_v34  ;;  %722 = vmatpush2.bf16.msra.mxu1 %v1483_v35  ;;  %v1299_v26 = vcombine.high %v93_v23, %v95_v24  ;;  %v97_v27 = vld [vmem:[%s2037_s0 + $0x1c0] sm:$0xff]  ;;  %v1298_v29 = vcombine.low %v93_v23, %v95_v24 }
  0x24   :  { %610 = vmatprep.subr.bf16.mxu0 %v1484_v36  ;;  %723 = vmatprep.subr.bf16.mxu1 %v1486_v37  ;;  %v99_v28 = vld [vmem:[%s2037_s0 + $0x1e0] sm:$0xff]  ;;  %v822_v34 = vsub.s32 0, %v821_v33  ;;  %v830_v35 = vsub.s32 2, %v821_v33  ;;  %v826_v37 = vsub.s32 1, %v821_v33 }
  0x25   :  { %v1301_v30 = vcombine.high %v97_v27, %v99_v28  ;;  %v1300_v31 = vcombine.low %v97_v27, %v99_v28  ;;  %v818_v36 = vld [vmem:[%s2039_s2] sm:$0xf] }
  0x27   :  { %611 = vmatpush2.bf16.msra.mxu0 %v1488_v38  ;;  %724 = vmatpush2.bf16.msra.mxu1 %v1489_v39  ;;  %v834_v38 = vsub.s32 3, %v821_v33  ;;  %v904_v39 = vld [vmem:[%s2040_s3] sm:$0xf] }
  0x28   :  { %612 = vmatprep.subr.bf16.mxu0 %v1490_v40  ;;  %725 = vmatprep.subr.bf16.mxu1 %v1492_v41  ;;  %v1797_v40 = vrot.slane %v818_v36, %v822_v34  ;;  %v1799_v41 = vrot.slane %v818_v36, %v830_v35  ;;  %v1811_v50 = vrot.slane %v904_v39, %v826_v37 }
  0x2b   :  { %613 = vmatpush2.bf16.msra.mxu0 %v1494_v42  ;;  %726 = vmatpush2.bf16.msra.mxu1 %v1495_v43  ;;  %v1801_v42 = vrot.slane %v904_v39, %v822_v34  ;;  %v1803_v43 = vrot.slane %v904_v39, %v830_v35 }
  0x2c   :  { %614 = vmatprep.subr.bf16.mxu0 %v1496_v44  ;;  %727 = vmatprep.subr.bf16.mxu1 %v1498_v45  ;;  %v1805_v44 = vrot.slane %v818_v36, %v826_v37  ;;  %v1807_v45 = vrot.slane %v818_v36, %v834_v38 }
  0x2f   :  { %615 = vmatpush2.bf16.msra.mxu0 %v1500_v48  ;;  %728 = vmatpush2.bf16.msra.mxu1 %v1501_v49 }
  0x30   :  { %616 = vmatprep.subr.bf16.mxu0 %v1502_v51  ;;  %729 = vmatprep.subr.bf16.mxu1 %v1504_v52  ;;  %v1813_v51 = vrot.slane %v904_v39, %v834_v38 }
  0x33   :  { %617 = vmatpush2.bf16.msra.mxu0 %v1506_v53  ;;  %730 = vmatpush2.bf16.msra.mxu1 %v1507_v54 }
  0x34   :  { %618 = vmatprep.subr.bf16.mxu0 %v1508_v55  ;;  %731 = vmatprep.subr.bf16.mxu1 %v1510_v56 }
  0x37   :  { %619 = vmatpush2.bf16.msra.mxu0 %v1512_v57  ;;  %732 = vmatpush2.bf16.msra.mxu1 %v1513_v58 }
  0x38   :  { %620 = vmatprep.subr.bf16.mxu0 %v1514_v59  ;;  %733 = vmatprep.subr.bf16.mxu1 %v1516_v60 }
  0x3b   :  { %621 = vmatpush2.bf16.msra.mxu0 %v1518_v61  ;;  %734 = vmatpush2.bf16.msra.mxu1 %v1519_v62 }
  0x3c   :  { %622 = vmatprep.subr.bf16.mxu0 %v1520_v63  ;;  %735 = vmatprep.subr.bf16.mxu1 %v1522_v0 }
  0x3f   :  { %623 = vmatpush2.bf16.msra.mxu0 %v1524_v1  ;;  %736 = vmatpush2.bf16.msra.mxu1 %v1525_v2 }
  0x42   :  { %625 = vmatmul.mubr.bf16.vlgmr.msra.gmra.mxu0 %v1286_v5  ;;  %738 = vmatmul.mubr.bf16.vlgmr.msra.gmra.mxu1 %v1286_v5 }
  0x43   :  { %634 = vmatprep.mubr.bf16.mxu0 %v1289_v6  ;;  %747 = vmatprep.mubr.bf16.mxu1 %v1289_v6 }
  0x4a   :  { %635 = vmatmul.mubr.bf16.gmra.mxu0 %v1288_v9  ;;  %748 = vmatmul.mubr.bf16.gmra.mxu1 %v1288_v9 }
  0x4b   :  { %644 = vmatprep.mubr.bf16.mxu0 %v1291_v10  ;;  %757 = vmatprep.mubr.bf16.mxu1 %v1291_v10 }
  0x52   :  { %645 = vmatmul.mubr.bf16.gmra.mxu0 %v1290_v13  ;;  %758 = vmatmul.mubr.bf16.gmra.mxu1 %v1290_v13 }
  0x53   :  { %654 = vmatprep.mubr.bf16.mxu0 %v1293_v14  ;;  %767 = vmatprep.mubr.bf16.mxu1 %v1293_v14 }
  0x5a   :  { %655 = vmatmul.mubr.bf16.gmra.mxu0 %v1292_v17  ;;  %768 = vmatmul.mubr.bf16.gmra.mxu1 %v1292_v17 }
  0x5b   :  { %664 = vmatprep.mubr.bf16.mxu0 %v1295_v18  ;;  %777 = vmatprep.mubr.bf16.mxu1 %v1295_v18 }
  0x62   :  { %665 = vmatmul.mubr.bf16.gmra.mxu0 %v1294_v21  ;;  %778 = vmatmul.mubr.bf16.gmra.mxu1 %v1294_v21 }
  0x63   :  { %674 = vmatprep.mubr.bf16.mxu0 %v1297_v22  ;;  %787 = vmatprep.mubr.bf16.mxu1 %v1297_v22 }
  0x6a   :  { %675 = vmatmul.mubr.bf16.gmra.mxu0 %v1296_v25  ;;  %788 = vmatmul.mubr.bf16.gmra.mxu1 %v1296_v25 }
  0x6b   :  { %684 = vmatprep.mubr.bf16.mxu0 %v1299_v26  ;;  %797 = vmatprep.mubr.bf16.mxu1 %v1299_v26 }
  0x72   :  { %685 = vmatmul.mubr.bf16.gmra.mxu0 %v1298_v29  ;;  %798 = vmatmul.mubr.bf16.gmra.mxu1 %v1298_v29 }
  0x73   :  { %694 = vmatprep.mubr.bf16.mxu0 %v1301_v30  ;;  %807 = vmatprep.mubr.bf16.mxu1 %v1301_v30 }
  0x7a   :  { %695 = vmatmul.mubr.bf16.gmra.mxu0 %v1300_v31  ;;  %808 = vmatmul.mubr.bf16.gmra.mxu1 %v1300_v31 }
 0x102   :  { %v626_v46 = vpop.f32.mrf.mxu0  ;;  %v739_v47 = vpop.f32.mrf.mxu1 }
 0x103   :  { %v840_v48 = vmul.f32 %v1797_v40, %v626_v46  ;;  %v842_v49 = vmul.f32 %v1799_v41, %v739_v47 }
 0x104   :  { %v628_v52 = vpop.f32.mrf.mxu0  ;;  %v741_v53 = vpop.f32.mrf.mxu1 }
 0x105   :  { %v926_v54 = vadd.f32 %v1801_v42, %v840_v48  ;;  %v928_v55 = vadd.f32 %v1803_v43, %v842_v49  ;;  %v841_v56 = vmul.f32 %v1805_v44, %v628_v52  ;;  %v843_v57 = vmul.f32 %v1807_v45, %v741_v53 }
 0x106   :  { %v630_v58 = vpop.f32.mrf.mxu0  ;;  %v743_v59 = vpop.f32.mrf.mxu1 }
 0x107   :  { %v927_v60 = vadd.f32 %v1811_v50, %v841_v56  ;;  %v929_v61 = vadd.f32 %v1813_v51, %v843_v57  ;;  %v990_v62 = vmax.f32 %v926_v54, 0.0  ;;  %v992_v63 = vmax.f32 %v928_v55, 0.0 }
 0x108   :  { %v844_v0 = vmul.f32 %v1797_v40, %v630_v58  ;;  %v846_v1 = vmul.f32 %v1799_v41, %v743_v59  ;;  %v632_v2 = vpop.f32.mrf.mxu0  ;;  %v745_v3 = vpop.f32.mrf.mxu1 }
 0x109   :  { %v991_v4 = vmax.f32 %v927_v60, 0.0  ;;  %v993_v5 = vmax.f32 %v929_v61, 0.0  ;;  %v845_v6 = vmul.f32 %v1805_v44, %v632_v2  ;;  %v847_v7 = vmul.f32 %v1807_v45, %v745_v3 }
 0x10a   :  { %v930_v8 = vadd.f32 %v1801_v42, %v844_v0  ;;  %v932_v9 = vadd.f32 %v1803_v43, %v846_v1  ;;  %v636_v10 = vpop.f32.mrf.mxu0  ;;  %v749_v11 = vpop.f32.mrf.mxu1 }
 0x10b   :  { %v1398_v12 = vpack.c.bf16 %v991_v4, %v990_v62  ;;  %v1399_v13 = vpack.c.bf16 %v993_v5, %v992_v63  ;;  %v931_v14 = vadd.f32 %v1811_v50, %v845_v6  ;;  %v933_v15 = vadd.f32 %v1813_v51, %v847_v7 }
 0x10c   :  { %v994_v16 = vmax.f32 %v930_v8, 0.0  ;;  %v996_v17 = vmax.f32 %v932_v9, 0.0  ;;  %v848_v18 = vmul.f32 %v1797_v40, %v636_v10  ;;  %v850_v19 = vmul.f32 %v1799_v41, %v749_v11  ;;  %v638_v20 = vpop.f32.mrf.mxu0  ;;  %v751_v21 = vpop.f32.mrf.mxu1 }
 0x10d   :  { %1246 = vst [vmem:[%s2041_s4] sm:$0xff] %v1398_v12  ;;  %1247 = vst [vmem:[%s2041_s4 + $0x8] sm:$0xff] %v1399_v13  ;;  %v995_v22 = vmax.f32 %v931_v14, 0.0  ;;  %v997_v23 = vmax.f32 %v933_v15, 0.0  ;;  %v849_v24 = vmul.f32 %v1805_v44, %v638_v20  ;;  %v851_v25 = vmul.f32 %v1807_v45, %v751_v21 }
 0x10e   :  { %v934_v26 = vadd.f32 %v1801_v42, %v848_v18  ;;  %v936_v27 = vadd.f32 %v1803_v43, %v850_v19  ;;  %v640_v28 = vpop.f32.mrf.mxu0  ;;  %v753_v29 = vpop.f32.mrf.mxu1 }
 0x10f   :  { %v1400_v30 = vpack.c.bf16 %v995_v22, %v994_v16  ;;  %v1401_v31 = vpack.c.bf16 %v997_v23, %v996_v17  ;;  %v935_v32 = vadd.f32 %v1811_v50, %v849_v24  ;;  %v937_v33 = vadd.f32 %v1813_v51, %v851_v25 }
 0x110   :  { %v998_v34 = vmax.f32 %v934_v26, 0.0  ;;  %v1000_v35 = vmax.f32 %v936_v27, 0.0  ;;  %v852_v36 = vmul.f32 %v1797_v40, %v640_v28  ;;  %v854_v37 = vmul.f32 %v1799_v41, %v753_v29  ;;  %v642_v38 = vpop.f32.mrf.mxu0  ;;  %v755_v39 = vpop.f32.mrf.mxu1 }
 0x111   :  { %1248 = vst [vmem:[%s2041_s4 + $0x10] sm:$0xff] %v1400_v30  ;;  %1249 = vst [vmem:[%s2041_s4 + $0x18] sm:$0xff] %v1401_v31  ;;  %v999_v46 = vmax.f32 %v935_v32, 0.0  ;;  %v1001_v47 = vmax.f32 %v937_v33, 0.0  ;;  %v853_v48 = vmul.f32 %v1805_v44, %v642_v38  ;;  %v855_v49 = vmul.f32 %v1807_v45, %v755_v39 }
 0x112   :  { %v938_v52 = vadd.f32 %v1801_v42, %v852_v36  ;;  %v940_v53 = vadd.f32 %v1803_v43, %v854_v37  ;;  %v646_v54 = vpop.f32.mrf.mxu0  ;;  %v759_v55 = vpop.f32.mrf.mxu1 }
 0x113   :  { %v1402_v56 = vpack.c.bf16 %v999_v46, %v998_v34  ;;  %v1403_v57 = vpack.c.bf16 %v1001_v47, %v1000_v35  ;;  %v939_v58 = vadd.f32 %v1811_v50, %v853_v48  ;;  %v941_v59 = vadd.f32 %v1813_v51, %v855_v49 }
 0x114   :  { %v1002_v60 = vmax.f32 %v938_v52, 0.0  ;;  %v1004_v61 = vmax.f32 %v940_v53, 0.0  ;;  %v856_v62 = vmul.f32 %v1797_v40, %v646_v54  ;;  %v858_v63 = vmul.f32 %v1799_v41, %v759_v55  ;;  %v648_v0 = vpop.f32.mrf.mxu0  ;;  %v761_v1 = vpop.f32.mrf.mxu1 }
 0x115   :  { %1250 = vst [vmem:[%s2041_s4 + $0x20] sm:$0xff] %v1402_v56  ;;  %1251 = vst [vmem:[%s2041_s4 + $0x28] sm:$0xff] %v1403_v57  ;;  %v1003_v2 = vmax.f32 %v939_v58, 0.0  ;;  %v1005_v3 = vmax.f32 %v941_v59, 0.0  ;;  %v857_v4 = vmul.f32 %v1805_v44, %v648_v0  ;;  %v859_v5 = vmul.f32 %v1807_v45, %v761_v1 }
 0x116   :  { %v942_v6 = vadd.f32 %v1801_v42, %v856_v62  ;;  %v944_v7 = vadd.f32 %v1803_v43, %v858_v63  ;;  %v650_v8 = vpop.f32.mrf.mxu0  ;;  %v763_v9 = vpop.f32.mrf.mxu1 }
 0x117   :  { %v1404_v10 = vpack.c.bf16 %v1003_v2, %v1002_v60  ;;  %v1405_v11 = vpack.c.bf16 %v1005_v3, %v1004_v61  ;;  %v943_v12 = vadd.f32 %v1811_v50, %v857_v4  ;;  %v945_v13 = vadd.f32 %v1813_v51, %v859_v5 }
 0x118   :  { %v1006_v14 = vmax.f32 %v942_v6, 0.0  ;;  %v1008_v15 = vmax.f32 %v944_v7, 0.0  ;;  %v860_v16 = vmul.f32 %v1797_v40, %v650_v8  ;;  %v862_v17 = vmul.f32 %v1799_v41, %v763_v9  ;;  %v652_v18 = vpop.f32.mrf.mxu0  ;;  %v765_v19 = vpop.f32.mrf.mxu1 }
 0x119   :  { %1252 = vst [vmem:[%s2041_s4 + $0x30] sm:$0xff] %v1404_v10  ;;  %1253 = vst [vmem:[%s2041_s4 + $0x38] sm:$0xff] %v1405_v11  ;;  %v1007_v20 = vmax.f32 %v943_v12, 0.0  ;;  %v1009_v21 = vmax.f32 %v945_v13, 0.0  ;;  %v861_v22 = vmul.f32 %v1805_v44, %v652_v18  ;;  %v863_v23 = vmul.f32 %v1807_v45, %v765_v19 }
 0x11a   :  { %v946_v24 = vadd.f32 %v1801_v42, %v860_v16  ;;  %v948_v25 = vadd.f32 %v1803_v43, %v862_v17  ;;  %v656_v26 = vpop.f32.mrf.mxu0  ;;  %v769_v27 = vpop.f32.mrf.mxu1 }
 0x11b   :  { %v1406_v28 = vpack.c.bf16 %v1007_v20, %v1006_v14  ;;  %v1407_v29 = vpack.c.bf16 %v1009_v21, %v1008_v15  ;;  %v947_v30 = vadd.f32 %v1811_v50, %v861_v22  ;;  %v949_v31 = vadd.f32 %v1813_v51, %v863_v23 }
 0x11c   :  { %v1010_v32 = vmax.f32 %v946_v24, 0.0  ;;  %v1012_v33 = vmax.f32 %v948_v25, 0.0  ;;  %v864_v34 = vmul.f32 %v1797_v40, %v656_v26  ;;  %v866_v35 = vmul.f32 %v1799_v41, %v769_v27  ;;  %v658_v36 = vpop.f32.mrf.mxu0  ;;  %v771_v37 = vpop.f32.mrf.mxu1 }
 0x11d   :  { %1254 = vst [vmem:[%s2041_s4 + $0x40] sm:$0xff] %v1406_v28  ;;  %1255 = vst [vmem:[%s2041_s4 + $0x48] sm:$0xff] %v1407_v29  ;;  %v1011_v38 = vmax.f32 %v947_v30, 0.0  ;;  %v1013_v39 = vmax.f32 %v949_v31, 0.0  ;;  %v865_v46 = vmul.f32 %v1805_v44, %v658_v36  ;;  %v867_v47 = vmul.f32 %v1807_v45, %v771_v37 }
 0x11e   :  { %v950_v48 = vadd.f32 %v1801_v42, %v864_v34  ;;  %v952_v49 = vadd.f32 %v1803_v43, %v866_v35  ;;  %v660_v52 = vpop.f32.mrf.mxu0  ;;  %v773_v53 = vpop.f32.mrf.mxu1 }
 0x11f   :  { %v1408_v54 = vpack.c.bf16 %v1011_v38, %v1010_v32  ;;  %v1409_v55 = vpack.c.bf16 %v1013_v39, %v1012_v33  ;;  %v951_v56 = vadd.f32 %v1811_v50, %v865_v46  ;;  %v953_v57 = vadd.f32 %v1813_v51, %v867_v47 }
 0x120   :  { %v1014_v58 = vmax.f32 %v950_v48, 0.0  ;;  %v1016_v59 = vmax.f32 %v952_v49, 0.0  ;;  %v868_v60 = vmul.f32 %v1797_v40, %v660_v52  ;;  %v870_v61 = vmul.f32 %v1799_v41, %v773_v53  ;;  %v662_v62 = vpop.f32.mrf.mxu0  ;;  %v775_v63 = vpop.f32.mrf.mxu1 }
 0x121   :  { %1256 = vst [vmem:[%s2041_s4 + $0x50] sm:$0xff] %v1408_v54  ;;  %1257 = vst [vmem:[%s2041_s4 + $0x58] sm:$0xff] %v1409_v55  ;;  %v1015_v0 = vmax.f32 %v951_v56, 0.0  ;;  %v1017_v1 = vmax.f32 %v953_v57, 0.0  ;;  %v869_v2 = vmul.f32 %v1805_v44, %v662_v62  ;;  %v871_v3 = vmul.f32 %v1807_v45, %v775_v63 }
 0x122   :  { %v954_v4 = vadd.f32 %v1801_v42, %v868_v60  ;;  %v956_v5 = vadd.f32 %v1803_v43, %v870_v61  ;;  %v666_v6 = vpop.f32.mrf.mxu0  ;;  %v779_v7 = vpop.f32.mrf.mxu1 }
 0x123   :  { %v1410_v8 = vpack.c.bf16 %v1015_v0, %v1014_v58  ;;  %v1411_v9 = vpack.c.bf16 %v1017_v1, %v1016_v59  ;;  %v955_v10 = vadd.f32 %v1811_v50, %v869_v2  ;;  %v957_v11 = vadd.f32 %v1813_v51, %v871_v3 }
 0x124   :  { %v1018_v12 = vmax.f32 %v954_v4, 0.0  ;;  %v1020_v13 = vmax.f32 %v956_v5, 0.0  ;;  %v872_v14 = vmul.f32 %v1797_v40, %v666_v6  ;;  %v874_v15 = vmul.f32 %v1799_v41, %v779_v7  ;;  %v668_v16 = vpop.f32.mrf.mxu0  ;;  %v781_v17 = vpop.f32.mrf.mxu1 }
 0x125   :  { %1258 = vst [vmem:[%s2041_s4 + $0x60] sm:$0xff] %v1410_v8  ;;  %1259 = vst [vmem:[%s2041_s4 + $0x68] sm:$0xff] %v1411_v9  ;;  %v1019_v18 = vmax.f32 %v955_v10, 0.0  ;;  %v1021_v19 = vmax.f32 %v957_v11, 0.0  ;;  %v873_v20 = vmul.f32 %v1805_v44, %v668_v16  ;;  %v875_v21 = vmul.f32 %v1807_v45, %v781_v17 }
 0x126   :  { %v958_v22 = vadd.f32 %v1801_v42, %v872_v14  ;;  %v960_v23 = vadd.f32 %v1803_v43, %v874_v15  ;;  %v670_v24 = vpop.f32.mrf.mxu0  ;;  %v783_v25 = vpop.f32.mrf.mxu1 }
 0x127   :  { %v1412_v26 = vpack.c.bf16 %v1019_v18, %v1018_v12  ;;  %v1413_v27 = vpack.c.bf16 %v1021_v19, %v1020_v13  ;;  %v959_v28 = vadd.f32 %v1811_v50, %v873_v20  ;;  %v961_v29 = vadd.f32 %v1813_v51, %v875_v21 }
 0x128   :  { %v1022_v30 = vmax.f32 %v958_v22, 0.0  ;;  %v1024_v31 = vmax.f32 %v960_v23, 0.0  ;;  %v876_v32 = vmul.f32 %v1797_v40, %v670_v24  ;;  %v878_v33 = vmul.f32 %v1799_v41, %v783_v25  ;;  %v672_v34 = vpop.f32.mrf.mxu0  ;;  %v785_v35 = vpop.f32.mrf.mxu1 }
 0x129   :  { %1260 = vst [vmem:[%s2041_s4 + $0x70] sm:$0xff] %v1412_v26  ;;  %1261 = vst [vmem:[%s2041_s4 + $0x78] sm:$0xff] %v1413_v27  ;;  %v1023_v36 = vmax.f32 %v959_v28, 0.0  ;;  %v1025_v37 = vmax.f32 %v961_v29, 0.0  ;;  %v877_v38 = vmul.f32 %v1805_v44, %v672_v34  ;;  %v879_v39 = vmul.f32 %v1807_v45, %v785_v35 }
 0x12a   :  { %v962_v46 = vadd.f32 %v1801_v42, %v876_v32  ;;  %v964_v47 = vadd.f32 %v1803_v43, %v878_v33  ;;  %v676_v48 = vpop.f32.mrf.mxu0  ;;  %v789_v49 = vpop.f32.mrf.mxu1 }
 0x12b   :  { %v1414_v52 = vpack.c.bf16 %v1023_v36, %v1022_v30  ;;  %v1415_v53 = vpack.c.bf16 %v1025_v37, %v1024_v31  ;;  %v963_v54 = vadd.f32 %v1811_v50, %v877_v38  ;;  %v965_v55 = vadd.f32 %v1813_v51, %v879_v39 }
 0x12c   :  { %v1026_v56 = vmax.f32 %v962_v46, 0.0  ;;  %v1028_v57 = vmax.f32 %v964_v47, 0.0  ;;  %v880_v58 = vmul.f32 %v1797_v40, %v676_v48  ;;  %v882_v59 = vmul.f32 %v1799_v41, %v789_v49  ;;  %v678_v60 = vpop.f32.mrf.mxu0  ;;  %v791_v61 = vpop.f32.mrf.mxu1 }
 0x12d   :  { %1262 = vst [vmem:[%s2041_s4 + $0x80] sm:$0xff] %v1414_v52  ;;  %1263 = vst [vmem:[%s2041_s4 + $0x88] sm:$0xff] %v1415_v53  ;;  %v1027_v62 = vmax.f32 %v963_v54, 0.0  ;;  %v1029_v63 = vmax.f32 %v965_v55, 0.0  ;;  %v881_v0 = vmul.f32 %v1805_v44, %v678_v60  ;;  %v883_v1 = vmul.f32 %v1807_v45, %v791_v61 }
 0x12e   :  { %v966_v2 = vadd.f32 %v1801_v42, %v880_v58  ;;  %v968_v3 = vadd.f32 %v1803_v43, %v882_v59  ;;  %v680_v4 = vpop.f32.mrf.mxu0  ;;  %v793_v5 = vpop.f32.mrf.mxu1 }
 0x12f   :  { %v1416_v6 = vpack.c.bf16 %v1027_v62, %v1026_v56  ;;  %v1417_v7 = vpack.c.bf16 %v1029_v63, %v1028_v57  ;;  %v967_v8 = vadd.f32 %v1811_v50, %v881_v0  ;;  %v969_v9 = vadd.f32 %v1813_v51, %v883_v1 }
 0x130   :  { %v1030_v10 = vmax.f32 %v966_v2, 0.0  ;;  %v1032_v11 = vmax.f32 %v968_v3, 0.0  ;;  %v884_v12 = vmul.f32 %v1797_v40, %v680_v4  ;;  %v886_v13 = vmul.f32 %v1799_v41, %v793_v5  ;;  %v682_v14 = vpop.f32.mrf.mxu0  ;;  %v795_v15 = vpop.f32.mrf.mxu1 }
 0x131   :  { %1264 = vst [vmem:[%s2041_s4 + $0x90] sm:$0xff] %v1416_v6  ;;  %1265 = vst [vmem:[%s2041_s4 + $0x98] sm:$0xff] %v1417_v7  ;;  %v1031_v16 = vmax.f32 %v967_v8, 0.0  ;;  %v1033_v17 = vmax.f32 %v969_v9, 0.0  ;;  %v885_v18 = vmul.f32 %v1805_v44, %v682_v14  ;;  %v887_v19 = vmul.f32 %v1807_v45, %v795_v15 }
 0x132   :  { %v970_v20 = vadd.f32 %v1801_v42, %v884_v12  ;;  %v972_v21 = vadd.f32 %v1803_v43, %v886_v13  ;;  %v686_v22 = vpop.f32.mrf.mxu0  ;;  %v799_v23 = vpop.f32.mrf.mxu1 }
 0x133   :  { %v1418_v24 = vpack.c.bf16 %v1031_v16, %v1030_v10  ;;  %v1419_v25 = vpack.c.bf16 %v1033_v17, %v1032_v11  ;;  %v971_v26 = vadd.f32 %v1811_v50, %v885_v18  ;;  %v973_v27 = vadd.f32 %v1813_v51, %v887_v19 }
 0x134   :  { %v1034_v28 = vmax.f32 %v970_v20, 0.0  ;;  %v1036_v29 = vmax.f32 %v972_v21, 0.0  ;;  %v888_v30 = vmul.f32 %v1797_v40, %v686_v22  ;;  %v890_v31 = vmul.f32 %v1799_v41, %v799_v23  ;;  %v688_v32 = vpop.f32.mrf.mxu0  ;;  %v801_v33 = vpop.f32.mrf.mxu1 }
 0x135   :  { %1266 = vst [vmem:[%s2041_s4 + $0xa0] sm:$0xff] %v1418_v24  ;;  %1267 = vst [vmem:[%s2041_s4 + $0xa8] sm:$0xff] %v1419_v25  ;;  %v1035_v34 = vmax.f32 %v971_v26, 0.0  ;;  %v1037_v35 = vmax.f32 %v973_v27, 0.0  ;;  %v889_v36 = vmul.f32 %v1805_v44, %v688_v32  ;;  %v891_v37 = vmul.f32 %v1807_v45, %v801_v33 }
 0x136   :  { %v974_v38 = vadd.f32 %v1801_v42, %v888_v30  ;;  %v976_v39 = vadd.f32 %v1803_v43, %v890_v31  ;;  %v690_v46 = vpop.f32.mrf.mxu0  ;;  %v803_v47 = vpop.f32.mrf.mxu1 }
 0x137   :  { %v1420_v48 = vpack.c.bf16 %v1035_v34, %v1034_v28  ;;  %v1421_v49 = vpack.c.bf16 %v1037_v35, %v1036_v29  ;;  %v975_v52 = vadd.f32 %v1811_v50, %v889_v36  ;;  %v977_v53 = vadd.f32 %v1813_v51, %v891_v37 }
 0x138   :  { %v1038_v54 = vmax.f32 %v974_v38, 0.0  ;;  %v1040_v55 = vmax.f32 %v976_v39, 0.0  ;;  %v892_v56 = vmul.f32 %v1797_v40, %v690_v46  ;;  %v894_v57 = vmul.f32 %v1799_v41, %v803_v47  ;;  %v692_v58 = vpop.f32.mrf.mxu0  ;;  %v805_v59 = vpop.f32.mrf.mxu1 }
 0x139   :  { %1268 = vst [vmem:[%s2041_s4 + $0xb0] sm:$0xff] %v1420_v48  ;;  %1269 = vst [vmem:[%s2041_s4 + $0xb8] sm:$0xff] %v1421_v49  ;;  %v1039_v60 = vmax.f32 %v975_v52, 0.0  ;;  %v1041_v61 = vmax.f32 %v977_v53, 0.0  ;;  %v893_v62 = vmul.f32 %v1805_v44, %v692_v58  ;;  %v895_v63 = vmul.f32 %v1807_v45, %v805_v59 }
 0x13a   :  { %v978_v0 = vadd.f32 %v1801_v42, %v892_v56  ;;  %v980_v1 = vadd.f32 %v1803_v43, %v894_v57  ;;  %v696_v2 = vpop.f32.mrf.mxu0  ;;  %v809_v3 = vpop.f32.mrf.mxu1 }
 0x13b   :  { %v1422_v4 = vpack.c.bf16 %v1039_v60, %v1038_v54  ;;  %v1423_v5 = vpack.c.bf16 %v1041_v61, %v1040_v55  ;;  %v979_v6 = vadd.f32 %v1811_v50, %v893_v62  ;;  %v981_v7 = vadd.f32 %v1813_v51, %v895_v63 }
 0x13c   :  { %v1042_v8 = vmax.f32 %v978_v0, 0.0  ;;  %v1044_v9 = vmax.f32 %v980_v1, 0.0  ;;  %v896_v10 = vmul.f32 %v1797_v40, %v696_v2  ;;  %v898_v11 = vmul.f32 %v1799_v41, %v809_v3  ;;  %v698_v12 = vpop.f32.mrf.mxu0  ;;  %v811_v13 = vpop.f32.mrf.mxu1 }
 0x13d   :  { %1270 = vst [vmem:[%s2041_s4 + $0xc0] sm:$0xff] %v1422_v4  ;;  %1271 = vst [vmem:[%s2041_s4 + $0xc8] sm:$0xff] %v1423_v5  ;;  %v1043_v14 = vmax.f32 %v979_v6, 0.0  ;;  %v1045_v15 = vmax.f32 %v981_v7, 0.0  ;;  %v897_v16 = vmul.f32 %v1805_v44, %v698_v12  ;;  %v899_v17 = vmul.f32 %v1807_v45, %v811_v13 }
 0x13e   :  { %v982_v18 = vadd.f32 %v1801_v42, %v896_v10  ;;  %v984_v19 = vadd.f32 %v1803_v43, %v898_v11  ;;  %v700_v20 = vpop.f32.mrf.mxu0  ;;  %v813_v21 = vpop.f32.mrf.mxu1 }
 0x13f   :  { %v1424_v22 = vpack.c.bf16 %v1043_v14, %v1042_v8  ;;  %v1425_v23 = vpack.c.bf16 %v1045_v15, %v1044_v9  ;;  %v983_v24 = vadd.f32 %v1811_v50, %v897_v16  ;;  %v985_v25 = vadd.f32 %v1813_v51, %v899_v17 }
 0x140   :  { %v1046_v26 = vmax.f32 %v982_v18, 0.0  ;;  %v1048_v27 = vmax.f32 %v984_v19, 0.0  ;;  %v900_v28 = vmul.f32 %v1797_v40, %v700_v20  ;;  %v902_v29 = vmul.f32 %v1799_v41, %v813_v21  ;;  %v702_v30 = vpop.f32.mrf.mxu0  ;;  %v815_v31 = vpop.f32.mrf.mxu1 }
 0x141   :  { %1272 = vst [vmem:[%s2041_s4 + $0xd0] sm:$0xff] %v1424_v22  ;;  %1273 = vst [vmem:[%s2041_s4 + $0xd8] sm:$0xff] %v1425_v23  ;;  %v1047_v32 = vmax.f32 %v983_v24, 0.0  ;;  %v1049_v33 = vmax.f32 %v985_v25, 0.0  ;;  %v901_v34 = vmul.f32 %v1805_v44, %v702_v30  ;;  %v903_v35 = vmul.f32 %v1807_v45, %v815_v31 }
 0x142   :  { %v986_v40 = vadd.f32 %v1801_v42, %v900_v28  ;;  %v988_v41 = vadd.f32 %v1803_v43, %v902_v29 }
 0x143   :  { %v1426_v36 = vpack.c.bf16 %v1047_v32, %v1046_v26  ;;  %v1427_v37 = vpack.c.bf16 %v1049_v33, %v1048_v27  ;;  %v987_v38 = vadd.f32 %v1811_v50, %v901_v34  ;;  %v989_v39 = vadd.f32 %v1813_v51, %v903_v35 }
 0x144   :  { %v1050_v44 = vmax.f32 %v986_v40, 0.0  ;;  %v1052_v45 = vmax.f32 %v988_v41, 0.0 }
 0x145   :  { %1274 = vst [vmem:[%s2041_s4 + $0xe0] sm:$0xff] %v1426_v36  ;;  %1275 = vst [vmem:[%s2041_s4 + $0xe8] sm:$0xff] %v1427_v37  ;;  %v1051_v46 = vmax.f32 %v987_v38, 0.0  ;;  %v1053_v42 = vmax.f32 %v989_v39, 0.0 }
 0x147   :  { %v1428_v47 = vpack.c.bf16 %v1051_v46, %v1050_v44  ;;  %v1429_v43 = vpack.c.bf16 %v1053_v42, %v1052_v45 }
 0x149   :  { %1276 = vst [vmem:[%s2041_s4 + $0xf0] sm:$0xff] %v1428_v47  ;;  %1277 = vst [vmem:[%s2041_s4 + $0xf8] sm:$0xff] %v1429_v43 }

// kernel: _lambda_.9
= control target key start
LH: loop header
LB: loop body
LE: loop exit
PB: predicated region body
PF: predicated region fallthrough
CT: control target
= control target key end

     0   :  { %s2348_s15 = smov 0   ;;  %s2350_s16 = smov 0   ;;  %s2919_s0 = inlined_call_operand.vmem [shape: bf16[32,512], index: 0, kind: input, shape index: {}]   ;;  %s2920_s1 = inlined_call_operand.vmem [shape: bf16[512,1024], index: 1, kind: input, shape index: {}]   ;;  %s2921_s2 = inlined_call_operand.vmem [shape: f32[1,1024], index: 2, kind: input, shape index: {}]   ;;  %s2922_s3 = inlined_call_operand.vmem [shape: f32[1,1024], index: 3, kind: input, shape index: {}]   ;;  %s2923_s4 = inlined_call_operand.vmem [shape: bf16[32,1024], index: 4, kind: output, shape index: {}]  }
   0x1   :  { %s2352_s17 = smov 0   ;;  %s2354_s18 = smov 0  }
   0x2   :  { %s2356_s19 = smov 0  }
   0x3 LB: > { %s23_s20 = sadd.s32 1, %s2317_s18  ;;  %s1867_s21 = sadd.s32 4294967295, %s2321_s19   ;;  %s2321_s19 = sphi %s2356_s19, %s14_s19   ;;  %s2317_s18 = sphi %s2354_s18, %s2928_s18   ;;  %s2313_s17 = sphi %s2352_s17, %s2927_s17   ;;  %s2309_s16 = sphi %s2350_s16, %s2926_s16   ;;  %s2305_s15 = sphi %s2348_s15, %s2925_s15  }
   0x4   : > { %p24_p0 = scmp.ge.s32.totalorder %s23_s20, 2  ;;  %p66_p1 = scmp.ne.s32.totalorder %s2309_s16, %s2305_s15 }
   0x5   : > { %p67_p2 = scmp.eq.s32.totalorder %s2321_s19, 0  ;;  %p150_p4 = scmp.eq.s32.totalorder %s1867_s21, 1 }
   0x6   : > { %s2930_s20 = smov (%p24_p0, %s23_s20), 0  ;;  %s59_s23 = sadd.s32 1, %s2309_s16 }
   0x7   : > { %p68_p3 = por %p67_p2, %p66_p1  ;;  %s56_s22 = ssub.s32 %s2317_s18, %s2930_s20 }
   0x8   : > { %p57_p5 = scmp.eq.s32.totalorder %s56_s22, 0  ;;  %p2383_p6 = por %p150_p4, %p66_p1 }
   0x9   : > { %p1871_p7 = scmp.ge.s32.totalorder %s2321_s19, 2 }
   0xa   : > { %s2388_s25 = scalar_select %p57_p5, %s2309_s16, %s59_s23  }
   0xb   : > { %182 = sbr.rel (%p1871_p7) target bundleno = 84 (0x54), region = 20 }
  0x10   : > { %185 = sbr.rel (!%p68_p3) target bundleno = 84 (0x54), region = 24  ;;  %s187_s26 = sand.u32 (%p68_p3), 1, %s2309_s16  }
  0x11   : > { %s2029_s27 = sshll.u32 (%p68_p3), %s2317_s18, 4  ;;  %s1872_s28 = sshll.u32 (%p68_p3), %s187_s26, 10 }
  0x12   : > { %s2396_s5 = scalar_lea.vmem (%p68_p3), %s2920_s1, %s2029_s27  ;;  %s2401_s6 = scalar_lea.vmem (%p68_p3), [#allocation2], %s1872_s28 }
  0x13   : > { %v205_v0 = vld [vmem:[%s2396_s5] sm:$0xff] (%p68_p3)  ;;  %v207_v1 = vld [vmem:[%s2396_s5 + $0x8] sm:$0xff] (%p68_p3) }
  0x14   : > { %v209_v2 = vld [vmem:[%s2396_s5 + $0x20] sm:$0xff] (%p68_p3)  ;;  %206 = vst [vmem:[%s2401_s6] sm:$0xff] (%p68_p3), %v205_v0  ;;  %208 = vst [vmem:[%s2401_s6 + $0x8] sm:$0xff] (%p68_p3), %v207_v1  ;;  %v211_v3 = vld [vmem:[%s2396_s5 + $0x28] sm:$0xff] (%p68_p3) }
  0x15   : > { %210 = vst [vmem:[%s2401_s6 + $0x10] sm:$0xff] %v209_v2  ;;  %v213_v4 = vld [vmem:[%s2396_s5 + $0x40] sm:$0xff]  ;;  %v215_v5 = vld [vmem:[%s2396_s5 + $0x48] sm:$0xff]  ;;  %212 = vst [vmem:[%s2401_s6 + $0x18] sm:$0xff] %v211_v3 }
  0x16   : > { %214 = vst [vmem:[%s2401_s6 + $0x20] sm:$0xff] %v213_v4  ;;  %216 = vst [vmem:[%s2401_s6 + $0x28] sm:$0xff] %v215_v5  ;;  %v217_v6 = vld [vmem:[%s2396_s5 + $0x60] sm:$0xff]  ;;  %v219_v7 = vld [vmem:[%s2396_s5 + $0x68] sm:$0xff] }
  0x17   : > { %v221_v8 = vld [vmem:[%s2396_s5 + $0x80] sm:$0xff]  ;;  %218 = vst [vmem:[%s2401_s6 + $0x30] sm:$0xff] %v217_v6  ;;  %220 = vst [vmem:[%s2401_s6 + $0x38] sm:$0xff] %v219_v7  ;;  %v223_v9 = vld [vmem:[%s2396_s5 + $0x88] sm:$0xff] }
  0x18   : > { %222 = vst [vmem:[%s2401_s6 + $0x40] sm:$0xff] %v221_v8  ;;  %v225_v10 = vld [vmem:[%s2396_s5 + $0xa0] sm:$0xff]  ;;  %v227_v11 = vld [vmem:[%s2396_s5 + $0xa8] sm:$0xff]  ;;  %224 = vst [vmem:[%s2401_s6 + $0x48] sm:$0xff] %v223_v9 }
  0x19   : > { %226 = vst [vmem:[%s2401_s6 + $0x50] sm:$0xff] %v225_v10  ;;  %228 = vst [vmem:[%s2401_s6 + $0x58] sm:$0xff] %v227_v11  ;;  %v229_v12 = vld [vmem:[%s2396_s5 + $0xc0] sm:$0xff]  ;;  %v231_v13 = vld [vmem:[%s2396_s5 + $0xc8] sm:$0xff] }
  0x1a   : > { %v233_v14 = vld [vmem:[%s2396_s5 + $0xe0] sm:$0xff]  ;;  %230 = vst [vmem:[%s2401_s6 + $0x60] sm:$0xff] %v229_v12  ;;  %232 = vst [vmem:[%s2401_s6 + $0x68] sm:$0xff] %v231_v13  ;;  %v235_v15 = vld [vmem:[%s2396_s5 + $0xe8] sm:$0xff] }
  0x1b   : > { %234 = vst [vmem:[%s2401_s6 + $0x70] sm:$0xff] %v233_v14  ;;  %v237_v16 = vld [vmem:[%s2396_s5 + $0x100] sm:$0xff]  ;;  %v239_v17 = vld [vmem:[%s2396_s5 + $0x108] sm:$0xff]  ;;  %236 = vst [vmem:[%s2401_s6 + $0x78] sm:$0xff] %v235_v15 }
  0x1c   : > { %238 = vst [vmem:[%s2401_s6 + $0x80] sm:$0xff] %v237_v16  ;;  %240 = vst [vmem:[%s2401_s6 + $0x88] sm:$0xff] %v239_v17  ;;  %v241_v18 = vld [vmem:[%s2396_s5 + $0x120] sm:$0xff]  ;;  %v243_v19 = vld [vmem:[%s2396_s5 + $0x128] sm:$0xff] }
  0x1d   : > { %v245_v20 = vld [vmem:[%s2396_s5 + $0x140] sm:$0xff]  ;;  %242 = vst [vmem:[%s2401_s6 + $0x90] sm:$0xff] %v241_v18  ;;  %244 = vst [vmem:[%s2401_s6 + $0x98] sm:$0xff] %v243_v19  ;;  %v247_v21 = vld [vmem:[%s2396_s5 + $0x148] sm:$0xff] }
  0x1e   : > { %246 = vst [vmem:[%s2401_s6 + $0xa0] sm:$0xff] %v245_v20  ;;  %v249_v22 = vld [vmem:[%s2396_s5 + $0x160] sm:$0xff]  ;;  %v251_v23 = vld [vmem:[%s2396_s5 + $0x168] sm:$0xff]  ;;  %248 = vst [vmem:[%s2401_s6 + $0xa8] sm:$0xff] %v247_v21 }
  0x1f   : > { %250 = vst [vmem:[%s2401_s6 + $0xb0] sm:$0xff] %v249_v22  ;;  %252 = vst [vmem:[%s2401_s6 + $0xb8] sm:$0xff] %v251_v23  ;;  %v253_v24 = vld [vmem:[%s2396_s5 + $0x180] sm:$0xff]  ;;  %v255_v25 = vld [vmem:[%s2396_s5 + $0x188] sm:$0xff] }
  0x20   : > { %v257_v26 = vld [vmem:[%s2396_s5 + $0x1a0] sm:$0xff]  ;;  %254 = vst [vmem:[%s2401_s6 + $0xc0] sm:$0xff] %v253_v24  ;;  %256 = vst [vmem:[%s2401_s6 + $0xc8] sm:$0xff] %v255_v25  ;;  %v259_v27 = vld [vmem:[%s2396_s5 + $0x1a8] sm:$0xff] }
  0x21   : > { %258 = vst [vmem:[%s2401_s6 + $0xd0] sm:$0xff] %v257_v26  ;;  %v261_v28 = vld [vmem:[%s2396_s5 + $0x1c0] sm:$0xff]  ;;  %v263_v29 = vld [vmem:[%s2396_s5 + $0x1c8] sm:$0xff]  ;;  %260 = vst [vmem:[%s2401_s6 + $0xd8] sm:$0xff] %v259_v27 }
  0x22   : > { %262 = vst [vmem:[%s2401_s6 + $0xe0] sm:$0xff] %v261_v28  ;;  %264 = vst [vmem:[%s2401_s6 + $0xe8] sm:$0xff] %v263_v29  ;;  %v265_v30 = vld [vmem:[%s2396_s5 + $0x1e0] sm:$0xff]  ;;  %v267_v31 = vld [vmem:[%s2396_s5 + $0x1e8] sm:$0xff] }
  0x23   : > { %v269_v32 = vld [vmem:[%s2396_s5 + $0x200] sm:$0xff]  ;;  %266 = vst [vmem:[%s2401_s6 + $0xf0] sm:$0xff] %v265_v30  ;;  %268 = vst [vmem:[%s2401_s6 + $0xf8] sm:$0xff] %v267_v31  ;;  %v271_v33 = vld [vmem:[%s2396_s5 + $0x208] sm:$0xff] }
  0x24   : > { %270 = vst [vmem:[%s2401_s6 + $0x100] sm:$0xff] %v269_v32  ;;  %v273_v34 = vld [vmem:[%s2396_s5 + $0x220] sm:$0xff]  ;;  %v275_v35 = vld [vmem:[%s2396_s5 + $0x228] sm:$0xff]  ;;  %272 = vst [vmem:[%s2401_s6 + $0x108] sm:$0xff] %v271_v33 }
  0x25   : > { %274 = vst [vmem:[%s2401_s6 + $0x110] sm:$0xff] %v273_v34  ;;  %276 = vst [vmem:[%s2401_s6 + $0x118] sm:$0xff] %v275_v35  ;;  %v277_v36 = vld [vmem:[%s2396_s5 + $0x240] sm:$0xff]  ;;  %v279_v37 = vld [vmem:[%s2396_s5 + $0x248] sm:$0xff] }
  0x26   : > { %v281_v38 = vld [vmem:[%s2396_s5 + $0x260] sm:$0xff]  ;;  %278 = vst [vmem:[%s2401_s6 + $0x120] sm:$0xff] %v277_v36  ;;  %280 = vst [vmem:[%s2401_s6 + $0x128] sm:$0xff] %v279_v37  ;;  %v283_v39 = vld [vmem:[%s2396_s5 + $0x268] sm:$0xff] }
  0x27   : > { %282 = vst [vmem:[%s2401_s6 + $0x130] sm:$0xff] %v281_v38  ;;  %v285_v40 = vld [vmem:[%s2396_s5 + $0x280] sm:$0xff]  ;;  %v287_v41 = vld [vmem:[%s2396_s5 + $0x288] sm:$0xff]  ;;  %284 = vst [vmem:[%s2401_s6 + $0x138] sm:$0xff] %v283_v39 }
  0x28   : > { %286 = vst [vmem:[%s2401_s6 + $0x140] sm:$0xff] %v285_v40  ;;  %288 = vst [vmem:[%s2401_s6 + $0x148] sm:$0xff] %v287_v41  ;;  %v289_v42 = vld [vmem:[%s2396_s5 + $0x2a0] sm:$0xff]  ;;  %v291_v43 = vld [vmem:[%s2396_s5 + $0x2a8] sm:$0xff] }
  0x29   : > { %v293_v44 = vld [vmem:[%s2396_s5 + $0x2c0] sm:$0xff]  ;;  %290 = vst [vmem:[%s2401_s6 + $0x150] sm:$0xff] %v289_v42  ;;  %292 = vst [vmem:[%s2401_s6 + $0x158] sm:$0xff] %v291_v43  ;;  %v295_v45 = vld [vmem:[%s2396_s5 + $0x2c8] sm:$0xff] }
  0x2a   : > { %294 = vst [vmem:[%s2401_s6 + $0x160] sm:$0xff] %v293_v44  ;;  %v297_v46 = vld [vmem:[%s2396_s5 + $0x2e0] sm:$0xff]  ;;  %v299_v47 = vld [vmem:[%s2396_s5 + $0x2e8] sm:$0xff]  ;;  %296 = vst [vmem:[%s2401_s6 + $0x168] sm:$0xff] %v295_v45 }
  0x2b   : > { %298 = vst [vmem:[%s2401_s6 + $0x170] sm:$0xff] %v297_v46  ;;  %300 = vst [vmem:[%s2401_s6 + $0x178] sm:$0xff] %v299_v47  ;;  %v301_v48 = vld [vmem:[%s2396_s5 + $0x300] sm:$0xff]  ;;  %v303_v49 = vld [vmem:[%s2396_s5 + $0x308] sm:$0xff] }
  0x2c   : > { %v305_v50 = vld [vmem:[%s2396_s5 + $0x320] sm:$0xff]  ;;  %302 = vst [vmem:[%s2401_s6 + $0x180] sm:$0xff] %v301_v48  ;;  %304 = vst [vmem:[%s2401_s6 + $0x188] sm:$0xff] %v303_v49  ;;  %v307_v51 = vld [vmem:[%s2396_s5 + $0x328] sm:$0xff] }
  0x2d   : > { %306 = vst [vmem:[%s2401_s6 + $0x190] sm:$0xff] %v305_v50  ;;  %v309_v52 = vld [vmem:[%s2396_s5 + $0x340] sm:$0xff]  ;;  %v311_v53 = vld [vmem:[%s2396_s5 + $0x348] sm:$0xff]  ;;  %308 = vst [vmem:[%s2401_s6 + $0x198] sm:$0xff] %v307_v51 }
  0x2e   : > { %310 = vst [vmem:[%s2401_s6 + $0x1a0] sm:$0xff] %v309_v52  ;;  %312 = vst [vmem:[%s2401_s6 + $0x1a8] sm:$0xff] %v311_v53  ;;  %v313_v54 = vld [vmem:[%s2396_s5 + $0x360] sm:$0xff]  ;;  %v315_v55 = vld [vmem:[%s2396_s5 + $0x368] sm:$0xff] }
  0x2f   : > { %v317_v56 = vld [vmem:[%s2396_s5 + $0x380] sm:$0xff]  ;;  %314 = vst [vmem:[%s2401_s6 + $0x1b0] sm:$0xff] %v313_v54  ;;  %316 = vst [vmem:[%s2401_s6 + $0x1b8] sm:$0xff] %v315_v55  ;;  %v319_v57 = vld [vmem:[%s2396_s5 + $0x388] sm:$0xff] }
  0x30   : > { %318 = vst [vmem:[%s2401_s6 + $0x1c0] sm:$0xff] %v317_v56  ;;  %v321_v58 = vld [vmem:[%s2396_s5 + $0x3a0] sm:$0xff]  ;;  %v323_v59 = vld [vmem:[%s2396_s5 + $0x3a8] sm:$0xff]  ;;  %320 = vst [vmem:[%s2401_s6 + $0x1c8] sm:$0xff] %v319_v57 }
  0x31   : > { %322 = vst [vmem:[%s2401_s6 + $0x1d0] sm:$0xff] %v321_v58  ;;  %324 = vst [vmem:[%s2401_s6 + $0x1d8] sm:$0xff] %v323_v59  ;;  %v325_v60 = vld [vmem:[%s2396_s5 + $0x3c0] sm:$0xff]  ;;  %v327_v61 = vld [vmem:[%s2396_s5 + $0x3c8] sm:$0xff] }
  0x32   : > { %v329_v62 = vld [vmem:[%s2396_s5 + $0x3e0] sm:$0xff]  ;;  %326 = vst [vmem:[%s2401_s6 + $0x1e0] sm:$0xff] %v325_v60  ;;  %328 = vst [vmem:[%s2401_s6 + $0x1e8] sm:$0xff] %v327_v61  ;;  %v331_v63 = vld [vmem:[%s2396_s5 + $0x3e8] sm:$0xff] }
  0x33   : > { %330 = vst [vmem:[%s2401_s6 + $0x1f0] sm:$0xff] %v329_v62  ;;  %v333_v0 = vld [vmem:[%s2396_s5 + $0x400] sm:$0xff]  ;;  %v335_v1 = vld [vmem:[%s2396_s5 + $0x408] sm:$0xff]  ;;  %332 = vst [vmem:[%s2401_s6 + $0x1f8] sm:$0xff] %v331_v63 }
  0x34   : > { %334 = vst [vmem:[%s2401_s6 + $0x200] sm:$0xff] %v333_v0  ;;  %336 = vst [vmem:[%s2401_s6 + $0x208] sm:$0xff] %v335_v1  ;;  %v337_v2 = vld [vmem:[%s2396_s5 + $0x420] sm:$0xff]  ;;  %v339_v3 = vld [vmem:[%s2396_s5 + $0x428] sm:$0xff] }
  0x35   : > { %v341_v4 = vld [vmem:[%s2396_s5 + $0x440] sm:$0xff]  ;;  %338 = vst [vmem:[%s2401_s6 + $0x210] sm:$0xff] %v337_v2  ;;  %340 = vst [vmem:[%s2401_s6 + $0x218] sm:$0xff] %v339_v3  ;;  %v343_v5 = vld [vmem:[%s2396_s5 + $0x448] sm:$0xff] }
  0x36   : > { %342 = vst [vmem:[%s2401_s6 + $0x220] sm:$0xff] %v341_v4  ;;  %v345_v6 = vld [vmem:[%s2396_s5 + $0x460] sm:$0xff]  ;;  %v347_v7 = vld [vmem:[%s2396_s5 + $0x468] sm:$0xff]  ;;  %344 = vst [vmem:[%s2401_s6 + $0x228] sm:$0xff] %v343_v5 }
  0x37   : > { %346 = vst [vmem:[%s2401_s6 + $0x230] sm:$0xff] %v345_v6  ;;  %348 = vst [vmem:[%s2401_s6 + $0x238] sm:$0xff] %v347_v7  ;;  %v349_v8 = vld [vmem:[%s2396_s5 + $0x480] sm:$0xff]  ;;  %v351_v9 = vld [vmem:[%s2396_s5 + $0x488] sm:$0xff] }
  0x38   : > { %v353_v10 = vld [vmem:[%s2396_s5 + $0x4a0] sm:$0xff]  ;;  %350 = vst [vmem:[%s2401_s6 + $0x240] sm:$0xff] %v349_v8  ;;  %352 = vst [vmem:[%s2401_s6 + $0x248] sm:$0xff] %v351_v9  ;;  %v355_v11 = vld [vmem:[%s2396_s5 + $0x4a8] sm:$0xff] }
  0x39   : > { %354 = vst [vmem:[%s2401_s6 + $0x250] sm:$0xff] %v353_v10  ;;  %v357_v12 = vld [vmem:[%s2396_s5 + $0x4c0] sm:$0xff]  ;;  %v359_v13 = vld [vmem:[%s2396_s5 + $0x4c8] sm:$0xff]  ;;  %356 = vst [vmem:[%s2401_s6 + $0x258] sm:$0xff] %v355_v11 }
  0x3a   : > { %358 = vst [vmem:[%s2401_s6 + $0x260] sm:$0xff] %v357_v12  ;;  %360 = vst [vmem:[%s2401_s6 + $0x268] sm:$0xff] %v359_v13  ;;  %v361_v14 = vld [vmem:[%s2396_s5 + $0x4e0] sm:$0xff]  ;;  %v363_v15 = vld [vmem:[%s2396_s5 + $0x4e8] sm:$0xff] }
  0x3b   : > { %v365_v16 = vld [vmem:[%s2396_s5 + $0x500] sm:$0xff]  ;;  %362 = vst [vmem:[%s2401_s6 + $0x270] sm:$0xff] %v361_v14  ;;  %364 = vst [vmem:[%s2401_s6 + $0x278] sm:$0xff] %v363_v15  ;;  %v367_v17 = vld [vmem:[%s2396_s5 + $0x508] sm:$0xff] }
  0x3c   : > { %366 = vst [vmem:[%s2401_s6 + $0x280] sm:$0xff] %v365_v16  ;;  %v369_v18 = vld [vmem:[%s2396_s5 + $0x520] sm:$0xff]  ;;  %v371_v19 = vld [vmem:[%s2396_s5 + $0x528] sm:$0xff]  ;;  %368 = vst [vmem:[%s2401_s6 + $0x288] sm:$0xff] %v367_v17 }
  0x3d   : > { %370 = vst [vmem:[%s2401_s6 + $0x290] sm:$0xff] %v369_v18  ;;  %372 = vst [vmem:[%s2401_s6 + $0x298] sm:$0xff] %v371_v19  ;;  %v373_v20 = vld [vmem:[%s2396_s5 + $0x540] sm:$0xff]  ;;  %v375_v21 = vld [vmem:[%s2396_s5 + $0x548] sm:$0xff] }
  0x3e   : > { %v377_v22 = vld [vmem:[%s2396_s5 + $0x560] sm:$0xff]  ;;  %374 = vst [vmem:[%s2401_s6 + $0x2a0] sm:$0xff] %v373_v20  ;;  %376 = vst [vmem:[%s2401_s6 + $0x2a8] sm:$0xff] %v375_v21  ;;  %v379_v23 = vld [vmem:[%s2396_s5 + $0x568] sm:$0xff] }
  0x3f   : > { %378 = vst [vmem:[%s2401_s6 + $0x2b0] sm:$0xff] %v377_v22  ;;  %v381_v24 = vld [vmem:[%s2396_s5 + $0x580] sm:$0xff]  ;;  %v383_v25 = vld [vmem:[%s2396_s5 + $0x588] sm:$0xff]  ;;  %380 = vst [vmem:[%s2401_s6 + $0x2b8] sm:$0xff] %v379_v23 }
  0x40   : > { %382 = vst [vmem:[%s2401_s6 + $0x2c0] sm:$0xff] %v381_v24  ;;  %384 = vst [vmem:[%s2401_s6 + $0x2c8] sm:$0xff] %v383_v25  ;;  %v385_v26 = vld [vmem:[%s2396_s5 + $0x5a0] sm:$0xff]  ;;  %v387_v27 = vld [vmem:[%s2396_s5 + $0x5a8] sm:$0xff] }
  0x41   : > { %v389_v28 = vld [vmem:[%s2396_s5 + $0x5c0] sm:$0xff]  ;;  %386 = vst [vmem:[%s2401_s6 + $0x2d0] sm:$0xff] %v385_v26  ;;  %388 = vst [vmem:[%s2401_s6 + $0x2d8] sm:$0xff] %v387_v27  ;;  %v391_v29 = vld [vmem:[%s2396_s5 + $0x5c8] sm:$0xff] }
  0x42   : > { %390 = vst [vmem:[%s2401_s6 + $0x2e0] sm:$0xff] %v389_v28  ;;  %v393_v30 = vld [vmem:[%s2396_s5 + $0x5e0] sm:$0xff]  ;;  %v395_v31 = vld [vmem:[%s2396_s5 + $0x5e8] sm:$0xff]  ;;  %392 = vst [vmem:[%s2401_s6 + $0x2e8] sm:$0xff] %v391_v29 }
  0x43   : > { %394 = vst [vmem:[%s2401_s6 + $0x2f0] sm:$0xff] %v393_v30  ;;  %396 = vst [vmem:[%s2401_s6 + $0x2f8] sm:$0xff] %v395_v31  ;;  %v397_v32 = vld [vmem:[%s2396_s5 + $0x600] sm:$0xff]  ;;  %v399_v33 = vld [vmem:[%s2396_s5 + $0x608] sm:$0xff] }
  0x44   : > { %v401_v34 = vld [vmem:[%s2396_s5 + $0x620] sm:$0xff]  ;;  %398 = vst [vmem:[%s2401_s6 + $0x300] sm:$0xff] %v397_v32  ;;  %400 = vst [vmem:[%s2401_s6 + $0x308] sm:$0xff] %v399_v33  ;;  %v403_v35 = vld [vmem:[%s2396_s5 + $0x628] sm:$0xff] }
  0x45   : > { %402 = vst [vmem:[%s2401_s6 + $0x310] sm:$0xff] %v401_v34  ;;  %v405_v36 = vld [vmem:[%s2396_s5 + $0x640] sm:$0xff]  ;;  %v407_v37 = vld [vmem:[%s2396_s5 + $0x648] sm:$0xff]  ;;  %404 = vst [vmem:[%s2401_s6 + $0x318] sm:$0xff] %v403_v35 }
  0x46   : > { %406 = vst [vmem:[%s2401_s6 + $0x320] sm:$0xff] %v405_v36  ;;  %408 = vst [vmem:[%s2401_s6 + $0x328] sm:$0xff] %v407_v37  ;;  %v409_v38 = vld [vmem:[%s2396_s5 + $0x660] sm:$0xff]  ;;  %v411_v39 = vld [vmem:[%s2396_s5 + $0x668] sm:$0xff] }
  0x47   : > { %v413_v40 = vld [vmem:[%s2396_s5 + $0x680] sm:$0xff]  ;;  %410 = vst [vmem:[%s2401_s6 + $0x330] sm:$0xff] %v409_v38  ;;  %412 = vst [vmem:[%s2401_s6 + $0x338] sm:$0xff] %v411_v39  ;;  %v415_v41 = vld [vmem:[%s2396_s5 + $0x688] sm:$0xff] }
  0x48   : > { %414 = vst [vmem:[%s2401_s6 + $0x340] sm:$0xff] %v413_v40  ;;  %v417_v42 = vld [vmem:[%s2396_s5 + $0x6a0] sm:$0xff]  ;;  %v419_v43 = vld [vmem:[%s2396_s5 + $0x6a8] sm:$0xff]  ;;  %416 = vst [vmem:[%s2401_s6 + $0x348] sm:$0xff] %v415_v41 }
  0x49   : > { %418 = vst [vmem:[%s2401_s6 + $0x350] sm:$0xff] %v417_v42  ;;  %420 = vst [vmem:[%s2401_s6 + $0x358] sm:$0xff] %v419_v43  ;;  %v421_v44 = vld [vmem:[%s2396_s5 + $0x6c0] sm:$0xff]  ;;  %v423_v45 = vld [vmem:[%s2396_s5 + $0x6c8] sm:$0xff] }
  0x4a   : > { %v425_v46 = vld [vmem:[%s2396_s5 + $0x6e0] sm:$0xff]  ;;  %422 = vst [vmem:[%s2401_s6 + $0x360] sm:$0xff] %v421_v44  ;;  %424 = vst [vmem:[%s2401_s6 + $0x368] sm:$0xff] %v423_v45  ;;  %v427_v47 = vld [vmem:[%s2396_s5 + $0x6e8] sm:$0xff] }
  0x4b   : > { %426 = vst [vmem:[%s2401_s6 + $0x370] sm:$0xff] %v425_v46  ;;  %v429_v48 = vld [vmem:[%s2396_s5 + $0x700] sm:$0xff]  ;;  %v431_v49 = vld [vmem:[%s2396_s5 + $0x708] sm:$0xff]  ;;  %428 = vst [vmem:[%s2401_s6 + $0x378] sm:$0xff] %v427_v47 }
  0x4c   : > { %430 = vst [vmem:[%s2401_s6 + $0x380] sm:$0xff] %v429_v48  ;;  %432 = vst [vmem:[%s2401_s6 + $0x388] sm:$0xff] %v431_v49  ;;  %v433_v50 = vld [vmem:[%s2396_s5 + $0x720] sm:$0xff]  ;;  %v435_v51 = vld [vmem:[%s2396_s5 + $0x728] sm:$0xff] }
  0x4d   : > { %v437_v52 = vld [vmem:[%s2396_s5 + $0x740] sm:$0xff]  ;;  %434 = vst [vmem:[%s2401_s6 + $0x390] sm:$0xff] %v433_v50  ;;  %436 = vst [vmem:[%s2401_s6 + $0x398] sm:$0xff] %v435_v51  ;;  %v439_v53 = vld [vmem:[%s2396_s5 + $0x748] sm:$0xff] }
  0x4e   : > { %438 = vst [vmem:[%s2401_s6 + $0x3a0] sm:$0xff] %v437_v52  ;;  %v441_v54 = vld [vmem:[%s2396_s5 + $0x760] sm:$0xff]  ;;  %v443_v55 = vld [vmem:[%s2396_s5 + $0x768] sm:$0xff]  ;;  %440 = vst [vmem:[%s2401_s6 + $0x3a8] sm:$0xff] %v439_v53 }
  0x4f   : > { %442 = vst [vmem:[%s2401_s6 + $0x3b0] sm:$0xff] %v441_v54  ;;  %444 = vst [vmem:[%s2401_s6 + $0x3b8] sm:$0xff] %v443_v55  ;;  %v445_v56 = vld [vmem:[%s2396_s5 + $0x780] sm:$0xff]  ;;  %v447_v57 = vld [vmem:[%s2396_s5 + $0x788] sm:$0xff] }
  0x50   : > { %v449_v58 = vld [vmem:[%s2396_s5 + $0x7a0] sm:$0xff]  ;;  %446 = vst [vmem:[%s2401_s6 + $0x3c0] sm:$0xff] %v445_v56  ;;  %448 = vst [vmem:[%s2401_s6 + $0x3c8] sm:$0xff] %v447_v57  ;;  %v451_v59 = vld [vmem:[%s2396_s5 + $0x7a8] sm:$0xff] }
  0x51   : > { %450 = vst [vmem:[%s2401_s6 + $0x3d0] sm:$0xff] %v449_v58  ;;  %v453_v60 = vld [vmem:[%s2396_s5 + $0x7c0] sm:$0xff]  ;;  %v455_v61 = vld [vmem:[%s2396_s5 + $0x7c8] sm:$0xff]  ;;  %452 = vst [vmem:[%s2401_s6 + $0x3d8] sm:$0xff] %v451_v59 }
  0x52   : > { %454 = vst [vmem:[%s2401_s6 + $0x3e0] sm:$0xff] %v453_v60  ;;  %456 = vst [vmem:[%s2401_s6 + $0x3e8] sm:$0xff] %v455_v61  ;;  %v457_v62 = vld [vmem:[%s2396_s5 + $0x7e0] sm:$0xff]  ;;  %v459_v63 = vld [vmem:[%s2396_s5 + $0x7e8] sm:$0xff] }
  0x53   : > { %458 = vst [vmem:[%s2401_s6 + $0x3f0] sm:$0xff] %v457_v62  ;;  %460 = vst [vmem:[%s2401_s6 + $0x3f8] sm:$0xff] %v459_v63 }
  0x54 PF: > { %p1875_p8 = scmp.ge.s32.totalorder %s2321_s19, 1  ;;  %p481_p9 = scmp.lt.s32.totalorder %s2321_s19, 3 }
  0x56   : > { %p482_p10 = pnand %p1875_p8, %p481_p9 }
  0x57   : > { %s488_s7 = sand.u32 (!%p482_p10), 1, %s2305_s15   ;;  %s1878_s9 = sshll.u32 (!%p482_p10), %s2313_s17, 2 }
  0x58   : > { %485 = sbr.rel (%p482_p10) target bundleno = 450 (0x1c2), region = 55  ;;  %s1876_s8 = sshll.u32 (!%p482_p10), %s488_s7, 10 }
  0x59   : > { %s2671_s13 = scalar_lea.vmem (!%p482_p10), [#allocation2], %s1876_s8  ;;  %p535_p11 = scmp.lt.s32.totalorder (!%p482_p10), %s1878_s9, 7 }
  0x5a   : > { %s1877_s22 = sshll.u32 (!%p482_p10), %s488_s7, 6 }
  0x5b   : > { %s2864_s23 = scalar_lea.vmem (!%p482_p10), [#allocation3], %s1877_s22 }
  0x5d   : > { %v2664_v0 = vld [vmem:[%s2919_s0 + $0x4] ss:$16 sps:$4 sm:$0xff]   ;;  %v2669_v1 = vld [vmem:[%s2919_s0 + $0xc] ss:$16 sps:$4 sm:$0xff]   ;;  %v2083_v4 = vld [vmem:[%s2671_s13 + $0xe0] ss:$16 sps:$4 sm:$0xff]  }
  0x5e   : > { %v2079_v2 = vld [vmem:[%s2671_s13 + $0xe4] ss:$16 sps:$4 sm:$0xff]   ;;  %1394 = vmatprep.mubr.bf16.mxu0 %v2664_v0  ;;  %1447 = vmatprep.mubr.bf16.mxu1 %v2669_v1  ;;  %v2084_v5 = vld [vmem:[%s2671_s13 + $0x2e0] ss:$16 sps:$4 sm:$0xff]   ;;  %s2932_s9 = smov (!%p535_p11, %s1878_s9), 7  ;;  %s2038_s15 = sshll.u32 (%p2383_p6), %s2313_s17, 4 }
  0x5f   : > { %v2081_v3 = vld [vmem:[%s2671_s13 + $0x2e4] ss:$16 sps:$4 sm:$0xff]   ;;  %1362 = vmatprep.subr.bf16.mxu0 %v2079_v2  ;;  %v2089_v8 = vld [vmem:[%s2671_s13 + $0xc0] ss:$16 sps:$4 sm:$0xff]   ;;  %s537_s12 = scalar_lea.vmem %s2921_s2, %s2932_s9  ;;  %s542_s21 = scalar_lea.vmem %s2922_s3, %s2932_s9 }
  0x60   : > { %1415 = vmatprep.subr.bf16.mxu1 %v2081_v3  ;;  %v2085_v6 = vld [vmem:[%s2671_s13 + $0xc4] ss:$16 sps:$4 sm:$0xff]   ;;  %1363 = vmatpush1.bf16.msra.mxu0 %v2083_v4  ;;  %v2090_v9 = vld [vmem:[%s2671_s13 + $0x2c0] ss:$16 sps:$4 sm:$0xff]   ;;  %v2183_v4 = vld [vmem:[%s2671_s13 + $0xec] ss:$16 sps:$4 sm:$0xff]   ;;  %s1734_s27 = scalar_lea.vmem (%p2383_p6), %s2923_s4, %s2038_s15 }
  0x61   : > { %1416 = vmatpush1.bf16.msra.mxu1 %v2084_v5  ;;  %v2087_v7 = vld [vmem:[%s2671_s13 + $0x2c4] ss:$16 sps:$4 sm:$0xff]   ;;  %1364 = vmatprep.subr.bf16.mxu0 %v2085_v6  ;;  %v2095_v12 = vld [vmem:[%s2671_s13 + $0xa0] ss:$16 sps:$4 sm:$0xff]   ;;  %v2186_v5 = vld [vmem:[%s2671_s13 + $0x2ec] ss:$16 sps:$4 sm:$0xff]  }
  0x62   : > { %1417 = vmatprep.subr.bf16.mxu1 %v2087_v7  ;;  %v2091_v10 = vld [vmem:[%s2671_s13 + $0xa4] ss:$16 sps:$4 sm:$0xff]   ;;  %v2096_v13 = vld [vmem:[%s2671_s13 + $0x2a0] ss:$16 sps:$4 sm:$0xff]   ;;  %v2749_v7 = vld [vmem:[%s2919_s0 + $0x8] ss:$16 sps:$4 sm:$0xff]  }
  0x63   : > { %v2093_v11 = vld [vmem:[%s2671_s13 + $0x2a4] ss:$16 sps:$4 sm:$0xff]   ;;  %v2101_v16 = vld [vmem:[%s2671_s13 + $0x80] ss:$16 sps:$4 sm:$0xff]  }
  0x64   : > { %1365 = vmatpush1.bf16.msra.mxu0 %v2089_v8  ;;  %v2097_v14 = vld [vmem:[%s2671_s13 + $0x84] ss:$16 sps:$4 sm:$0xff]   ;;  %v2102_v17 = vld [vmem:[%s2671_s13 + $0x280] ss:$16 sps:$4 sm:$0xff]   ;;  %v2181_v8 = vld [vmem:[%s2671_s13 + $0xe8] ss:$16 sps:$4 sm:$0xff]  }
  0x65   : > { %1418 = vmatpush1.bf16.msra.mxu1 %v2090_v9  ;;  %1366 = vmatprep.subr.bf16.mxu0 %v2091_v10  ;;  %v2099_v15 = vld [vmem:[%s2671_s13 + $0x284] ss:$16 sps:$4 sm:$0xff]   ;;  %v2107_v20 = vld [vmem:[%s2671_s13 + $0x60] ss:$16 sps:$4 sm:$0xff]   ;;  %v2184_v9 = vld [vmem:[%s2671_s13 + $0x2e8] ss:$16 sps:$4 sm:$0xff]  }
  0x66   : > { %1419 = vmatprep.subr.bf16.mxu1 %v2093_v11  ;;  %v2103_v18 = vld [vmem:[%s2671_s13 + $0x64] ss:$16 sps:$4 sm:$0xff]   ;;  %v2108_v21 = vld [vmem:[%s2671_s13 + $0x260] ss:$16 sps:$4 sm:$0xff]   ;;  %v2189_v10 = vld [vmem:[%s2671_s13 + $0xcc] ss:$16 sps:$4 sm:$0xff]  }
  0x67   : > { %v2105_v19 = vld [vmem:[%s2671_s13 + $0x264] ss:$16 sps:$4 sm:$0xff]   ;;  %v2113_v24 = vld [vmem:[%s2671_s13 + $0x40] ss:$16 sps:$4 sm:$0xff]   ;;  %v2192_v11 = vld [vmem:[%s2671_s13 + $0x2cc] ss:$16 sps:$4 sm:$0xff]  }
  0x68   : > { %1367 = vmatpush1.bf16.msra.mxu0 %v2095_v12  ;;  %v2109_v22 = vld [vmem:[%s2671_s13 + $0x44] ss:$16 sps:$4 sm:$0xff]   ;;  %v2114_v25 = vld [vmem:[%s2671_s13 + $0x240] ss:$16 sps:$4 sm:$0xff]   ;;  %v2187_v12 = vld [vmem:[%s2671_s13 + $0xc8] ss:$16 sps:$4 sm:$0xff]  }
  0x69   : > { %1420 = vmatpush1.bf16.msra.mxu1 %v2096_v13  ;;  %1368 = vmatprep.subr.bf16.mxu0 %v2097_v14  ;;  %v2111_v23 = vld [vmem:[%s2671_s13 + $0x244] ss:$16 sps:$4 sm:$0xff]   ;;  %v2119_v28 = vld [vmem:[%s2671_s13 + $0x20] ss:$16 sps:$4 sm:$0xff]   ;;  %v2190_v13 = vld [vmem:[%s2671_s13 + $0x2c8] ss:$16 sps:$4 sm:$0xff]  }
  0x6a   : > { %1421 = vmatprep.subr.bf16.mxu1 %v2099_v15  ;;  %v2115_v26 = vld [vmem:[%s2671_s13 + $0x24] ss:$16 sps:$4 sm:$0xff]   ;;  %v2120_v29 = vld [vmem:[%s2671_s13 + $0x220] ss:$16 sps:$4 sm:$0xff]   ;;  %v2195_v14 = vld [vmem:[%s2671_s13 + $0xac] ss:$16 sps:$4 sm:$0xff]  }
  0x6b   : > { %v2117_v27 = vld [vmem:[%s2671_s13 + $0x224] ss:$16 sps:$4 sm:$0xff]   ;;  %v2125_v32 = vld [vmem:[%s2671_s13] ss:$16 sps:$4 sm:$0xff]   ;;  %v2198_v15 = vld [vmem:[%s2671_s13 + $0x2ac] ss:$16 sps:$4 sm:$0xff]  }
  0x6c   : > { %1369 = vmatpush1.bf16.msra.mxu0 %v2101_v16  ;;  %v2121_v30 = vld [vmem:[%s2671_s13 + $0x4] ss:$16 sps:$4 sm:$0xff]   ;;  %v2126_v33 = vld [vmem:[%s2671_s13 + $0x200] ss:$16 sps:$4 sm:$0xff]   ;;  %v2193_v16 = vld [vmem:[%s2671_s13 + $0xa8] ss:$16 sps:$4 sm:$0xff]  }
  0x6d   : > { %1422 = vmatpush1.bf16.msra.mxu1 %v2102_v17  ;;  %1370 = vmatprep.subr.bf16.mxu0 %v2103_v18  ;;  %v2123_v31 = vld [vmem:[%s2671_s13 + $0x204] ss:$16 sps:$4 sm:$0xff]   ;;  %v2131_v36 = vld [vmem:[%s2671_s13 + $0x1e0] ss:$16 sps:$4 sm:$0xff]   ;;  %v2196_v17 = vld [vmem:[%s2671_s13 + $0x2a8] ss:$16 sps:$4 sm:$0xff]  }
  0x6e   : > { %1423 = vmatprep.subr.bf16.mxu1 %v2105_v19  ;;  %v2127_v34 = vld [vmem:[%s2671_s13 + $0x1e4] ss:$16 sps:$4 sm:$0xff]   ;;  %v2132_v37 = vld [vmem:[%s2671_s13 + $0x3e0] ss:$16 sps:$4 sm:$0xff]   ;;  %v2201_v18 = vld [vmem:[%s2671_s13 + $0x8c] ss:$16 sps:$4 sm:$0xff]  }
  0x6f   : > { %v2129_v35 = vld [vmem:[%s2671_s13 + $0x3e4] ss:$16 sps:$4 sm:$0xff]   ;;  %v2137_v40 = vld [vmem:[%s2671_s13 + $0x1c0] ss:$16 sps:$4 sm:$0xff]   ;;  %v2204_v19 = vld [vmem:[%s2671_s13 + $0x28c] ss:$16 sps:$4 sm:$0xff]  }
  0x70   : > { %1371 = vmatpush1.bf16.msra.mxu0 %v2107_v20  ;;  %v2133_v38 = vld [vmem:[%s2671_s13 + $0x1c4] ss:$16 sps:$4 sm:$0xff]   ;;  %v2138_v41 = vld [vmem:[%s2671_s13 + $0x3c0] ss:$16 sps:$4 sm:$0xff]   ;;  %v2199_v20 = vld [vmem:[%s2671_s13 + $0x88] ss:$16 sps:$4 sm:$0xff]  }
  0x71   : > { %1424 = vmatpush1.bf16.msra.mxu1 %v2108_v21  ;;  %1372 = vmatprep.subr.bf16.mxu0 %v2109_v22  ;;  %v2135_v39 = vld [vmem:[%s2671_s13 + $0x3c4] ss:$16 sps:$4 sm:$0xff]   ;;  %v2143_v44 = vld [vmem:[%s2671_s13 + $0x1a0] ss:$16 sps:$4 sm:$0xff]   ;;  %v2202_v21 = vld [vmem:[%s2671_s13 + $0x288] ss:$16 sps:$4 sm:$0xff]  }
  0x72   : > { %1425 = vmatprep.subr.bf16.mxu1 %v2111_v23  ;;  %v2139_v42 = vld [vmem:[%s2671_s13 + $0x1a4] ss:$16 sps:$4 sm:$0xff]   ;;  %v2144_v45 = vld [vmem:[%s2671_s13 + $0x3a0] ss:$16 sps:$4 sm:$0xff]   ;;  %v2207_v22 = vld [vmem:[%s2671_s13 + $0x6c] ss:$16 sps:$4 sm:$0xff]  }
  0x73   : > { %v2141_v43 = vld [vmem:[%s2671_s13 + $0x3a4] ss:$16 sps:$4 sm:$0xff]   ;;  %v2149_v48 = vld [vmem:[%s2671_s13 + $0x180] ss:$16 sps:$4 sm:$0xff]   ;;  %v2210_v23 = vld [vmem:[%s2671_s13 + $0x26c] ss:$16 sps:$4 sm:$0xff]  }
  0x74   : > { %1373 = vmatpush1.bf16.msra.mxu0 %v2113_v24  ;;  %v2145_v46 = vld [vmem:[%s2671_s13 + $0x184] ss:$16 sps:$4 sm:$0xff]   ;;  %v2150_v49 = vld [vmem:[%s2671_s13 + $0x380] ss:$16 sps:$4 sm:$0xff]  }
  0x75   : > { %1426 = vmatpush1.bf16.msra.mxu1 %v2114_v25  ;;  %1374 = vmatprep.subr.bf16.mxu0 %v2115_v26  ;;  %v2147_v47 = vld [vmem:[%s2671_s13 + $0x384] ss:$16 sps:$4 sm:$0xff]   ;;  %v2155_v52 = vld [vmem:[%s2671_s13 + $0x160] ss:$16 sps:$4 sm:$0xff]   ;;  %v2205_v25 = vld [vmem:[%s2671_s13 + $0x68] ss:$16 sps:$4 sm:$0xff]  }
  0x76   : > { %1427 = vmatprep.subr.bf16.mxu1 %v2117_v27  ;;  %v2151_v50 = vld [vmem:[%s2671_s13 + $0x164] ss:$16 sps:$4 sm:$0xff]   ;;  %v2156_v53 = vld [vmem:[%s2671_s13 + $0x360] ss:$16 sps:$4 sm:$0xff]   ;;  %v2778_v26 = vld [vmem:[%s2919_s0 + $0x2c] ss:$16 sps:$4 sm:$0xff]  }
  0x77   : > { %v2153_v51 = vld [vmem:[%s2671_s13 + $0x364] ss:$16 sps:$4 sm:$0xff]   ;;  %v2161_v56 = vld [vmem:[%s2671_s13 + $0x140] ss:$16 sps:$4 sm:$0xff]  }
  0x78   : > { %1375 = vmatpush1.bf16.msra.mxu0 %v2119_v28  ;;  %v2157_v54 = vld [vmem:[%s2671_s13 + $0x144] ss:$16 sps:$4 sm:$0xff]   ;;  %v2162_v57 = vld [vmem:[%s2671_s13 + $0x340] ss:$16 sps:$4 sm:$0xff]   ;;  %v2789_v28 = vld [vmem:[%s2919_s0 + $0x28] ss:$16 sps:$4 sm:$0xff]  }
  0x79   : > { %1428 = vmatpush1.bf16.msra.mxu1 %v2120_v29  ;;  %1376 = vmatprep.subr.bf16.mxu0 %v2121_v30  ;;  %v2159_v55 = vld [vmem:[%s2671_s13 + $0x344] ss:$16 sps:$4 sm:$0xff]   ;;  %v2167_v60 = vld [vmem:[%s2671_s13 + $0x120] ss:$16 sps:$4 sm:$0xff]   ;;  %v2208_v29 = vld [vmem:[%s2671_s13 + $0x268] ss:$16 sps:$4 sm:$0xff]  }
  0x7a   : > { %1429 = vmatprep.subr.bf16.mxu1 %v2123_v31  ;;  %v2163_v58 = vld [vmem:[%s2671_s13 + $0x124] ss:$16 sps:$4 sm:$0xff]   ;;  %v2168_v61 = vld [vmem:[%s2671_s13 + $0x320] ss:$16 sps:$4 sm:$0xff]   ;;  %v2213_v30 = vld [vmem:[%s2671_s13 + $0x4c] ss:$16 sps:$4 sm:$0xff]  }
  0x7b   : > { %v2165_v59 = vld [vmem:[%s2671_s13 + $0x324] ss:$16 sps:$4 sm:$0xff]   ;;  %v2173_v2 = vld [vmem:[%s2671_s13 + $0x100] ss:$16 sps:$4 sm:$0xff]   ;;  %v2216_v31 = vld [vmem:[%s2671_s13 + $0x24c] ss:$16 sps:$4 sm:$0xff]  }
  0x7c   : > { %1377 = vmatpush1.bf16.msra.mxu0 %v2125_v32  ;;  %v2169_v62 = vld [vmem:[%s2671_s13 + $0x104] ss:$16 sps:$4 sm:$0xff]   ;;  %v2174_v3 = vld [vmem:[%s2671_s13 + $0x300] ss:$16 sps:$4 sm:$0xff]   ;;  %v2211_v32 = vld [vmem:[%s2671_s13 + $0x48] ss:$16 sps:$4 sm:$0xff]  }
  0x7d   : > { %1430 = vmatpush1.bf16.msra.mxu1 %v2126_v33  ;;  %1378 = vmatprep.subr.bf16.mxu0 %v2127_v34  ;;  %v2171_v63 = vld [vmem:[%s2671_s13 + $0x304] ss:$16 sps:$4 sm:$0xff]   ;;  %v2744_v6 = vld [vmem:[%s2919_s0] ss:$16 sps:$4 sm:$0xff]   ;;  %v2214_v33 = vld [vmem:[%s2671_s13 + $0x248] ss:$16 sps:$4 sm:$0xff]  }
  0x7e   : > { %1431 = vmatprep.subr.bf16.mxu1 %v2129_v35  ;;  %v2772_v24 = vld [vmem:[%s2919_s0 + $0x24] ss:$16 sps:$4 sm:$0xff]   ;;  %v2784_v27 = vld [vmem:[%s2919_s0 + $0x20] ss:$16 sps:$4 sm:$0xff]   ;;  %v2219_v34 = vld [vmem:[%s2671_s13 + $0x2c] ss:$16 sps:$4 sm:$0xff]  }
  0x7f   : > { %v2222_v35 = vld [vmem:[%s2671_s13 + $0x22c] ss:$16 sps:$4 sm:$0xff]  }
  0x80   : > { %1379 = vmatpush2.bf16.msra.mxu0 %v2131_v36  ;;  %v2217_v36 = vld [vmem:[%s2671_s13 + $0x28] ss:$16 sps:$4 sm:$0xff]  }
  0x81   : > { %1432 = vmatpush2.bf16.msra.mxu1 %v2132_v37  ;;  %1380 = vmatprep.subr.bf16.mxu0 %v2133_v38  ;;  %v2220_v37 = vld [vmem:[%s2671_s13 + $0x228] ss:$16 sps:$4 sm:$0xff]   ;;  %v2228_v38 = vld [vmem:[%s2671_s13 + $0x20c] ss:$16 sps:$4 sm:$0xff]  }
  0x82   : > { %1433 = vmatprep.subr.bf16.mxu1 %v2135_v39  ;;  %v2223_v39 = vld [vmem:[%s2671_s13 + $0x8] ss:$16 sps:$4 sm:$0xff]  }
  0x84   : > { %1381 = vmatpush2.bf16.msra.mxu0 %v2137_v40  ;;  %v2226_v40 = vld [vmem:[%s2671_s13 + $0x208] ss:$16 sps:$4 sm:$0xff]  }
  0x85   : > { %1434 = vmatpush2.bf16.msra.mxu1 %v2138_v41  ;;  %1382 = vmatprep.subr.bf16.mxu0 %v2139_v42  ;;  %v2234_v41 = vld [vmem:[%s2671_s13 + $0x3ec] ss:$16 sps:$4 sm:$0xff]   ;;  %v2229_v42 = vld [vmem:[%s2671_s13 + $0x1e8] ss:$16 sps:$4 sm:$0xff]  }
  0x86   : > { %1435 = vmatprep.subr.bf16.mxu1 %v2141_v43  ;;  %v2232_v43 = vld [vmem:[%s2671_s13 + $0x3e8] ss:$16 sps:$4 sm:$0xff]  }
  0x88   : > { %1383 = vmatpush2.bf16.msra.mxu0 %v2143_v44  ;;  %v2237_v44 = vld [vmem:[%s2671_s13 + $0x1cc] ss:$16 sps:$4 sm:$0xff]  }
  0x89   : > { %1436 = vmatpush2.bf16.msra.mxu1 %v2144_v45  ;;  %1384 = vmatprep.subr.bf16.mxu0 %v2145_v46  ;;  %v2240_v45 = vld [vmem:[%s2671_s13 + $0x3cc] ss:$16 sps:$4 sm:$0xff]   ;;  %v2235_v46 = vld [vmem:[%s2671_s13 + $0x1c8] ss:$16 sps:$4 sm:$0xff]  }
  0x8a   : > { %1437 = vmatprep.subr.bf16.mxu1 %v2147_v47  ;;  %v2238_v47 = vld [vmem:[%s2671_s13 + $0x3c8] ss:$16 sps:$4 sm:$0xff]  }
  0x8c   : > { %1385 = vmatpush2.bf16.msra.mxu0 %v2149_v48  ;;  %v2243_v48 = vld [vmem:[%s2671_s13 + $0x1ac] ss:$16 sps:$4 sm:$0xff]  }
  0x8d   : > { %1438 = vmatpush2.bf16.msra.mxu1 %v2150_v49  ;;  %1386 = vmatprep.subr.bf16.mxu0 %v2151_v50  ;;  %v2246_v49 = vld [vmem:[%s2671_s13 + $0x3ac] ss:$16 sps:$4 sm:$0xff]   ;;  %v2241_v50 = vld [vmem:[%s2671_s13 + $0x1a8] ss:$16 sps:$4 sm:$0xff]  }
  0x8e   : > { %1439 = vmatprep.subr.bf16.mxu1 %v2153_v51  ;;  %v2244_v51 = vld [vmem:[%s2671_s13 + $0x3a8] ss:$16 sps:$4 sm:$0xff]  }
  0x90   : > { %1387 = vmatpush2.bf16.msra.mxu0 %v2155_v52  ;;  %v2249_v52 = vld [vmem:[%s2671_s13 + $0x18c] ss:$16 sps:$4 sm:$0xff]  }
  0x91   : > { %1440 = vmatpush2.bf16.msra.mxu1 %v2156_v53  ;;  %1388 = vmatprep.subr.bf16.mxu0 %v2157_v54  ;;  %v2252_v53 = vld [vmem:[%s2671_s13 + $0x38c] ss:$16 sps:$4 sm:$0xff]   ;;  %v2247_v54 = vld [vmem:[%s2671_s13 + $0x188] ss:$16 sps:$4 sm:$0xff]  }
  0x92   : > { %1441 = vmatprep.subr.bf16.mxu1 %v2159_v55  ;;  %v2250_v55 = vld [vmem:[%s2671_s13 + $0x388] ss:$16 sps:$4 sm:$0xff]  }
  0x94   : > { %1389 = vmatpush2.bf16.msra.mxu0 %v2161_v56  ;;  %v2255_v56 = vld [vmem:[%s2671_s13 + $0x16c] ss:$16 sps:$4 sm:$0xff]  }
  0x95   : > { %1442 = vmatpush2.bf16.msra.mxu1 %v2162_v57  ;;  %1390 = vmatprep.subr.bf16.mxu0 %v2163_v58  ;;  %v2258_v57 = vld [vmem:[%s2671_s13 + $0x36c] ss:$16 sps:$4 sm:$0xff]   ;;  %v2253_v58 = vld [vmem:[%s2671_s13 + $0x168] ss:$16 sps:$4 sm:$0xff]  }
  0x96   : > { %1443 = vmatprep.subr.bf16.mxu1 %v2165_v59  ;;  %v2256_v59 = vld [vmem:[%s2671_s13 + $0x368] ss:$16 sps:$4 sm:$0xff]  }
  0x98   : > { %1391 = vmatpush2.bf16.msra.mxu0 %v2167_v60  ;;  %v2267_v60 = vld [vmem:[%s2671_s13 + $0x14c] ss:$16 sps:$4 sm:$0xff]  }
  0x99   : > { %1444 = vmatpush2.bf16.msra.mxu1 %v2168_v61  ;;  %1392 = vmatprep.subr.bf16.mxu0 %v2169_v62  ;;  %v2270_v61 = vld [vmem:[%s2671_s13 + $0x34c] ss:$16 sps:$4 sm:$0xff]   ;;  %v2265_v62 = vld [vmem:[%s2671_s13 + $0x148] ss:$16 sps:$4 sm:$0xff]  }
  0x9a   : > { %1445 = vmatprep.subr.bf16.mxu1 %v2171_v63  ;;  %v2268_v63 = vld [vmem:[%s2671_s13 + $0x348] ss:$16 sps:$4 sm:$0xff]  }
  0x9c   : > { %1393 = vmatpush2.bf16.msra.mxu0 %v2173_v2  ;;  %v2273_v2 = vld [vmem:[%s2671_s13 + $0x12c] ss:$16 sps:$4 sm:$0xff]  }
  0x9d   : > { %1446 = vmatpush2.bf16.msra.mxu1 %v2174_v3  ;;  %1468 = vmatprep.subr.bf16.mxu0 %v2183_v4  ;;  %v2276_v3 = vld [vmem:[%s2671_s13 + $0x32c] ss:$16 sps:$4 sm:$0xff]   ;;  %v2271_v4 = vld [vmem:[%s2671_s13 + $0x128] ss:$16 sps:$4 sm:$0xff]  }
  0x9e   : > { %1521 = vmatprep.subr.bf16.mxu1 %v2186_v5  ;;  %v2274_v5 = vld [vmem:[%s2671_s13 + $0x328] ss:$16 sps:$4 sm:$0xff]  }
  0x9f   : > { %1395 = vmatmul.mubr.bf16.vlgmr.msra.gmra.mxu0 %v2744_v6 }
  0xa0   : > { %1448 = vmatmul.mubr.bf16.vlgmr.msra.gmra.mxu1 %v2749_v7  ;;  %1469 = vmatpush1.bf16.msra.mxu0 %v2181_v8  ;;  %v2279_v8 = vld [vmem:[%s2671_s13 + $0x10c] ss:$16 sps:$4 sm:$0xff]  }
  0xa1   : > { %1522 = vmatpush1.bf16.msra.mxu1 %v2184_v9  ;;  %1470 = vmatprep.subr.bf16.mxu0 %v2189_v10  ;;  %v2282_v9 = vld [vmem:[%s2671_s13 + $0x30c] ss:$16 sps:$4 sm:$0xff]   ;;  %v2277_v10 = vld [vmem:[%s2671_s13 + $0x108] ss:$16 sps:$4 sm:$0xff]  }
  0xa2   : > { %1523 = vmatprep.subr.bf16.mxu1 %v2192_v11  ;;  %1404 = vmatprep.mubr.bf16.mxu0 %v2772_v24  ;;  %v2280_v11 = vld [vmem:[%s2671_s13 + $0x308] ss:$16 sps:$4 sm:$0xff]  }
  0xa3   : > { %1457 = vmatprep.mubr.bf16.mxu1 %v2778_v26 }
  0xa4   : > { %1471 = vmatpush1.bf16.msra.mxu0 %v2187_v12  ;;  %v1576_v12 = vlaneseq }
  0xa5   : > { %1524 = vmatpush1.bf16.msra.mxu1 %v2190_v13  ;;  %1472 = vmatprep.subr.bf16.mxu0 %v2195_v14 }
  0xa6   : > { %1525 = vmatprep.subr.bf16.mxu1 %v2198_v15  ;;  %v1577_v13 = vshrl.u32 %v1576_v12, 7 }
  0xa7   : > { %1405 = vmatmul.mubr.bf16.gmra.mxu0 %v2784_v27 }
  0xa8   : > { %1473 = vmatpush1.bf16.msra.mxu0 %v2193_v16  ;;  %1458 = vmatmul.mubr.bf16.gmra.mxu1 %v2789_v28  ;;  %v1590_v15 = vsub.s32 3, %v1577_v13  ;;  %v1612_v16 = vld [vmem:[%s542_s21] sm:$0xf] }
  0xa9   : > { %1526 = vmatpush1.bf16.msra.mxu1 %v2196_v17  ;;  %1474 = vmatprep.subr.bf16.mxu0 %v2201_v18 }
  0xaa   : > { %1527 = vmatprep.subr.bf16.mxu1 %v2204_v19  ;;  %1500 = vmatprep.mubr.bf16.mxu0 %v2664_v0  ;;  %v2225_v0 = vld [vmem:[%s2671_s13 + $0xc] ss:$16 sps:$4 sm:$0xff]   ;;  %v2860_v19 = vrot.slane %v1612_v16, %v1590_v15 }
  0xab   : > { %1553 = vmatprep.mubr.bf16.mxu1 %v2669_v1  ;;  %v2231_v1 = vld [vmem:[%s2671_s13 + $0x1ec] ss:$16 sps:$4 sm:$0xff]  }
  0xac   : > { %1475 = vmatpush1.bf16.msra.mxu0 %v2199_v20  ;;  %v1578_v20 = vsub.s32 0, %v1577_v13 }
  0xad   : > { %1528 = vmatpush1.bf16.msra.mxu1 %v2202_v21  ;;  %1476 = vmatprep.subr.bf16.mxu0 %v2207_v22  ;;  %v1582_v21 = vsub.s32 1, %v1577_v13 }
  0xae   : > { %1529 = vmatprep.subr.bf16.mxu1 %v2210_v23 }
  0xb0   : > { %1477 = vmatpush1.bf16.msra.mxu0 %v2205_v25 }
  0xb1   : > { %1530 = vmatpush1.bf16.msra.mxu1 %v2208_v29  ;;  %1478 = vmatprep.subr.bf16.mxu0 %v2213_v30 }
  0xb2   : > { %1531 = vmatprep.subr.bf16.mxu1 %v2216_v31 }
  0xb4   : > { %1479 = vmatpush1.bf16.msra.mxu0 %v2211_v32  ;;  %v1621_v32 = vrot.slane %v1612_v16, %v1582_v21 }
  0xb5   : > { %1532 = vmatpush1.bf16.msra.mxu1 %v2214_v33  ;;  %1480 = vmatprep.subr.bf16.mxu0 %v2219_v34 }
  0xb6   : > { %1533 = vmatprep.subr.bf16.mxu1 %v2222_v35 }
  0xb8   : > { %1481 = vmatpush1.bf16.msra.mxu0 %v2217_v36 }
  0xb9   : > { %1534 = vmatpush1.bf16.msra.mxu1 %v2220_v37  ;;  %1482 = vmatprep.subr.bf16.mxu0 %v2225_v0 }
  0xba   : > { %1535 = vmatprep.subr.bf16.mxu1 %v2228_v38 }
  0xbc   : > { %1483 = vmatpush1.bf16.msra.mxu0 %v2223_v39 }
  0xbd   : > { %1536 = vmatpush1.bf16.msra.mxu1 %v2226_v40  ;;  %1484 = vmatprep.subr.bf16.mxu0 %v2231_v1 }
  0xbe   : > { %1537 = vmatprep.subr.bf16.mxu1 %v2234_v41 }
  0xc0   : > { %1485 = vmatpush2.bf16.msra.mxu0 %v2229_v42 }
  0xc1   : > { %1538 = vmatpush2.bf16.msra.mxu1 %v2232_v43  ;;  %1486 = vmatprep.subr.bf16.mxu0 %v2237_v44 }
  0xc2   : > { %1539 = vmatprep.subr.bf16.mxu1 %v2240_v45 }
  0xc4   : > { %1487 = vmatpush2.bf16.msra.mxu0 %v2235_v46 }
  0xc5   : > { %1540 = vmatpush2.bf16.msra.mxu1 %v2238_v47  ;;  %1488 = vmatprep.subr.bf16.mxu0 %v2243_v48 }
  0xc6   : > { %1541 = vmatprep.subr.bf16.mxu1 %v2246_v49 }
  0xc8   : > { %1489 = vmatpush2.bf16.msra.mxu0 %v2241_v50 }
  0xc9   : > { %1542 = vmatpush2.bf16.msra.mxu1 %v2244_v51  ;;  %1490 = vmatprep.subr.bf16.mxu0 %v2249_v52 }
  0xca   : > { %1543 = vmatprep.subr.bf16.mxu1 %v2252_v53 }
  0xcc   : > { %1491 = vmatpush2.bf16.msra.mxu0 %v2247_v54 }
  0xcd   : > { %1544 = vmatpush2.bf16.msra.mxu1 %v2250_v55  ;;  %1492 = vmatprep.subr.bf16.mxu0 %v2255_v56 }
  0xce   : > { %1545 = vmatprep.subr.bf16.mxu1 %v2258_v57 }
  0xd0   : > { %1493 = vmatpush2.bf16.msra.mxu0 %v2253_v58 }
  0xd1   : > { %1546 = vmatpush2.bf16.msra.mxu1 %v2256_v59  ;;  %1494 = vmatprep.subr.bf16.mxu0 %v2267_v60 }
  0xd2   : > { %1547 = vmatprep.subr.bf16.mxu1 %v2270_v61 }
  0xd4   : > { %1495 = vmatpush2.bf16.msra.mxu0 %v2265_v62 }
  0xd5   : > { %1548 = vmatpush2.bf16.msra.mxu1 %v2268_v63  ;;  %1496 = vmatprep.subr.bf16.mxu0 %v2273_v2 }
  0xd6   : > { %1549 = vmatprep.subr.bf16.mxu1 %v2276_v3 }
  0xd8   : > { %1497 = vmatpush2.bf16.msra.mxu0 %v2271_v4 }
  0xd9   : > { %1550 = vmatpush2.bf16.msra.mxu1 %v2274_v5  ;;  %1498 = vmatprep.subr.bf16.mxu0 %v2279_v8 }
  0xda   : > { %1551 = vmatprep.subr.bf16.mxu1 %v2282_v9 }
  0xdc   : > { %1499 = vmatpush2.bf16.msra.mxu0 %v2277_v10 }
  0xdd   : > { %1552 = vmatpush2.bf16.msra.mxu1 %v2280_v11 }
  0xdf   : > { %1501 = vmatmul.mubr.bf16.vlgmr.msra.gmra.mxu0 %v2744_v6  ;;  %v1586_v6 = vsub.s32 2, %v1577_v13 }
  0xe0   : > { %1554 = vmatmul.mubr.bf16.vlgmr.msra.gmra.mxu1 %v2749_v7  ;;  %1510 = vmatprep.mubr.bf16.mxu0 %v2772_v24  ;;  %v1574_v7 = vld [vmem:[%s537_s12] sm:$0xf] }
  0xe1   : > { %1563 = vmatprep.mubr.bf16.mxu1 %v2778_v26  ;;  %v2854_v14 = vrot.slane %v1574_v7, %v1586_v6  ;;  %v2856_v17 = vrot.slane %v1612_v16, %v1586_v6  ;;  %v2858_v18 = vrot.slane %v1574_v7, %v1590_v15  ;;  %v1579_v22 = vrot.slane %v1574_v7, %v1578_v20 }
  0xe2   : > { %v1617_v26 = vrot.slane %v1612_v16, %v1578_v20 }
  0xe7   : > { %1511 = vmatmul.mubr.bf16.gmra.mxu0 %v2784_v27  ;;  %v1583_v27 = vrot.slane %v1574_v7, %v1582_v21 }
  0xe8   : > { %1564 = vmatmul.mubr.bf16.gmra.mxu1 %v2789_v28 }
 0x15f   : > { %v1396_v23 = vpop.f32.mrf.mxu0 }
 0x160   : > { %v1449_v24 = vpop.f32.mrf.mxu1 }
 0x161   : > { %v1450_v25 = vadd.f32 %v1449_v24, %v1396_v23  ;;  %v1398_v28 = vpop.f32.mrf.mxu0 }
 0x162   : > { %v1451_v29 = vpop.f32.mrf.mxu1 }
 0x163   : > { %v1596_v30 = vmul.f32 %v1579_v22, %v1450_v25  ;;  %v1452_v31 = vadd.f32 %v1451_v29, %v1398_v28  ;;  %v1400_v33 = vpop.f32.mrf.mxu0 }
 0x164   : > { %v1453_v34 = vpop.f32.mrf.mxu1 }
 0x165   : > { %v1634_v35 = vadd.f32 %v1617_v26, %v1596_v30  ;;  %v1597_v36 = vmul.f32 %v1583_v27, %v1452_v31  ;;  %v1454_v37 = vadd.f32 %v1453_v34, %v1400_v33  ;;  %v1402_v0 = vpop.f32.mrf.mxu0 }
 0x166   : > { %v1455_v38 = vpop.f32.mrf.mxu1 }
 0x167   : > { %v1650_v39 = vmax.f32 %v1634_v35, 0.0  ;;  %v1635_v40 = vadd.f32 %v1621_v32, %v1597_v36  ;;  %v1600_v1 = vmul.f32 %v1579_v22, %v1454_v37  ;;  %v1456_v41 = vadd.f32 %v1455_v38, %v1402_v0  ;;  %v1406_v50 = vpop.f32.mrf.mxu0 }
 0x168   : > { %v1459_v51 = vpop.f32.mrf.mxu1 }
 0x169   : > { %v1651_v42 = vmax.f32 %v1635_v40, 0.0  ;;  %v1638_v43 = vadd.f32 %v1617_v26, %v1600_v1  ;;  %v1601_v44 = vmul.f32 %v1583_v27, %v1456_v41  ;;  %v1460_v52 = vadd.f32 %v1459_v51, %v1406_v50  ;;  %v1408_v53 = vpop.f32.mrf.mxu0 }
 0x16a   : > { %v1461_v54 = vpop.f32.mrf.mxu1 }
 0x16b   : > { %v2030_v45 = vpack.c.bf16 %v1651_v42, %v1650_v39  ;;  %v1639_v46 = vadd.f32 %v1621_v32, %v1601_v44  ;;  %v1654_v47 = vmax.f32 %v1638_v43, 0.0  ;;  %v1604_v55 = vmul.f32 %v1579_v22, %v1460_v52  ;;  %v1410_v57 = vpop.f32.mrf.mxu0 }
 0x16c   : > { %v1462_v56 = vadd.f32 %v1461_v54, %v1408_v53  ;;  %v1463_v58 = vpop.f32.mrf.mxu1 }
 0x16d   : > { %1714 = vst [vmem:[%s2864_s23] sm:$0xff] %v2030_v45  ;;  %v1655_v48 = vmax.f32 %v1639_v46, 0.0  ;;  %v1642_v59 = vadd.f32 %v1617_v26, %v1604_v55  ;;  %v1464_v61 = vadd.f32 %v1463_v58, %v1410_v57  ;;  %v1412_v62 = vpop.f32.mrf.mxu0 }
 0x16e   : > { %v1605_v60 = vmul.f32 %v1583_v27, %v1462_v56  ;;  %v1465_v63 = vpop.f32.mrf.mxu1 }
 0x16f   : > { %v2032_v49 = vpack.c.bf16 %v1655_v48, %v1654_v47  ;;  %v1658_v2 = vmax.f32 %v1642_v59, 0.0  ;;  %v1608_v4 = vmul.f32 %v1579_v22, %v1464_v61  ;;  %v1466_v5 = vadd.f32 %v1465_v63, %v1412_v62 }
 0x170   : > { %v1643_v3 = vadd.f32 %v1621_v32, %v1605_v60 }
 0x171   : > { %1716 = vst [vmem:[%s2864_s23 + $0x10] sm:$0xff] %v2032_v49  ;;  %v1646_v9 = vadd.f32 %v1617_v26, %v1608_v4  ;;  %v1609_v10 = vmul.f32 %v1583_v27, %v1466_v5 }
 0x172   : > { %v1659_v8 = vmax.f32 %v1643_v3, 0.0 }
 0x173   : > { %v1662_v12 = vmax.f32 %v1646_v9, 0.0  ;;  %v1647_v13 = vadd.f32 %v1621_v32, %v1609_v10 }
 0x174   : > { %v2034_v11 = vpack.c.bf16 %v1659_v8, %v1658_v2 }
 0x175   : > { %v1663_v6 = vmax.f32 %v1647_v13, 0.0 }
 0x176   : > { %1718 = vst [vmem:[%s2864_s23 + $0x20] sm:$0xff] %v2034_v11 }
 0x177   : > { %v2036_v7 = vpack.c.bf16 %v1663_v6, %v1662_v12 }
 0x179   : > { %1720 = vst [vmem:[%s2864_s23 + $0x30] sm:$0xff] %v2036_v7 }
 0x17d   : > { %v1755_v8 = vld [vmem:[%s2864_s23 + $0x20] sm:$0xff] (%p2383_p6) }
 0x17e   : > { %1756 = vst [vmem:[%s1734_s27 + $0x40] sm:$0xff] (%p2383_p6), %v1755_v8 }
 0x180   : > { %v1759_v10 = vld [vmem:[%s2864_s23 + $0x30] sm:$0xff] (%p2383_p6) }
 0x181   : > { %1760 = vst [vmem:[%s1734_s27 + $0x60] sm:$0xff] (%p2383_p6), %v1759_v10 }
 0x19f   : > { %v1502_v15 = vpop.f32.mrf.mxu0 }
 0x1a0   : > { %v1555_v16 = vpop.f32.mrf.mxu1 }
 0x1a1   : > { %v1556_v20 = vadd.f32 %v1555_v16, %v1502_v15  ;;  %v1504_v21 = vpop.f32.mrf.mxu0 }
 0x1a2   : > { %v1557_v23 = vpop.f32.mrf.mxu1 }
 0x1a3   : > { %v1598_v24 = vmul.f32 %v2854_v14, %v1556_v20  ;;  %v1558_v25 = vadd.f32 %v1557_v23, %v1504_v21  ;;  %v1506_v22 = vpop.f32.mrf.mxu0 }
 0x1a4   : > { %v1559_v28 = vpop.f32.mrf.mxu1 }
 0x1a5   : > { %v1636_v26 = vadd.f32 %v2856_v17, %v1598_v24  ;;  %v1599_v27 = vmul.f32 %v2858_v18, %v1558_v25  ;;  %v1560_v29 = vadd.f32 %v1559_v28, %v1506_v22  ;;  %v1508_v30 = vpop.f32.mrf.mxu0 }
 0x1a6   : > { %v1561_v31 = vpop.f32.mrf.mxu1 }
 0x1a7   : > { %v1637_v32 = vadd.f32 %v2860_v19, %v1599_v27  ;;  %v1602_v33 = vmul.f32 %v2854_v14, %v1560_v29  ;;  %v1562_v34 = vadd.f32 %v1561_v31, %v1508_v30  ;;  %v1652_v35 = vmax.f32 %v1636_v26, 0.0  ;;  %v1512_v36 = vpop.f32.mrf.mxu0 }
 0x1a8   : > { %v1565_v37 = vpop.f32.mrf.mxu1 }
 0x1a9   : > { %v1653_v0 = vmax.f32 %v1637_v32, 0.0  ;;  %v1640_v38 = vadd.f32 %v2856_v17, %v1602_v33  ;;  %v1603_v39 = vmul.f32 %v2858_v18, %v1562_v34  ;;  %v1566_v40 = vadd.f32 %v1565_v37, %v1512_v36  ;;  %v1514_v1 = vpop.f32.mrf.mxu0 }
 0x1aa   : > { %v1567_v41 = vpop.f32.mrf.mxu1 }
 0x1ab   : > { %v2031_v42 = vpack.c.bf16 %v1653_v0, %v1652_v35  ;;  %v1641_v43 = vadd.f32 %v2860_v19, %v1603_v39  ;;  %v1606_v44 = vmul.f32 %v2854_v14, %v1566_v40  ;;  %v1568_v45 = vadd.f32 %v1567_v41, %v1514_v1  ;;  %v1516_v46 = vpop.f32.mrf.mxu0 }
 0x1ac   : > { %v1569_v47 = vpop.f32.mrf.mxu1  ;;  %v1656_v48 = vmax.f32 %v1640_v38, 0.0 }
 0x1ad   : > { %1715 = vst [vmem:[%s2864_s23 + $0x8] sm:$0xff] %v2031_v42  ;;  %v1657_v49 = vmax.f32 %v1641_v43, 0.0  ;;  %v1644_v50 = vadd.f32 %v2856_v17, %v1606_v44  ;;  %v1570_v51 = vadd.f32 %v1569_v47, %v1516_v46  ;;  %v1607_v52 = vmul.f32 %v2858_v18, %v1568_v45  ;;  %v1518_v53 = vpop.f32.mrf.mxu0 }
 0x1ae   : > { %v1571_v54 = vpop.f32.mrf.mxu1 }
 0x1af   : > { %v2033_v55 = vpack.c.bf16 %v1657_v49, %v1656_v48  ;;  %v1610_v56 = vmul.f32 %v2854_v14, %v1570_v51  ;;  %v1572_v57 = vadd.f32 %v1571_v54, %v1518_v53  ;;  %v1645_v58 = vadd.f32 %v2860_v19, %v1607_v52  ;;  %v1747_v14 = vld [vmem:[%s2864_s23] sm:$0xff] (%p2383_p6) }
 0x1b0   : > { %v1660_v61 = vmax.f32 %v1644_v50, 0.0  ;;  %1748 = vst [vmem:[%s1734_s27] sm:$0xff] (%p2383_p6), %v1747_v14 }
 0x1b1   : > { %1717 = vst [vmem:[%s2864_s23 + $0x18] sm:$0xff] %v2033_v55  ;;  %v1648_v59 = vadd.f32 %v2856_v17, %v1610_v56  ;;  %v1611_v60 = vmul.f32 %v2858_v18, %v1572_v57  ;;  %v1661_v62 = vmax.f32 %v1645_v58, 0.0  ;;  %v1751_v18 = vld [vmem:[%s2864_s23 + $0x10] sm:$0xff] (%p2383_p6) }
 0x1b2   : > { %1752 = vst [vmem:[%s1734_s27 + $0x20] sm:$0xff] (%p2383_p6), %v1751_v18 }
 0x1b3   : > { %v1649_v63 = vadd.f32 %v2860_v19, %v1611_v60  ;;  %v2035_v2 = vpack.c.bf16 %v1661_v62, %v1660_v61  ;;  %v1664_v3 = vmax.f32 %v1648_v59, 0.0 }
 0x1b4   : > { %v1749_v17 = vld [vmem:[%s2864_s23 + $0x8] sm:$0xff] (%p2383_p6) }
 0x1b5   : > { %v1665_v4 = vmax.f32 %v1649_v63, 0.0  ;;  %1719 = vst [vmem:[%s2864_s23 + $0x28] sm:$0xff] %v2035_v2  ;;  %1728 = sbr.rel (!%p2383_p6) target bundleno = 450 (0x1c2), region = 63  ;;  %1750 = vst [vmem:[%s1734_s27 + $0x8] sm:$0xff] (%p2383_p6), %v1749_v17 }
 0x1b7   : > { %v2037_v5 = vpack.c.bf16 %v1665_v4, %v1664_v3 }
 0x1b8   : > { %v1753_v19 = vld [vmem:[%s2864_s23 + $0x18] sm:$0xff] (%p2383_p6) }
 0x1b9   : > { %1721 = vst [vmem:[%s2864_s23 + $0x38] sm:$0xff] %v2037_v5  ;;  %1754 = vst [vmem:[%s1734_s27 + $0x28] sm:$0xff] (%p2383_p6), %v1753_v19 }
 0x1bc   : > { %v1757_v9 = vld [vmem:[%s2864_s23 + $0x28] sm:$0xff] }
 0x1bd   : > { %1758 = vst [vmem:[%s1734_s27 + $0x48] sm:$0xff] %v1757_v9 }
 0x1c0   : > { %v1761_v11 = vld [vmem:[%s2864_s23 + $0x38] sm:$0xff] }
 0x1c1   : > { %1762 = vst [vmem:[%s1734_s27 + $0x68] sm:$0xff] %v1761_v11 }
 0x1c2 PF: > { %s14_s19 = sadd.s32 1, %s2321_s19   ;;  %s2925_s15 = smov %s2309_s16 }
 0x1c3   : > { %p11_p12 = scmp.ge.s32.totalorder %s14_s19, 4   ;;  %s2926_s16 = smov %s2388_s25 }
 0x1c4   : > { %s2927_s17 = smov %s2317_s18  ;;  %s2928_s18 = smov %s2930_s20 }
 0x1c5   :  { %13 = sbr.rel (!%p11_p12) target bundleno = 3 (0x3), region = 126 }

// kernel: _lambda_.11
= control target key start
LH: loop header
LB: loop body
LE: loop exit
PB: predicated region body
PF: predicated region fallthrough
CT: control target
= control target key end

     0   :  { %s2486_s0 = inlined_call_operand.vmem [shape: f32[8,2048], index: 0, kind: input, shape index: {}]   ;;  %s2487_s1 = inlined_call_operand.vmem [shape: bf16[2048,128], index: 1, kind: input, shape index: {}]   ;;  %s2488_s2 = inlined_call_operand.vmem [shape: f32[1,128], index: 2, kind: input, shape index: {}]   ;;  %s2489_s3 = inlined_call_operand.hbm [shape: f32[8,128], index: 3, kind: output, shape index: {}]  }
   0x1   :  { %v1957_v0 = vld [vmem:[%s2486_s0] sm:$0xff]  ;;  %v1962_v1 = vld [vmem:[%s2486_s0 + $0x8] sm:$0xff]  ;;  %v1967_v2 = vld [vmem:[%s2486_s0 + $0x10] sm:$0xff] }
   0x2   :  { %v1972_v3 = vld [vmem:[%s2486_s0 + $0x18] sm:$0xff]  ;;  %v32_v4 = vmul.f32 %v1957_v0, %v1957_v0  ;;  %v33_v5 = vmul.f32 %v1962_v1, %v1962_v1  ;;  %v34_v6 = vmul.f32 %v1967_v2, %v1967_v2  ;;  %v1983_v7 = vld [vmem:[%s2486_s0 + $0x20] sm:$0xff]  ;;  %v1990_v10 = vld [vmem:[%s2486_s0 + $0x28] sm:$0xff] }
   0x3   :  { %v35_v8 = vmul.f32 %v1972_v3, %v1972_v3  ;;  %v1995_v11 = vld [vmem:[%s2486_s0 + $0x30] sm:$0xff]  ;;  %v36_v12 = vmul.f32 %v1983_v7, %v1983_v7  ;;  %v2002_v14 = vld [vmem:[%s2486_s0 + $0x38] sm:$0xff]  ;;  %v37_v16 = vmul.f32 %v1990_v10, %v1990_v10  ;;  %v2015_v19 = vld [vmem:[%s2486_s0 + $0x40] sm:$0xff] }
   0x4   :  { %v48_v9 = vadd.f32 %v33_v5, %v32_v4  ;;  %v1777_v15 = vld [vmem:[%s2487_s1 + $0x78] sm:$0xff]   ;;  %v38_v21 = vmul.f32 %v1995_v11, %v1995_v11  ;;  %v2028_v24 = vld [vmem:[%s2486_s0 + $0x48] sm:$0xff]  ;;  %v1781_v25 = vld [vmem:[%s2487_s1 + $0x70] sm:$0xff]   ;;  %v39_v26 = vmul.f32 %v2002_v14, %v2002_v14  ;;  %v40_v31 = vmul.f32 %v2015_v19, %v2015_v19 }
   0x5   :  { %v1778_v18 = vld [vmem:[%s2487_s1 + $0xf8] sm:$0xff]   ;;  %1600 = vmatprep.subr.bf16.mxu0 %v1777_v15  ;;  %v1782_v28 = vld [vmem:[%s2487_s1 + $0xf0] sm:$0xff]   ;;  %v1785_v35 = vld [vmem:[%s2487_s1 + $0x68] sm:$0xff]   ;;  %v41_v36 = vmul.f32 %v2028_v24, %v2028_v24 }
   0x6   :  { %v49_v13 = vadd.f32 %v48_v9, %v34_v6  ;;  %v1779_v20 = vld [vmem:[%s2487_s1 + $0x38] sm:$0xff]   ;;  %1622 = vmatprep.subr.bf16.mxu1 %v1778_v18  ;;  %v2041_v29 = vld [vmem:[%s2486_s0 + $0x50] sm:$0xff]  ;;  %v1786_v38 = vld [vmem:[%s2487_s1 + $0xe8] sm:$0xff]  }
   0x7   :  { %v1780_v23 = vld [vmem:[%s2487_s1 + $0xb8] sm:$0xff]   ;;  %1601 = vmatpush3.bf16.msra.mxu0 %v1779_v20  ;;  %v1783_v30 = vld [vmem:[%s2487_s1 + $0x30] sm:$0xff]   ;;  %v28_v39 = vld [vmem:[%s2486_s0 + $0x60] sm:$0xff]  ;;  %v42_v41 = vmul.f32 %v2041_v29, %v2041_v29 }
   0x8   :  { %v50_v17 = vadd.f32 %v49_v13, %v35_v8  ;;  %1623 = vmatpush3.bf16.msra.mxu1 %v1780_v23  ;;  %1602 = vmatprep.subr.bf16.mxu0 %v1781_v25  ;;  %v1784_v33 = vld [vmem:[%s2487_s1 + $0xb0] sm:$0xff]   ;;  %v2054_v34 = vld [vmem:[%s2486_s0 + $0x58] sm:$0xff]  ;;  %v1787_v40 = vld [vmem:[%s2487_s1 + $0x28] sm:$0xff]   ;;  %v44_v48 = vmul.f32 %v28_v39, %v28_v39 }
   0x9   :  { %1624 = vmatprep.subr.bf16.mxu1 %v1782_v28  ;;  %v1788_v43 = vld [vmem:[%s2487_s1 + $0xa8] sm:$0xff]   ;;  %v43_v45 = vmul.f32 %v2054_v34, %v2054_v34  ;;  %v30_v47 = vld [vmem:[%s2486_s0 + $0x70] sm:$0xff]  ;;  %v2088_v50 = vld [vmem:[%s2486_s0 + $0x78] sm:$0xff] }
   0xa   :  { %v51_v22 = vadd.f32 %v50_v17, %v36_v12  ;;  %v2078_v44 = vld [vmem:[%s2486_s0 + $0x68] sm:$0xff]  ;;  %v46_v53 = vmul.f32 %v30_v47, %v30_v47  ;;  %v47_v55 = vmul.f32 %v2088_v50, %v2088_v50  ;;  %v1789_v59 = vld [vmem:[%s2487_s1 + $0x60] sm:$0xff]   ;;  %v1793_v63 = vld [vmem:[%s2487_s1 + $0x58] sm:$0xff]  }
   0xb   :  { %1603 = vmatpush3.bf16.msra.mxu0 %v1783_v30  ;;  %v45_v51 = vmul.f32 %v2078_v44, %v2078_v44  ;;  %v1790_v60 = vld [vmem:[%s2487_s1 + $0xe0] sm:$0xff]   ;;  %v1794_v4 = vld [vmem:[%s2487_s1 + $0xd8] sm:$0xff]   ;;  %v1797_v8 = vld [vmem:[%s2487_s1 + $0x50] sm:$0xff]  }
   0xc   :  { %v52_v27 = vadd.f32 %v51_v22, %v37_v16  ;;  %1625 = vmatpush3.bf16.msra.mxu1 %v1784_v33  ;;  %1604 = vmatprep.subr.bf16.mxu0 %v1785_v35  ;;  %v1791_v61 = vld [vmem:[%s2487_s1 + $0x20] sm:$0xff]   ;;  %v1795_v5 = vld [vmem:[%s2487_s1 + $0x18] sm:$0xff]   ;;  %v1798_v9 = vld [vmem:[%s2487_s1 + $0xd0] sm:$0xff]  }
   0xd   :  { %1626 = vmatprep.subr.bf16.mxu1 %v1786_v38  ;;  %v1792_v62 = vld [vmem:[%s2487_s1 + $0xa0] sm:$0xff]   ;;  %v1796_v6 = vld [vmem:[%s2487_s1 + $0x98] sm:$0xff]   ;;  %v1799_v12 = vld [vmem:[%s2487_s1 + $0x10] sm:$0xff]  }
   0xe   :  { %v53_v32 = vadd.f32 %v52_v27, %v38_v21  ;;  %v1800_v13 = vld [vmem:[%s2487_s1 + $0x90] sm:$0xff]   ;;  %v1801_v15 = vld [vmem:[%s2487_s1 + $0x48] sm:$0xff]   ;;  %v1805_v20 = vld [vmem:[%s2487_s1 + $0x40] sm:$0xff]  }
   0xf   :  { %1605 = vmatpush3.bf16.msra.mxu0 %v1787_v40  ;;  %v1802_v16 = vld [vmem:[%s2487_s1 + $0xc8] sm:$0xff]   ;;  %v1806_v21 = vld [vmem:[%s2487_s1 + $0xc0] sm:$0xff]   ;;  %v1809_v25 = vld [vmem:[%s2487_s1 + $0x178] sm:$0xff]  }
  0x10   :  { %v54_v37 = vadd.f32 %v53_v32, %v39_v26  ;;  %1627 = vmatpush3.bf16.msra.mxu1 %v1788_v43  ;;  %1606 = vmatprep.subr.bf16.mxu0 %v1789_v59  ;;  %v1803_v17 = vld [vmem:[%s2487_s1 + $0x8] sm:$0xff]   ;;  %v1807_v22 = vld [vmem:[%s2487_s1] sm:$0xff]   ;;  %v1810_v26 = vld [vmem:[%s2487_s1 + $0x1f8] sm:$0xff]  }
  0x11   :  { %1628 = vmatprep.subr.bf16.mxu1 %v1790_v60  ;;  %v1804_v18 = vld [vmem:[%s2487_s1 + $0x88] sm:$0xff]   ;;  %v1808_v23 = vld [vmem:[%s2487_s1 + $0x80] sm:$0xff]  }
  0x12   :  { %v55_v42 = vadd.f32 %v54_v37, %v40_v31 }
  0x13   :  { %1607 = vmatpush3.bf16.msra.mxu0 %v1791_v61 }
  0x14   :  { %v56_v46 = vadd.f32 %v55_v42, %v41_v36  ;;  %1629 = vmatpush3.bf16.msra.mxu1 %v1792_v62  ;;  %1608 = vmatprep.subr.bf16.mxu0 %v1793_v63 }
  0x15   :  { %1630 = vmatprep.subr.bf16.mxu1 %v1794_v4 }
  0x16   :  { %v57_v49 = vadd.f32 %v56_v46, %v42_v41 }
  0x17   :  { %1609 = vmatpush3.bf16.msra.mxu0 %v1795_v5 }
  0x18   :  { %v58_v52 = vadd.f32 %v57_v49, %v43_v45  ;;  %1631 = vmatpush3.bf16.msra.mxu1 %v1796_v6  ;;  %1610 = vmatprep.subr.bf16.mxu0 %v1797_v8 }
  0x19   :  { %1632 = vmatprep.subr.bf16.mxu1 %v1798_v9 }
  0x1a   :  { %v59_v54 = vadd.f32 %v58_v52, %v44_v48 }
  0x1b   :  { %1611 = vmatpush3.bf16.msra.mxu0 %v1799_v12 }
  0x1c   :  { %v60_v56 = vadd.f32 %v59_v54, %v45_v51  ;;  %1633 = vmatpush3.bf16.msra.mxu1 %v1800_v13  ;;  %1612 = vmatprep.subr.bf16.mxu0 %v1801_v15 }
  0x1d   :  { %1634 = vmatprep.subr.bf16.mxu1 %v1802_v16 }
  0x1e   :  { %v61_v57 = vadd.f32 %v60_v56, %v46_v53 }
  0x1f   :  { %1613 = vmatpush3.bf16.msra.mxu0 %v1803_v17 }
  0x20   :  { %v62_v58 = vadd.f32 %v61_v57, %v47_v55  ;;  %1635 = vmatpush3.bf16.msra.mxu1 %v1804_v18  ;;  %1614 = vmatprep.subr.bf16.mxu0 %v1805_v20 }
  0x21   :  { %1636 = vmatprep.subr.bf16.mxu1 %v1806_v21 }
  0x22   :  { %63 = vadd.xlane.f32.xlu0 %v62_v58 }
  0x23   :  { %1615 = vmatpush3.bf16.msra.mxu0 %v1807_v22 }
  0x24   :  { %1637 = vmatpush3.bf16.msra.mxu1 %v1808_v23  ;;  %1644 = vmatprep.subr.bf16.mxu0 %v1809_v25 }
  0x25   :  { %1666 = vmatprep.subr.bf16.mxu1 %v1810_v26 }
  0x26   :  { %8 = vsyncpa [#allocation3], 0  ;;  %v1815_v42 = vld [vmem:[%s2487_s1 + $0x130] sm:$0xff]   ;;  %v1817_v45 = vld [vmem:[%s2487_s1 + $0x168] sm:$0xff]  }
  0x27   :  { %v1816_v43 = vld [vmem:[%s2487_s1 + $0x1b0] sm:$0xff]   ;;  %v1818_v46 = vld [vmem:[%s2487_s1 + $0x1e8] sm:$0xff]   ;;  %v1821_v49 = vld [vmem:[%s2487_s1 + $0x160] sm:$0xff]  }
  0x28   :  { %v1819_v47 = vld [vmem:[%s2487_s1 + $0x128] sm:$0xff]   ;;  %v1822_v51 = vld [vmem:[%s2487_s1 + $0x1e0] sm:$0xff]   ;;  %v1825_v54 = vld [vmem:[%s2487_s1 + $0x158] sm:$0xff]  }
  0x29   :  { %v1820_v48 = vld [vmem:[%s2487_s1 + $0x1a8] sm:$0xff]   ;;  %v1823_v52 = vld [vmem:[%s2487_s1 + $0x120] sm:$0xff]   ;;  %v1826_v55 = vld [vmem:[%s2487_s1 + $0x1d8] sm:$0xff]  }
  0x2a   :  { %v1824_v53 = vld [vmem:[%s2487_s1 + $0x1a0] sm:$0xff]   ;;  %v1827_v56 = vld [vmem:[%s2487_s1 + $0x118] sm:$0xff]   ;;  %v1829_v58 = vld [vmem:[%s2487_s1 + $0x150] sm:$0xff]  }
  0x2b   :  { %v1828_v57 = vld [vmem:[%s2487_s1 + $0x198] sm:$0xff]   ;;  %v1830_v59 = vld [vmem:[%s2487_s1 + $0x1d0] sm:$0xff]   ;;  %v1833_v62 = vld [vmem:[%s2487_s1 + $0x148] sm:$0xff]  }
  0x2c   :  { %v1831_v60 = vld [vmem:[%s2487_s1 + $0x110] sm:$0xff]   ;;  %v1834_v63 = vld [vmem:[%s2487_s1 + $0x1c8] sm:$0xff]   ;;  %v1837_v6 = vld [vmem:[%s2487_s1 + $0x140] sm:$0xff]  }
  0x2d   :  { %v1832_v61 = vld [vmem:[%s2487_s1 + $0x190] sm:$0xff]   ;;  %v1835_v4 = vld [vmem:[%s2487_s1 + $0x108] sm:$0xff]   ;;  %v1838_v8 = vld [vmem:[%s2487_s1 + $0x1c0] sm:$0xff]  }
  0x2e   :  { %v1836_v5 = vld [vmem:[%s2487_s1 + $0x188] sm:$0xff]   ;;  %v1839_v9 = vld [vmem:[%s2487_s1 + $0x100] sm:$0xff]   ;;  %v1841_v16 = vld [vmem:[%s2487_s1 + $0x278] sm:$0xff]  }
  0x2f   :  { %v1840_v12 = vld [vmem:[%s2487_s1 + $0x180] sm:$0xff]   ;;  %v1842_v17 = vld [vmem:[%s2487_s1 + $0x2f8] sm:$0xff]   ;;  %v1847_v26 = vld [vmem:[%s2487_s1 + $0x230] sm:$0xff]  }
  0x30   :  { %v1844_v22 = vld [vmem:[%s2487_s1 + $0x2b8] sm:$0xff]  }
  0xab   :  { %v64_v27 = vpop.xlane.xlu0 %63 }
  0xac   :  { %v65_v28 = vadd.f32 1e-12, %v64_v27  ;;  %v1848_v27 = vld [vmem:[%s2487_s1 + $0x2b0] sm:$0xff]  }
  0xae   :  { %1905 = vrsqrt.f32 %v65_v28  ;;  %v1849_v28 = vld [vmem:[%s2487_s1 + $0x268] sm:$0xff]  }
  0xbb   :  { %v2160_v30 = vpop.eup %1905 }
  0xbc   :  { %v68_v31 = vmul.f32 %v2160_v30, %v1962_v1  ;;  %v70_v32 = vmul.f32 %v2160_v30, %v1972_v3  ;;  %v67_v33 = vmul.f32 %v2160_v30, %v1957_v0  ;;  %v69_v35 = vmul.f32 %v2160_v30, %v1967_v2  ;;  %v1811_v1 = vld [vmem:[%s2487_s1 + $0x138] sm:$0xff]   ;;  %v1813_v2 = vld [vmem:[%s2487_s1 + $0x170] sm:$0xff]  }
  0xbd   :  { %v72_v36 = vmul.f32 %v2160_v30, %v1990_v10  ;;  %v74_v37 = vmul.f32 %v2160_v30, %v2002_v14  ;;  %v1812_v0 = vld [vmem:[%s2487_s1 + $0x1b8] sm:$0xff]   ;;  %v1814_v3 = vld [vmem:[%s2487_s1 + $0x1f0] sm:$0xff]   ;;  %v71_v13 = vmul.f32 %v2160_v30, %v1983_v7  ;;  %v73_v15 = vmul.f32 %v2160_v30, %v1995_v11 }
  0xbe   :  { %v84_v38 = vpack.c.bf16 %v68_v31, %v68_v31  ;;  %v86_v39 = vpack.c.bf16 %v70_v32, %v70_v32  ;;  %v83_v40 = vpack.c.bf16 %v67_v33, %v67_v33  ;;  %v85_v41 = vpack.c.bf16 %v69_v35, %v69_v35  ;;  %v1843_v7 = vld [vmem:[%s2487_s1 + $0x238] sm:$0xff]   ;;  %v1850_v31 = vld [vmem:[%s2487_s1 + $0x2e8] sm:$0xff]   ;;  %v1853_v35 = vld [vmem:[%s2487_s1 + $0x260] sm:$0xff]  }
  0xbf   :  { %v88_v10 = vpack.c.bf16 %v72_v36, %v72_v36  ;;  %v90_v14 = vpack.c.bf16 %v74_v37, %v74_v37  ;;  %v76_v18 = vmul.f32 %v2160_v30, %v2028_v24  ;;  %v78_v20 = vmul.f32 %v2160_v30, %v2054_v34  ;;  %v1845_v24 = vld [vmem:[%s2487_s1 + $0x270] sm:$0xff]   ;;  %v1851_v32 = vld [vmem:[%s2487_s1 + $0x228] sm:$0xff]   ;;  %v1854_v36 = vld [vmem:[%s2487_s1 + $0x2e0] sm:$0xff]  }
  0xc0   :  { %1162 = vmatprep.mubr.bf16.mxu0 %v84_v38  ;;  %1202 = vmatprep.mubr.bf16.mxu1 %v86_v39  ;;  %v87_v11 = vpack.c.bf16 %v71_v13, %v71_v13  ;;  %v89_v21 = vpack.c.bf16 %v73_v15, %v73_v15  ;;  %v1846_v34 = vld [vmem:[%s2487_s1 + $0x2f0] sm:$0xff]   ;;  %v1852_v33 = vld [vmem:[%s2487_s1 + $0x2a8] sm:$0xff]   ;;  %v1855_v37 = vld [vmem:[%s2487_s1 + $0x220] sm:$0xff]  }
  0xc1   :  { %1163 = vmatmul.mubr.bf16.vlgmr.msra.gmra.mxu0 %v83_v40  ;;  %1203 = vmatmul.mubr.bf16.vlgmr.msra.gmra.mxu1 %v85_v41  ;;  %v92_v23 = vpack.c.bf16 %v76_v18, %v76_v18  ;;  %v94_v25 = vpack.c.bf16 %v78_v20, %v78_v20  ;;  %v1856_v38 = vld [vmem:[%s2487_s1 + $0x2a0] sm:$0xff]   ;;  %v1857_v39 = vld [vmem:[%s2487_s1 + $0x258] sm:$0xff]   ;;  %v1893_v20 = vld [vmem:[%s2487_s1 + $0x350] sm:$0xff]  }
  0xc2   :  { %1645 = vmatpush3.bf16.msra.mxu0 %v1811_v1  ;;  %1667 = vmatpush3.bf16.msra.mxu1 %v1812_v0  ;;  %v1858_v40 = vld [vmem:[%s2487_s1 + $0x2d8] sm:$0xff]   ;;  %v1861_v0 = vld [vmem:[%s2487_s1 + $0x250] sm:$0xff]   ;;  %v1888_v13 = vld [vmem:[%s2487_s1 + $0x3a0] sm:$0xff]  }
  0xc3   :  { %1242 = vmatprep.mubr.bf16.mxu0 %v88_v10  ;;  %1282 = vmatprep.mubr.bf16.mxu1 %v90_v14  ;;  %v1859_v41 = vld [vmem:[%s2487_s1 + $0x218] sm:$0xff]   ;;  %v1864_v10 = vld [vmem:[%s2487_s1 + $0x290] sm:$0xff]   ;;  %v1865_v14 = vld [vmem:[%s2487_s1 + $0x248] sm:$0xff]  }
  0xc4   :  { %1646 = vmatprep.subr.bf16.mxu0 %v1813_v2  ;;  %1668 = vmatprep.subr.bf16.mxu1 %v1814_v3  ;;  %v1860_v1 = vld [vmem:[%s2487_s1 + $0x298] sm:$0xff]   ;;  %v1862_v2 = vld [vmem:[%s2487_s1 + $0x2d0] sm:$0xff]  }
  0xc5   :  { %v1863_v3 = vld [vmem:[%s2487_s1 + $0x210] sm:$0xff]   ;;  %v1889_v15 = vld [vmem:[%s2487_s1 + $0x358] sm:$0xff]  }
  0xc6   :  { %1647 = vmatpush3.bf16.msra.mxu0 %v1815_v42  ;;  %1669 = vmatpush3.bf16.msra.mxu1 %v1816_v43  ;;  %v1866_v42 = vld [vmem:[%s2487_s1 + $0x2c8] sm:$0xff]   ;;  %v1892_v18 = vld [vmem:[%s2487_s1 + $0x398] sm:$0xff]  }
  0xc7   :  { %1648 = vmatprep.subr.bf16.mxu0 %v1817_v45  ;;  %1670 = vmatprep.subr.bf16.mxu1 %v1818_v46  ;;  %v1867_v43 = vld [vmem:[%s2487_s1 + $0x208] sm:$0xff]   ;;  %v1869_v46 = vld [vmem:[%s2487_s1 + $0x240] sm:$0xff]  }
  0xc8   :  { %v1868_v45 = vld [vmem:[%s2487_s1 + $0x288] sm:$0xff]  }
  0xca   :  { %1649 = vmatpush3.bf16.msra.mxu0 %v1819_v47  ;;  %1671 = vmatpush3.bf16.msra.mxu1 %v1820_v48  ;;  %v1870_v47 = vld [vmem:[%s2487_s1 + $0x2c0] sm:$0xff]  }
  0xcb   :  { %1650 = vmatprep.subr.bf16.mxu0 %v1821_v49  ;;  %1672 = vmatprep.subr.bf16.mxu1 %v1822_v51  ;;  %v1871_v48 = vld [vmem:[%s2487_s1 + $0x200] sm:$0xff]   ;;  %v75_v51 = vmul.f32 %v2160_v30, %v2015_v19  ;;  %v1875_v19 = vld [vmem:[%s2487_s1 + $0x338] sm:$0xff]  }
  0xcc   :  { %v1872_v49 = vld [vmem:[%s2487_s1 + $0x280] sm:$0xff]  }
  0xce   :  { %1651 = vmatpush3.bf16.msra.mxu0 %v1823_v52  ;;  %1673 = vmatpush3.bf16.msra.mxu1 %v1824_v53  ;;  %v1873_v52 = vld [vmem:[%s2487_s1 + $0x378] sm:$0xff]   ;;  %v77_v53 = vmul.f32 %v2160_v30, %v2041_v29 }
  0xcf   :  { %1652 = vmatprep.subr.bf16.mxu0 %v1825_v54  ;;  %1674 = vmatprep.subr.bf16.mxu1 %v1826_v55  ;;  %v1874_v54 = vld [vmem:[%s2487_s1 + $0x3f8] sm:$0xff]   ;;  %v80_v55 = vmul.f32 %v2160_v30, %v2078_v44  ;;  %v1877_v44 = vld [vmem:[%s2487_s1 + $0x370] sm:$0xff]  }
  0xd0   :  { %v1876_v29 = vld [vmem:[%s2487_s1 + $0x3b8] sm:$0xff]  }
  0xd2   :  { %1653 = vmatpush3.bf16.msra.mxu0 %v1827_v56  ;;  %1675 = vmatpush3.bf16.msra.mxu1 %v1828_v57  ;;  %v82_v56 = vmul.f32 %v2160_v30, %v2088_v50  ;;  %v91_v57 = vpack.c.bf16 %v75_v51, %v75_v51 }
  0xd3   :  { %1654 = vmatprep.subr.bf16.mxu0 %v1829_v58  ;;  %1676 = vmatprep.subr.bf16.mxu1 %v1830_v59  ;;  %v93_v58 = vpack.c.bf16 %v77_v53, %v77_v53  ;;  %v96_v59 = vpack.c.bf16 %v80_v55, %v80_v55 }
  0xd4   :  { %v98_v50 = vpack.c.bf16 %v82_v56, %v82_v56 }
  0xd6   :  { %1655 = vmatpush3.bf16.msra.mxu0 %v1831_v60  ;;  %1677 = vmatpush3.bf16.msra.mxu1 %v1832_v61  ;;  %v1878_v60 = vld [vmem:[%s2487_s1 + $0x3f0] sm:$0xff]  }
  0xd7   :  { %1656 = vmatprep.subr.bf16.mxu0 %v1833_v62  ;;  %1678 = vmatprep.subr.bf16.mxu1 %v1834_v63  ;;  %v1879_v61 = vld [vmem:[%s2487_s1 + $0x330] sm:$0xff]   ;;  %v1881_v63 = vld [vmem:[%s2487_s1 + $0x368] sm:$0xff]  }
  0xd8   :  { %v1880_v62 = vld [vmem:[%s2487_s1 + $0x3b0] sm:$0xff]  }
  0xda   :  { %1657 = vmatpush3.bf16.msra.mxu0 %v1835_v4  ;;  %1679 = vmatpush3.bf16.msra.mxu1 %v1836_v5  ;;  %v1882_v4 = vld [vmem:[%s2487_s1 + $0x3e8] sm:$0xff]  }
  0xdb   :  { %1658 = vmatprep.subr.bf16.mxu0 %v1837_v6  ;;  %1680 = vmatprep.subr.bf16.mxu1 %v1838_v8  ;;  %v1883_v5 = vld [vmem:[%s2487_s1 + $0x328] sm:$0xff]   ;;  %v1885_v8 = vld [vmem:[%s2487_s1 + $0x360] sm:$0xff]  }
  0xdc   :  { %v1884_v6 = vld [vmem:[%s2487_s1 + $0x3a8] sm:$0xff]  }
  0xde   :  { %1659 = vmatpush3.bf16.msra.mxu0 %v1839_v9  ;;  %1681 = vmatpush3.bf16.msra.mxu1 %v1840_v12  ;;  %v1886_v9 = vld [vmem:[%s2487_s1 + $0x3e0] sm:$0xff]  }
  0xdf   :  { %1688 = vmatprep.subr.bf16.mxu0 %v1841_v16  ;;  %1710 = vmatprep.subr.bf16.mxu1 %v1842_v17  ;;  %v1887_v12 = vld [vmem:[%s2487_s1 + $0x320] sm:$0xff]   ;;  %v1890_v16 = vld [vmem:[%s2487_s1 + $0x3d8] sm:$0xff]  }
  0xe0   :  { %v1891_v17 = vld [vmem:[%s2487_s1 + $0x318] sm:$0xff]  }
  0xe1   :  { %1243 = vmatmul.mubr.bf16.vlgmr.msra.gmra.mxu0 %v87_v11  ;;  %1283 = vmatmul.mubr.bf16.vlgmr.msra.gmra.mxu1 %v89_v21  ;;  %v1895_v11 = vld [vmem:[%s2487_s1 + $0x310] sm:$0xff]  }
  0xe2   :  { %1689 = vmatpush3.bf16.msra.mxu0 %v1843_v7  ;;  %1322 = vmatprep.mubr.bf16.mxu0 %v92_v23  ;;  %v1894_v7 = vld [vmem:[%s2487_s1 + $0x3d0] sm:$0xff]   ;;  %v1898_v23 = vld [vmem:[%s2487_s1 + $0x3c8] sm:$0xff]  }
  0xe3   :  { %1711 = vmatpush3.bf16.msra.mxu1 %v1844_v22  ;;  %1362 = vmatprep.mubr.bf16.mxu1 %v94_v25  ;;  %v1896_v21 = vld [vmem:[%s2487_s1 + $0x390] sm:$0xff]   ;;  %v1897_v22 = vld [vmem:[%s2487_s1 + $0x348] sm:$0xff]   ;;  %v1901_v25 = vld [vmem:[%s2487_s1 + $0x340] sm:$0xff]  }
  0xe4   :  { %1690 = vmatprep.subr.bf16.mxu0 %v1845_v24  ;;  %1712 = vmatprep.subr.bf16.mxu1 %v1846_v34  ;;  %v1899_v24 = vld [vmem:[%s2487_s1 + $0x308] sm:$0xff]  }
  0xe5   :  { %v1900_v34 = vld [vmem:[%s2487_s1 + $0x388] sm:$0xff]  }
  0xe6   :  { %1691 = vmatpush3.bf16.msra.mxu0 %v1847_v26  ;;  %v1902_v26 = vld [vmem:[%s2487_s1 + $0x3c0] sm:$0xff]  }
  0xe7   :  { %1713 = vmatpush3.bf16.msra.mxu1 %v1848_v27  ;;  %1692 = vmatprep.subr.bf16.mxu0 %v1849_v28  ;;  %v1903_v27 = vld [vmem:[%s2487_s1 + $0x300] sm:$0xff]  }
  0xe8   :  { %1714 = vmatprep.subr.bf16.mxu1 %v1850_v31  ;;  %v1904_v28 = vld [vmem:[%s2487_s1 + $0x380] sm:$0xff]  }
  0xe9   :  { %v1909_v31 = vld [vmem:[%s2486_s0 + $0x60] sm:$0xff] }
  0xea   :  { %1693 = vmatpush3.bf16.msra.mxu0 %v1851_v32  ;;  %v79_v32 = vmul.f32 %v1909_v31, %v2160_v30 }
  0xeb   :  { %1715 = vmatpush3.bf16.msra.mxu1 %v1852_v33  ;;  %1694 = vmatprep.subr.bf16.mxu0 %v1853_v35  ;;  %v1910_v33 = vld [vmem:[%s2486_s0 + $0x70] sm:$0xff]  ;;  %s1933_s0 = smov [#allocation2]  }
  0xec   :  { %1716 = vmatprep.subr.bf16.mxu1 %v1854_v36  ;;  %v81_v35 = vmul.f32 %v1910_v33, %v2160_v30  ;;  %v95_v36 = vpack.c.bf16 %v79_v32, %v79_v32 }
  0xee   :  { %1695 = vmatpush3.bf16.msra.mxu0 %v1855_v37  ;;  %v97_v37 = vpack.c.bf16 %v81_v35, %v81_v35 }
  0xef   :  { %1717 = vmatpush3.bf16.msra.mxu1 %v1856_v38  ;;  %1696 = vmatprep.subr.bf16.mxu0 %v1857_v39 }
  0xf0   :  { %1718 = vmatprep.subr.bf16.mxu1 %v1858_v40  ;;  %v1471_v40 = vld [vmem:[%s2488_s2] ss:$0 sm:$0xff]  ;;  %s1463_s2 = sshll.u32 %s1933_s0, 4  ;;  %s1464_s2 = int_to_ptr.vmem [resolvable:$true] %s1463_s2 }
  0xf1   :  { %s1911_s8 = scalar_lea.vmem %s1464_s2, 128  ;;  %p1916_p1 = scmp.lt.s32.totalorder %s1464_s2, %s1464_s2 }
  0xf2   :  { %1697 = vmatpush3.bf16.msra.mxu0 %v1859_v41  ;;  %p1912_p0 = scmp.ne.s32.totalorder %s1464_s2, %s1911_s8  ;;  %p1917_p2 = scmp.lt.s32.totalorder %s1911_s8, %s1911_s8 }
  0xf3   :  { %1719 = vmatpush3.bf16.msra.mxu1 %v1860_v1  ;;  %1698 = vmatprep.subr.bf16.mxu0 %v1861_v0 }
  0xf4   :  { %1720 = vmatprep.subr.bf16.mxu1 %v1862_v2  ;;  %p1918_p3 = por %p1917_p2, %p1916_p1 }
  0xf6   :  { %1699 = vmatpush3.bf16.msra.mxu0 %v1863_v3  ;;  %p1919_p4 = pnand %p1918_p3, %p1912_p0 }
  0xf7   :  { %1721 = vmatpush3.bf16.msra.mxu1 %v1864_v10  ;;  %1700 = vmatprep.subr.bf16.mxu0 %v1865_v14 }
  0xf8   :  { %1722 = vmatprep.subr.bf16.mxu1 %v1866_v42 }
  0xfa   :  { %1701 = vmatpush3.bf16.msra.mxu0 %v1867_v43 }
  0xfb   :  { %1723 = vmatpush3.bf16.msra.mxu1 %v1868_v45  ;;  %1702 = vmatprep.subr.bf16.mxu0 %v1869_v46 }
  0xfc   :  { %1724 = vmatprep.subr.bf16.mxu1 %v1870_v47 }
  0xfe   :  { %1703 = vmatpush3.bf16.msra.mxu0 %v1871_v48 }
  0xff   :  { %1725 = vmatpush3.bf16.msra.mxu1 %v1872_v49  ;;  %1732 = vmatprep.subr.bf16.mxu0 %v1873_v52 }
 0x100   :  { %1754 = vmatprep.subr.bf16.mxu1 %v1874_v54 }
 0x101   :  { %1323 = vmatmul.mubr.bf16.vlgmr.msra.gmra.mxu0 %v91_v57 }
 0x102   :  { %1363 = vmatmul.mubr.bf16.vlgmr.msra.gmra.mxu1 %v93_v58  ;;  %1733 = vmatpush3.bf16.msra.mxu0 %v1875_v19 }
 0x103   :  { %1402 = vmatprep.mubr.bf16.mxu0 %v96_v59  ;;  %1755 = vmatpush3.bf16.msra.mxu1 %v1876_v29 }
 0x104   :  { %1442 = vmatprep.mubr.bf16.mxu1 %v98_v50  ;;  %1734 = vmatprep.subr.bf16.mxu0 %v1877_v44 }
 0x105   :  { %1756 = vmatprep.subr.bf16.mxu1 %v1878_v60 }
 0x106   :  { %1735 = vmatpush3.bf16.msra.mxu0 %v1879_v61 }
 0x107   :  { %1757 = vmatpush3.bf16.msra.mxu1 %v1880_v62  ;;  %1736 = vmatprep.subr.bf16.mxu0 %v1881_v63 }
 0x108   :  { %1758 = vmatprep.subr.bf16.mxu1 %v1882_v4 }
 0x10a   :  { %1737 = vmatpush3.bf16.msra.mxu0 %v1883_v5 }
 0x10b   :  { %1759 = vmatpush3.bf16.msra.mxu1 %v1884_v6  ;;  %1738 = vmatprep.subr.bf16.mxu0 %v1885_v8 }
 0x10c   :  { %1760 = vmatprep.subr.bf16.mxu1 %v1886_v9 }
 0x10e   :  { %1739 = vmatpush3.bf16.msra.mxu0 %v1887_v12 }
 0x10f   :  { %1761 = vmatpush3.bf16.msra.mxu1 %v1888_v13  ;;  %1740 = vmatprep.subr.bf16.mxu0 %v1889_v15 }
 0x110   :  { %1762 = vmatprep.subr.bf16.mxu1 %v1890_v16 }
 0x112   :  { %1741 = vmatpush3.bf16.msra.mxu0 %v1891_v17 }
 0x113   :  { %1763 = vmatpush3.bf16.msra.mxu1 %v1892_v18  ;;  %1742 = vmatprep.subr.bf16.mxu0 %v1893_v20 }
 0x114   :  { %1764 = vmatprep.subr.bf16.mxu1 %v1894_v7 }
 0x116   :  { %1743 = vmatpush3.bf16.msra.mxu0 %v1895_v11 }
 0x117   :  { %1765 = vmatpush3.bf16.msra.mxu1 %v1896_v21  ;;  %1744 = vmatprep.subr.bf16.mxu0 %v1897_v22 }
 0x118   :  { %1766 = vmatprep.subr.bf16.mxu1 %v1898_v23 }
 0x11a   :  { %1745 = vmatpush3.bf16.msra.mxu0 %v1899_v24 }
 0x11b   :  { %1767 = vmatpush3.bf16.msra.mxu1 %v1900_v34  ;;  %1746 = vmatprep.subr.bf16.mxu0 %v1901_v25 }
 0x11c   :  { %1768 = vmatprep.subr.bf16.mxu1 %v1902_v26 }
 0x11e   :  { %1747 = vmatpush3.bf16.msra.mxu0 %v1903_v27 }
 0x11f   :  { %1769 = vmatpush3.bf16.msra.mxu1 %v1904_v28 }
 0x121   :  { %1403 = vmatmul.mubr.bf16.vlgmr.msra.gmra.mxu0 %v95_v36 }
 0x122   :  { %1443 = vmatmul.mubr.bf16.vlgmr.msra.gmra.mxu1 %v97_v37 }
 0x181   :  { %v1616_v38 = vpop.f32.mrf.mxu0  ;;  %v1638_v39 = vpop.f32.mrf.mxu1 }
 0x183   :  { %v1617_v41 = vpop.f32.mrf.mxu0  ;;  %v1639_v1 = vpop.f32.mrf.mxu1 }
 0x184   :  { %v1618_v0 = vadd.f32 %v1617_v41, %v1616_v38  ;;  %v1640_v2 = vadd.f32 %v1639_v1, %v1638_v39 }
 0x185   :  { %v1619_v3 = vpop.f32.mrf.mxu0  ;;  %v1641_v10 = vpop.f32.mrf.mxu1 }
 0x186   :  { %v1165_v14 = vadd.f32 %v1618_v0, %v1471_v40 }
 0x187   :  { %v1620_v30 = vpop.f32.mrf.mxu0  ;;  %v1642_v42 = vpop.f32.mrf.mxu1 }
 0x188   :  { %v1205_v43 = vadd.f32 %v1640_v2, %v1165_v14 }
 0x1a1   :  { %v1660_v45 = vpop.f32.mrf.mxu0  ;;  %v1682_v46 = vpop.f32.mrf.mxu1 }
 0x1a3   :  { %v1661_v47 = vpop.f32.mrf.mxu0  ;;  %v1683_v48 = vpop.f32.mrf.mxu1 }
 0x1a4   :  { %v1662_v59 = vadd.f32 %v1661_v47, %v1660_v45  ;;  %v1684_v50 = vadd.f32 %v1683_v48, %v1682_v46 }
 0x1a5   :  { %v1663_v49 = vpop.f32.mrf.mxu0  ;;  %v1685_v51 = vpop.f32.mrf.mxu1 }
 0x1a6   :  { %v1245_v60 = vadd.f32 %v1662_v59, %v1205_v43 }
 0x1a7   :  { %v1664_v52 = vpop.f32.mrf.mxu0  ;;  %v1686_v53 = vpop.f32.mrf.mxu1 }
 0x1a8   :  { %v1285_v62 = vadd.f32 %v1684_v50, %v1245_v60 }
 0x1c1   :  { %v1704_v54 = vpop.f32.mrf.mxu0 }
 0x1c2   :  { %v1726_v55 = vpop.f32.mrf.mxu1 }
 0x1c3   :  { %v1705_v19 = vpop.f32.mrf.mxu0 }
 0x1c4   :  { %v1727_v56 = vpop.f32.mrf.mxu1  ;;  %v1706_v61 = vadd.f32 %v1705_v19, %v1704_v54 }
 0x1c5   :  { %v1707_v57 = vpop.f32.mrf.mxu0  ;;  %v1728_v5 = vadd.f32 %v1727_v56, %v1726_v55 }
 0x1c6   :  { %v1729_v29 = vpop.f32.mrf.mxu1  ;;  %v1325_v63 = vadd.f32 %v1706_v61, %v1285_v62 }
 0x1c7   :  { %v1708_v58 = vpop.f32.mrf.mxu0 }
 0x1c8   :  { %v1730_v44 = vpop.f32.mrf.mxu1  ;;  %v1365_v9 = vadd.f32 %v1728_v5, %v1325_v63 }
 0x1e1   :  { %v1748_v4 = vpop.f32.mrf.mxu0 }
 0x1e2   :  { %v1770_v6 = vpop.f32.mrf.mxu1 }
 0x1e3   :  { %v1749_v8 = vpop.f32.mrf.mxu0 }
 0x1e4   :  { %v1750_v12 = vadd.f32 %v1749_v8, %v1748_v4  ;;  %v1771_v13 = vpop.f32.mrf.mxu1 }
 0x1e5   :  { %v1751_v15 = vpop.f32.mrf.mxu0  ;;  %v1772_v17 = vadd.f32 %v1771_v13, %v1770_v6 }
 0x1e6   :  { %v1405_v16 = vadd.f32 %v1750_v12, %v1365_v9  ;;  %v1773_v18 = vpop.f32.mrf.mxu1 }
 0x1e7   :  { %v1752_v20 = vpop.f32.mrf.mxu0 }
 0x1e8   :  { %v1445_v7 = vadd.f32 %v1772_v17, %v1405_v16  ;;  %v1774_v11 = vpop.f32.mrf.mxu1 }
 0x1ea   :  { %v1450_v21 = vmul.f32 %v1445_v7, %v1445_v7 }
 0x1ec   :  { %1451 = vadd.xlane.f32.xlu0 %v1450_v21 }
 0x275   :  { %v1452_v22 = vpop.xlane.xlu0 %1451 }
 0x276   :  { %v1453_v23 = vadd.f32 1e-12, %v1452_v22 }
 0x278   :  { %1907 = vrsqrt.f32 %v1453_v23 }
 0x285   :  { %v1908_v24 = vpop.eup %1907 }
 0x286   :  { %v1455_v34 = vmul.f32 %v1908_v24, %v1445_v7 }
 0x288   :  { %1456 = vst [vmem:[#allocation2] sm:$0xff] %v1455_v34 }
 0x289   :  { %1922 = shalt.err (!%p1919_p4)
}
 0x28a   :  { %1466 = dma.vmem_to_hbm [thread:$0]  %s1464_s2, 128, %s2489_s3, [#allocation3]  }
 0x28b   :  { %1931 = dma.done.wait [#allocation3], 128  }
 0x28c   :  { %1932 = vsyncadd [#allocation3], 4294967168 }
 0x28d   :  { %1470 = vsyncpa [#allocation3], 1 }

// kernel: _lambda_.10
= control target key start
LH: loop header
LB: loop body
LE: loop exit
PB: predicated region body
PF: predicated region fallthrough
CT: control target
= control target key end

     0   :  { %s3664_s15 = smov 0   ;;  %s3666_s16 = smov 0   ;;  %s4588_s0 = inlined_call_operand.vmem [shape: bf16[8,1024], index: 0, kind: input, shape index: {}]   ;;  %s4589_s1 = inlined_call_operand.vmem [shape: bf16[1024,2048], index: 1, kind: input, shape index: {}]   ;;  %s4590_s2 = inlined_call_operand.vmem [shape: f32[1,2048], index: 2, kind: input, shape index: {}]   ;;  %s4591_s3 = inlined_call_operand.vmem [shape: f32[1,2048], index: 3, kind: input, shape index: {}]   ;;  %s4592_s4 = inlined_call_operand.vmem [shape: f32[8,2048], index: 4, kind: output, shape index: {}]  }
   0x1   :  { %s3668_s17 = smov 0   ;;  %s3670_s18 = smov 0  }
   0x2   :  { %s3672_s19 = smov 0  }
   0x3 LB: > { %s23_s20 = sadd.s32 1, %s3633_s18  ;;  %p66_p1 = scmp.ne.s32.totalorder %s3625_s16, %s3621_s15  ;;  %s3637_s19 = sphi %s3672_s19, %s14_s19   ;;  %s3633_s18 = sphi %s3670_s18, %s4596_s18   ;;  %s3629_s17 = sphi %s3668_s17, %s4595_s17   ;;  %s3625_s16 = sphi %s3666_s16, %s4594_s16   ;;  %s3621_s15 = sphi %s3664_s15, %s4593_s15  }
   0x4   : > { %p24_p0 = scmp.ge.s32.totalorder %s23_s20, 4  ;;  %p67_p2 = scmp.eq.s32.totalorder %s3637_s19, 0 }
   0x5   : > { %s59_s22 = sadd.s32 1, %s3625_s16  ;;  %p2890_p5 = scmp.ge.s32.totalorder %s3637_s19, 4 }
   0x6   : > { %s4598_s20 = smov (%p24_p0, %s23_s20), 0  ;;  %p68_p3 = por %p67_p2, %p66_p1 }
   0x7   : > { %s56_s21 = ssub.s32 %s3633_s18, %s4598_s20  ;;  %180 = sbr.rel (%p2890_p5) target bundleno = 144 (0x90), region = 20 }
   0x8   : > { %p57_p4 = scmp.eq.s32.totalorder %s56_s21, 0 }
   0xa   : > { %s3699_s23 = scalar_select %p57_p4, %s3625_s16, %s59_s22  }
   0xc   : > { %183 = sbr.rel (!%p68_p3) target bundleno = 144 (0x90), region = 24  ;;  %s185_s24 = sand.u32 (%p68_p3), 1, %s3625_s16  }
   0xd   : > { %s3166_s25 = sshll.u32 (%p68_p3), %s3633_s18, 4  ;;  %s2891_s26 = sshll.u32 (%p68_p3), %s185_s24, 11 }
   0xe   : > { %s3707_s29 = scalar_lea.vmem (%p68_p3), %s4589_s1, %s3166_s25  ;;  %s3712_s30 = scalar_lea.vmem (%p68_p3), [#allocation2], %s2891_s26 }
   0xf   : > { %v203_v0 = vld [vmem:[%s3707_s29] sm:$0xff] (%p68_p3)  ;;  %v205_v1 = vld [vmem:[%s3707_s29 + $0x8] sm:$0xff] (%p68_p3) }
  0x10   : > { %v207_v2 = vld [vmem:[%s3707_s29 + $0x40] sm:$0xff] (%p68_p3)  ;;  %204 = vst [vmem:[%s3712_s30] sm:$0xff] (%p68_p3), %v203_v0  ;;  %206 = vst [vmem:[%s3712_s30 + $0x8] sm:$0xff] (%p68_p3), %v205_v1  ;;  %v209_v3 = vld [vmem:[%s3707_s29 + $0x48] sm:$0xff] (%p68_p3) }
  0x11   : > { %208 = vst [vmem:[%s3712_s30 + $0x10] sm:$0xff] %v207_v2  ;;  %v211_v4 = vld [vmem:[%s3707_s29 + $0x80] sm:$0xff]  ;;  %v213_v5 = vld [vmem:[%s3707_s29 + $0x88] sm:$0xff]  ;;  %210 = vst [vmem:[%s3712_s30 + $0x18] sm:$0xff] %v209_v3 }
  0x12   : > { %212 = vst [vmem:[%s3712_s30 + $0x20] sm:$0xff] %v211_v4  ;;  %214 = vst [vmem:[%s3712_s30 + $0x28] sm:$0xff] %v213_v5  ;;  %v215_v6 = vld [vmem:[%s3707_s29 + $0xc0] sm:$0xff]  ;;  %v217_v7 = vld [vmem:[%s3707_s29 + $0xc8] sm:$0xff] }
  0x13   : > { %v219_v8 = vld [vmem:[%s3707_s29 + $0x100] sm:$0xff]  ;;  %216 = vst [vmem:[%s3712_s30 + $0x30] sm:$0xff] %v215_v6  ;;  %218 = vst [vmem:[%s3712_s30 + $0x38] sm:$0xff] %v217_v7  ;;  %v221_v9 = vld [vmem:[%s3707_s29 + $0x108] sm:$0xff] }
  0x14   : > { %220 = vst [vmem:[%s3712_s30 + $0x40] sm:$0xff] %v219_v8  ;;  %v223_v10 = vld [vmem:[%s3707_s29 + $0x140] sm:$0xff]  ;;  %v225_v11 = vld [vmem:[%s3707_s29 + $0x148] sm:$0xff]  ;;  %222 = vst [vmem:[%s3712_s30 + $0x48] sm:$0xff] %v221_v9 }
  0x15   : > { %224 = vst [vmem:[%s3712_s30 + $0x50] sm:$0xff] %v223_v10  ;;  %226 = vst [vmem:[%s3712_s30 + $0x58] sm:$0xff] %v225_v11  ;;  %v227_v12 = vld [vmem:[%s3707_s29 + $0x180] sm:$0xff]  ;;  %v229_v13 = vld [vmem:[%s3707_s29 + $0x188] sm:$0xff] }
  0x16   : > { %v231_v14 = vld [vmem:[%s3707_s29 + $0x1c0] sm:$0xff]  ;;  %228 = vst [vmem:[%s3712_s30 + $0x60] sm:$0xff] %v227_v12  ;;  %230 = vst [vmem:[%s3712_s30 + $0x68] sm:$0xff] %v229_v13  ;;  %v233_v15 = vld [vmem:[%s3707_s29 + $0x1c8] sm:$0xff] }
  0x17   : > { %232 = vst [vmem:[%s3712_s30 + $0x70] sm:$0xff] %v231_v14  ;;  %v235_v16 = vld [vmem:[%s3707_s29 + $0x200] sm:$0xff]  ;;  %v237_v17 = vld [vmem:[%s3707_s29 + $0x208] sm:$0xff]  ;;  %234 = vst [vmem:[%s3712_s30 + $0x78] sm:$0xff] %v233_v15 }
  0x18   : > { %236 = vst [vmem:[%s3712_s30 + $0x80] sm:$0xff] %v235_v16  ;;  %238 = vst [vmem:[%s3712_s30 + $0x88] sm:$0xff] %v237_v17  ;;  %v239_v18 = vld [vmem:[%s3707_s29 + $0x240] sm:$0xff]  ;;  %v241_v19 = vld [vmem:[%s3707_s29 + $0x248] sm:$0xff] }
  0x19   : > { %v243_v20 = vld [vmem:[%s3707_s29 + $0x280] sm:$0xff]  ;;  %240 = vst [vmem:[%s3712_s30 + $0x90] sm:$0xff] %v239_v18  ;;  %242 = vst [vmem:[%s3712_s30 + $0x98] sm:$0xff] %v241_v19  ;;  %v245_v21 = vld [vmem:[%s3707_s29 + $0x288] sm:$0xff] }
  0x1a   : > { %244 = vst [vmem:[%s3712_s30 + $0xa0] sm:$0xff] %v243_v20  ;;  %v247_v22 = vld [vmem:[%s3707_s29 + $0x2c0] sm:$0xff]  ;;  %v249_v23 = vld [vmem:[%s3707_s29 + $0x2c8] sm:$0xff]  ;;  %246 = vst [vmem:[%s3712_s30 + $0xa8] sm:$0xff] %v245_v21 }
  0x1b   : > { %248 = vst [vmem:[%s3712_s30 + $0xb0] sm:$0xff] %v247_v22  ;;  %250 = vst [vmem:[%s3712_s30 + $0xb8] sm:$0xff] %v249_v23  ;;  %v251_v24 = vld [vmem:[%s3707_s29 + $0x300] sm:$0xff]  ;;  %v253_v25 = vld [vmem:[%s3707_s29 + $0x308] sm:$0xff] }
  0x1c   : > { %v255_v26 = vld [vmem:[%s3707_s29 + $0x340] sm:$0xff]  ;;  %252 = vst [vmem:[%s3712_s30 + $0xc0] sm:$0xff] %v251_v24  ;;  %254 = vst [vmem:[%s3712_s30 + $0xc8] sm:$0xff] %v253_v25  ;;  %v257_v27 = vld [vmem:[%s3707_s29 + $0x348] sm:$0xff] }
  0x1d   : > { %256 = vst [vmem:[%s3712_s30 + $0xd0] sm:$0xff] %v255_v26  ;;  %v259_v28 = vld [vmem:[%s3707_s29 + $0x380] sm:$0xff]  ;;  %v261_v29 = vld [vmem:[%s3707_s29 + $0x388] sm:$0xff]  ;;  %258 = vst [vmem:[%s3712_s30 + $0xd8] sm:$0xff] %v257_v27 }
  0x1e   : > { %260 = vst [vmem:[%s3712_s30 + $0xe0] sm:$0xff] %v259_v28  ;;  %262 = vst [vmem:[%s3712_s30 + $0xe8] sm:$0xff] %v261_v29  ;;  %v263_v30 = vld [vmem:[%s3707_s29 + $0x3c0] sm:$0xff]  ;;  %v265_v31 = vld [vmem:[%s3707_s29 + $0x3c8] sm:$0xff] }
  0x1f   : > { %v267_v32 = vld [vmem:[%s3707_s29 + $0x400] sm:$0xff]  ;;  %264 = vst [vmem:[%s3712_s30 + $0xf0] sm:$0xff] %v263_v30  ;;  %266 = vst [vmem:[%s3712_s30 + $0xf8] sm:$0xff] %v265_v31  ;;  %v269_v33 = vld [vmem:[%s3707_s29 + $0x408] sm:$0xff] }
  0x20   : > { %268 = vst [vmem:[%s3712_s30 + $0x100] sm:$0xff] %v267_v32  ;;  %v271_v34 = vld [vmem:[%s3707_s29 + $0x440] sm:$0xff]  ;;  %v273_v35 = vld [vmem:[%s3707_s29 + $0x448] sm:$0xff]  ;;  %270 = vst [vmem:[%s3712_s30 + $0x108] sm:$0xff] %v269_v33 }
  0x21   : > { %272 = vst [vmem:[%s3712_s30 + $0x110] sm:$0xff] %v271_v34  ;;  %274 = vst [vmem:[%s3712_s30 + $0x118] sm:$0xff] %v273_v35  ;;  %v275_v36 = vld [vmem:[%s3707_s29 + $0x480] sm:$0xff]  ;;  %v277_v37 = vld [vmem:[%s3707_s29 + $0x488] sm:$0xff] }
  0x22   : > { %v279_v38 = vld [vmem:[%s3707_s29 + $0x4c0] sm:$0xff]  ;;  %276 = vst [vmem:[%s3712_s30 + $0x120] sm:$0xff] %v275_v36  ;;  %278 = vst [vmem:[%s3712_s30 + $0x128] sm:$0xff] %v277_v37  ;;  %v281_v39 = vld [vmem:[%s3707_s29 + $0x4c8] sm:$0xff] }
  0x23   : > { %280 = vst [vmem:[%s3712_s30 + $0x130] sm:$0xff] %v279_v38  ;;  %v283_v40 = vld [vmem:[%s3707_s29 + $0x500] sm:$0xff]  ;;  %v285_v41 = vld [vmem:[%s3707_s29 + $0x508] sm:$0xff]  ;;  %282 = vst [vmem:[%s3712_s30 + $0x138] sm:$0xff] %v281_v39 }
  0x24   : > { %284 = vst [vmem:[%s3712_s30 + $0x140] sm:$0xff] %v283_v40  ;;  %286 = vst [vmem:[%s3712_s30 + $0x148] sm:$0xff] %v285_v41  ;;  %v287_v42 = vld [vmem:[%s3707_s29 + $0x540] sm:$0xff]  ;;  %v289_v43 = vld [vmem:[%s3707_s29 + $0x548] sm:$0xff] }
  0x25   : > { %v291_v44 = vld [vmem:[%s3707_s29 + $0x580] sm:$0xff]  ;;  %288 = vst [vmem:[%s3712_s30 + $0x150] sm:$0xff] %v287_v42  ;;  %290 = vst [vmem:[%s3712_s30 + $0x158] sm:$0xff] %v289_v43  ;;  %v293_v45 = vld [vmem:[%s3707_s29 + $0x588] sm:$0xff] }
  0x26   : > { %292 = vst [vmem:[%s3712_s30 + $0x160] sm:$0xff] %v291_v44  ;;  %v295_v46 = vld [vmem:[%s3707_s29 + $0x5c0] sm:$0xff]  ;;  %v297_v47 = vld [vmem:[%s3707_s29 + $0x5c8] sm:$0xff]  ;;  %294 = vst [vmem:[%s3712_s30 + $0x168] sm:$0xff] %v293_v45 }
  0x27   : > { %296 = vst [vmem:[%s3712_s30 + $0x170] sm:$0xff] %v295_v46  ;;  %298 = vst [vmem:[%s3712_s30 + $0x178] sm:$0xff] %v297_v47  ;;  %v299_v48 = vld [vmem:[%s3707_s29 + $0x600] sm:$0xff]  ;;  %v301_v49 = vld [vmem:[%s3707_s29 + $0x608] sm:$0xff] }
  0x28   : > { %v303_v50 = vld [vmem:[%s3707_s29 + $0x640] sm:$0xff]  ;;  %300 = vst [vmem:[%s3712_s30 + $0x180] sm:$0xff] %v299_v48  ;;  %302 = vst [vmem:[%s3712_s30 + $0x188] sm:$0xff] %v301_v49  ;;  %v305_v51 = vld [vmem:[%s3707_s29 + $0x648] sm:$0xff] }
  0x29   : > { %304 = vst [vmem:[%s3712_s30 + $0x190] sm:$0xff] %v303_v50  ;;  %v307_v52 = vld [vmem:[%s3707_s29 + $0x680] sm:$0xff]  ;;  %v309_v53 = vld [vmem:[%s3707_s29 + $0x688] sm:$0xff]  ;;  %306 = vst [vmem:[%s3712_s30 + $0x198] sm:$0xff] %v305_v51 }
  0x2a   : > { %308 = vst [vmem:[%s3712_s30 + $0x1a0] sm:$0xff] %v307_v52  ;;  %310 = vst [vmem:[%s3712_s30 + $0x1a8] sm:$0xff] %v309_v53  ;;  %v311_v54 = vld [vmem:[%s3707_s29 + $0x6c0] sm:$0xff]  ;;  %v313_v55 = vld [vmem:[%s3707_s29 + $0x6c8] sm:$0xff] }
  0x2b   : > { %v315_v56 = vld [vmem:[%s3707_s29 + $0x700] sm:$0xff]  ;;  %312 = vst [vmem:[%s3712_s30 + $0x1b0] sm:$0xff] %v311_v54  ;;  %314 = vst [vmem:[%s3712_s30 + $0x1b8] sm:$0xff] %v313_v55  ;;  %v317_v57 = vld [vmem:[%s3707_s29 + $0x708] sm:$0xff] }
  0x2c   : > { %316 = vst [vmem:[%s3712_s30 + $0x1c0] sm:$0xff] %v315_v56  ;;  %v319_v58 = vld [vmem:[%s3707_s29 + $0x740] sm:$0xff]  ;;  %v321_v59 = vld [vmem:[%s3707_s29 + $0x748] sm:$0xff]  ;;  %318 = vst [vmem:[%s3712_s30 + $0x1c8] sm:$0xff] %v317_v57 }
  0x2d   : > { %320 = vst [vmem:[%s3712_s30 + $0x1d0] sm:$0xff] %v319_v58  ;;  %322 = vst [vmem:[%s3712_s30 + $0x1d8] sm:$0xff] %v321_v59  ;;  %v323_v60 = vld [vmem:[%s3707_s29 + $0x780] sm:$0xff]  ;;  %v325_v61 = vld [vmem:[%s3707_s29 + $0x788] sm:$0xff] }
  0x2e   : > { %v327_v62 = vld [vmem:[%s3707_s29 + $0x7c0] sm:$0xff]  ;;  %324 = vst [vmem:[%s3712_s30 + $0x1e0] sm:$0xff] %v323_v60  ;;  %326 = vst [vmem:[%s3712_s30 + $0x1e8] sm:$0xff] %v325_v61  ;;  %v329_v63 = vld [vmem:[%s3707_s29 + $0x7c8] sm:$0xff] }
  0x2f   : > { %328 = vst [vmem:[%s3712_s30 + $0x1f0] sm:$0xff] %v327_v62  ;;  %v331_v0 = vld [vmem:[%s3707_s29 + $0x800] sm:$0xff]  ;;  %v333_v1 = vld [vmem:[%s3707_s29 + $0x808] sm:$0xff]  ;;  %330 = vst [vmem:[%s3712_s30 + $0x1f8] sm:$0xff] %v329_v63 }
  0x30   : > { %332 = vst [vmem:[%s3712_s30 + $0x200] sm:$0xff] %v331_v0  ;;  %334 = vst [vmem:[%s3712_s30 + $0x208] sm:$0xff] %v333_v1  ;;  %v335_v2 = vld [vmem:[%s3707_s29 + $0x840] sm:$0xff]  ;;  %v337_v3 = vld [vmem:[%s3707_s29 + $0x848] sm:$0xff] }
  0x31   : > { %v339_v4 = vld [vmem:[%s3707_s29 + $0x880] sm:$0xff]  ;;  %336 = vst [vmem:[%s3712_s30 + $0x210] sm:$0xff] %v335_v2  ;;  %338 = vst [vmem:[%s3712_s30 + $0x218] sm:$0xff] %v337_v3  ;;  %v341_v5 = vld [vmem:[%s3707_s29 + $0x888] sm:$0xff] }
  0x32   : > { %340 = vst [vmem:[%s3712_s30 + $0x220] sm:$0xff] %v339_v4  ;;  %v343_v6 = vld [vmem:[%s3707_s29 + $0x8c0] sm:$0xff]  ;;  %v345_v7 = vld [vmem:[%s3707_s29 + $0x8c8] sm:$0xff]  ;;  %342 = vst [vmem:[%s3712_s30 + $0x228] sm:$0xff] %v341_v5 }
  0x33   : > { %344 = vst [vmem:[%s3712_s30 + $0x230] sm:$0xff] %v343_v6  ;;  %346 = vst [vmem:[%s3712_s30 + $0x238] sm:$0xff] %v345_v7  ;;  %v347_v8 = vld [vmem:[%s3707_s29 + $0x900] sm:$0xff]  ;;  %v349_v9 = vld [vmem:[%s3707_s29 + $0x908] sm:$0xff] }
  0x34   : > { %v351_v10 = vld [vmem:[%s3707_s29 + $0x940] sm:$0xff]  ;;  %348 = vst [vmem:[%s3712_s30 + $0x240] sm:$0xff] %v347_v8  ;;  %350 = vst [vmem:[%s3712_s30 + $0x248] sm:$0xff] %v349_v9  ;;  %v353_v11 = vld [vmem:[%s3707_s29 + $0x948] sm:$0xff] }
  0x35   : > { %352 = vst [vmem:[%s3712_s30 + $0x250] sm:$0xff] %v351_v10  ;;  %v355_v12 = vld [vmem:[%s3707_s29 + $0x980] sm:$0xff]  ;;  %v357_v13 = vld [vmem:[%s3707_s29 + $0x988] sm:$0xff]  ;;  %354 = vst [vmem:[%s3712_s30 + $0x258] sm:$0xff] %v353_v11 }
  0x36   : > { %356 = vst [vmem:[%s3712_s30 + $0x260] sm:$0xff] %v355_v12  ;;  %358 = vst [vmem:[%s3712_s30 + $0x268] sm:$0xff] %v357_v13  ;;  %v359_v14 = vld [vmem:[%s3707_s29 + $0x9c0] sm:$0xff]  ;;  %v361_v15 = vld [vmem:[%s3707_s29 + $0x9c8] sm:$0xff] }
  0x37   : > { %v363_v16 = vld [vmem:[%s3707_s29 + $0xa00] sm:$0xff]  ;;  %360 = vst [vmem:[%s3712_s30 + $0x270] sm:$0xff] %v359_v14  ;;  %362 = vst [vmem:[%s3712_s30 + $0x278] sm:$0xff] %v361_v15  ;;  %v365_v17 = vld [vmem:[%s3707_s29 + $0xa08] sm:$0xff] }
  0x38   : > { %364 = vst [vmem:[%s3712_s30 + $0x280] sm:$0xff] %v363_v16  ;;  %v367_v18 = vld [vmem:[%s3707_s29 + $0xa40] sm:$0xff]  ;;  %v369_v19 = vld [vmem:[%s3707_s29 + $0xa48] sm:$0xff]  ;;  %366 = vst [vmem:[%s3712_s30 + $0x288] sm:$0xff] %v365_v17 }
  0x39   : > { %368 = vst [vmem:[%s3712_s30 + $0x290] sm:$0xff] %v367_v18  ;;  %370 = vst [vmem:[%s3712_s30 + $0x298] sm:$0xff] %v369_v19  ;;  %v371_v20 = vld [vmem:[%s3707_s29 + $0xa80] sm:$0xff]  ;;  %v373_v21 = vld [vmem:[%s3707_s29 + $0xa88] sm:$0xff] }
  0x3a   : > { %v375_v22 = vld [vmem:[%s3707_s29 + $0xac0] sm:$0xff]  ;;  %372 = vst [vmem:[%s3712_s30 + $0x2a0] sm:$0xff] %v371_v20  ;;  %374 = vst [vmem:[%s3712_s30 + $0x2a8] sm:$0xff] %v373_v21  ;;  %v377_v23 = vld [vmem:[%s3707_s29 + $0xac8] sm:$0xff] }
  0x3b   : > { %376 = vst [vmem:[%s3712_s30 + $0x2b0] sm:$0xff] %v375_v22  ;;  %v379_v24 = vld [vmem:[%s3707_s29 + $0xb00] sm:$0xff]  ;;  %v381_v25 = vld [vmem:[%s3707_s29 + $0xb08] sm:$0xff]  ;;  %378 = vst [vmem:[%s3712_s30 + $0x2b8] sm:$0xff] %v377_v23 }
  0x3c   : > { %380 = vst [vmem:[%s3712_s30 + $0x2c0] sm:$0xff] %v379_v24  ;;  %382 = vst [vmem:[%s3712_s30 + $0x2c8] sm:$0xff] %v381_v25  ;;  %v383_v26 = vld [vmem:[%s3707_s29 + $0xb40] sm:$0xff]  ;;  %v385_v27 = vld [vmem:[%s3707_s29 + $0xb48] sm:$0xff] }
  0x3d   : > { %v387_v28 = vld [vmem:[%s3707_s29 + $0xb80] sm:$0xff]  ;;  %384 = vst [vmem:[%s3712_s30 + $0x2d0] sm:$0xff] %v383_v26  ;;  %386 = vst [vmem:[%s3712_s30 + $0x2d8] sm:$0xff] %v385_v27  ;;  %v389_v29 = vld [vmem:[%s3707_s29 + $0xb88] sm:$0xff] }
  0x3e   : > { %388 = vst [vmem:[%s3712_s30 + $0x2e0] sm:$0xff] %v387_v28  ;;  %v391_v30 = vld [vmem:[%s3707_s29 + $0xbc0] sm:$0xff]  ;;  %v393_v31 = vld [vmem:[%s3707_s29 + $0xbc8] sm:$0xff]  ;;  %390 = vst [vmem:[%s3712_s30 + $0x2e8] sm:$0xff] %v389_v29 }
  0x3f   : > { %392 = vst [vmem:[%s3712_s30 + $0x2f0] sm:$0xff] %v391_v30  ;;  %394 = vst [vmem:[%s3712_s30 + $0x2f8] sm:$0xff] %v393_v31  ;;  %v395_v32 = vld [vmem:[%s3707_s29 + $0xc00] sm:$0xff]  ;;  %v397_v33 = vld [vmem:[%s3707_s29 + $0xc08] sm:$0xff] }
  0x40   : > { %v399_v34 = vld [vmem:[%s3707_s29 + $0xc40] sm:$0xff]  ;;  %396 = vst [vmem:[%s3712_s30 + $0x300] sm:$0xff] %v395_v32  ;;  %398 = vst [vmem:[%s3712_s30 + $0x308] sm:$0xff] %v397_v33  ;;  %v401_v35 = vld [vmem:[%s3707_s29 + $0xc48] sm:$0xff] }
  0x41   : > { %400 = vst [vmem:[%s3712_s30 + $0x310] sm:$0xff] %v399_v34  ;;  %v403_v36 = vld [vmem:[%s3707_s29 + $0xc80] sm:$0xff]  ;;  %v405_v37 = vld [vmem:[%s3707_s29 + $0xc88] sm:$0xff]  ;;  %402 = vst [vmem:[%s3712_s30 + $0x318] sm:$0xff] %v401_v35 }
  0x42   : > { %404 = vst [vmem:[%s3712_s30 + $0x320] sm:$0xff] %v403_v36  ;;  %406 = vst [vmem:[%s3712_s30 + $0x328] sm:$0xff] %v405_v37  ;;  %v407_v38 = vld [vmem:[%s3707_s29 + $0xcc0] sm:$0xff]  ;;  %v409_v39 = vld [vmem:[%s3707_s29 + $0xcc8] sm:$0xff] }
  0x43   : > { %v411_v40 = vld [vmem:[%s3707_s29 + $0xd00] sm:$0xff]  ;;  %408 = vst [vmem:[%s3712_s30 + $0x330] sm:$0xff] %v407_v38  ;;  %410 = vst [vmem:[%s3712_s30 + $0x338] sm:$0xff] %v409_v39  ;;  %v413_v41 = vld [vmem:[%s3707_s29 + $0xd08] sm:$0xff] }
  0x44   : > { %412 = vst [vmem:[%s3712_s30 + $0x340] sm:$0xff] %v411_v40  ;;  %v415_v42 = vld [vmem:[%s3707_s29 + $0xd40] sm:$0xff]  ;;  %v417_v43 = vld [vmem:[%s3707_s29 + $0xd48] sm:$0xff]  ;;  %414 = vst [vmem:[%s3712_s30 + $0x348] sm:$0xff] %v413_v41 }
  0x45   : > { %416 = vst [vmem:[%s3712_s30 + $0x350] sm:$0xff] %v415_v42  ;;  %418 = vst [vmem:[%s3712_s30 + $0x358] sm:$0xff] %v417_v43  ;;  %v419_v44 = vld [vmem:[%s3707_s29 + $0xd80] sm:$0xff]  ;;  %v421_v45 = vld [vmem:[%s3707_s29 + $0xd88] sm:$0xff] }
  0x46   : > { %v423_v46 = vld [vmem:[%s3707_s29 + $0xdc0] sm:$0xff]  ;;  %420 = vst [vmem:[%s3712_s30 + $0x360] sm:$0xff] %v419_v44  ;;  %422 = vst [vmem:[%s3712_s30 + $0x368] sm:$0xff] %v421_v45  ;;  %v425_v47 = vld [vmem:[%s3707_s29 + $0xdc8] sm:$0xff] }
  0x47   : > { %424 = vst [vmem:[%s3712_s30 + $0x370] sm:$0xff] %v423_v46  ;;  %v427_v48 = vld [vmem:[%s3707_s29 + $0xe00] sm:$0xff]  ;;  %v429_v49 = vld [vmem:[%s3707_s29 + $0xe08] sm:$0xff]  ;;  %426 = vst [vmem:[%s3712_s30 + $0x378] sm:$0xff] %v425_v47 }
  0x48   : > { %428 = vst [vmem:[%s3712_s30 + $0x380] sm:$0xff] %v427_v48  ;;  %430 = vst [vmem:[%s3712_s30 + $0x388] sm:$0xff] %v429_v49  ;;  %v431_v50 = vld [vmem:[%s3707_s29 + $0xe40] sm:$0xff]  ;;  %v433_v51 = vld [vmem:[%s3707_s29 + $0xe48] sm:$0xff] }
  0x49   : > { %v435_v52 = vld [vmem:[%s3707_s29 + $0xe80] sm:$0xff]  ;;  %432 = vst [vmem:[%s3712_s30 + $0x390] sm:$0xff] %v431_v50  ;;  %434 = vst [vmem:[%s3712_s30 + $0x398] sm:$0xff] %v433_v51  ;;  %v437_v53 = vld [vmem:[%s3707_s29 + $0xe88] sm:$0xff] }
  0x4a   : > { %436 = vst [vmem:[%s3712_s30 + $0x3a0] sm:$0xff] %v435_v52  ;;  %v439_v54 = vld [vmem:[%s3707_s29 + $0xec0] sm:$0xff]  ;;  %v441_v55 = vld [vmem:[%s3707_s29 + $0xec8] sm:$0xff]  ;;  %438 = vst [vmem:[%s3712_s30 + $0x3a8] sm:$0xff] %v437_v53 }
  0x4b   : > { %440 = vst [vmem:[%s3712_s30 + $0x3b0] sm:$0xff] %v439_v54  ;;  %442 = vst [vmem:[%s3712_s30 + $0x3b8] sm:$0xff] %v441_v55  ;;  %v443_v56 = vld [vmem:[%s3707_s29 + $0xf00] sm:$0xff]  ;;  %v445_v57 = vld [vmem:[%s3707_s29 + $0xf08] sm:$0xff] }
  0x4c   : > { %v447_v58 = vld [vmem:[%s3707_s29 + $0xf40] sm:$0xff]  ;;  %444 = vst [vmem:[%s3712_s30 + $0x3c0] sm:$0xff] %v443_v56  ;;  %446 = vst [vmem:[%s3712_s30 + $0x3c8] sm:$0xff] %v445_v57  ;;  %v449_v59 = vld [vmem:[%s3707_s29 + $0xf48] sm:$0xff] }
  0x4d   : > { %448 = vst [vmem:[%s3712_s30 + $0x3d0] sm:$0xff] %v447_v58  ;;  %v451_v60 = vld [vmem:[%s3707_s29 + $0xf80] sm:$0xff]  ;;  %v453_v61 = vld [vmem:[%s3707_s29 + $0xf88] sm:$0xff]  ;;  %450 = vst [vmem:[%s3712_s30 + $0x3d8] sm:$0xff] %v449_v59 }
  0x4e   : > { %452 = vst [vmem:[%s3712_s30 + $0x3e0] sm:$0xff] %v451_v60  ;;  %454 = vst [vmem:[%s3712_s30 + $0x3e8] sm:$0xff] %v453_v61  ;;  %v455_v62 = vld [vmem:[%s3707_s29 + $0xfc0] sm:$0xff]  ;;  %v457_v63 = vld [vmem:[%s3707_s29 + $0xfc8] sm:$0xff] }
  0x4f   : > { %v459_v0 = vld [vmem:[%s3707_s29 + $0x1000] sm:$0xff]  ;;  %456 = vst [vmem:[%s3712_s30 + $0x3f0] sm:$0xff] %v455_v62  ;;  %458 = vst [vmem:[%s3712_s30 + $0x3f8] sm:$0xff] %v457_v63  ;;  %v461_v1 = vld [vmem:[%s3707_s29 + $0x1008] sm:$0xff] }
  0x50   : > { %460 = vst [vmem:[%s3712_s30 + $0x400] sm:$0xff] %v459_v0  ;;  %v463_v2 = vld [vmem:[%s3707_s29 + $0x1040] sm:$0xff]  ;;  %v465_v3 = vld [vmem:[%s3707_s29 + $0x1048] sm:$0xff]  ;;  %462 = vst [vmem:[%s3712_s30 + $0x408] sm:$0xff] %v461_v1 }
  0x51   : > { %464 = vst [vmem:[%s3712_s30 + $0x410] sm:$0xff] %v463_v2  ;;  %466 = vst [vmem:[%s3712_s30 + $0x418] sm:$0xff] %v465_v3  ;;  %v467_v4 = vld [vmem:[%s3707_s29 + $0x1080] sm:$0xff]  ;;  %v469_v5 = vld [vmem:[%s3707_s29 + $0x1088] sm:$0xff] }
  0x52   : > { %v471_v6 = vld [vmem:[%s3707_s29 + $0x10c0] sm:$0xff]  ;;  %468 = vst [vmem:[%s3712_s30 + $0x420] sm:$0xff] %v467_v4  ;;  %470 = vst [vmem:[%s3712_s30 + $0x428] sm:$0xff] %v469_v5  ;;  %v473_v7 = vld [vmem:[%s3707_s29 + $0x10c8] sm:$0xff] }
  0x53   : > { %472 = vst [vmem:[%s3712_s30 + $0x430] sm:$0xff] %v471_v6  ;;  %v475_v8 = vld [vmem:[%s3707_s29 + $0x1100] sm:$0xff]  ;;  %v477_v9 = vld [vmem:[%s3707_s29 + $0x1108] sm:$0xff]  ;;  %474 = vst [vmem:[%s3712_s30 + $0x438] sm:$0xff] %v473_v7 }
  0x54   : > { %476 = vst [vmem:[%s3712_s30 + $0x440] sm:$0xff] %v475_v8  ;;  %478 = vst [vmem:[%s3712_s30 + $0x448] sm:$0xff] %v477_v9  ;;  %v479_v10 = vld [vmem:[%s3707_s29 + $0x1140] sm:$0xff]  ;;  %v481_v11 = vld [vmem:[%s3707_s29 + $0x1148] sm:$0xff] }
  0x55   : > { %v483_v12 = vld [vmem:[%s3707_s29 + $0x1180] sm:$0xff]  ;;  %480 = vst [vmem:[%s3712_s30 + $0x450] sm:$0xff] %v479_v10  ;;  %482 = vst [vmem:[%s3712_s30 + $0x458] sm:$0xff] %v481_v11  ;;  %v485_v13 = vld [vmem:[%s3707_s29 + $0x1188] sm:$0xff] }
  0x56   : > { %484 = vst [vmem:[%s3712_s30 + $0x460] sm:$0xff] %v483_v12  ;;  %v487_v14 = vld [vmem:[%s3707_s29 + $0x11c0] sm:$0xff]  ;;  %v489_v15 = vld [vmem:[%s3707_s29 + $0x11c8] sm:$0xff]  ;;  %486 = vst [vmem:[%s3712_s30 + $0x468] sm:$0xff] %v485_v13 }
  0x57   : > { %488 = vst [vmem:[%s3712_s30 + $0x470] sm:$0xff] %v487_v14  ;;  %490 = vst [vmem:[%s3712_s30 + $0x478] sm:$0xff] %v489_v15  ;;  %v491_v16 = vld [vmem:[%s3707_s29 + $0x1200] sm:$0xff]  ;;  %v493_v17 = vld [vmem:[%s3707_s29 + $0x1208] sm:$0xff] }
  0x58   : > { %v495_v18 = vld [vmem:[%s3707_s29 + $0x1240] sm:$0xff]  ;;  %492 = vst [vmem:[%s3712_s30 + $0x480] sm:$0xff] %v491_v16  ;;  %494 = vst [vmem:[%s3712_s30 + $0x488] sm:$0xff] %v493_v17  ;;  %v497_v19 = vld [vmem:[%s3707_s29 + $0x1248] sm:$0xff] }
  0x59   : > { %496 = vst [vmem:[%s3712_s30 + $0x490] sm:$0xff] %v495_v18  ;;  %v499_v20 = vld [vmem:[%s3707_s29 + $0x1280] sm:$0xff]  ;;  %v501_v21 = vld [vmem:[%s3707_s29 + $0x1288] sm:$0xff]  ;;  %498 = vst [vmem:[%s3712_s30 + $0x498] sm:$0xff] %v497_v19 }
  0x5a   : > { %500 = vst [vmem:[%s3712_s30 + $0x4a0] sm:$0xff] %v499_v20  ;;  %502 = vst [vmem:[%s3712_s30 + $0x4a8] sm:$0xff] %v501_v21  ;;  %v503_v22 = vld [vmem:[%s3707_s29 + $0x12c0] sm:$0xff]  ;;  %v505_v23 = vld [vmem:[%s3707_s29 + $0x12c8] sm:$0xff] }
  0x5b   : > { %v507_v24 = vld [vmem:[%s3707_s29 + $0x1300] sm:$0xff]  ;;  %504 = vst [vmem:[%s3712_s30 + $0x4b0] sm:$0xff] %v503_v22  ;;  %506 = vst [vmem:[%s3712_s30 + $0x4b8] sm:$0xff] %v505_v23  ;;  %v509_v25 = vld [vmem:[%s3707_s29 + $0x1308] sm:$0xff] }
  0x5c   : > { %508 = vst [vmem:[%s3712_s30 + $0x4c0] sm:$0xff] %v507_v24  ;;  %v511_v26 = vld [vmem:[%s3707_s29 + $0x1340] sm:$0xff]  ;;  %v513_v27 = vld [vmem:[%s3707_s29 + $0x1348] sm:$0xff]  ;;  %510 = vst [vmem:[%s3712_s30 + $0x4c8] sm:$0xff] %v509_v25 }
  0x5d   : > { %512 = vst [vmem:[%s3712_s30 + $0x4d0] sm:$0xff] %v511_v26  ;;  %514 = vst [vmem:[%s3712_s30 + $0x4d8] sm:$0xff] %v513_v27  ;;  %v515_v28 = vld [vmem:[%s3707_s29 + $0x1380] sm:$0xff]  ;;  %v517_v29 = vld [vmem:[%s3707_s29 + $0x1388] sm:$0xff] }
  0x5e   : > { %v519_v30 = vld [vmem:[%s3707_s29 + $0x13c0] sm:$0xff]  ;;  %516 = vst [vmem:[%s3712_s30 + $0x4e0] sm:$0xff] %v515_v28  ;;  %518 = vst [vmem:[%s3712_s30 + $0x4e8] sm:$0xff] %v517_v29  ;;  %v521_v31 = vld [vmem:[%s3707_s29 + $0x13c8] sm:$0xff] }
  0x5f   : > { %520 = vst [vmem:[%s3712_s30 + $0x4f0] sm:$0xff] %v519_v30  ;;  %v523_v32 = vld [vmem:[%s3707_s29 + $0x1400] sm:$0xff]  ;;  %v525_v33 = vld [vmem:[%s3707_s29 + $0x1408] sm:$0xff]  ;;  %522 = vst [vmem:[%s3712_s30 + $0x4f8] sm:$0xff] %v521_v31 }
  0x60   : > { %524 = vst [vmem:[%s3712_s30 + $0x500] sm:$0xff] %v523_v32  ;;  %526 = vst [vmem:[%s3712_s30 + $0x508] sm:$0xff] %v525_v33  ;;  %v527_v34 = vld [vmem:[%s3707_s29 + $0x1440] sm:$0xff]  ;;  %v529_v35 = vld [vmem:[%s3707_s29 + $0x1448] sm:$0xff] }
  0x61   : > { %v531_v36 = vld [vmem:[%s3707_s29 + $0x1480] sm:$0xff]  ;;  %528 = vst [vmem:[%s3712_s30 + $0x510] sm:$0xff] %v527_v34  ;;  %530 = vst [vmem:[%s3712_s30 + $0x518] sm:$0xff] %v529_v35  ;;  %v533_v37 = vld [vmem:[%s3707_s29 + $0x1488] sm:$0xff] }
  0x62   : > { %532 = vst [vmem:[%s3712_s30 + $0x520] sm:$0xff] %v531_v36  ;;  %v535_v38 = vld [vmem:[%s3707_s29 + $0x14c0] sm:$0xff]  ;;  %v537_v39 = vld [vmem:[%s3707_s29 + $0x14c8] sm:$0xff]  ;;  %534 = vst [vmem:[%s3712_s30 + $0x528] sm:$0xff] %v533_v37 }
  0x63   : > { %536 = vst [vmem:[%s3712_s30 + $0x530] sm:$0xff] %v535_v38  ;;  %538 = vst [vmem:[%s3712_s30 + $0x538] sm:$0xff] %v537_v39  ;;  %v539_v40 = vld [vmem:[%s3707_s29 + $0x1500] sm:$0xff]  ;;  %v541_v41 = vld [vmem:[%s3707_s29 + $0x1508] sm:$0xff] }
  0x64   : > { %v543_v42 = vld [vmem:[%s3707_s29 + $0x1540] sm:$0xff]  ;;  %540 = vst [vmem:[%s3712_s30 + $0x540] sm:$0xff] %v539_v40  ;;  %542 = vst [vmem:[%s3712_s30 + $0x548] sm:$0xff] %v541_v41  ;;  %v545_v43 = vld [vmem:[%s3707_s29 + $0x1548] sm:$0xff] }
  0x65   : > { %544 = vst [vmem:[%s3712_s30 + $0x550] sm:$0xff] %v543_v42  ;;  %v547_v44 = vld [vmem:[%s3707_s29 + $0x1580] sm:$0xff]  ;;  %v549_v45 = vld [vmem:[%s3707_s29 + $0x1588] sm:$0xff]  ;;  %546 = vst [vmem:[%s3712_s30 + $0x558] sm:$0xff] %v545_v43 }
  0x66   : > { %548 = vst [vmem:[%s3712_s30 + $0x560] sm:$0xff] %v547_v44  ;;  %550 = vst [vmem:[%s3712_s30 + $0x568] sm:$0xff] %v549_v45  ;;  %v551_v46 = vld [vmem:[%s3707_s29 + $0x15c0] sm:$0xff]  ;;  %v553_v47 = vld [vmem:[%s3707_s29 + $0x15c8] sm:$0xff] }
  0x67   : > { %v555_v48 = vld [vmem:[%s3707_s29 + $0x1600] sm:$0xff]  ;;  %552 = vst [vmem:[%s3712_s30 + $0x570] sm:$0xff] %v551_v46  ;;  %554 = vst [vmem:[%s3712_s30 + $0x578] sm:$0xff] %v553_v47  ;;  %v557_v49 = vld [vmem:[%s3707_s29 + $0x1608] sm:$0xff] }
  0x68   : > { %556 = vst [vmem:[%s3712_s30 + $0x580] sm:$0xff] %v555_v48  ;;  %v559_v50 = vld [vmem:[%s3707_s29 + $0x1640] sm:$0xff]  ;;  %v561_v51 = vld [vmem:[%s3707_s29 + $0x1648] sm:$0xff]  ;;  %558 = vst [vmem:[%s3712_s30 + $0x588] sm:$0xff] %v557_v49 }
  0x69   : > { %560 = vst [vmem:[%s3712_s30 + $0x590] sm:$0xff] %v559_v50  ;;  %562 = vst [vmem:[%s3712_s30 + $0x598] sm:$0xff] %v561_v51  ;;  %v563_v52 = vld [vmem:[%s3707_s29 + $0x1680] sm:$0xff]  ;;  %v565_v53 = vld [vmem:[%s3707_s29 + $0x1688] sm:$0xff] }
  0x6a   : > { %v567_v54 = vld [vmem:[%s3707_s29 + $0x16c0] sm:$0xff]  ;;  %564 = vst [vmem:[%s3712_s30 + $0x5a0] sm:$0xff] %v563_v52  ;;  %566 = vst [vmem:[%s3712_s30 + $0x5a8] sm:$0xff] %v565_v53  ;;  %v569_v55 = vld [vmem:[%s3707_s29 + $0x16c8] sm:$0xff] }
  0x6b   : > { %568 = vst [vmem:[%s3712_s30 + $0x5b0] sm:$0xff] %v567_v54  ;;  %v571_v56 = vld [vmem:[%s3707_s29 + $0x1700] sm:$0xff]  ;;  %v573_v57 = vld [vmem:[%s3707_s29 + $0x1708] sm:$0xff]  ;;  %570 = vst [vmem:[%s3712_s30 + $0x5b8] sm:$0xff] %v569_v55 }
  0x6c   : > { %572 = vst [vmem:[%s3712_s30 + $0x5c0] sm:$0xff] %v571_v56  ;;  %574 = vst [vmem:[%s3712_s30 + $0x5c8] sm:$0xff] %v573_v57  ;;  %v575_v58 = vld [vmem:[%s3707_s29 + $0x1740] sm:$0xff]  ;;  %v577_v59 = vld [vmem:[%s3707_s29 + $0x1748] sm:$0xff] }
  0x6d   : > { %v579_v60 = vld [vmem:[%s3707_s29 + $0x1780] sm:$0xff]  ;;  %576 = vst [vmem:[%s3712_s30 + $0x5d0] sm:$0xff] %v575_v58  ;;  %578 = vst [vmem:[%s3712_s30 + $0x5d8] sm:$0xff] %v577_v59  ;;  %v581_v61 = vld [vmem:[%s3707_s29 + $0x1788] sm:$0xff] }
  0x6e   : > { %580 = vst [vmem:[%s3712_s30 + $0x5e0] sm:$0xff] %v579_v60  ;;  %v583_v62 = vld [vmem:[%s3707_s29 + $0x17c0] sm:$0xff]  ;;  %v585_v63 = vld [vmem:[%s3707_s29 + $0x17c8] sm:$0xff]  ;;  %582 = vst [vmem:[%s3712_s30 + $0x5e8] sm:$0xff] %v581_v61 }
  0x6f   : > { %584 = vst [vmem:[%s3712_s30 + $0x5f0] sm:$0xff] %v583_v62  ;;  %586 = vst [vmem:[%s3712_s30 + $0x5f8] sm:$0xff] %v585_v63  ;;  %v587_v0 = vld [vmem:[%s3707_s29 + $0x1800] sm:$0xff]  ;;  %v589_v1 = vld [vmem:[%s3707_s29 + $0x1808] sm:$0xff] }
  0x70   : > { %v591_v2 = vld [vmem:[%s3707_s29 + $0x1840] sm:$0xff]  ;;  %588 = vst [vmem:[%s3712_s30 + $0x600] sm:$0xff] %v587_v0  ;;  %590 = vst [vmem:[%s3712_s30 + $0x608] sm:$0xff] %v589_v1  ;;  %v593_v3 = vld [vmem:[%s3707_s29 + $0x1848] sm:$0xff] }
  0x71   : > { %592 = vst [vmem:[%s3712_s30 + $0x610] sm:$0xff] %v591_v2  ;;  %v595_v4 = vld [vmem:[%s3707_s29 + $0x1880] sm:$0xff]  ;;  %v597_v5 = vld [vmem:[%s3707_s29 + $0x1888] sm:$0xff]  ;;  %594 = vst [vmem:[%s3712_s30 + $0x618] sm:$0xff] %v593_v3 }
  0x72   : > { %596 = vst [vmem:[%s3712_s30 + $0x620] sm:$0xff] %v595_v4  ;;  %598 = vst [vmem:[%s3712_s30 + $0x628] sm:$0xff] %v597_v5  ;;  %v599_v6 = vld [vmem:[%s3707_s29 + $0x18c0] sm:$0xff]  ;;  %v601_v7 = vld [vmem:[%s3707_s29 + $0x18c8] sm:$0xff] }
  0x73   : > { %v603_v8 = vld [vmem:[%s3707_s29 + $0x1900] sm:$0xff]  ;;  %600 = vst [vmem:[%s3712_s30 + $0x630] sm:$0xff] %v599_v6  ;;  %602 = vst [vmem:[%s3712_s30 + $0x638] sm:$0xff] %v601_v7  ;;  %v605_v9 = vld [vmem:[%s3707_s29 + $0x1908] sm:$0xff] }
  0x74   : > { %604 = vst [vmem:[%s3712_s30 + $0x640] sm:$0xff] %v603_v8  ;;  %v607_v10 = vld [vmem:[%s3707_s29 + $0x1940] sm:$0xff]  ;;  %v609_v11 = vld [vmem:[%s3707_s29 + $0x1948] sm:$0xff]  ;;  %606 = vst [vmem:[%s3712_s30 + $0x648] sm:$0xff] %v605_v9 }
  0x75   : > { %608 = vst [vmem:[%s3712_s30 + $0x650] sm:$0xff] %v607_v10  ;;  %610 = vst [vmem:[%s3712_s30 + $0x658] sm:$0xff] %v609_v11  ;;  %v611_v12 = vld [vmem:[%s3707_s29 + $0x1980] sm:$0xff]  ;;  %v613_v13 = vld [vmem:[%s3707_s29 + $0x1988] sm:$0xff] }
  0x76   : > { %v615_v14 = vld [vmem:[%s3707_s29 + $0x19c0] sm:$0xff]  ;;  %612 = vst [vmem:[%s3712_s30 + $0x660] sm:$0xff] %v611_v12  ;;  %614 = vst [vmem:[%s3712_s30 + $0x668] sm:$0xff] %v613_v13  ;;  %v617_v15 = vld [vmem:[%s3707_s29 + $0x19c8] sm:$0xff] }
  0x77   : > { %616 = vst [vmem:[%s3712_s30 + $0x670] sm:$0xff] %v615_v14  ;;  %v619_v16 = vld [vmem:[%s3707_s29 + $0x1a00] sm:$0xff]  ;;  %v621_v17 = vld [vmem:[%s3707_s29 + $0x1a08] sm:$0xff]  ;;  %618 = vst [vmem:[%s3712_s30 + $0x678] sm:$0xff] %v617_v15 }
  0x78   : > { %620 = vst [vmem:[%s3712_s30 + $0x680] sm:$0xff] %v619_v16  ;;  %622 = vst [vmem:[%s3712_s30 + $0x688] sm:$0xff] %v621_v17  ;;  %v623_v18 = vld [vmem:[%s3707_s29 + $0x1a40] sm:$0xff]  ;;  %v625_v19 = vld [vmem:[%s3707_s29 + $0x1a48] sm:$0xff] }
  0x79   : > { %v627_v20 = vld [vmem:[%s3707_s29 + $0x1a80] sm:$0xff]  ;;  %624 = vst [vmem:[%s3712_s30 + $0x690] sm:$0xff] %v623_v18  ;;  %626 = vst [vmem:[%s3712_s30 + $0x698] sm:$0xff] %v625_v19  ;;  %v629_v21 = vld [vmem:[%s3707_s29 + $0x1a88] sm:$0xff] }
  0x7a   : > { %628 = vst [vmem:[%s3712_s30 + $0x6a0] sm:$0xff] %v627_v20  ;;  %v631_v22 = vld [vmem:[%s3707_s29 + $0x1ac0] sm:$0xff]  ;;  %v633_v23 = vld [vmem:[%s3707_s29 + $0x1ac8] sm:$0xff]  ;;  %630 = vst [vmem:[%s3712_s30 + $0x6a8] sm:$0xff] %v629_v21 }
  0x7b   : > { %632 = vst [vmem:[%s3712_s30 + $0x6b0] sm:$0xff] %v631_v22  ;;  %634 = vst [vmem:[%s3712_s30 + $0x6b8] sm:$0xff] %v633_v23  ;;  %v635_v24 = vld [vmem:[%s3707_s29 + $0x1b00] sm:$0xff]  ;;  %v637_v25 = vld [vmem:[%s3707_s29 + $0x1b08] sm:$0xff] }
  0x7c   : > { %v639_v26 = vld [vmem:[%s3707_s29 + $0x1b40] sm:$0xff]  ;;  %636 = vst [vmem:[%s3712_s30 + $0x6c0] sm:$0xff] %v635_v24  ;;  %638 = vst [vmem:[%s3712_s30 + $0x6c8] sm:$0xff] %v637_v25  ;;  %v641_v27 = vld [vmem:[%s3707_s29 + $0x1b48] sm:$0xff] }
  0x7d   : > { %640 = vst [vmem:[%s3712_s30 + $0x6d0] sm:$0xff] %v639_v26  ;;  %v643_v28 = vld [vmem:[%s3707_s29 + $0x1b80] sm:$0xff]  ;;  %v645_v29 = vld [vmem:[%s3707_s29 + $0x1b88] sm:$0xff]  ;;  %642 = vst [vmem:[%s3712_s30 + $0x6d8] sm:$0xff] %v641_v27 }
  0x7e   : > { %644 = vst [vmem:[%s3712_s30 + $0x6e0] sm:$0xff] %v643_v28  ;;  %646 = vst [vmem:[%s3712_s30 + $0x6e8] sm:$0xff] %v645_v29  ;;  %v647_v30 = vld [vmem:[%s3707_s29 + $0x1bc0] sm:$0xff]  ;;  %v649_v31 = vld [vmem:[%s3707_s29 + $0x1bc8] sm:$0xff] }
  0x7f   : > { %v651_v32 = vld [vmem:[%s3707_s29 + $0x1c00] sm:$0xff]  ;;  %648 = vst [vmem:[%s3712_s30 + $0x6f0] sm:$0xff] %v647_v30  ;;  %650 = vst [vmem:[%s3712_s30 + $0x6f8] sm:$0xff] %v649_v31  ;;  %v653_v33 = vld [vmem:[%s3707_s29 + $0x1c08] sm:$0xff] }
  0x80   : > { %652 = vst [vmem:[%s3712_s30 + $0x700] sm:$0xff] %v651_v32  ;;  %v655_v34 = vld [vmem:[%s3707_s29 + $0x1c40] sm:$0xff]  ;;  %v657_v35 = vld [vmem:[%s3707_s29 + $0x1c48] sm:$0xff]  ;;  %654 = vst [vmem:[%s3712_s30 + $0x708] sm:$0xff] %v653_v33 }
  0x81   : > { %656 = vst [vmem:[%s3712_s30 + $0x710] sm:$0xff] %v655_v34  ;;  %658 = vst [vmem:[%s3712_s30 + $0x718] sm:$0xff] %v657_v35  ;;  %v659_v36 = vld [vmem:[%s3707_s29 + $0x1c80] sm:$0xff]  ;;  %v661_v37 = vld [vmem:[%s3707_s29 + $0x1c88] sm:$0xff] }
  0x82   : > { %v663_v38 = vld [vmem:[%s3707_s29 + $0x1cc0] sm:$0xff]  ;;  %660 = vst [vmem:[%s3712_s30 + $0x720] sm:$0xff] %v659_v36  ;;  %662 = vst [vmem:[%s3712_s30 + $0x728] sm:$0xff] %v661_v37  ;;  %v665_v39 = vld [vmem:[%s3707_s29 + $0x1cc8] sm:$0xff] }
  0x83   : > { %664 = vst [vmem:[%s3712_s30 + $0x730] sm:$0xff] %v663_v38  ;;  %v667_v40 = vld [vmem:[%s3707_s29 + $0x1d00] sm:$0xff]  ;;  %v669_v41 = vld [vmem:[%s3707_s29 + $0x1d08] sm:$0xff]  ;;  %666 = vst [vmem:[%s3712_s30 + $0x738] sm:$0xff] %v665_v39 }
  0x84   : > { %668 = vst [vmem:[%s3712_s30 + $0x740] sm:$0xff] %v667_v40  ;;  %670 = vst [vmem:[%s3712_s30 + $0x748] sm:$0xff] %v669_v41  ;;  %v671_v42 = vld [vmem:[%s3707_s29 + $0x1d40] sm:$0xff]  ;;  %v673_v43 = vld [vmem:[%s3707_s29 + $0x1d48] sm:$0xff] }
  0x85   : > { %v675_v44 = vld [vmem:[%s3707_s29 + $0x1d80] sm:$0xff]  ;;  %672 = vst [vmem:[%s3712_s30 + $0x750] sm:$0xff] %v671_v42  ;;  %674 = vst [vmem:[%s3712_s30 + $0x758] sm:$0xff] %v673_v43  ;;  %v677_v45 = vld [vmem:[%s3707_s29 + $0x1d88] sm:$0xff] }
  0x86   : > { %676 = vst [vmem:[%s3712_s30 + $0x760] sm:$0xff] %v675_v44  ;;  %v679_v46 = vld [vmem:[%s3707_s29 + $0x1dc0] sm:$0xff]  ;;  %v681_v47 = vld [vmem:[%s3707_s29 + $0x1dc8] sm:$0xff]  ;;  %678 = vst [vmem:[%s3712_s30 + $0x768] sm:$0xff] %v677_v45 }
  0x87   : > { %680 = vst [vmem:[%s3712_s30 + $0x770] sm:$0xff] %v679_v46  ;;  %682 = vst [vmem:[%s3712_s30 + $0x778] sm:$0xff] %v681_v47  ;;  %v683_v48 = vld [vmem:[%s3707_s29 + $0x1e00] sm:$0xff]  ;;  %v685_v49 = vld [vmem:[%s3707_s29 + $0x1e08] sm:$0xff] }
  0x88   : > { %v687_v50 = vld [vmem:[%s3707_s29 + $0x1e40] sm:$0xff]  ;;  %684 = vst [vmem:[%s3712_s30 + $0x780] sm:$0xff] %v683_v48  ;;  %686 = vst [vmem:[%s3712_s30 + $0x788] sm:$0xff] %v685_v49  ;;  %v689_v51 = vld [vmem:[%s3707_s29 + $0x1e48] sm:$0xff] }
  0x89   : > { %688 = vst [vmem:[%s3712_s30 + $0x790] sm:$0xff] %v687_v50  ;;  %v691_v52 = vld [vmem:[%s3707_s29 + $0x1e80] sm:$0xff]  ;;  %v693_v53 = vld [vmem:[%s3707_s29 + $0x1e88] sm:$0xff]  ;;  %690 = vst [vmem:[%s3712_s30 + $0x798] sm:$0xff] %v689_v51 }
  0x8a   : > { %692 = vst [vmem:[%s3712_s30 + $0x7a0] sm:$0xff] %v691_v52  ;;  %694 = vst [vmem:[%s3712_s30 + $0x7a8] sm:$0xff] %v693_v53  ;;  %v695_v54 = vld [vmem:[%s3707_s29 + $0x1ec0] sm:$0xff]  ;;  %v697_v55 = vld [vmem:[%s3707_s29 + $0x1ec8] sm:$0xff] }
  0x8b   : > { %v699_v56 = vld [vmem:[%s3707_s29 + $0x1f00] sm:$0xff]  ;;  %696 = vst [vmem:[%s3712_s30 + $0x7b0] sm:$0xff] %v695_v54  ;;  %698 = vst [vmem:[%s3712_s30 + $0x7b8] sm:$0xff] %v697_v55  ;;  %v701_v57 = vld [vmem:[%s3707_s29 + $0x1f08] sm:$0xff] }
  0x8c   : > { %700 = vst [vmem:[%s3712_s30 + $0x7c0] sm:$0xff] %v699_v56  ;;  %v703_v58 = vld [vmem:[%s3707_s29 + $0x1f40] sm:$0xff]  ;;  %v705_v59 = vld [vmem:[%s3707_s29 + $0x1f48] sm:$0xff]  ;;  %702 = vst [vmem:[%s3712_s30 + $0x7c8] sm:$0xff] %v701_v57 }
  0x8d   : > { %704 = vst [vmem:[%s3712_s30 + $0x7d0] sm:$0xff] %v703_v58  ;;  %706 = vst [vmem:[%s3712_s30 + $0x7d8] sm:$0xff] %v705_v59  ;;  %v707_v60 = vld [vmem:[%s3707_s29 + $0x1f80] sm:$0xff]  ;;  %v709_v61 = vld [vmem:[%s3707_s29 + $0x1f88] sm:$0xff] }
  0x8e   : > { %v711_v62 = vld [vmem:[%s3707_s29 + $0x1fc0] sm:$0xff]  ;;  %708 = vst [vmem:[%s3712_s30 + $0x7e0] sm:$0xff] %v707_v60  ;;  %710 = vst [vmem:[%s3712_s30 + $0x7e8] sm:$0xff] %v709_v61  ;;  %v713_v63 = vld [vmem:[%s3707_s29 + $0x1fc8] sm:$0xff] }
  0x8f   : > { %712 = vst [vmem:[%s3712_s30 + $0x7f0] sm:$0xff] %v711_v62  ;;  %714 = vst [vmem:[%s3712_s30 + $0x7f8] sm:$0xff] %v713_v63 }
  0x90 PF: > { %p2894_p6 = scmp.ge.s32.totalorder %s3637_s19, 1  ;;  %p735_p7 = scmp.lt.s32.totalorder %s3637_s19, 5 }
  0x92   : > { %p736_p8 = pnand %p2894_p6, %p735_p7 }
  0x93   : > { %s742_s5 = sand.u32 (!%p736_p8), 1, %s3621_s15   ;;  %s2896_s21 = sshll.u32 (!%p736_p8), %s3629_s17, 2 }
  0x94   : > { %739 = sbr.rel (%p736_p8) target bundleno = 618 (0x26a), region = 55  ;;  %s2895_s10 = sshll.u32 (!%p736_p8), %s742_s5, 11 }
  0x95   : > { %s4244_s11 = scalar_lea.vmem (!%p736_p8), [#allocation2], %s2895_s10  ;;  %p791_p9 = scmp.lt.s32.totalorder (!%p736_p8), %s2896_s21, 15 }
  0x99   : > { %v4229_v0 = vld [vmem:[%s4588_s0] sm:$0xff]  ;;  %v4234_v1 = vld [vmem:[%s4588_s0 + $0x8] sm:$0xff]  ;;  %s4600_s21 = smov (!%p791_p9, %s2896_s21), 15 }
  0x9a   : > { %v4238_v2 = vcombine.high %v4229_v0, %v4229_v0  ;;  %v4242_v3 = vcombine.high %v4234_v1, %v4234_v1  ;;  %v3207_v4 = vld [vmem:[%s4244_s11 + $0xe4] ss:$16 sps:$4 sm:$0xff]   ;;  %v3211_v6 = vld [vmem:[%s4244_s11 + $0xe0] ss:$16 sps:$4 sm:$0xff]   ;;  %s793_s25 = scalar_lea.vmem %s4590_s2, %s4600_s21  ;;  %s798_s28 = scalar_lea.vmem %s4591_s3, %s4600_s21 }
  0x9b   : > { %v3209_v5 = vld [vmem:[%s4244_s11 + $0x2e4] ss:$16 sps:$4 sm:$0xff]   ;;  %2378 = vmatprep.subr.bf16.mxu0 %v3207_v4  ;;  %v3212_v7 = vld [vmem:[%s4244_s11 + $0x2e0] ss:$16 sps:$4 sm:$0xff]   ;;  %s2899_s17 = sshll.u32 %s4600_s21, 3 }
  0x9c   : > { %2410 = vmatprep.mubr.bf16.mxu0 %v4238_v2  ;;  %2451 = vmatprep.mubr.bf16.mxu1 %v4242_v3  ;;  %v3213_v8 = vld [vmem:[%s4244_s11 + $0xc4] ss:$16 sps:$4 sm:$0xff]   ;;  %v3217_v10 = vld [vmem:[%s4244_s11 + $0xc0] ss:$16 sps:$4 sm:$0xff]   ;;  %s4567_s5 = scalar_lea.vmem %s4592_s4, %s2899_s17 }
  0x9d   : > { %2419 = vmatprep.subr.bf16.mxu1 %v3209_v5  ;;  %2379 = vmatpush1.bf16.msra.mxu0 %v3211_v6  ;;  %v3215_v9 = vld [vmem:[%s4244_s11 + $0x2c4] ss:$16 sps:$4 sm:$0xff]   ;;  %v3218_v11 = vld [vmem:[%s4244_s11 + $0x2c0] ss:$16 sps:$4 sm:$0xff]  }
  0x9e   : > { %2420 = vmatpush1.bf16.msra.mxu1 %v3212_v7  ;;  %2380 = vmatprep.subr.bf16.mxu0 %v3213_v8  ;;  %v3219_v12 = vld [vmem:[%s4244_s11 + $0xa4] ss:$16 sps:$4 sm:$0xff]   ;;  %v3223_v14 = vld [vmem:[%s4244_s11 + $0xa0] ss:$16 sps:$4 sm:$0xff]  }
  0x9f   : > { %2421 = vmatprep.subr.bf16.mxu1 %v3215_v9  ;;  %v3221_v13 = vld [vmem:[%s4244_s11 + $0x2a4] ss:$16 sps:$4 sm:$0xff]   ;;  %v3224_v15 = vld [vmem:[%s4244_s11 + $0x2a0] ss:$16 sps:$4 sm:$0xff]  }
  0xa0   : > { %v3225_v16 = vld [vmem:[%s4244_s11 + $0x84] ss:$16 sps:$4 sm:$0xff]   ;;  %v3229_v18 = vld [vmem:[%s4244_s11 + $0x80] ss:$16 sps:$4 sm:$0xff]  }
  0xa1   : > { %2381 = vmatpush1.bf16.msra.mxu0 %v3217_v10  ;;  %v3227_v17 = vld [vmem:[%s4244_s11 + $0x284] ss:$16 sps:$4 sm:$0xff]   ;;  %v3230_v19 = vld [vmem:[%s4244_s11 + $0x280] ss:$16 sps:$4 sm:$0xff]  }
  0xa2   : > { %2422 = vmatpush1.bf16.msra.mxu1 %v3218_v11  ;;  %2382 = vmatprep.subr.bf16.mxu0 %v3219_v12  ;;  %v3231_v20 = vld [vmem:[%s4244_s11 + $0x64] ss:$16 sps:$4 sm:$0xff]   ;;  %v3235_v22 = vld [vmem:[%s4244_s11 + $0x60] ss:$16 sps:$4 sm:$0xff]   ;;  %v4322_v11 = vld [vmem:[%s4588_s0 + $0x18] sm:$0xff]  ;;  %v4326_v12 = vcombine.low %v4229_v0, %v4229_v0 }
  0xa3   : > { %2423 = vmatprep.subr.bf16.mxu1 %v3221_v13  ;;  %v3233_v21 = vld [vmem:[%s4244_s11 + $0x264] ss:$16 sps:$4 sm:$0xff]   ;;  %v3236_v23 = vld [vmem:[%s4244_s11 + $0x260] ss:$16 sps:$4 sm:$0xff]   ;;  %v4330_v13 = vcombine.low %v4234_v1, %v4234_v1  ;;  %v4342_v1 = vcombine.high %v4322_v11, %v4322_v11 }
  0xa4   : > { %v3237_v24 = vld [vmem:[%s4244_s11 + $0x44] ss:$16 sps:$4 sm:$0xff]   ;;  %v3241_v26 = vld [vmem:[%s4244_s11 + $0x40] ss:$16 sps:$4 sm:$0xff]  }
  0xa5   : > { %2383 = vmatpush1.bf16.msra.mxu0 %v3223_v14  ;;  %v3239_v25 = vld [vmem:[%s4244_s11 + $0x244] ss:$16 sps:$4 sm:$0xff]   ;;  %v3242_v27 = vld [vmem:[%s4244_s11 + $0x240] ss:$16 sps:$4 sm:$0xff]  }
  0xa6   : > { %2424 = vmatpush1.bf16.msra.mxu1 %v3224_v15  ;;  %2384 = vmatprep.subr.bf16.mxu0 %v3225_v16  ;;  %v3243_v28 = vld [vmem:[%s4244_s11 + $0x24] ss:$16 sps:$4 sm:$0xff]   ;;  %v3247_v30 = vld [vmem:[%s4244_s11 + $0x20] ss:$16 sps:$4 sm:$0xff]  }
  0xa7   : > { %2425 = vmatprep.subr.bf16.mxu1 %v3227_v17  ;;  %v3245_v29 = vld [vmem:[%s4244_s11 + $0x224] ss:$16 sps:$4 sm:$0xff]   ;;  %v3248_v31 = vld [vmem:[%s4244_s11 + $0x220] ss:$16 sps:$4 sm:$0xff]  }
  0xa8   : > { %v3249_v32 = vld [vmem:[%s4244_s11 + $0x4] ss:$16 sps:$4 sm:$0xff]   ;;  %v3253_v34 = vld [vmem:[%s4244_s11] ss:$16 sps:$4 sm:$0xff]  }
  0xa9   : > { %2385 = vmatpush1.bf16.msra.mxu0 %v3229_v18  ;;  %v3251_v33 = vld [vmem:[%s4244_s11 + $0x204] ss:$16 sps:$4 sm:$0xff]   ;;  %v3254_v35 = vld [vmem:[%s4244_s11 + $0x200] ss:$16 sps:$4 sm:$0xff]  }
  0xaa   : > { %2426 = vmatpush1.bf16.msra.mxu1 %v3230_v19  ;;  %2386 = vmatprep.subr.bf16.mxu0 %v3231_v20  ;;  %v3255_v36 = vld [vmem:[%s4244_s11 + $0x1e4] ss:$16 sps:$4 sm:$0xff]   ;;  %v3259_v38 = vld [vmem:[%s4244_s11 + $0x1e0] ss:$16 sps:$4 sm:$0xff]  }
  0xab   : > { %2427 = vmatprep.subr.bf16.mxu1 %v3233_v21  ;;  %v3257_v37 = vld [vmem:[%s4244_s11 + $0x3e4] ss:$16 sps:$4 sm:$0xff]   ;;  %v3260_v39 = vld [vmem:[%s4244_s11 + $0x3e0] ss:$16 sps:$4 sm:$0xff]  }
  0xac   : > { %v3261_v40 = vld [vmem:[%s4244_s11 + $0x1c4] ss:$16 sps:$4 sm:$0xff]   ;;  %v3265_v42 = vld [vmem:[%s4244_s11 + $0x1c0] ss:$16 sps:$4 sm:$0xff]  }
  0xad   : > { %2387 = vmatpush1.bf16.msra.mxu0 %v3235_v22  ;;  %v3263_v41 = vld [vmem:[%s4244_s11 + $0x3c4] ss:$16 sps:$4 sm:$0xff]   ;;  %v3266_v43 = vld [vmem:[%s4244_s11 + $0x3c0] ss:$16 sps:$4 sm:$0xff]  }
  0xae   : > { %2428 = vmatpush1.bf16.msra.mxu1 %v3236_v23  ;;  %2388 = vmatprep.subr.bf16.mxu0 %v3237_v24  ;;  %v3267_v44 = vld [vmem:[%s4244_s11 + $0x1a4] ss:$16 sps:$4 sm:$0xff]   ;;  %v3271_v46 = vld [vmem:[%s4244_s11 + $0x1a0] ss:$16 sps:$4 sm:$0xff]  }
  0xaf   : > { %2429 = vmatprep.subr.bf16.mxu1 %v3239_v25  ;;  %v3269_v45 = vld [vmem:[%s4244_s11 + $0x3a4] ss:$16 sps:$4 sm:$0xff]   ;;  %v3272_v47 = vld [vmem:[%s4244_s11 + $0x3a0] ss:$16 sps:$4 sm:$0xff]  }
  0xb0   : > { %v3273_v48 = vld [vmem:[%s4244_s11 + $0x184] ss:$16 sps:$4 sm:$0xff]   ;;  %v3277_v50 = vld [vmem:[%s4244_s11 + $0x180] ss:$16 sps:$4 sm:$0xff]  }
  0xb1   : > { %2389 = vmatpush1.bf16.msra.mxu0 %v3241_v26  ;;  %v3275_v49 = vld [vmem:[%s4244_s11 + $0x384] ss:$16 sps:$4 sm:$0xff]   ;;  %v3278_v51 = vld [vmem:[%s4244_s11 + $0x380] ss:$16 sps:$4 sm:$0xff]  }
  0xb2   : > { %2430 = vmatpush1.bf16.msra.mxu1 %v3242_v27  ;;  %2390 = vmatprep.subr.bf16.mxu0 %v3243_v28  ;;  %v3279_v52 = vld [vmem:[%s4244_s11 + $0x164] ss:$16 sps:$4 sm:$0xff]   ;;  %v3283_v54 = vld [vmem:[%s4244_s11 + $0x160] ss:$16 sps:$4 sm:$0xff]  }
  0xb3   : > { %2431 = vmatprep.subr.bf16.mxu1 %v3245_v29  ;;  %v3281_v53 = vld [vmem:[%s4244_s11 + $0x364] ss:$16 sps:$4 sm:$0xff]   ;;  %v3284_v55 = vld [vmem:[%s4244_s11 + $0x360] ss:$16 sps:$4 sm:$0xff]  }
  0xb4   : > { %v3285_v56 = vld [vmem:[%s4244_s11 + $0x144] ss:$16 sps:$4 sm:$0xff]   ;;  %v3289_v58 = vld [vmem:[%s4244_s11 + $0x140] ss:$16 sps:$4 sm:$0xff]  }
  0xb5   : > { %2391 = vmatpush1.bf16.msra.mxu0 %v3247_v30  ;;  %v3287_v57 = vld [vmem:[%s4244_s11 + $0x344] ss:$16 sps:$4 sm:$0xff]   ;;  %v3290_v59 = vld [vmem:[%s4244_s11 + $0x340] ss:$16 sps:$4 sm:$0xff]  }
  0xb6   : > { %2432 = vmatpush1.bf16.msra.mxu1 %v3248_v31  ;;  %2392 = vmatprep.subr.bf16.mxu0 %v3249_v32  ;;  %v3291_v60 = vld [vmem:[%s4244_s11 + $0x124] ss:$16 sps:$4 sm:$0xff]   ;;  %v3295_v62 = vld [vmem:[%s4244_s11 + $0x120] ss:$16 sps:$4 sm:$0xff]  }
  0xb7   : > { %2433 = vmatprep.subr.bf16.mxu1 %v3251_v33  ;;  %v3293_v61 = vld [vmem:[%s4244_s11 + $0x324] ss:$16 sps:$4 sm:$0xff]   ;;  %v3296_v63 = vld [vmem:[%s4244_s11 + $0x320] ss:$16 sps:$4 sm:$0xff]  }
  0xb8   : > { %v3297_v4 = vld [vmem:[%s4244_s11 + $0x104] ss:$16 sps:$4 sm:$0xff]   ;;  %v3301_v6 = vld [vmem:[%s4244_s11 + $0x100] ss:$16 sps:$4 sm:$0xff]  }
  0xb9   : > { %2393 = vmatpush1.bf16.msra.mxu0 %v3253_v34  ;;  %v3299_v5 = vld [vmem:[%s4244_s11 + $0x304] ss:$16 sps:$4 sm:$0xff]   ;;  %v3302_v7 = vld [vmem:[%s4244_s11 + $0x300] ss:$16 sps:$4 sm:$0xff]  }
  0xba   : > { %2434 = vmatpush1.bf16.msra.mxu1 %v3254_v35  ;;  %2394 = vmatprep.subr.bf16.mxu0 %v3255_v36  ;;  %v3309_v8 = vld [vmem:[%s4244_s11 + $0x4e4] ss:$16 sps:$4 sm:$0xff]   ;;  %v3307_v14 = vld [vmem:[%s4244_s11 + $0x4e0] ss:$16 sps:$4 sm:$0xff]  }
  0xbb   : > { %2435 = vmatprep.subr.bf16.mxu1 %v3257_v37  ;;  %v3312_v9 = vld [vmem:[%s4244_s11 + $0x6e4] ss:$16 sps:$4 sm:$0xff]   ;;  %v3310_v15 = vld [vmem:[%s4244_s11 + $0x6e0] ss:$16 sps:$4 sm:$0xff]  }
  0xbc   : > { %v4317_v10 = vld [vmem:[%s4588_s0 + $0x10] sm:$0xff] }
  0xbd   : > { %2395 = vmatpush2.bf16.msra.mxu0 %v3259_v38  ;;  %v3315_v16 = vld [vmem:[%s4244_s11 + $0x4c4] ss:$16 sps:$4 sm:$0xff]   ;;  %v4338_v0 = vcombine.high %v4317_v10, %v4317_v10  ;;  %v3313_v18 = vld [vmem:[%s4244_s11 + $0x4c0] ss:$16 sps:$4 sm:$0xff]  }
  0xbe   : > { %2436 = vmatpush2.bf16.msra.mxu1 %v3260_v39  ;;  %2396 = vmatprep.subr.bf16.mxu0 %v3261_v40  ;;  %v3318_v17 = vld [vmem:[%s4244_s11 + $0x6c4] ss:$16 sps:$4 sm:$0xff]   ;;  %v3316_v19 = vld [vmem:[%s4244_s11 + $0x6c0] ss:$16 sps:$4 sm:$0xff]  }
  0xbf   : > { %2437 = vmatprep.subr.bf16.mxu1 %v3263_v41  ;;  %v3321_v20 = vld [vmem:[%s4244_s11 + $0x4a4] ss:$16 sps:$4 sm:$0xff]   ;;  %v3319_v22 = vld [vmem:[%s4244_s11 + $0x4a0] ss:$16 sps:$4 sm:$0xff]  }
  0xc0   : > { %v3324_v21 = vld [vmem:[%s4244_s11 + $0x6a4] ss:$16 sps:$4 sm:$0xff]   ;;  %v3322_v23 = vld [vmem:[%s4244_s11 + $0x6a0] ss:$16 sps:$4 sm:$0xff]  }
  0xc1   : > { %2397 = vmatpush2.bf16.msra.mxu0 %v3265_v42  ;;  %v3327_v24 = vld [vmem:[%s4244_s11 + $0x484] ss:$16 sps:$4 sm:$0xff]   ;;  %v3325_v26 = vld [vmem:[%s4244_s11 + $0x480] ss:$16 sps:$4 sm:$0xff]  }
  0xc2   : > { %2438 = vmatpush2.bf16.msra.mxu1 %v3266_v43  ;;  %2398 = vmatprep.subr.bf16.mxu0 %v3267_v44  ;;  %v3330_v25 = vld [vmem:[%s4244_s11 + $0x684] ss:$16 sps:$4 sm:$0xff]   ;;  %v3328_v27 = vld [vmem:[%s4244_s11 + $0x680] ss:$16 sps:$4 sm:$0xff]  }
  0xc3   : > { %2439 = vmatprep.subr.bf16.mxu1 %v3269_v45  ;;  %v3333_v28 = vld [vmem:[%s4244_s11 + $0x464] ss:$16 sps:$4 sm:$0xff]   ;;  %v3331_v30 = vld [vmem:[%s4244_s11 + $0x460] ss:$16 sps:$4 sm:$0xff]  }
  0xc4   : > { %v3336_v29 = vld [vmem:[%s4244_s11 + $0x664] ss:$16 sps:$4 sm:$0xff]   ;;  %v3334_v31 = vld [vmem:[%s4244_s11 + $0x660] ss:$16 sps:$4 sm:$0xff]  }
  0xc5   : > { %2399 = vmatpush2.bf16.msra.mxu0 %v3271_v46  ;;  %v3339_v32 = vld [vmem:[%s4244_s11 + $0x444] ss:$16 sps:$4 sm:$0xff]   ;;  %v3337_v34 = vld [vmem:[%s4244_s11 + $0x440] ss:$16 sps:$4 sm:$0xff]  }
  0xc6   : > { %2440 = vmatpush2.bf16.msra.mxu1 %v3272_v47  ;;  %2400 = vmatprep.subr.bf16.mxu0 %v3273_v48  ;;  %v3342_v33 = vld [vmem:[%s4244_s11 + $0x644] ss:$16 sps:$4 sm:$0xff]   ;;  %v3340_v35 = vld [vmem:[%s4244_s11 + $0x640] ss:$16 sps:$4 sm:$0xff]  }
  0xc7   : > { %2441 = vmatprep.subr.bf16.mxu1 %v3275_v49  ;;  %v3345_v36 = vld [vmem:[%s4244_s11 + $0x424] ss:$16 sps:$4 sm:$0xff]   ;;  %v3343_v38 = vld [vmem:[%s4244_s11 + $0x420] ss:$16 sps:$4 sm:$0xff]  }
  0xc8   : > { %v3348_v37 = vld [vmem:[%s4244_s11 + $0x624] ss:$16 sps:$4 sm:$0xff]   ;;  %v3346_v39 = vld [vmem:[%s4244_s11 + $0x620] ss:$16 sps:$4 sm:$0xff]  }
  0xc9   : > { %2401 = vmatpush2.bf16.msra.mxu0 %v3277_v50  ;;  %v3351_v40 = vld [vmem:[%s4244_s11 + $0x404] ss:$16 sps:$4 sm:$0xff]   ;;  %v3349_v42 = vld [vmem:[%s4244_s11 + $0x400] ss:$16 sps:$4 sm:$0xff]  }
  0xca   : > { %2442 = vmatpush2.bf16.msra.mxu1 %v3278_v51  ;;  %2402 = vmatprep.subr.bf16.mxu0 %v3279_v52  ;;  %v3354_v41 = vld [vmem:[%s4244_s11 + $0x604] ss:$16 sps:$4 sm:$0xff]   ;;  %v3352_v43 = vld [vmem:[%s4244_s11 + $0x600] ss:$16 sps:$4 sm:$0xff]  }
  0xcb   : > { %2443 = vmatprep.subr.bf16.mxu1 %v3281_v53  ;;  %v3357_v44 = vld [vmem:[%s4244_s11 + $0x5e4] ss:$16 sps:$4 sm:$0xff]   ;;  %v3355_v46 = vld [vmem:[%s4244_s11 + $0x5e0] ss:$16 sps:$4 sm:$0xff]  }
  0xcc   : > { %v3360_v45 = vld [vmem:[%s4244_s11 + $0x7e4] ss:$16 sps:$4 sm:$0xff]   ;;  %v3358_v47 = vld [vmem:[%s4244_s11 + $0x7e0] ss:$16 sps:$4 sm:$0xff]  }
  0xcd   : > { %2403 = vmatpush2.bf16.msra.mxu0 %v3283_v54  ;;  %v3363_v48 = vld [vmem:[%s4244_s11 + $0x5c4] ss:$16 sps:$4 sm:$0xff]   ;;  %v3361_v50 = vld [vmem:[%s4244_s11 + $0x5c0] ss:$16 sps:$4 sm:$0xff]  }
  0xce   : > { %2444 = vmatpush2.bf16.msra.mxu1 %v3284_v55  ;;  %2404 = vmatprep.subr.bf16.mxu0 %v3285_v56  ;;  %v3366_v49 = vld [vmem:[%s4244_s11 + $0x7c4] ss:$16 sps:$4 sm:$0xff]   ;;  %v3364_v51 = vld [vmem:[%s4244_s11 + $0x7c0] ss:$16 sps:$4 sm:$0xff]  }
  0xcf   : > { %2445 = vmatprep.subr.bf16.mxu1 %v3287_v57  ;;  %v3369_v52 = vld [vmem:[%s4244_s11 + $0x5a4] ss:$16 sps:$4 sm:$0xff]   ;;  %v3367_v54 = vld [vmem:[%s4244_s11 + $0x5a0] ss:$16 sps:$4 sm:$0xff]  }
  0xd0   : > { %v3372_v53 = vld [vmem:[%s4244_s11 + $0x7a4] ss:$16 sps:$4 sm:$0xff]   ;;  %v3370_v55 = vld [vmem:[%s4244_s11 + $0x7a0] ss:$16 sps:$4 sm:$0xff]  }
  0xd1   : > { %2405 = vmatpush2.bf16.msra.mxu0 %v3289_v58  ;;  %v3375_v56 = vld [vmem:[%s4244_s11 + $0x584] ss:$16 sps:$4 sm:$0xff]   ;;  %v3373_v58 = vld [vmem:[%s4244_s11 + $0x580] ss:$16 sps:$4 sm:$0xff]  }
  0xd2   : > { %2446 = vmatpush2.bf16.msra.mxu1 %v3290_v59  ;;  %2406 = vmatprep.subr.bf16.mxu0 %v3291_v60  ;;  %v3378_v57 = vld [vmem:[%s4244_s11 + $0x784] ss:$16 sps:$4 sm:$0xff]   ;;  %v3376_v59 = vld [vmem:[%s4244_s11 + $0x780] ss:$16 sps:$4 sm:$0xff]  }
  0xd3   : > { %2447 = vmatprep.subr.bf16.mxu1 %v3293_v61  ;;  %v3381_v60 = vld [vmem:[%s4244_s11 + $0x564] ss:$16 sps:$4 sm:$0xff]  }
  0xd4   : > { %v3384_v61 = vld [vmem:[%s4244_s11 + $0x764] ss:$16 sps:$4 sm:$0xff]  }
  0xd5   : > { %2407 = vmatpush2.bf16.msra.mxu0 %v3295_v62  ;;  %v3379_v62 = vld [vmem:[%s4244_s11 + $0x560] ss:$16 sps:$4 sm:$0xff]  }
  0xd6   : > { %2448 = vmatpush2.bf16.msra.mxu1 %v3296_v63  ;;  %2408 = vmatprep.subr.bf16.mxu0 %v3297_v4  ;;  %v3382_v63 = vld [vmem:[%s4244_s11 + $0x760] ss:$16 sps:$4 sm:$0xff]   ;;  %v3387_v4 = vld [vmem:[%s4244_s11 + $0x544] ss:$16 sps:$4 sm:$0xff]  }
  0xd7   : > { %2449 = vmatprep.subr.bf16.mxu1 %v3299_v5  ;;  %v3390_v5 = vld [vmem:[%s4244_s11 + $0x744] ss:$16 sps:$4 sm:$0xff]  }
  0xd9   : > { %2409 = vmatpush2.bf16.msra.mxu0 %v3301_v6  ;;  %v3385_v6 = vld [vmem:[%s4244_s11 + $0x540] ss:$16 sps:$4 sm:$0xff]  }
  0xda   : > { %2450 = vmatpush2.bf16.msra.mxu1 %v3302_v7  ;;  %2460 = vmatprep.subr.bf16.mxu0 %v3309_v8  ;;  %v3388_v7 = vld [vmem:[%s4244_s11 + $0x740] ss:$16 sps:$4 sm:$0xff]   ;;  %v3393_v8 = vld [vmem:[%s4244_s11 + $0x524] ss:$16 sps:$4 sm:$0xff]  }
  0xdb   : > { %2501 = vmatprep.subr.bf16.mxu1 %v3312_v9  ;;  %v3396_v9 = vld [vmem:[%s4244_s11 + $0x724] ss:$16 sps:$4 sm:$0xff]  }
  0xdc   : > { %2411 = vmatmul.mubr.bf16.vlgmr.msra.gmra.mxu0 %v4326_v12 }
  0xdd   : > { %2452 = vmatmul.mubr.bf16.vlgmr.msra.gmra.mxu1 %v4330_v13  ;;  %2461 = vmatpush1.bf16.msra.mxu0 %v3307_v14  ;;  %v3391_v14 = vld [vmem:[%s4244_s11 + $0x520] ss:$16 sps:$4 sm:$0xff]  }
  0xde   : > { %2502 = vmatpush1.bf16.msra.mxu1 %v3310_v15  ;;  %2462 = vmatprep.subr.bf16.mxu0 %v3315_v16  ;;  %v3394_v15 = vld [vmem:[%s4244_s11 + $0x720] ss:$16 sps:$4 sm:$0xff]   ;;  %v3399_v16 = vld [vmem:[%s4244_s11 + $0x504] ss:$16 sps:$4 sm:$0xff]  }
  0xdf   : > { %2503 = vmatprep.subr.bf16.mxu1 %v3318_v17  ;;  %2492 = vmatprep.mubr.bf16.mxu0 %v4338_v0  ;;  %v3402_v17 = vld [vmem:[%s4244_s11 + $0x704] ss:$16 sps:$4 sm:$0xff]  }
  0xe0   : > { %2533 = vmatprep.mubr.bf16.mxu1 %v4342_v1 }
  0xe1   : > { %2463 = vmatpush1.bf16.msra.mxu0 %v3313_v18  ;;  %v3397_v18 = vld [vmem:[%s4244_s11 + $0x500] ss:$16 sps:$4 sm:$0xff]  }
  0xe2   : > { %2504 = vmatpush1.bf16.msra.mxu1 %v3316_v19  ;;  %2464 = vmatprep.subr.bf16.mxu0 %v3321_v20  ;;  %v3400_v19 = vld [vmem:[%s4244_s11 + $0x700] ss:$16 sps:$4 sm:$0xff]   ;;  %v3409_v20 = vld [vmem:[%s4244_s11 + $0xec] ss:$16 sps:$4 sm:$0xff]  }
  0xe3   : > { %2505 = vmatprep.subr.bf16.mxu1 %v3324_v21  ;;  %v3412_v21 = vld [vmem:[%s4244_s11 + $0x2ec] ss:$16 sps:$4 sm:$0xff]  }
  0xe5   : > { %2465 = vmatpush1.bf16.msra.mxu0 %v3319_v22  ;;  %v4410_v22 = vcombine.low %v4317_v10, %v4317_v10  ;;  %v3413_v10 = vld [vmem:[%s4244_s11 + $0xc8] ss:$16 sps:$4 sm:$0xff]  }
  0xe6   : > { %2506 = vmatpush1.bf16.msra.mxu1 %v3322_v23  ;;  %2466 = vmatprep.subr.bf16.mxu0 %v3327_v24  ;;  %v4414_v23 = vcombine.low %v4322_v11, %v4322_v11  ;;  %v3407_v24 = vld [vmem:[%s4244_s11 + $0xe8] ss:$16 sps:$4 sm:$0xff]   ;;  %v3421_v11 = vld [vmem:[%s4244_s11 + $0xac] ss:$16 sps:$4 sm:$0xff]  }
  0xe7   : > { %2507 = vmatprep.subr.bf16.mxu1 %v3330_v25  ;;  %v3410_v25 = vld [vmem:[%s4244_s11 + $0x2e8] ss:$16 sps:$4 sm:$0xff]  }
  0xe9   : > { %2467 = vmatpush1.bf16.msra.mxu0 %v3325_v26  ;;  %v3415_v26 = vld [vmem:[%s4244_s11 + $0xcc] ss:$16 sps:$4 sm:$0xff]  }
  0xea   : > { %2508 = vmatpush1.bf16.msra.mxu1 %v3328_v27  ;;  %2468 = vmatprep.subr.bf16.mxu0 %v3333_v28  ;;  %v3418_v27 = vld [vmem:[%s4244_s11 + $0x2cc] ss:$16 sps:$4 sm:$0xff]   ;;  %v3416_v28 = vld [vmem:[%s4244_s11 + $0x2c8] ss:$16 sps:$4 sm:$0xff]  }
  0xeb   : > { %2509 = vmatprep.subr.bf16.mxu1 %v3336_v29  ;;  %v3424_v29 = vld [vmem:[%s4244_s11 + $0x2ac] ss:$16 sps:$4 sm:$0xff]  }
  0xed   : > { %2469 = vmatpush1.bf16.msra.mxu0 %v3331_v30  ;;  %v3419_v30 = vld [vmem:[%s4244_s11 + $0xa8] ss:$16 sps:$4 sm:$0xff]  }
  0xee   : > { %2510 = vmatpush1.bf16.msra.mxu1 %v3334_v31  ;;  %2470 = vmatprep.subr.bf16.mxu0 %v3339_v32  ;;  %v3422_v31 = vld [vmem:[%s4244_s11 + $0x2a8] ss:$16 sps:$4 sm:$0xff]   ;;  %v3427_v32 = vld [vmem:[%s4244_s11 + $0x8c] ss:$16 sps:$4 sm:$0xff]  }
  0xef   : > { %2511 = vmatprep.subr.bf16.mxu1 %v3342_v33  ;;  %v3430_v33 = vld [vmem:[%s4244_s11 + $0x28c] ss:$16 sps:$4 sm:$0xff]  }
  0xf1   : > { %2471 = vmatpush1.bf16.msra.mxu0 %v3337_v34  ;;  %v3425_v34 = vld [vmem:[%s4244_s11 + $0x88] ss:$16 sps:$4 sm:$0xff]  }
  0xf2   : > { %2512 = vmatpush1.bf16.msra.mxu1 %v3340_v35  ;;  %2472 = vmatprep.subr.bf16.mxu0 %v3345_v36  ;;  %v3428_v35 = vld [vmem:[%s4244_s11 + $0x288] ss:$16 sps:$4 sm:$0xff]  }
  0xf3   : > { %2513 = vmatprep.subr.bf16.mxu1 %v3348_v37  ;;  %v3431_v36 = vld [vmem:[%s4244_s11 + $0x68] ss:$16 sps:$4 sm:$0xff]  }
  0xf4   : > { %v3434_v37 = vld [vmem:[%s4244_s11 + $0x268] ss:$16 sps:$4 sm:$0xff]  }
  0xf5   : > { %2473 = vmatpush1.bf16.msra.mxu0 %v3343_v38  ;;  %v3439_v38 = vld [vmem:[%s4244_s11 + $0x4c] ss:$16 sps:$4 sm:$0xff]  }
  0xf6   : > { %2514 = vmatpush1.bf16.msra.mxu1 %v3346_v39  ;;  %2474 = vmatprep.subr.bf16.mxu0 %v3351_v40  ;;  %v3442_v39 = vld [vmem:[%s4244_s11 + $0x24c] ss:$16 sps:$4 sm:$0xff]   ;;  %v3437_v40 = vld [vmem:[%s4244_s11 + $0x48] ss:$16 sps:$4 sm:$0xff]  }
  0xf7   : > { %2515 = vmatprep.subr.bf16.mxu1 %v3354_v41  ;;  %v3440_v41 = vld [vmem:[%s4244_s11 + $0x248] ss:$16 sps:$4 sm:$0xff]  }
  0xf9   : > { %2475 = vmatpush1.bf16.msra.mxu0 %v3349_v42  ;;  %v3445_v42 = vld [vmem:[%s4244_s11 + $0x2c] ss:$16 sps:$4 sm:$0xff]  }
  0xfa   : > { %2516 = vmatpush1.bf16.msra.mxu1 %v3352_v43  ;;  %2476 = vmatprep.subr.bf16.mxu0 %v3357_v44  ;;  %v3448_v43 = vld [vmem:[%s4244_s11 + $0x22c] ss:$16 sps:$4 sm:$0xff]   ;;  %v3443_v44 = vld [vmem:[%s4244_s11 + $0x28] ss:$16 sps:$4 sm:$0xff]  }
  0xfb   : > { %2517 = vmatprep.subr.bf16.mxu1 %v3360_v45  ;;  %v3446_v45 = vld [vmem:[%s4244_s11 + $0x228] ss:$16 sps:$4 sm:$0xff]  }
  0xfd   : > { %2477 = vmatpush2.bf16.msra.mxu0 %v3355_v46  ;;  %v3451_v46 = vld [vmem:[%s4244_s11 + $0xc] ss:$16 sps:$4 sm:$0xff]  }
  0xfe   : > { %2518 = vmatpush2.bf16.msra.mxu1 %v3358_v47  ;;  %2478 = vmatprep.subr.bf16.mxu0 %v3363_v48  ;;  %v3454_v47 = vld [vmem:[%s4244_s11 + $0x20c] ss:$16 sps:$4 sm:$0xff]   ;;  %v3449_v48 = vld [vmem:[%s4244_s11 + $0x8] ss:$16 sps:$4 sm:$0xff]  }
  0xff   : > { %2519 = vmatprep.subr.bf16.mxu1 %v3366_v49  ;;  %v3452_v49 = vld [vmem:[%s4244_s11 + $0x208] ss:$16 sps:$4 sm:$0xff]  }
 0x101   : > { %2479 = vmatpush2.bf16.msra.mxu0 %v3361_v50  ;;  %v3457_v50 = vld [vmem:[%s4244_s11 + $0x1ec] ss:$16 sps:$4 sm:$0xff]  }
 0x102   : > { %2520 = vmatpush2.bf16.msra.mxu1 %v3364_v51  ;;  %2480 = vmatprep.subr.bf16.mxu0 %v3369_v52  ;;  %v3460_v51 = vld [vmem:[%s4244_s11 + $0x3ec] ss:$16 sps:$4 sm:$0xff]   ;;  %v3455_v52 = vld [vmem:[%s4244_s11 + $0x1e8] ss:$16 sps:$4 sm:$0xff]  }
 0x103   : > { %2521 = vmatprep.subr.bf16.mxu1 %v3372_v53  ;;  %v3458_v53 = vld [vmem:[%s4244_s11 + $0x3e8] ss:$16 sps:$4 sm:$0xff]  }
 0x105   : > { %2481 = vmatpush2.bf16.msra.mxu0 %v3367_v54  ;;  %v3463_v54 = vld [vmem:[%s4244_s11 + $0x1cc] ss:$16 sps:$4 sm:$0xff]  }
 0x106   : > { %2522 = vmatpush2.bf16.msra.mxu1 %v3370_v55  ;;  %2482 = vmatprep.subr.bf16.mxu0 %v3375_v56  ;;  %v3466_v55 = vld [vmem:[%s4244_s11 + $0x3cc] ss:$16 sps:$4 sm:$0xff]   ;;  %v3461_v56 = vld [vmem:[%s4244_s11 + $0x1c8] ss:$16 sps:$4 sm:$0xff]  }
 0x107   : > { %2523 = vmatprep.subr.bf16.mxu1 %v3378_v57  ;;  %v3464_v57 = vld [vmem:[%s4244_s11 + $0x3c8] ss:$16 sps:$4 sm:$0xff]  }
 0x109   : > { %2483 = vmatpush2.bf16.msra.mxu0 %v3373_v58  ;;  %v3469_v58 = vld [vmem:[%s4244_s11 + $0x1ac] ss:$16 sps:$4 sm:$0xff]  }
 0x10a   : > { %2524 = vmatpush2.bf16.msra.mxu1 %v3376_v59  ;;  %2484 = vmatprep.subr.bf16.mxu0 %v3381_v60  ;;  %v3472_v59 = vld [vmem:[%s4244_s11 + $0x3ac] ss:$16 sps:$4 sm:$0xff]   ;;  %v3467_v60 = vld [vmem:[%s4244_s11 + $0x1a8] ss:$16 sps:$4 sm:$0xff]  }
 0x10b   : > { %2525 = vmatprep.subr.bf16.mxu1 %v3384_v61  ;;  %v3470_v61 = vld [vmem:[%s4244_s11 + $0x3a8] ss:$16 sps:$4 sm:$0xff]  }
 0x10d   : > { %2485 = vmatpush2.bf16.msra.mxu0 %v3379_v62  ;;  %v3475_v62 = vld [vmem:[%s4244_s11 + $0x18c] ss:$16 sps:$4 sm:$0xff]  }
 0x10e   : > { %2526 = vmatpush2.bf16.msra.mxu1 %v3382_v63  ;;  %2486 = vmatprep.subr.bf16.mxu0 %v3387_v4  ;;  %v3478_v63 = vld [vmem:[%s4244_s11 + $0x38c] ss:$16 sps:$4 sm:$0xff]   ;;  %v3473_v4 = vld [vmem:[%s4244_s11 + $0x188] ss:$16 sps:$4 sm:$0xff]  }
 0x10f   : > { %2527 = vmatprep.subr.bf16.mxu1 %v3390_v5  ;;  %v3476_v5 = vld [vmem:[%s4244_s11 + $0x388] ss:$16 sps:$4 sm:$0xff]  }
 0x111   : > { %2487 = vmatpush2.bf16.msra.mxu0 %v3385_v6  ;;  %v3481_v6 = vld [vmem:[%s4244_s11 + $0x16c] ss:$16 sps:$4 sm:$0xff]  }
 0x112   : > { %2528 = vmatpush2.bf16.msra.mxu1 %v3388_v7  ;;  %2488 = vmatprep.subr.bf16.mxu0 %v3393_v8  ;;  %v3484_v7 = vld [vmem:[%s4244_s11 + $0x36c] ss:$16 sps:$4 sm:$0xff]   ;;  %v3479_v8 = vld [vmem:[%s4244_s11 + $0x168] ss:$16 sps:$4 sm:$0xff]  }
 0x113   : > { %2529 = vmatprep.subr.bf16.mxu1 %v3396_v9  ;;  %v3482_v9 = vld [vmem:[%s4244_s11 + $0x368] ss:$16 sps:$4 sm:$0xff]  }
 0x115   : > { %2489 = vmatpush2.bf16.msra.mxu0 %v3391_v14  ;;  %v3487_v14 = vld [vmem:[%s4244_s11 + $0x14c] ss:$16 sps:$4 sm:$0xff]  }
 0x116   : > { %2530 = vmatpush2.bf16.msra.mxu1 %v3394_v15  ;;  %2490 = vmatprep.subr.bf16.mxu0 %v3399_v16  ;;  %v3490_v15 = vld [vmem:[%s4244_s11 + $0x34c] ss:$16 sps:$4 sm:$0xff]   ;;  %v3485_v16 = vld [vmem:[%s4244_s11 + $0x148] ss:$16 sps:$4 sm:$0xff]  }
 0x117   : > { %2531 = vmatprep.subr.bf16.mxu1 %v3402_v17  ;;  %v3488_v17 = vld [vmem:[%s4244_s11 + $0x348] ss:$16 sps:$4 sm:$0xff]  }
 0x119   : > { %2491 = vmatpush2.bf16.msra.mxu0 %v3397_v18  ;;  %v3493_v18 = vld [vmem:[%s4244_s11 + $0x12c] ss:$16 sps:$4 sm:$0xff]  }
 0x11a   : > { %2532 = vmatpush2.bf16.msra.mxu1 %v3400_v19  ;;  %2542 = vmatprep.subr.bf16.mxu0 %v3409_v20  ;;  %v3496_v19 = vld [vmem:[%s4244_s11 + $0x32c] ss:$16 sps:$4 sm:$0xff]   ;;  %v3491_v20 = vld [vmem:[%s4244_s11 + $0x128] ss:$16 sps:$4 sm:$0xff]  }
 0x11b   : > { %2583 = vmatprep.subr.bf16.mxu1 %v3412_v21  ;;  %v3494_v21 = vld [vmem:[%s4244_s11 + $0x328] ss:$16 sps:$4 sm:$0xff]  }
 0x11c   : > { %2493 = vmatmul.mubr.bf16.vlgmr.msra.gmra.mxu0 %v4410_v22 }
 0x11d   : > { %2534 = vmatmul.mubr.bf16.vlgmr.msra.gmra.mxu1 %v4414_v23  ;;  %2543 = vmatpush1.bf16.msra.mxu0 %v3407_v24  ;;  %v3499_v24 = vld [vmem:[%s4244_s11 + $0x10c] ss:$16 sps:$4 sm:$0xff]  }
 0x11e   : > { %2584 = vmatpush1.bf16.msra.mxu1 %v3410_v25  ;;  %2544 = vmatprep.subr.bf16.mxu0 %v3415_v26  ;;  %v3502_v25 = vld [vmem:[%s4244_s11 + $0x30c] ss:$16 sps:$4 sm:$0xff]   ;;  %v3497_v26 = vld [vmem:[%s4244_s11 + $0x108] ss:$16 sps:$4 sm:$0xff]  }
 0x11f   : > { %2585 = vmatprep.subr.bf16.mxu1 %v3418_v27  ;;  %2574 = vmatprep.mubr.bf16.mxu0 %v4238_v2  ;;  %v3433_v2 = vld [vmem:[%s4244_s11 + $0x6c] ss:$16 sps:$4 sm:$0xff]   ;;  %v3500_v27 = vld [vmem:[%s4244_s11 + $0x308] ss:$16 sps:$4 sm:$0xff]  }
 0x120   : > { %2615 = vmatprep.mubr.bf16.mxu1 %v4242_v3  ;;  %v3436_v3 = vld [vmem:[%s4244_s11 + $0x26c] ss:$16 sps:$4 sm:$0xff]  }
 0x121   : > { %2545 = vmatpush1.bf16.msra.mxu0 %v3413_v10  ;;  %v3505_v10 = vld [vmem:[%s4244_s11 + $0x4ec] ss:$16 sps:$4 sm:$0xff]  }
 0x122   : > { %2586 = vmatpush1.bf16.msra.mxu1 %v3416_v28  ;;  %2546 = vmatprep.subr.bf16.mxu0 %v3421_v11  ;;  %v3508_v28 = vld [vmem:[%s4244_s11 + $0x6ec] ss:$16 sps:$4 sm:$0xff]   ;;  %v3503_v11 = vld [vmem:[%s4244_s11 + $0x4e8] ss:$16 sps:$4 sm:$0xff]  }
 0x123   : > { %2587 = vmatprep.subr.bf16.mxu1 %v3424_v29  ;;  %v3506_v29 = vld [vmem:[%s4244_s11 + $0x6e8] ss:$16 sps:$4 sm:$0xff]  }
 0x125   : > { %2547 = vmatpush1.bf16.msra.mxu0 %v3419_v30  ;;  %v3511_v30 = vld [vmem:[%s4244_s11 + $0x4cc] ss:$16 sps:$4 sm:$0xff]  }
 0x126   : > { %2588 = vmatpush1.bf16.msra.mxu1 %v3422_v31  ;;  %2548 = vmatprep.subr.bf16.mxu0 %v3427_v32  ;;  %v3514_v31 = vld [vmem:[%s4244_s11 + $0x6cc] ss:$16 sps:$4 sm:$0xff]   ;;  %v3509_v32 = vld [vmem:[%s4244_s11 + $0x4c8] ss:$16 sps:$4 sm:$0xff]  }
 0x127   : > { %2589 = vmatprep.subr.bf16.mxu1 %v3430_v33  ;;  %v3512_v33 = vld [vmem:[%s4244_s11 + $0x6c8] ss:$16 sps:$4 sm:$0xff]  }
 0x129   : > { %2549 = vmatpush1.bf16.msra.mxu0 %v3425_v34  ;;  %v3517_v34 = vld [vmem:[%s4244_s11 + $0x4ac] ss:$16 sps:$4 sm:$0xff]  }
 0x12a   : > { %2590 = vmatpush1.bf16.msra.mxu1 %v3428_v35  ;;  %2550 = vmatprep.subr.bf16.mxu0 %v3433_v2  ;;  %v3520_v35 = vld [vmem:[%s4244_s11 + $0x6ac] ss:$16 sps:$4 sm:$0xff]  }
 0x12b   : > { %2591 = vmatprep.subr.bf16.mxu1 %v3436_v3  ;;  %v3523_v2 = vld [vmem:[%s4244_s11 + $0x48c] ss:$16 sps:$4 sm:$0xff]  }
 0x12c   : > { %v3526_v3 = vld [vmem:[%s4244_s11 + $0x68c] ss:$16 sps:$4 sm:$0xff]  }
 0x12d   : > { %2551 = vmatpush1.bf16.msra.mxu0 %v3431_v36  ;;  %v3521_v36 = vld [vmem:[%s4244_s11 + $0x488] ss:$16 sps:$4 sm:$0xff]  }
 0x12e   : > { %2592 = vmatpush1.bf16.msra.mxu1 %v3434_v37  ;;  %2552 = vmatprep.subr.bf16.mxu0 %v3439_v38  ;;  %v3532_v37 = vld [vmem:[%s4244_s11 + $0x66c] ss:$16 sps:$4 sm:$0xff]   ;;  %v3527_v38 = vld [vmem:[%s4244_s11 + $0x468] ss:$16 sps:$4 sm:$0xff]  }
 0x12f   : > { %2593 = vmatprep.subr.bf16.mxu1 %v3442_v39  ;;  %v3530_v39 = vld [vmem:[%s4244_s11 + $0x668] ss:$16 sps:$4 sm:$0xff]  }
 0x131   : > { %2553 = vmatpush1.bf16.msra.mxu0 %v3437_v40  ;;  %v3535_v40 = vld [vmem:[%s4244_s11 + $0x44c] ss:$16 sps:$4 sm:$0xff]  }
 0x132   : > { %2594 = vmatpush1.bf16.msra.mxu1 %v3440_v41  ;;  %2554 = vmatprep.subr.bf16.mxu0 %v3445_v42  ;;  %v3538_v41 = vld [vmem:[%s4244_s11 + $0x64c] ss:$16 sps:$4 sm:$0xff]   ;;  %v3533_v42 = vld [vmem:[%s4244_s11 + $0x448] ss:$16 sps:$4 sm:$0xff]  }
 0x133   : > { %2595 = vmatprep.subr.bf16.mxu1 %v3448_v43  ;;  %v3536_v43 = vld [vmem:[%s4244_s11 + $0x648] ss:$16 sps:$4 sm:$0xff]  }
 0x135   : > { %2555 = vmatpush1.bf16.msra.mxu0 %v3443_v44  ;;  %v3541_v44 = vld [vmem:[%s4244_s11 + $0x42c] ss:$16 sps:$4 sm:$0xff]  }
 0x136   : > { %2596 = vmatpush1.bf16.msra.mxu1 %v3446_v45  ;;  %2556 = vmatprep.subr.bf16.mxu0 %v3451_v46  ;;  %v3544_v45 = vld [vmem:[%s4244_s11 + $0x62c] ss:$16 sps:$4 sm:$0xff]   ;;  %v3539_v46 = vld [vmem:[%s4244_s11 + $0x428] ss:$16 sps:$4 sm:$0xff]  }
 0x137   : > { %2597 = vmatprep.subr.bf16.mxu1 %v3454_v47  ;;  %v3542_v47 = vld [vmem:[%s4244_s11 + $0x628] ss:$16 sps:$4 sm:$0xff]  }
 0x139   : > { %2557 = vmatpush1.bf16.msra.mxu0 %v3449_v48  ;;  %v3547_v48 = vld [vmem:[%s4244_s11 + $0x40c] ss:$16 sps:$4 sm:$0xff]  }
 0x13a   : > { %2598 = vmatpush1.bf16.msra.mxu1 %v3452_v49  ;;  %2558 = vmatprep.subr.bf16.mxu0 %v3457_v50  ;;  %v3550_v49 = vld [vmem:[%s4244_s11 + $0x60c] ss:$16 sps:$4 sm:$0xff]   ;;  %v3545_v50 = vld [vmem:[%s4244_s11 + $0x408] ss:$16 sps:$4 sm:$0xff]  }
 0x13b   : > { %2599 = vmatprep.subr.bf16.mxu1 %v3460_v51  ;;  %v3548_v51 = vld [vmem:[%s4244_s11 + $0x608] ss:$16 sps:$4 sm:$0xff]  }
 0x13d   : > { %2559 = vmatpush2.bf16.msra.mxu0 %v3455_v52  ;;  %v3553_v52 = vld [vmem:[%s4244_s11 + $0x5ec] ss:$16 sps:$4 sm:$0xff]  }
 0x13e   : > { %2600 = vmatpush2.bf16.msra.mxu1 %v3458_v53  ;;  %2560 = vmatprep.subr.bf16.mxu0 %v3463_v54  ;;  %v3556_v53 = vld [vmem:[%s4244_s11 + $0x7ec] ss:$16 sps:$4 sm:$0xff]   ;;  %v3551_v54 = vld [vmem:[%s4244_s11 + $0x5e8] ss:$16 sps:$4 sm:$0xff]  }
 0x13f   : > { %2601 = vmatprep.subr.bf16.mxu1 %v3466_v55  ;;  %v3554_v55 = vld [vmem:[%s4244_s11 + $0x7e8] ss:$16 sps:$4 sm:$0xff]  }
 0x141   : > { %2561 = vmatpush2.bf16.msra.mxu0 %v3461_v56  ;;  %v3559_v56 = vld [vmem:[%s4244_s11 + $0x5cc] ss:$16 sps:$4 sm:$0xff]  }
 0x142   : > { %2602 = vmatpush2.bf16.msra.mxu1 %v3464_v57  ;;  %2562 = vmatprep.subr.bf16.mxu0 %v3469_v58  ;;  %v3562_v57 = vld [vmem:[%s4244_s11 + $0x7cc] ss:$16 sps:$4 sm:$0xff]   ;;  %v3557_v58 = vld [vmem:[%s4244_s11 + $0x5c8] ss:$16 sps:$4 sm:$0xff]  }
 0x143   : > { %2603 = vmatprep.subr.bf16.mxu1 %v3472_v59  ;;  %v3560_v59 = vld [vmem:[%s4244_s11 + $0x7c8] ss:$16 sps:$4 sm:$0xff]  }
 0x145   : > { %2563 = vmatpush2.bf16.msra.mxu0 %v3467_v60  ;;  %v3565_v60 = vld [vmem:[%s4244_s11 + $0x5ac] ss:$16 sps:$4 sm:$0xff]  }
 0x146   : > { %2604 = vmatpush2.bf16.msra.mxu1 %v3470_v61  ;;  %2564 = vmatprep.subr.bf16.mxu0 %v3475_v62  ;;  %v3568_v61 = vld [vmem:[%s4244_s11 + $0x7ac] ss:$16 sps:$4 sm:$0xff]   ;;  %v3563_v62 = vld [vmem:[%s4244_s11 + $0x5a8] ss:$16 sps:$4 sm:$0xff]  }
 0x147   : > { %2605 = vmatprep.subr.bf16.mxu1 %v3478_v63  ;;  %v3566_v63 = vld [vmem:[%s4244_s11 + $0x7a8] ss:$16 sps:$4 sm:$0xff]  }
 0x149   : > { %2565 = vmatpush2.bf16.msra.mxu0 %v3473_v4  ;;  %v3571_v4 = vld [vmem:[%s4244_s11 + $0x58c] ss:$16 sps:$4 sm:$0xff]  }
 0x14a   : > { %2606 = vmatpush2.bf16.msra.mxu1 %v3476_v5  ;;  %2566 = vmatprep.subr.bf16.mxu0 %v3481_v6  ;;  %v3574_v5 = vld [vmem:[%s4244_s11 + $0x78c] ss:$16 sps:$4 sm:$0xff]   ;;  %v3569_v6 = vld [vmem:[%s4244_s11 + $0x588] ss:$16 sps:$4 sm:$0xff]  }
 0x14b   : > { %2607 = vmatprep.subr.bf16.mxu1 %v3484_v7  ;;  %v3572_v7 = vld [vmem:[%s4244_s11 + $0x788] ss:$16 sps:$4 sm:$0xff]  }
 0x14d   : > { %2567 = vmatpush2.bf16.msra.mxu0 %v3479_v8  ;;  %v3577_v8 = vld [vmem:[%s4244_s11 + $0x56c] ss:$16 sps:$4 sm:$0xff]  }
 0x14e   : > { %2608 = vmatpush2.bf16.msra.mxu1 %v3482_v9  ;;  %2568 = vmatprep.subr.bf16.mxu0 %v3487_v14  ;;  %v3580_v9 = vld [vmem:[%s4244_s11 + $0x76c] ss:$16 sps:$4 sm:$0xff]   ;;  %v3575_v14 = vld [vmem:[%s4244_s11 + $0x568] ss:$16 sps:$4 sm:$0xff]  }
 0x14f   : > { %2609 = vmatprep.subr.bf16.mxu1 %v3490_v15  ;;  %v3578_v15 = vld [vmem:[%s4244_s11 + $0x768] ss:$16 sps:$4 sm:$0xff]  }
 0x151   : > { %2569 = vmatpush2.bf16.msra.mxu0 %v3485_v16  ;;  %v3583_v16 = vld [vmem:[%s4244_s11 + $0x54c] ss:$16 sps:$4 sm:$0xff]  }
 0x152   : > { %2610 = vmatpush2.bf16.msra.mxu1 %v3488_v17  ;;  %2570 = vmatprep.subr.bf16.mxu0 %v3493_v18  ;;  %v3586_v17 = vld [vmem:[%s4244_s11 + $0x74c] ss:$16 sps:$4 sm:$0xff]   ;;  %v3581_v18 = vld [vmem:[%s4244_s11 + $0x548] ss:$16 sps:$4 sm:$0xff]  }
 0x153   : > { %2611 = vmatprep.subr.bf16.mxu1 %v3496_v19  ;;  %v3584_v19 = vld [vmem:[%s4244_s11 + $0x748] ss:$16 sps:$4 sm:$0xff]  }
 0x155   : > { %2571 = vmatpush2.bf16.msra.mxu0 %v3491_v20  ;;  %v3589_v20 = vld [vmem:[%s4244_s11 + $0x52c] ss:$16 sps:$4 sm:$0xff]  }
 0x156   : > { %2612 = vmatpush2.bf16.msra.mxu1 %v3494_v21  ;;  %2572 = vmatprep.subr.bf16.mxu0 %v3499_v24  ;;  %v3592_v21 = vld [vmem:[%s4244_s11 + $0x72c] ss:$16 sps:$4 sm:$0xff]   ;;  %v3587_v24 = vld [vmem:[%s4244_s11 + $0x528] ss:$16 sps:$4 sm:$0xff]  }
 0x157   : > { %2613 = vmatprep.subr.bf16.mxu1 %v3502_v25  ;;  %v3590_v25 = vld [vmem:[%s4244_s11 + $0x728] ss:$16 sps:$4 sm:$0xff]  }
 0x159   : > { %2573 = vmatpush2.bf16.msra.mxu0 %v3497_v26  ;;  %v3595_v26 = vld [vmem:[%s4244_s11 + $0x50c] ss:$16 sps:$4 sm:$0xff]  }
 0x15a   : > { %2614 = vmatpush2.bf16.msra.mxu1 %v3500_v27  ;;  %2624 = vmatprep.subr.bf16.mxu0 %v3505_v10  ;;  %v3598_v27 = vld [vmem:[%s4244_s11 + $0x70c] ss:$16 sps:$4 sm:$0xff]   ;;  %v3593_v10 = vld [vmem:[%s4244_s11 + $0x508] ss:$16 sps:$4 sm:$0xff]  }
 0x15b   : > { %2665 = vmatprep.subr.bf16.mxu1 %v3508_v28  ;;  %v3596_v28 = vld [vmem:[%s4244_s11 + $0x708] ss:$16 sps:$4 sm:$0xff]  }
 0x15c   : > { %2575 = vmatmul.mubr.bf16.vlgmr.msra.gmra.mxu0 %v4326_v12  ;;  %v3515_v12 = vld [vmem:[%s4244_s11 + $0x4a8] ss:$16 sps:$4 sm:$0xff]  }
 0x15d   : > { %2616 = vmatmul.mubr.bf16.vlgmr.msra.gmra.mxu1 %v4330_v13  ;;  %2625 = vmatpush1.bf16.msra.mxu0 %v3503_v11  ;;  %v3518_v13 = vld [vmem:[%s4244_s11 + $0x6a8] ss:$16 sps:$4 sm:$0xff]  }
 0x15e   : > { %2666 = vmatpush1.bf16.msra.mxu1 %v3506_v29  ;;  %2626 = vmatprep.subr.bf16.mxu0 %v3511_v30 }
 0x15f   : > { %2667 = vmatprep.subr.bf16.mxu1 %v3514_v31  ;;  %2656 = vmatprep.mubr.bf16.mxu0 %v4338_v0  ;;  %v3524_v0 = vld [vmem:[%s4244_s11 + $0x688] ss:$16 sps:$4 sm:$0xff]  }
 0x160   : > { %2697 = vmatprep.mubr.bf16.mxu1 %v4342_v1  ;;  %v3529_v1 = vld [vmem:[%s4244_s11 + $0x46c] ss:$16 sps:$4 sm:$0xff]  }
 0x161   : > { %2627 = vmatpush1.bf16.msra.mxu0 %v3509_v32 }
 0x162   : > { %2668 = vmatpush1.bf16.msra.mxu1 %v3512_v33  ;;  %2628 = vmatprep.subr.bf16.mxu0 %v3517_v34 }
 0x163   : > { %2669 = vmatprep.subr.bf16.mxu1 %v3520_v35 }
 0x165   : > { %2629 = vmatpush1.bf16.msra.mxu0 %v3515_v12  ;;  %v2708_v12 = vlaneseq }
 0x166   : > { %2670 = vmatpush1.bf16.msra.mxu1 %v3518_v13  ;;  %2630 = vmatprep.subr.bf16.mxu0 %v3523_v2 }
 0x167   : > { %2671 = vmatprep.subr.bf16.mxu1 %v3526_v3  ;;  %v2709_v13 = vshrl.u32 %v2708_v12, 7 }
 0x169   : > { %2631 = vmatpush1.bf16.msra.mxu0 %v3521_v36  ;;  %v2714_v3 = vsub.s32 1, %v2709_v13 }
 0x16a   : > { %2672 = vmatpush1.bf16.msra.mxu1 %v3524_v0  ;;  %2632 = vmatprep.subr.bf16.mxu0 %v3529_v1  ;;  %v2732_v1 = vld [vmem:[%s798_s28] sm:$0xf] }
 0x16b   : > { %2673 = vmatprep.subr.bf16.mxu1 %v3532_v37 }
 0x16d   : > { %2633 = vmatpush1.bf16.msra.mxu0 %v3527_v38 }
 0x16e   : > { %2674 = vmatpush1.bf16.msra.mxu1 %v3530_v39  ;;  %2634 = vmatprep.subr.bf16.mxu0 %v3535_v40 }
 0x16f   : > { %2675 = vmatprep.subr.bf16.mxu1 %v3538_v41 }
 0x171   : > { %2635 = vmatpush1.bf16.msra.mxu0 %v3533_v42 }
 0x172   : > { %2676 = vmatpush1.bf16.msra.mxu1 %v3536_v43  ;;  %2636 = vmatprep.subr.bf16.mxu0 %v3541_v44 }
 0x173   : > { %2677 = vmatprep.subr.bf16.mxu1 %v3544_v45 }
 0x175   : > { %2637 = vmatpush1.bf16.msra.mxu0 %v3539_v46 }
 0x176   : > { %2678 = vmatpush1.bf16.msra.mxu1 %v3542_v47  ;;  %2638 = vmatprep.subr.bf16.mxu0 %v3547_v48 }
 0x177   : > { %2679 = vmatprep.subr.bf16.mxu1 %v3550_v49 }
 0x179   : > { %2639 = vmatpush1.bf16.msra.mxu0 %v3545_v50  ;;  %v2741_v50 = vrot.slane %v2732_v1, %v2714_v3 }
 0x17a   : > { %2680 = vmatpush1.bf16.msra.mxu1 %v3548_v51  ;;  %2640 = vmatprep.subr.bf16.mxu0 %v3553_v52 }
 0x17b   : > { %2681 = vmatprep.subr.bf16.mxu1 %v3556_v53 }
 0x17d   : > { %2641 = vmatpush2.bf16.msra.mxu0 %v3551_v54 }
 0x17e   : > { %2682 = vmatpush2.bf16.msra.mxu1 %v3554_v55  ;;  %2642 = vmatprep.subr.bf16.mxu0 %v3559_v56 }
 0x17f   : > { %2683 = vmatprep.subr.bf16.mxu1 %v3562_v57 }
 0x181   : > { %2643 = vmatpush2.bf16.msra.mxu0 %v3557_v58 }
 0x182   : > { %2684 = vmatpush2.bf16.msra.mxu1 %v3560_v59  ;;  %2644 = vmatprep.subr.bf16.mxu0 %v3565_v60 }
 0x183   : > { %2685 = vmatprep.subr.bf16.mxu1 %v3568_v61 }
 0x185   : > { %2645 = vmatpush2.bf16.msra.mxu0 %v3563_v62 }
 0x186   : > { %2686 = vmatpush2.bf16.msra.mxu1 %v3566_v63  ;;  %2646 = vmatprep.subr.bf16.mxu0 %v3571_v4 }
 0x187   : > { %2687 = vmatprep.subr.bf16.mxu1 %v3574_v5 }
 0x189   : > { %2647 = vmatpush2.bf16.msra.mxu0 %v3569_v6  ;;  %v2718_v6 = vsub.s32 2, %v2709_v13 }
 0x18a   : > { %2688 = vmatpush2.bf16.msra.mxu1 %v3572_v7  ;;  %2648 = vmatprep.subr.bf16.mxu0 %v3577_v8  ;;  %v2722_v8 = vsub.s32 3, %v2709_v13 }
 0x18b   : > { %2689 = vmatprep.subr.bf16.mxu1 %v3580_v9 }
 0x18d   : > { %2649 = vmatpush2.bf16.msra.mxu0 %v3575_v14 }
 0x18e   : > { %2690 = vmatpush2.bf16.msra.mxu1 %v3578_v15  ;;  %2650 = vmatprep.subr.bf16.mxu0 %v3583_v16 }
 0x18f   : > { %2691 = vmatprep.subr.bf16.mxu1 %v3586_v17 }
 0x191   : > { %2651 = vmatpush2.bf16.msra.mxu0 %v3581_v18 }
 0x192   : > { %2692 = vmatpush2.bf16.msra.mxu1 %v3584_v19  ;;  %2652 = vmatprep.subr.bf16.mxu0 %v3589_v20 }
 0x193   : > { %2693 = vmatprep.subr.bf16.mxu1 %v3592_v21  ;;  %v2745_v21 = vrot.slane %v2732_v1, %v2718_v6 }
 0x195   : > { %2653 = vmatpush2.bf16.msra.mxu0 %v3587_v24 }
 0x196   : > { %2694 = vmatpush2.bf16.msra.mxu1 %v3590_v25  ;;  %2654 = vmatprep.subr.bf16.mxu0 %v3595_v26 }
 0x197   : > { %2695 = vmatprep.subr.bf16.mxu1 %v3598_v27 }
 0x199   : > { %2655 = vmatpush2.bf16.msra.mxu0 %v3593_v10 }
 0x19a   : > { %2696 = vmatpush2.bf16.msra.mxu1 %v3596_v28 }
 0x19c   : > { %v2412_v11 = vpop.f32.mrf.mxu0  ;;  %2657 = vmatmul.mubr.bf16.vlgmr.msra.gmra.mxu0 %v4410_v22  ;;  %v2710_v22 = vsub.s32 0, %v2709_v13 }
 0x19d   : > { %v2453_v29 = vpop.f32.mrf.mxu1  ;;  %2698 = vmatmul.mubr.bf16.vlgmr.msra.gmra.mxu1 %v4414_v23  ;;  %v2706_v23 = vld [vmem:[%s793_s25] sm:$0xf] }
 0x19e   : > { %v2414_v30 = vpop.f32.mrf.mxu0  ;;  %v2454_v2 = vadd.f32 %v2453_v29, %v2412_v11  ;;  %v2711_v39 = vrot.slane %v2706_v23, %v2710_v22  ;;  %v2737_v43 = vrot.slane %v2732_v1, %v2710_v22  ;;  %v2715_v45 = vrot.slane %v2706_v23, %v2714_v3 }
 0x19f   : > { %v2455_v31 = vpop.f32.mrf.mxu1  ;;  %v2719_v17 = vrot.slane %v2706_v23, %v2718_v6  ;;  %v2723_v25 = vrot.slane %v2706_v23, %v2722_v8  ;;  %v2749_v11 = vrot.slane %v2732_v1, %v2722_v8 }
 0x1a0   : > { %v2416_v32 = vpop.f32.mrf.mxu0  ;;  %v2456_v37 = vadd.f32 %v2455_v31, %v2414_v30 }
 0x1a1   : > { %v2457_v33 = vpop.f32.mrf.mxu1 }
 0x1a2   : > { %v2417_v34 = vpop.f32.mrf.mxu0 }
 0x1a3   : > { %v2458_v35 = vpop.f32.mrf.mxu1 }
 0x1dc   : > { %v2494_v36 = vpop.f32.mrf.mxu0 }
 0x1dd   : > { %v2535_v0 = vpop.f32.mrf.mxu1  ;;  %v2495_v38 = vadd.f32 %v2494_v36, %v2454_v2 }
 0x1de   : > { %v2496_v40 = vpop.f32.mrf.mxu0 }
 0x1df   : > { %v2537_v41 = vpop.f32.mrf.mxu1  ;;  %v2536_v42 = vadd.f32 %v2535_v0, %v2495_v38  ;;  %v2497_v44 = vadd.f32 %v2496_v40, %v2456_v37 }
 0x1e0   : > { %v2498_v46 = vpop.f32.mrf.mxu0 }
 0x1e1   : > { %v2539_v47 = vpop.f32.mrf.mxu1  ;;  %v2728_v48 = vmul.f32 %v2711_v39, %v2536_v42  ;;  %v2538_v49 = vadd.f32 %v2537_v41, %v2497_v44 }
 0x1e2   : > { %v2499_v51 = vpop.f32.mrf.mxu0 }
 0x1e3   : > { %v2540_v52 = vpop.f32.mrf.mxu1  ;;  %v2754_v53 = vadd.f32 %v2737_v43, %v2728_v48  ;;  %v2729_v54 = vmul.f32 %v2715_v45, %v2538_v49 }
 0x1e5   : > { %v2758_v55 = vmax.f32 %v2754_v53, 0.0  ;;  %v2755_v56 = vadd.f32 %v2741_v50, %v2729_v54 }
 0x1e7   : > { %2762 = vst [vmem:[%s4567_s5] sm:$0xff] %v2758_v55  ;;  %v2759_v57 = vmax.f32 %v2755_v56, 0.0 }
 0x1e9   : > { %2763 = vst [vmem:[%s4567_s5 + $0x8] sm:$0xff] %v2759_v57 }
 0x21c   : > { %v2576_v58 = vpop.f32.mrf.mxu0 }
 0x21d   : > { %v2617_v59 = vpop.f32.mrf.mxu1 }
 0x21e   : > { %v2578_v60 = vpop.f32.mrf.mxu0  ;;  %v2618_v7 = vadd.f32 %v2617_v59, %v2576_v58 }
 0x21f   : > { %v2619_v61 = vpop.f32.mrf.mxu1 }
 0x220   : > { %v2580_v62 = vpop.f32.mrf.mxu0  ;;  %v2620_v15 = vadd.f32 %v2619_v61, %v2578_v60 }
 0x221   : > { %v2621_v63 = vpop.f32.mrf.mxu1 }
 0x222   : > { %v2581_v4 = vpop.f32.mrf.mxu0 }
 0x223   : > { %v2622_v5 = vpop.f32.mrf.mxu1 }
 0x25c   : > { %v2658_v9 = vpop.f32.mrf.mxu0 }
 0x25d   : > { %v2699_v14 = vpop.f32.mrf.mxu1  ;;  %v2659_v16 = vadd.f32 %v2658_v9, %v2618_v7 }
 0x25e   : > { %v2660_v18 = vpop.f32.mrf.mxu0 }
 0x25f   : > { %v2701_v19 = vpop.f32.mrf.mxu1  ;;  %v2700_v20 = vadd.f32 %v2699_v14, %v2659_v16  ;;  %v2661_v24 = vadd.f32 %v2660_v18, %v2620_v15 }
 0x260   : > { %v2662_v26 = vpop.f32.mrf.mxu0 }
 0x261   : > { %v2703_v27 = vpop.f32.mrf.mxu1  ;;  %v2730_v10 = vmul.f32 %v2719_v17, %v2700_v20  ;;  %v2702_v28 = vadd.f32 %v2701_v19, %v2661_v24 }
 0x262   : > { %v2663_v29 = vpop.f32.mrf.mxu0 }
 0x263   : > { %v2704_v30 = vpop.f32.mrf.mxu1  ;;  %v2756_v31 = vadd.f32 %v2745_v21, %v2730_v10  ;;  %v2731_v32 = vmul.f32 %v2723_v25, %v2702_v28 }
 0x265   : > { %v2760_v33 = vmax.f32 %v2756_v31, 0.0  ;;  %v2757_v34 = vadd.f32 %v2749_v11, %v2731_v32 }
 0x267   : > { %2764 = vst [vmem:[%s4567_s5 + $0x10] sm:$0xff] %v2760_v33  ;;  %v2761_v35 = vmax.f32 %v2757_v34, 0.0 }
 0x269   : > { %2765 = vst [vmem:[%s4567_s5 + $0x18] sm:$0xff] %v2761_v35 }
 0x26a PF: > { %s14_s19 = sadd.s32 1, %s3637_s19   ;;  %s4593_s15 = smov %s3625_s16 }
 0x26b   : > { %p11_p10 = scmp.ge.s32.totalorder %s14_s19, 6   ;;  %s4594_s16 = smov %s3699_s23 }
 0x26c   : > { %s4595_s17 = smov %s3633_s18  ;;  %s4596_s18 = smov %s4598_s20 }
 0x26d   :  { %13 = sbr.rel (!%p11_p10) target bundleno = 3 (0x3), region = 103 }

</bundles_post_ra>
